<compile_context>
chip_gen: v5e
topology: v5e:2x2
jax: 0.10.0
libtpu: 0.0.40
codegen_flags: <defaults>
</compile_context>

<pallas_src>
import functools

import jax
import jax.numpy as jnp
from jax.experimental import pallas as pl
from jax.experimental.pallas import tpu as pltpu

EPS = 1e-5  # nn.BatchNorm2d default eps


def _largest_divisor_leq(n, cap):
    d = min(n, cap)
    while n % d:
        d -= 1
    return d


def _conv_stats_kernel(x_ref, w_ref, conv_ref, psum_ref, pssq_ref,
                       xp_scr, patch_scr, *, NB, H, W, C):
    """Per-sample 3x3 conv as a single im2col matmul (K = 9*C) per sample,
    batched over NB samples, plus per-block partial BN sum / sum-of-squares."""
    # On-chip zero padding (padding=1): interior overwrite of a zeroed scratch.
    xp_scr[...] = jnp.zeros_like(xp_scr)
    xp_scr[:, 1:H + 1, 1:W + 1, :] = x_ref[...]

    # im2col into a lane-contiguous (NB, H*W, 9*C) bf16 scratch:
    #   patch[b, i*W + j, (3*di + dj)*C + c] = xp[b, i + di, j + dj, c]
    for di in range(3):
        for dj in range(3):
            t = 3 * di + dj
            piece = xp_scr[:, di:di + H, dj:dj + W, :].reshape(NB, H * W, C)
            patch_scr[:, :, t * C:(t + 1) * C] = piece.astype(patch_scr.dtype)

    # One K=576 matmul per sample on the bf16 MXU path, f32 accumulation.
    acc = jnp.einsum("bpk,bkc->bpc", patch_scr[...], w_ref[...],
                     preferred_element_type=jnp.float32)        # (NB, H*W, C)

    conv_ref[...] = acc
    # Per-block partial statistics (reduced in the wrapper) -> no resident
    # accumulator, so the grid axis can stay "parallel".
    psum_ref[...] = jnp.sum(acc, axis=(0, 1), keepdims=True)
    pssq_ref[...] = jnp.sum(acc * acc, axis=(0, 1), keepdims=True)


def _bn_relu_add_kernel(x_ref, conv_ref, scale_ref, bias_ref, out_ref):
    """out = x + relu(conv * scale + bias)  (BN folded into scale/bias).
    All tensors are lane-dense: last dim = W*C (512 lanes)."""
    y = conv_ref[...] * scale_ref[...] + bias_ref[...]
    out_ref[...] = x_ref[...] + jnp.maximum(y, 0.0)


@functools.partial(jax.jit, static_argnames=("block_b",))
def brain_kitchen_forward(c1, prev_out, gamma, beta, *, block_b=8):
    """c1: (B, Cout, Cin, 3, 3), prev_out: (B, C, H, W)  -- PyTorch layouts."""
    B, C, H, W = prev_out.shape

    x_nhwc = jnp.transpose(prev_out, (0, 2, 3, 1)).astype(jnp.float32)   # (B,H,W,C)
    # Weights OIHW -> (B, 9*Cin, Cout) bf16: one fused XLA transpose+convert.
    # k-ordering (di, dj, ci) matches the im2col layout built in the kernel.
    w_mat = jnp.transpose(c1, (0, 3, 4, 2, 1)).reshape(B, 9 * C, C)
    w_mat = w_mat.astype(jnp.bfloat16)

    nb1 = _largest_divisor_leq(B, block_b)
    nblk = B // nb1

    conv_flat, psum, pssq = pl.pallas_call(
        functools.partial(_conv_stats_kernel, NB=nb1, H=H, W=W, C=C),
        grid=(nblk,),
        in_specs=[
            pl.BlockSpec((nb1, H, W, C), lambda b: (b, 0, 0, 0)),
            pl.BlockSpec((nb1, 9 * C, C), lambda b: (b, 0, 0)),
        ],
        out_specs=[
            pl.BlockSpec((nb1, H * W, C), lambda b: (b, 0, 0)),
            pl.BlockSpec((1, 1, C), lambda b: (b, 0, 0)),
            pl.BlockSpec((1, 1, C), lambda b: (b, 0, 0)),
        ],
        out_shape=[
            jax.ShapeDtypeStruct((B, H * W, C), jnp.float32),
            jax.ShapeDtypeStruct((nblk, 1, C), jnp.float32),
            jax.ShapeDtypeStruct((nblk, 1, C), jnp.float32),
        ],
        scratch_shapes=[
            pltpu.VMEM((nb1, H + 2, W + 2, C), jnp.float32),     # padded activations
            pltpu.VMEM((nb1, H * W, 9 * C), jnp.bfloat16),       # im2col patches
        ],
        compiler_params=pltpu.CompilerParams(
            dimension_semantics=("parallel",)),
    )(x_nhwc, w_mat)

    # BatchNorm2d (training mode => batch statistics), folded into a per-channel
    # affine scale/bias.  Tiny (nblk, C) reductions in f32 -- no cancellation
    # issue at these magnitudes; partials are already f32 per block.
    n = jnp.float32(B * H * W)
    csum = jnp.sum(psum, axis=0)                     # (1, C)
    cssq = jnp.sum(pssq, axis=0)                     # (1, C)
    mean = csum / n
    var = cssq / n - mean * mean
    inv_std = jax.lax.rsqrt(var + EPS)
    scale = gamma[None, :].astype(jnp.float32) * inv_std
    bias = beta[None, :].astype(jnp.float32) - mean * scale

    # Lane-dense second pass: last dim W*C = 512 lanes.  The reshapes below are
    # contiguous row-major reshapes (free bitcasts), not extra HBM passes.
    WC = W * C
    x2 = x_nhwc.reshape(B, H, WC)
    conv2 = conv_flat.reshape(B, H, WC)              # (b, i*W+j, c) -> (b, i, j*C+c)
    scale_t = jnp.tile(scale, (1, W))                # channel pattern repeated per column
    bias_t = jnp.tile(bias, (1, W))

    nb2 = _largest_divisor_leq(B, 32)

    out2 = pl.pallas_call(
        _bn_relu_add_kernel,
        grid=(B // nb2,),
        in_specs=[
            pl.BlockSpec((nb2, H, WC), lambda b: (b, 0, 0)),
            pl.BlockSpec((nb2, H, WC), lambda b: (b, 0, 0)),
            pl.BlockSpec((1, WC), lambda b: (0, 0)),
            pl.BlockSpec((1, WC), lambda b: (0, 0)),
        ],
        out_specs=pl.BlockSpec((nb2, H, WC), lambda b: (b, 0, 0)),
        out_shape=jax.ShapeDtypeStruct((B, H, WC), jnp.float32),
        compiler_params=pltpu.CompilerParams(
            dimension_semantics=("parallel",)),
    )(x2, conv2, scale_t, bias_t)

    out = out2.reshape(B, H, W, C)
    return jnp.transpose(out, (0, 3, 1, 2))          # back to NCHW


def _reference(c1, prev_out, gamma, beta):
    """Pure-JAX f32 reference of the PyTorch forward (NCHW)."""
    B = prev_out.shape[0]
    outs = [
        jax.lax.conv_general_dilated(
            prev_out[b:b + 1], c1[b], window_strides=(1, 1),
            padding=((1, 1), (1, 1)),
            dimension_numbers=("NCHW", "OIHW", "NCHW"),
            precision=jax.lax.Precision.HIGHEST)
        for b in range(B)
    ]
    out = jnp.concatenate(outs, axis=0)
    mean = out.mean(axis=(0, 2, 3))
    var = out.var(axis=(0, 2, 3))
    y = (out - mean[None, :, None, None]) * jax.lax.rsqrt(var + EPS)[None, :, None, None]
    y = y * gamma[None, :, None, None] + beta[None, :, None, None]
    return prev_out + jnp.maximum(y, 0.0)


if __name__ == "__main__":
    B, C, H, W = 16, 64, 8, 8   # C = 64 fixed by nn.BatchNorm2d(64); H=W=8 per the module
    key = jax.random.PRNGKey(0)
    k1, k2, k3, k4 = jax.random.split(key, 4)

    prev_out = jax.random.normal(k1, (B, C, H, W), jnp.float32)
    c1 = 0.05 * jax.random.normal(k2, (B, C, C, 3, 3), jnp.float32)
    gamma = 1.0 + 0.1 * jax.random.normal(k3, (C,), jnp.float32)
    beta = 0.1 * jax.random.normal(k4, (C,), jnp.float32)

    out = jax.block_until_ready(brain_kitchen_forward(c1, prev_out, gamma, beta))
    ref = _reference(c1, prev_out, gamma, beta)

    assert out.shape == ref.shape == (B, C, H, W)
    max_err = float(jnp.max(jnp.abs(out - ref)))
    # Conv operands run on the bf16 MXU path (f32 accumulation over K=576), so
    # the tolerance is sized for bf16 input rounding (~2e-3 relative per operand).
    assert max_err < 3e-2, f"mismatch vs reference, max abs err = {max_err}"

    print("KERNEL_OK")
</pallas_src>

<mosaic_0001>
module attributes {stable_mosaic.version = 11 : i64} {
  func.func @_conv_stats_kernel(%arg0: i32, %arg1: memref<8x8x8x64xf32, #tpu.memory_space<vmem>>, %arg2: memref<8x576x64xbf16, #tpu.memory_space<vmem>>, %arg3: memref<8x64x64xf32, #tpu.memory_space<vmem>>, %arg4: memref<1x1x64xf32, #tpu.memory_space<vmem>>, %arg5: memref<1x1x64xf32, #tpu.memory_space<vmem>>, %arg6: memref<8x10x10x64xf32, #tpu.memory_space<vmem>>, %arg7: memref<8x64x576xbf16, #tpu.memory_space<vmem>>) attributes {dimension_semantics = [#tpu.dimension_semantics<parallel>], iteration_bounds = array<i64: 2>, scalar_prefetch = 0 : i64, scratch_operands = 2 : i64, tpu.core_type = #tpu.core_type<tc>, window_params = [{transform_indices = @transform_0, window_bounds = array<i64: 8, 8, 8, 64>}, {transform_indices = @transform_1, window_bounds = array<i64: 8, 576, 64>}, {transform_indices = @transform_2, window_bounds = array<i64: 8, 64, 64>}, {transform_indices = @transform_3, window_bounds = array<i64: 1, 1, 64>}, {transform_indices = @transform_4, window_bounds = array<i64: 1, 1, 64>}]} {
    %cst = arith.constant 0.000000e+00 : f32
    %0 = vector.broadcast %cst : f32 to vector<8x10x10x64xf32>
    %c0 = arith.constant 0 : index
    %c0_0 = arith.constant 0 : index
    %c0_1 = arith.constant 0 : index
    %c0_2 = arith.constant 0 : index
    %1 = vector.load %arg6[%c0, %c0_0, %c0_1, %c0_2] : memref<8x10x10x64xf32, #tpu.memory_space<vmem>>, vector<8x10x10x64xf32>
    tpu.vector_store %arg6[%c0, %c0_0, %c0_1, %c0_2], %0 {strides = array<i32>} : memref<8x10x10x64xf32, #tpu.memory_space<vmem>>, vector<8x10x10x64xf32>,
    %c0_3 = arith.constant 0 : index
    %c0_4 = arith.constant 0 : index
    %c0_5 = arith.constant 0 : index
    %c0_6 = arith.constant 0 : index
    %2 = vector.load %arg1[%c0_3, %c0_4, %c0_5, %c0_6] : memref<8x8x8x64xf32, #tpu.memory_space<vmem>>, vector<8x8x8x64xf32>
    %c0_7 = arith.constant 0 : index
    %c1 = arith.constant 1 : index
    %c1_8 = arith.constant 1 : index
    %c0_9 = arith.constant 0 : index
    %3 = vector.load %arg6[%c0_7, %c1, %c1_8, %c0_9] : memref<8x10x10x64xf32, #tpu.memory_space<vmem>>, vector<8x8x8x64xf32>
    tpu.vector_store %arg6[%c0_7, %c1, %c1_8, %c0_9], %2 {strides = array<i32>} : memref<8x10x10x64xf32, #tpu.memory_space<vmem>>, vector<8x8x8x64xf32>,
    %c0_10 = arith.constant 0 : index
    %c0_11 = arith.constant 0 : index
    %c0_12 = arith.constant 0 : index
    %c0_13 = arith.constant 0 : index
    %4 = vector.load %arg6[%c0_10, %c0_11, %c0_12, %c0_13] : memref<8x10x10x64xf32, #tpu.memory_space<vmem>>, vector<8x8x8x64xf32>
    %5 = vector.shape_cast %4 : vector<8x8x8x64xf32> to vector<8x64x64xf32>
    %6 = arith.truncf %5 : vector<8x64x64xf32> to vector<8x64x64xbf16>
    %c0_14 = arith.constant 0 : index
    %c0_15 = arith.constant 0 : index
    %c0_16 = arith.constant 0 : index
    %7 = vector.load %arg7[%c0_14, %c0_15, %c0_16] : memref<8x64x576xbf16, #tpu.memory_space<vmem>>, vector<8x64x64xbf16>
    tpu.vector_store %arg7[%c0_14, %c0_15, %c0_16], %6 {strides = array<i32>} : memref<8x64x576xbf16, #tpu.memory_space<vmem>>, vector<8x64x64xbf16>,
    %c0_17 = arith.constant 0 : index
    %c0_18 = arith.constant 0 : index
    %c1_19 = arith.constant 1 : index
    %c0_20 = arith.constant 0 : index
    %8 = vector.load %arg6[%c0_17, %c0_18, %c1_19, %c0_20] : memref<8x10x10x64xf32, #tpu.memory_space<vmem>>, vector<8x8x8x64xf32>
    %9 = vector.shape_cast %8 : vector<8x8x8x64xf32> to vector<8x64x64xf32>
    %10 = arith.truncf %9 : vector<8x64x64xf32> to vector<8x64x64xbf16>
    %c0_21 = arith.constant 0 : index
    %c0_22 = arith.constant 0 : index
    %c64 = arith.constant 64 : index
    %11 = vector.load %arg7[%c0_21, %c0_22, %c64] : memref<8x64x576xbf16, #tpu.memory_space<vmem>>, vector<8x64x64xbf16>
    tpu.vector_store %arg7[%c0_21, %c0_22, %c64], %10 {strides = array<i32>} : memref<8x64x576xbf16, #tpu.memory_space<vmem>>, vector<8x64x64xbf16>,
    %c0_23 = arith.constant 0 : index
    %c0_24 = arith.constant 0 : index
    %c2 = arith.constant 2 : index
    %c0_25 = arith.constant 0 : index
    %12 = vector.load %arg6[%c0_23, %c0_24, %c2, %c0_25] : memref<8x10x10x64xf32, #tpu.memory_space<vmem>>, vector<8x8x8x64xf32>
    %13 = vector.shape_cast %12 : vector<8x8x8x64xf32> to vector<8x64x64xf32>
    %14 = arith.truncf %13 : vector<8x64x64xf32> to vector<8x64x64xbf16>
    %c0_26 = arith.constant 0 : index
    %c0_27 = arith.constant 0 : index
    %c128 = arith.constant 128 : index
    %15 = vector.load %arg7[%c0_26, %c0_27, %c128] : memref<8x64x576xbf16, #tpu.memory_space<vmem>>, vector<8x64x64xbf16>
    tpu.vector_store %arg7[%c0_26, %c0_27, %c128], %14 {strides = array<i32>} : memref<8x64x576xbf16, #tpu.memory_space<vmem>>, vector<8x64x64xbf16>,
    %c0_28 = arith.constant 0 : index
    %c1_29 = arith.constant 1 : index
    %c0_30 = arith.constant 0 : index
    %c0_31 = arith.constant 0 : index
    %16 = vector.load %arg6[%c0_28, %c1_29, %c0_30, %c0_31] : memref<8x10x10x64xf32, #tpu.memory_space<vmem>>, vector<8x8x8x64xf32>
    %17 = vector.shape_cast %16 : vector<8x8x8x64xf32> to vector<8x64x64xf32>
    %18 = arith.truncf %17 : vector<8x64x64xf32> to vector<8x64x64xbf16>
    %c0_32 = arith.constant 0 : index
    %c0_33 = arith.constant 0 : index
    %c192 = arith.constant 192 : index
    %19 = vector.load %arg7[%c0_32, %c0_33, %c192] : memref<8x64x576xbf16, #tpu.memory_space<vmem>>, vector<8x64x64xbf16>
    tpu.vector_store %arg7[%c0_32, %c0_33, %c192], %18 {strides = array<i32>} : memref<8x64x576xbf16, #tpu.memory_space<vmem>>, vector<8x64x64xbf16>,
    %c0_34 = arith.constant 0 : index
    %c1_35 = arith.constant 1 : index
    %c1_36 = arith.constant 1 : index
    %c0_37 = arith.constant 0 : index
    %20 = vector.load %arg6[%c0_34, %c1_35, %c1_36, %c0_37] : memref<8x10x10x64xf32, #tpu.memory_space<vmem>>, vector<8x8x8x64xf32>
    %21 = vector.shape_cast %20 : vector<8x8x8x64xf32> to vector<8x64x64xf32>
    %22 = arith.truncf %21 : vector<8x64x64xf32> to vector<8x64x64xbf16>
    %c0_38 = arith.constant 0 : index
    %c0_39 = arith.constant 0 : index
    %c256 = arith.constant 256 : index
    %23 = vector.load %arg7[%c0_38, %c0_39, %c256] : memref<8x64x576xbf16, #tpu.memory_space<vmem>>, vector<8x64x64xbf16>
    tpu.vector_store %arg7[%c0_38, %c0_39, %c256], %22 {strides = array<i32>} : memref<8x64x576xbf16, #tpu.memory_space<vmem>>, vector<8x64x64xbf16>,
    %c0_40 = arith.constant 0 : index
    %c1_41 = arith.constant 1 : index
    %c2_42 = arith.constant 2 : index
    %c0_43 = arith.constant 0 : index
    %24 = vector.load %arg6[%c0_40, %c1_41, %c2_42, %c0_43] : memref<8x10x10x64xf32, #tpu.memory_space<vmem>>, vector<8x8x8x64xf32>
    %25 = vector.shape_cast %24 : vector<8x8x8x64xf32> to vector<8x64x64xf32>
    %26 = arith.truncf %25 : vector<8x64x64xf32> to vector<8x64x64xbf16>
    %c0_44 = arith.constant 0 : index
    %c0_45 = arith.constant 0 : index
    %c320 = arith.constant 320 : index
    %27 = vector.load %arg7[%c0_44, %c0_45, %c320] : memref<8x64x576xbf16, #tpu.memory_space<vmem>>, vector<8x64x64xbf16>
    tpu.vector_store %arg7[%c0_44, %c0_45, %c320], %26 {strides = array<i32>} : memref<8x64x576xbf16, #tpu.memory_space<vmem>>, vector<8x64x64xbf16>,
    %c0_46 = arith.constant 0 : index
    %c2_47 = arith.constant 2 : index
    %c0_48 = arith.constant 0 : index
    %c0_49 = arith.constant 0 : index
    %28 = vector.load %arg6[%c0_46, %c2_47, %c0_48, %c0_49] : memref<8x10x10x64xf32, #tpu.memory_space<vmem>>, vector<8x8x8x64xf32>
    %29 = vector.shape_cast %28 : vector<8x8x8x64xf32> to vector<8x64x64xf32>
    %30 = arith.truncf %29 : vector<8x64x64xf32> to vector<8x64x64xbf16>
    %c0_50 = arith.constant 0 : index
    %c0_51 = arith.constant 0 : index
    %c384 = arith.constant 384 : index
    %31 = vector.load %arg7[%c0_50, %c0_51, %c384] : memref<8x64x576xbf16, #tpu.memory_space<vmem>>, vector<8x64x64xbf16>
    tpu.vector_store %arg7[%c0_50, %c0_51, %c384], %30 {strides = array<i32>} : memref<8x64x576xbf16, #tpu.memory_space<vmem>>, vector<8x64x64xbf16>,
    %c0_52 = arith.constant 0 : index
    %c2_53 = arith.constant 2 : index
    %c1_54 = arith.constant 1 : index
    %c0_55 = arith.constant 0 : index
    %32 = vector.load %arg6[%c0_52, %c2_53, %c1_54, %c0_55] : memref<8x10x10x64xf32, #tpu.memory_space<vmem>>, vector<8x8x8x64xf32>
    %33 = vector.shape_cast %32 : vector<8x8x8x64xf32> to vector<8x64x64xf32>
    %34 = arith.truncf %33 : vector<8x64x64xf32> to vector<8x64x64xbf16>
    %c0_56 = arith.constant 0 : index
    %c0_57 = arith.constant 0 : index
    %c448 = arith.constant 448 : index
    %35 = vector.load %arg7[%c0_56, %c0_57, %c448] : memref<8x64x576xbf16, #tpu.memory_space<vmem>>, vector<8x64x64xbf16>
    tpu.vector_store %arg7[%c0_56, %c0_57, %c448], %34 {strides = array<i32>} : memref<8x64x576xbf16, #tpu.memory_space<vmem>>, vector<8x64x64xbf16>,
    %c0_58 = arith.constant 0 : index
    %c2_59 = arith.constant 2 : index
    %c2_60 = arith.constant 2 : index
    %c0_61 = arith.constant 0 : index
    %36 = vector.load %arg6[%c0_58, %c2_59, %c2_60, %c0_61] : memref<8x10x10x64xf32, #tpu.memory_space<vmem>>, vector<8x8x8x64xf32>
    %37 = vector.shape_cast %36 : vector<8x8x8x64xf32> to vector<8x64x64xf32>
    %38 = arith.truncf %37 : vector<8x64x64xf32> to vector<8x64x64xbf16>
    %c0_62 = arith.constant 0 : index
    %c0_63 = arith.constant 0 : index
    %c512 = arith.constant 512 : index
    %39 = vector.load %arg7[%c0_62, %c0_63, %c512] : memref<8x64x576xbf16, #tpu.memory_space<vmem>>, vector<8x64x64xbf16>
    tpu.vector_store %arg7[%c0_62, %c0_63, %c512], %38 {strides = array<i32>} : memref<8x64x576xbf16, #tpu.memory_space<vmem>>, vector<8x64x64xbf16>,
    %c0_64 = arith.constant 0 : index
    %c0_65 = arith.constant 0 : index
    %c0_66 = arith.constant 0 : index
    %40 = vector.load %arg7[%c0_64, %c0_65, %c0_66] : memref<8x64x576xbf16, #tpu.memory_space<vmem>>, vector<8x64x576xbf16>
    %c0_67 = arith.constant 0 : index
    %c0_68 = arith.constant 0 : index
    %c0_69 = arith.constant 0 : index
    %41 = vector.load %arg2[%c0_67, %c0_68, %c0_69] : memref<8x576x64xbf16, #tpu.memory_space<vmem>>, vector<8x576x64xbf16>
    "tpu.trace_start"() <{level = 10 : i32, message = "bpk,bkc->bpc"}> : () -> ()
    %cst_70 = arith.constant dense<0.000000e+00> : vector<8x64x64xf32>
    %42 = tpu.matmul %40, %41, %cst_70 {dimension_numbers = #tpu.dot_dimension_numbers<[2], [1], [1], [2], [0, 0, 0, 1, 1, 2], [0], [0]>} : vector<8x64x576xbf16>, vector<8x576x64xbf16>, vector<8x64x64xf32> -> vector<8x64x64xf32>
    "tpu.trace_stop"() : () -> ()
    %c0_71 = arith.constant 0 : index
    %c0_72 = arith.constant 0 : index
    %c0_73 = arith.constant 0 : index
    %43 = vector.load %arg3[%c0_71, %c0_72, %c0_73] : memref<8x64x64xf32, #tpu.memory_space<vmem>>, vector<8x64x64xf32>
    tpu.vector_store %arg3[%c0_71, %c0_72, %c0_73], %42 {strides = array<i32>} : memref<8x64x64xf32, #tpu.memory_space<vmem>>, vector<8x64x64xf32>,
    %cst_74 = arith.constant dense<0.000000e+00> : vector<64xf32>
    %44 = vector.multi_reduction <add>, %42, %cst_74 [0, 1] : vector<8x64x64xf32> to vector<64xf32>
    %45 = vector.shape_cast %44 : vector<64xf32> to vector<1x1x64xf32>
    %c0_75 = arith.constant 0 : index
    %c0_76 = arith.constant 0 : index
    %c0_77 = arith.constant 0 : index
    %46 = vector.load %arg4[%c0_75, %c0_76, %c0_77] : memref<1x1x64xf32, #tpu.memory_space<vmem>>, vector<1x1x64xf32>
    tpu.vector_store %arg4[%c0_75, %c0_76, %c0_77], %45 {strides = array<i32>} : memref<1x1x64xf32, #tpu.memory_space<vmem>>, vector<1x1x64xf32>,
    %47 = arith.mulf %42, %42 : vector<8x64x64xf32>
    %cst_78 = arith.constant dense<0.000000e+00> : vector<64xf32>
    %48 = vector.multi_reduction <add>, %47, %cst_78 [0, 1] : vector<8x64x64xf32> to vector<64xf32>
    %49 = vector.shape_cast %48 : vector<64xf32> to vector<1x1x64xf32>
    %c0_79 = arith.constant 0 : index
    %c0_80 = arith.constant 0 : index
    %c0_81 = arith.constant 0 : index
    %50 = vector.load %arg5[%c0_79, %c0_80, %c0_81] : memref<1x1x64xf32, #tpu.memory_space<vmem>>, vector<1x1x64xf32>
    tpu.vector_store %arg5[%c0_79, %c0_80, %c0_81], %49 {strides = array<i32>} : memref<1x1x64xf32, #tpu.memory_space<vmem>>, vector<1x1x64xf32>,
    return
  }
  func.func @transform_0(%arg0: i32) -> (i32, i32, i32, i32) {
    %c0_i32 = arith.constant 0 : i32
    %c0_i32_0 = arith.constant 0 : i32
    %c0_i32_1 = arith.constant 0 : i32
    %c0_i32_2 = arith.constant 0 : i32
    return %arg0, %c0_i32, %c0_i32_0, %c0_i32_1 : i32, i32, i32, i32
  }
  func.func @transform_1(%arg0: i32) -> (i32, i32, i32) {
    %c0_i32 = arith.constant 0 : i32
    %c0_i32_0 = arith.constant 0 : i32
    %c0_i32_1 = arith.constant 0 : i32
    return %arg0, %c0_i32, %c0_i32_0 : i32, i32, i32
  }
  func.func @transform_2(%arg0: i32) -> (i32, i32, i32) {
    %c0_i32 = arith.constant 0 : i32
    %c0_i32_0 = arith.constant 0 : i32
    %c0_i32_1 = arith.constant 0 : i32
    return %arg0, %c0_i32, %c0_i32_0 : i32, i32, i32
  }
  func.func @transform_3(%arg0: i32) -> (i32, i32, i32) {
    %c0_i32 = arith.constant 0 : i32
    %c0_i32_0 = arith.constant 0 : i32
    %c0_i32_1 = arith.constant 0 : i32
    return %arg0, %c0_i32, %c0_i32_0 : i32, i32, i32
  }
  func.func @transform_4(%arg0: i32) -> (i32, i32, i32) {
    %c0_i32 = arith.constant 0 : i32
    %c0_i32_0 = arith.constant 0 : i32
    %c0_i32_1 = arith.constant 0 : i32
    return %arg0, %c0_i32, %c0_i32_0 : i32, i32, i32
  }
}

module attributes {stable_mosaic.version = 11 : i64} {
  func.func @_bn_relu_add_kernel(%arg0: i32, %arg1: memref<16x8x512xf32, #tpu.memory_space<vmem>>, %arg2: memref<16x8x512xf32, #tpu.memory_space<vmem>>, %arg3: memref<1x512xf32, #tpu.memory_space<vmem>>, %arg4: memref<1x512xf32, #tpu.memory_space<vmem>>, %arg5: memref<16x8x512xf32, #tpu.memory_space<vmem>>) attributes {dimension_semantics = [#tpu.dimension_semantics<parallel>], iteration_bounds = array<i64: 1>, scalar_prefetch = 0 : i64, scratch_operands = 0 : i64, tpu.core_type = #tpu.core_type<tc>, window_params = [{transform_indices = @transform_0, window_bounds = array<i64: 16, 8, 512>}, {transform_indices = @transform_1, window_bounds = array<i64: 16, 8, 512>}, {pipeline_mode = #tpu.pipeline_mode<synchronous>, transform_indices = @transform_2, window_bounds = array<i64: 1, 512>}, {pipeline_mode = #tpu.pipeline_mode<synchronous>, transform_indices = @transform_3, window_bounds = array<i64: 1, 512>}, {transform_indices = @transform_4, window_bounds = array<i64: 16, 8, 512>}]} {
    %c0 = arith.constant 0 : index
    %c0_0 = arith.constant 0 : index
    %c0_1 = arith.constant 0 : index
    %0 = vector.load %arg2[%c0, %c0_0, %c0_1] : memref<16x8x512xf32, #tpu.memory_space<vmem>>, vector<16x8x512xf32>
    %c0_2 = arith.constant 0 : index
    %c0_3 = arith.constant 0 : index
    %1 = vector.load %arg3[%c0_2, %c0_3] : memref<1x512xf32, #tpu.memory_space<vmem>>, vector<1x512xf32>
    %2 = vector.shape_cast %1 : vector<1x512xf32> to vector<1x1x512xf32>
    %3 = vector.broadcast %2 : vector<1x1x512xf32> to vector<16x8x512xf32>
    %4 = arith.mulf %0, %3 : vector<16x8x512xf32>
    %c0_4 = arith.constant 0 : index
    %c0_5 = arith.constant 0 : index
    %5 = vector.load %arg4[%c0_4, %c0_5] : memref<1x512xf32, #tpu.memory_space<vmem>>, vector<1x512xf32>
    %6 = vector.shape_cast %5 : vector<1x512xf32> to vector<1x1x512xf32>
    %7 = vector.broadcast %6 : vector<1x1x512xf32> to vector<16x8x512xf32>
    %8 = arith.addf %4, %7 : vector<16x8x512xf32>
    %c0_6 = arith.constant 0 : index
    %c0_7 = arith.constant 0 : index
    %c0_8 = arith.constant 0 : index
    %9 = vector.load %arg1[%c0_6, %c0_7, %c0_8] : memref<16x8x512xf32, #tpu.memory_space<vmem>>, vector<16x8x512xf32>
    %cst = arith.constant 0.000000e+00 : f32
    %10 = vector.broadcast %cst : f32 to vector<16x8x512xf32>
    %11 = arith.maximumf %8, %10 : vector<16x8x512xf32>
    %12 = arith.addf %9, %11 : vector<16x8x512xf32>
    %c0_9 = arith.constant 0 : index
    %c0_10 = arith.constant 0 : index
    %c0_11 = arith.constant 0 : index
    %13 = vector.load %arg5[%c0_9, %c0_10, %c0_11] : memref<16x8x512xf32, #tpu.memory_space<vmem>>, vector<16x8x512xf32>
    tpu.vector_store %arg5[%c0_9, %c0_10, %c0_11], %12 {strides = array<i32>} : memref<16x8x512xf32, #tpu.memory_space<vmem>>, vector<16x8x512xf32>,
    return
  }
  func.func @transform_0(%arg0: i32) -> (i32, i32, i32) {
    %c0_i32 = arith.constant 0 : i32
    %c0_i32_0 = arith.constant 0 : i32
    %c0_i32_1 = arith.constant 0 : i32
    return %arg0, %c0_i32, %c0_i32_0 : i32, i32, i32
  }
  func.func @transform_1(%arg0: i32) -> (i32, i32, i32) {
    %c0_i32 = arith.constant 0 : i32
    %c0_i32_0 = arith.constant 0 : i32
    %c0_i32_1 = arith.constant 0 : i32
    return %arg0, %c0_i32, %c0_i32_0 : i32, i32, i32
  }
  func.func @transform_2(%arg0: i32) -> (i32, i32) {
    %c0_i32 = arith.constant 0 : i32
    %c0_i32_0 = arith.constant 0 : i32
    %c0_i32_1 = arith.constant 0 : i32
    return %c0_i32, %c0_i32_0 : i32, i32
  }
  func.func @transform_3(%arg0: i32) -> (i32, i32) {
    %c0_i32 = arith.constant 0 : i32
    %c0_i32_0 = arith.constant 0 : i32
    %c0_i32_1 = arith.constant 0 : i32
    return %c0_i32, %c0_i32_0 : i32, i32
  }
  func.func @transform_4(%arg0: i32) -> (i32, i32, i32) {
    %c0_i32 = arith.constant 0 : i32
    %c0_i32_0 = arith.constant 0 : i32
    %c0_i32_1 = arith.constant 0 : i32
    return %arg0, %c0_i32, %c0_i32_0 : i32, i32, i32
  }
}

</mosaic_0001>

<bundles_post_ra>
// kernel: brain_kitchen_forward.3
= control target key start
LH: loop header
LB: loop body
LE: loop exit
PB: predicated region body
PF: predicated region fallthrough
CT: control target
= control target key end

     0   :  { %s1240_s1 = inlined_call_operand.vmem [shape: f32[16,8,512], index: 1, kind: input, shape index: {}]   ;;  %s1241_s2 = inlined_call_operand.vmem [shape: f32[1,512], index: 2, kind: input, shape index: {}]   ;;  %s1242_s3 = inlined_call_operand.vmem [shape: f32[1,512], index: 3, kind: input, shape index: {}]   ;;  %s1243_s0 = inlined_call_operand.vmem [shape: f32[16,8,512], index: 0, kind: input, shape index: {}]   ;;  %s1244_s4 = inlined_call_operand.vmem [shape: f32[16,8,512], index: 4, kind: output, shape index: {}]  }
   0x1   :  { %v17_v0 = vld [vmem:[%s1240_s1] sm:$0xff]  ;;  %v18_v5 = vld [vmem:[%s1240_s1 + $0x8] sm:$0xff]  ;;  %v19_v8 = vld [vmem:[%s1240_s1 + $0x10] sm:$0xff] }
   0x2   :  { %v81_v1 = vld [vmem:[%s1241_s2] sm:$0xf]  ;;  %v20_v14 = vld [vmem:[%s1240_s1 + $0x18] sm:$0xff]  ;;  %v22_v20 = vld [vmem:[%s1240_s1 + $0x28] sm:$0xff] }
   0x3   :  { %v155_v2 = vld [vmem:[%s1242_s3] sm:$0xf]  ;;  %v523_v3 = vperm.slane %v81_v1, 0  ;;  %v530_v6 = vperm.slane %v81_v1, 1  ;;  %v537_v9 = vperm.slane %v81_v1, 2  ;;  %v541_v11 = vperm.slane %v81_v1, 3 }
   0x4   :  { %v525_v4 = vperm.slane %v155_v2, 0  ;;  %v532_v7 = vperm.slane %v155_v2, 1  ;;  %v539_v10 = vperm.slane %v155_v2, 2  ;;  %v548_v15 = vperm.slane %v155_v2, 3  ;;  %v21_v16 = vld [vmem:[%s1240_s1 + $0x20] sm:$0xff]  ;;  %v23_v24 = vld [vmem:[%s1240_s1 + $0x30] sm:$0xff] }
   0x5   :  { %v91_v12 = vmul.f32 %v523_v3, %v17_v0  ;;  %v92_v13 = vmul.f32 %v530_v6, %v18_v5  ;;  %v93_v17 = vmul.f32 %v537_v9, %v19_v8  ;;  %v94_v18 = vmul.f32 %v541_v11, %v20_v14  ;;  %v24_v25 = vld [vmem:[%s1240_s1 + $0x38] sm:$0xff]  ;;  %v229_v26 = vld [vmem:[%s1243_s0] sm:$0xff]  ;;  %v230_v27 = vld [vmem:[%s1243_s0 + $0x8] sm:$0xff] }
   0x6   :  { %v95_v19 = vmul.f32 %v523_v3, %v21_v16  ;;  %v96_v23 = vmul.f32 %v530_v6, %v22_v20  ;;  %v231_v29 = vld [vmem:[%s1243_s0 + $0x10] sm:$0xff]  ;;  %v97_v32 = vmul.f32 %v537_v9, %v23_v24  ;;  %v232_v35 = vld [vmem:[%s1243_s0 + $0x18] sm:$0xff]  ;;  %v233_v36 = vld [vmem:[%s1243_s0 + $0x20] sm:$0xff]  ;;  %v98_v39 = vmul.f32 %v541_v11, %v24_v25 }
   0x7   :  { %v165_v21 = vadd.f32 %v525_v4, %v91_v12  ;;  %v166_v22 = vadd.f32 %v532_v7, %v92_v13  ;;  %v167_v28 = vadd.f32 %v539_v10, %v93_v17  ;;  %v168_v30 = vadd.f32 %v548_v15, %v94_v18  ;;  %v234_v38 = vld [vmem:[%s1243_s0 + $0x28] sm:$0xff]  ;;  %v235_v44 = vld [vmem:[%s1243_s0 + $0x30] sm:$0xff]  ;;  %v25_v45 = vld [vmem:[%s1240_s1 + $0x40] sm:$0xff] }
   0x8   :  { %v169_v31 = vadd.f32 %v525_v4, %v95_v19  ;;  %v170_v37 = vadd.f32 %v532_v7, %v96_v23  ;;  %v171_v43 = vadd.f32 %v539_v10, %v97_v32  ;;  %v26_v46 = vld [vmem:[%s1240_s1 + $0x48] sm:$0xff]  ;;  %v172_v50 = vadd.f32 %v548_v15, %v98_v39  ;;  %v27_v51 = vld [vmem:[%s1240_s1 + $0x50] sm:$0xff]  ;;  %v28_v52 = vld [vmem:[%s1240_s1 + $0x58] sm:$0xff] }
   0x9   :  { %v293_v33 = vmax.f32 %v165_v21, 0.0  ;;  %v294_v34 = vmax.f32 %v166_v22, 0.0  ;;  %v295_v40 = vmax.f32 %v167_v28, 0.0  ;;  %v296_v41 = vmax.f32 %v168_v30, 0.0  ;;  %v29_v53 = vld [vmem:[%s1240_s1 + $0x60] sm:$0xff]  ;;  %v236_v58 = vld [vmem:[%s1243_s0 + $0x38] sm:$0xff] }
   0xa   :  { %v297_v42 = vmax.f32 %v169_v31, 0.0  ;;  %v298_v49 = vmax.f32 %v170_v37, 0.0  ;;  %v299_v57 = vmax.f32 %v171_v43, 0.0  ;;  %v30_v59 = vld [vmem:[%s1240_s1 + $0x68] sm:$0xff]  ;;  %v300_v61 = vmax.f32 %v172_v50, 0.0  ;;  %v31_v0 = vld [vmem:[%s1240_s1 + $0x70] sm:$0xff] }
   0xb   :  { %v357_v47 = vadd.f32 %v293_v33, %v229_v26  ;;  %v358_v48 = vadd.f32 %v294_v34, %v230_v27  ;;  %v359_v54 = vadd.f32 %v295_v40, %v231_v29  ;;  %v360_v55 = vadd.f32 %v296_v41, %v232_v35  ;;  %v32_v12 = vld [vmem:[%s1240_s1 + $0x78] sm:$0xff]  ;;  %v237_v16 = vld [vmem:[%s1243_s0 + $0x40] sm:$0xff]  ;;  %v238_v19 = vld [vmem:[%s1243_s0 + $0x48] sm:$0xff] }
   0xc   :  { %v361_v56 = vadd.f32 %v297_v42, %v233_v36  ;;  %v362_v60 = vadd.f32 %v298_v49, %v234_v38  ;;  %v99_v62 = vmul.f32 %v523_v3, %v25_v45  ;;  %v100_v63 = vmul.f32 %v530_v6, %v26_v46  ;;  %v239_v21 = vld [vmem:[%s1243_s0 + $0x50] sm:$0xff]  ;;  %v240_v23 = vld [vmem:[%s1243_s0 + $0x58] sm:$0xff]  ;;  %v241_v28 = vld [vmem:[%s1243_s0 + $0x60] sm:$0xff] }
   0xd   :  { %421 = vst [vmem:[%s1244_s4] sm:$0xff] %v357_v47  ;;  %v363_v1 = vadd.f32 %v299_v57, %v235_v44  ;;  %v101_v2 = vmul.f32 %v537_v9, %v27_v51  ;;  %v102_v5 = vmul.f32 %v541_v11, %v28_v52  ;;  %v103_v8 = vmul.f32 %v523_v3, %v29_v53  ;;  %v242_v30 = vld [vmem:[%s1243_s0 + $0x68] sm:$0xff]  ;;  %v243_v31 = vld [vmem:[%s1243_s0 + $0x70] sm:$0xff]  ;;  %v33_v37 = vld [vmem:[%s1240_s1 + $0x80] sm:$0xff] }
   0xe   :  { %422 = vst [vmem:[%s1244_s4 + $0x8] sm:$0xff] %v358_v48  ;;  %v364_v13 = vadd.f32 %v300_v61, %v236_v58  ;;  %v173_v14 = vadd.f32 %v525_v4, %v99_v62  ;;  %v174_v17 = vadd.f32 %v532_v7, %v100_v63  ;;  %v104_v18 = vmul.f32 %v530_v6, %v30_v59  ;;  %v34_v38 = vld [vmem:[%s1240_s1 + $0x88] sm:$0xff]  ;;  %v35_v43 = vld [vmem:[%s1240_s1 + $0x90] sm:$0xff]  ;;  %v36_v44 = vld [vmem:[%s1240_s1 + $0x98] sm:$0xff] }
   0xf   :  { %423 = vst [vmem:[%s1244_s4 + $0x10] sm:$0xff] %v359_v54  ;;  %v175_v20 = vadd.f32 %v539_v10, %v101_v2  ;;  %v176_v22 = vadd.f32 %v548_v15, %v102_v5  ;;  %v177_v24 = vadd.f32 %v525_v4, %v103_v8  ;;  %v105_v25 = vmul.f32 %v537_v9, %v31_v0  ;;  %v37_v45 = vld [vmem:[%s1240_s1 + $0xa0] sm:$0xff]  ;;  %v244_v50 = vld [vmem:[%s1243_s0 + $0x78] sm:$0xff]  ;;  %v38_v51 = vld [vmem:[%s1240_s1 + $0xa8] sm:$0xff] }
  0x10   :  { %424 = vst [vmem:[%s1244_s4 + $0x18] sm:$0xff] %v360_v55  ;;  %v301_v26 = vmax.f32 %v173_v14, 0.0  ;;  %v302_v27 = vmax.f32 %v174_v17, 0.0  ;;  %v178_v29 = vadd.f32 %v532_v7, %v104_v18  ;;  %v106_v32 = vmul.f32 %v541_v11, %v32_v12  ;;  %v40_v61 = vld [vmem:[%s1240_s1 + $0xb8] sm:$0xff]  ;;  %v245_v0 = vld [vmem:[%s1243_s0 + $0x80] sm:$0xff]  ;;  %v246_v5 = vld [vmem:[%s1243_s0 + $0x88] sm:$0xff] }
  0x11   :  { %425 = vst [vmem:[%s1244_s4 + $0x20] sm:$0xff] %v361_v56  ;;  %v303_v33 = vmax.f32 %v175_v20, 0.0  ;;  %v304_v34 = vmax.f32 %v176_v22, 0.0  ;;  %v305_v35 = vmax.f32 %v177_v24, 0.0  ;;  %v179_v36 = vadd.f32 %v539_v10, %v105_v25  ;;  %v39_v56 = vld [vmem:[%s1240_s1 + $0xb0] sm:$0xff]  ;;  %v248_v14 = vld [vmem:[%s1243_s0 + $0x98] sm:$0xff] }
  0x12   :  { %426 = vst [vmem:[%s1244_s4 + $0x28] sm:$0xff] %v362_v60  ;;  %v365_v39 = vadd.f32 %v301_v26, %v237_v16  ;;  %v366_v40 = vadd.f32 %v302_v27, %v238_v19  ;;  %v306_v41 = vmax.f32 %v178_v29, 0.0  ;;  %v180_v42 = vadd.f32 %v548_v15, %v106_v32  ;;  %v247_v12 = vld [vmem:[%s1243_s0 + $0x90] sm:$0xff]  ;;  %v249_v20 = vld [vmem:[%s1243_s0 + $0xa0] sm:$0xff]  ;;  %v250_v22 = vld [vmem:[%s1243_s0 + $0xa8] sm:$0xff] }
  0x13   :  { %427 = vst [vmem:[%s1244_s4 + $0x30] sm:$0xff] %v363_v1  ;;  %v367_v46 = vadd.f32 %v303_v33, %v239_v21  ;;  %v368_v47 = vadd.f32 %v304_v34, %v240_v23  ;;  %v369_v48 = vadd.f32 %v305_v35, %v241_v28  ;;  %v307_v49 = vmax.f32 %v179_v36, 0.0  ;;  %v251_v23 = vld [vmem:[%s1243_s0 + $0xb0] sm:$0xff]  ;;  %v41_v29 = vld [vmem:[%s1240_s1 + $0xc0] sm:$0xff]  ;;  %v44_v36 = vld [vmem:[%s1240_s1 + $0xd8] sm:$0xff] }
  0x14   :  { %428 = vst [vmem:[%s1244_s4 + $0x38] sm:$0xff] %v364_v13  ;;  %v370_v52 = vadd.f32 %v306_v41, %v242_v30  ;;  %v308_v53 = vmax.f32 %v180_v42, 0.0  ;;  %v107_v54 = vmul.f32 %v523_v3, %v33_v37  ;;  %v108_v55 = vmul.f32 %v530_v6, %v34_v38  ;;  %v42_v30 = vld [vmem:[%s1240_s1 + $0xc8] sm:$0xff]  ;;  %v43_v35 = vld [vmem:[%s1240_s1 + $0xd0] sm:$0xff]  ;;  %v45_v37 = vld [vmem:[%s1240_s1 + $0xe0] sm:$0xff] }
  0x15   :  { %429 = vst [vmem:[%s1244_s4 + $0x40] sm:$0xff] %v365_v39  ;;  %v371_v57 = vadd.f32 %v307_v49, %v243_v31  ;;  %v109_v58 = vmul.f32 %v537_v9, %v35_v43  ;;  %v110_v59 = vmul.f32 %v541_v11, %v36_v44  ;;  %v111_v60 = vmul.f32 %v523_v3, %v37_v45  ;;  %v252_v42 = vld [vmem:[%s1243_s0 + $0xb8] sm:$0xff]  ;;  %v46_v43 = vld [vmem:[%s1240_s1 + $0xe8] sm:$0xff] }
  0x16   :  { %430 = vst [vmem:[%s1244_s4 + $0x48] sm:$0xff] %v366_v40  ;;  %v372_v62 = vadd.f32 %v308_v53, %v244_v50  ;;  %v181_v63 = vadd.f32 %v525_v4, %v107_v54  ;;  %v182_v1 = vadd.f32 %v532_v7, %v108_v55  ;;  %v112_v2 = vmul.f32 %v530_v6, %v38_v51  ;;  %v48_v53 = vld [vmem:[%s1240_s1 + $0xf8] sm:$0xff] }
  0x17   :  { %431 = vst [vmem:[%s1244_s4 + $0x50] sm:$0xff] %v367_v46  ;;  %v183_v8 = vadd.f32 %v539_v10, %v109_v58  ;;  %v184_v13 = vadd.f32 %v548_v15, %v110_v59  ;;  %v185_v16 = vadd.f32 %v525_v4, %v111_v60  ;;  %v113_v17 = vmul.f32 %v537_v9, %v39_v56  ;;  %v253_v56 = vld [vmem:[%s1243_s0 + $0xc0] sm:$0xff]  ;;  %v254_v59 = vld [vmem:[%s1243_s0 + $0xc8] sm:$0xff] }
  0x18   :  { %432 = vst [vmem:[%s1244_s4 + $0x58] sm:$0xff] %v368_v47  ;;  %v309_v18 = vmax.f32 %v181_v63, 0.0  ;;  %v310_v19 = vmax.f32 %v182_v1, 0.0  ;;  %v186_v21 = vadd.f32 %v532_v7, %v112_v2  ;;  %v114_v24 = vmul.f32 %v541_v11, %v40_v61  ;;  %v255_v61 = vld [vmem:[%s1243_s0 + $0xd0] sm:$0xff]  ;;  %v256_v63 = vld [vmem:[%s1243_s0 + $0xd8] sm:$0xff] }
  0x19   :  { %433 = vst [vmem:[%s1244_s4 + $0x60] sm:$0xff] %v369_v48  ;;  %v311_v25 = vmax.f32 %v183_v8, 0.0  ;;  %v312_v26 = vmax.f32 %v184_v13, 0.0  ;;  %v313_v27 = vmax.f32 %v185_v16, 0.0  ;;  %v187_v28 = vadd.f32 %v539_v10, %v113_v17  ;;  %v47_v48 = vld [vmem:[%s1240_s1 + $0xf0] sm:$0xff]  ;;  %v257_v8 = vld [vmem:[%s1243_s0 + $0xe0] sm:$0xff] }
  0x1a   :  { %434 = vst [vmem:[%s1244_s4 + $0x68] sm:$0xff] %v370_v52  ;;  %v373_v31 = vadd.f32 %v309_v18, %v245_v0  ;;  %v374_v32 = vadd.f32 %v310_v19, %v246_v5  ;;  %v314_v33 = vmax.f32 %v186_v21, 0.0  ;;  %v188_v34 = vadd.f32 %v548_v15, %v114_v24  ;;  %v258_v13 = vld [vmem:[%s1243_s0 + $0xe8] sm:$0xff]  ;;  %v49_v21 = vld [vmem:[%s1240_s1 + $0x100] sm:$0xff] }
  0x1b   :  { %435 = vst [vmem:[%s1244_s4 + $0x70] sm:$0xff] %v371_v57  ;;  %v375_v38 = vadd.f32 %v311_v25, %v247_v12  ;;  %v376_v39 = vadd.f32 %v312_v26, %v248_v14  ;;  %v377_v40 = vadd.f32 %v313_v27, %v249_v20  ;;  %v315_v41 = vmax.f32 %v187_v28, 0.0  ;;  %v259_v14 = vld [vmem:[%s1243_s0 + $0xf0] sm:$0xff]  ;;  %v52_v28 = vld [vmem:[%s1240_s1 + $0x118] sm:$0xff] }
  0x1c   :  { %436 = vst [vmem:[%s1244_s4 + $0x78] sm:$0xff] %v372_v62  ;;  %v378_v44 = vadd.f32 %v314_v33, %v250_v22  ;;  %v316_v45 = vmax.f32 %v188_v34, 0.0  ;;  %v115_v46 = vmul.f32 %v523_v3, %v41_v29  ;;  %v116_v47 = vmul.f32 %v530_v6, %v42_v30  ;;  %v50_v22 = vld [vmem:[%s1240_s1 + $0x108] sm:$0xff]  ;;  %v51_v27 = vld [vmem:[%s1240_s1 + $0x110] sm:$0xff]  ;;  %v53_v29 = vld [vmem:[%s1240_s1 + $0x120] sm:$0xff] }
  0x1d   :  { %437 = vst [vmem:[%s1244_s4 + $0x80] sm:$0xff] %v373_v31  ;;  %v379_v49 = vadd.f32 %v315_v41, %v251_v23  ;;  %v117_v50 = vmul.f32 %v537_v9, %v43_v35  ;;  %v118_v51 = vmul.f32 %v541_v11, %v44_v36  ;;  %v119_v52 = vmul.f32 %v523_v3, %v45_v37  ;;  %v260_v34 = vld [vmem:[%s1243_s0 + $0xf8] sm:$0xff]  ;;  %v54_v35 = vld [vmem:[%s1240_s1 + $0x128] sm:$0xff] }
  0x1e   :  { %438 = vst [vmem:[%s1244_s4 + $0x88] sm:$0xff] %v374_v32  ;;  %v380_v54 = vadd.f32 %v316_v45, %v252_v42  ;;  %v189_v55 = vadd.f32 %v525_v4, %v115_v46  ;;  %v190_v57 = vadd.f32 %v532_v7, %v116_v47  ;;  %v120_v58 = vmul.f32 %v530_v6, %v46_v43  ;;  %v56_v45 = vld [vmem:[%s1240_s1 + $0x138] sm:$0xff] }
  0x1f   :  { %439 = vst [vmem:[%s1244_s4 + $0x90] sm:$0xff] %v375_v38  ;;  %v191_v60 = vadd.f32 %v539_v10, %v117_v50  ;;  %v192_v62 = vadd.f32 %v548_v15, %v118_v51  ;;  %v193_v0 = vadd.f32 %v525_v4, %v119_v52  ;;  %v121_v1 = vmul.f32 %v537_v9, %v47_v48  ;;  %v261_v48 = vld [vmem:[%s1243_s0 + $0x100] sm:$0xff]  ;;  %v262_v51 = vld [vmem:[%s1243_s0 + $0x108] sm:$0xff] }
  0x20   :  { %440 = vst [vmem:[%s1244_s4 + $0x98] sm:$0xff] %v376_v39  ;;  %v317_v2 = vmax.f32 %v189_v55, 0.0  ;;  %v318_v5 = vmax.f32 %v190_v57, 0.0  ;;  %v194_v12 = vadd.f32 %v532_v7, %v120_v58  ;;  %v122_v16 = vmul.f32 %v541_v11, %v48_v53  ;;  %v263_v53 = vld [vmem:[%s1243_s0 + $0x110] sm:$0xff]  ;;  %v264_v55 = vld [vmem:[%s1243_s0 + $0x118] sm:$0xff] }
  0x21   :  { %441 = vst [vmem:[%s1244_s4 + $0xa0] sm:$0xff] %v377_v40  ;;  %v319_v17 = vmax.f32 %v191_v60, 0.0  ;;  %v320_v18 = vmax.f32 %v192_v62, 0.0  ;;  %v321_v19 = vmax.f32 %v193_v0, 0.0  ;;  %v195_v20 = vadd.f32 %v539_v10, %v121_v1  ;;  %v55_v40 = vld [vmem:[%s1240_s1 + $0x130] sm:$0xff]  ;;  %v265_v60 = vld [vmem:[%s1243_s0 + $0x120] sm:$0xff] }
  0x22   :  { %442 = vst [vmem:[%s1244_s4 + $0xa8] sm:$0xff] %v378_v44  ;;  %v381_v23 = vadd.f32 %v317_v2, %v253_v56  ;;  %v382_v24 = vadd.f32 %v318_v5, %v254_v59  ;;  %v322_v25 = vmax.f32 %v194_v12, 0.0  ;;  %v196_v26 = vadd.f32 %v548_v15, %v122_v16  ;;  %v266_v62 = vld [vmem:[%s1243_s0 + $0x128] sm:$0xff]  ;;  %v57_v12 = vld [vmem:[%s1240_s1 + $0x140] sm:$0xff] }
  0x23   :  { %443 = vst [vmem:[%s1244_s4 + $0xb0] sm:$0xff] %v379_v49  ;;  %v383_v30 = vadd.f32 %v319_v17, %v255_v61  ;;  %v384_v31 = vadd.f32 %v320_v18, %v256_v63  ;;  %v385_v32 = vadd.f32 %v321_v19, %v257_v8  ;;  %v323_v33 = vmax.f32 %v195_v20, 0.0  ;;  %v267_v63 = vld [vmem:[%s1243_s0 + $0x130] sm:$0xff]  ;;  %v60_v20 = vld [vmem:[%s1240_s1 + $0x158] sm:$0xff] }
  0x24   :  { %444 = vst [vmem:[%s1244_s4 + $0xb8] sm:$0xff] %v380_v54  ;;  %v386_v36 = vadd.f32 %v322_v25, %v258_v13  ;;  %v324_v37 = vmax.f32 %v196_v26, 0.0  ;;  %v123_v38 = vmul.f32 %v523_v3, %v49_v21  ;;  %v124_v39 = vmul.f32 %v530_v6, %v50_v22  ;;  %v58_v13 = vld [vmem:[%s1240_s1 + $0x148] sm:$0xff]  ;;  %v59_v19 = vld [vmem:[%s1240_s1 + $0x150] sm:$0xff]  ;;  %v61_v21 = vld [vmem:[%s1240_s1 + $0x160] sm:$0xff] }
  0x25   :  { %445 = vst [vmem:[%s1244_s4 + $0xc0] sm:$0xff] %v381_v23  ;;  %v387_v41 = vadd.f32 %v323_v33, %v259_v14  ;;  %v125_v42 = vmul.f32 %v537_v9, %v51_v27  ;;  %v126_v43 = vmul.f32 %v541_v11, %v52_v28  ;;  %v127_v44 = vmul.f32 %v523_v3, %v53_v29  ;;  %v268_v26 = vld [vmem:[%s1243_s0 + $0x138] sm:$0xff]  ;;  %v62_v27 = vld [vmem:[%s1240_s1 + $0x168] sm:$0xff] }
  0x26   :  { %446 = vst [vmem:[%s1244_s4 + $0xc8] sm:$0xff] %v382_v24  ;;  %v388_v46 = vadd.f32 %v324_v37, %v260_v34  ;;  %v197_v47 = vadd.f32 %v525_v4, %v123_v38  ;;  %v198_v49 = vadd.f32 %v532_v7, %v124_v39  ;;  %v128_v50 = vmul.f32 %v530_v6, %v54_v35  ;;  %v64_v37 = vld [vmem:[%s1240_s1 + $0x178] sm:$0xff] }
  0x27   :  { %447 = vst [vmem:[%s1244_s4 + $0xd0] sm:$0xff] %v383_v30  ;;  %v199_v52 = vadd.f32 %v539_v10, %v125_v42  ;;  %v200_v54 = vadd.f32 %v548_v15, %v126_v43  ;;  %v201_v56 = vadd.f32 %v525_v4, %v127_v44  ;;  %v129_v57 = vmul.f32 %v537_v9, %v55_v40  ;;  %v269_v40 = vld [vmem:[%s1243_s0 + $0x140] sm:$0xff]  ;;  %v270_v43 = vld [vmem:[%s1243_s0 + $0x148] sm:$0xff] }
  0x28   :  { %448 = vst [vmem:[%s1244_s4 + $0xd8] sm:$0xff] %v384_v31  ;;  %v325_v58 = vmax.f32 %v197_v47, 0.0  ;;  %v326_v59 = vmax.f32 %v198_v49, 0.0  ;;  %v202_v61 = vadd.f32 %v532_v7, %v128_v50  ;;  %v130_v0 = vmul.f32 %v541_v11, %v56_v45  ;;  %v271_v45 = vld [vmem:[%s1243_s0 + $0x150] sm:$0xff]  ;;  %v272_v47 = vld [vmem:[%s1243_s0 + $0x158] sm:$0xff] }
  0x29   :  { %449 = vst [vmem:[%s1244_s4 + $0xe0] sm:$0xff] %v385_v32  ;;  %v327_v1 = vmax.f32 %v199_v52, 0.0  ;;  %v328_v2 = vmax.f32 %v200_v54, 0.0  ;;  %v329_v5 = vmax.f32 %v201_v56, 0.0  ;;  %v203_v8 = vadd.f32 %v539_v10, %v129_v57  ;;  %v63_v32 = vld [vmem:[%s1240_s1 + $0x170] sm:$0xff]  ;;  %v273_v52 = vld [vmem:[%s1243_s0 + $0x160] sm:$0xff] }
  0x2a   :  { %450 = vst [vmem:[%s1244_s4 + $0xe8] sm:$0xff] %v386_v36  ;;  %v389_v14 = vadd.f32 %v325_v58, %v261_v48  ;;  %v390_v16 = vadd.f32 %v326_v59, %v262_v51  ;;  %v330_v17 = vmax.f32 %v202_v61, 0.0  ;;  %v204_v18 = vadd.f32 %v548_v15, %v130_v0  ;;  %v274_v54 = vld [vmem:[%s1243_s0 + $0x168] sm:$0xff]  ;;  %v65_v61 = vld [vmem:[%s1240_s1 + $0x180] sm:$0xff] }
  0x2b   :  { %451 = vst [vmem:[%s1244_s4 + $0xf0] sm:$0xff] %v387_v41  ;;  %v391_v22 = vadd.f32 %v327_v1, %v263_v53  ;;  %v392_v23 = vadd.f32 %v328_v2, %v264_v55  ;;  %v393_v24 = vadd.f32 %v329_v5, %v265_v60  ;;  %v331_v25 = vmax.f32 %v203_v8, 0.0  ;;  %v275_v55 = vld [vmem:[%s1243_s0 + $0x170] sm:$0xff]  ;;  %v68_v8 = vld [vmem:[%s1240_s1 + $0x198] sm:$0xff] }
  0x2c   :  { %452 = vst [vmem:[%s1244_s4 + $0xf8] sm:$0xff] %v388_v46  ;;  %v394_v28 = vadd.f32 %v330_v17, %v266_v62  ;;  %v332_v29 = vmax.f32 %v204_v18, 0.0  ;;  %v131_v30 = vmul.f32 %v523_v3, %v57_v12  ;;  %v132_v31 = vmul.f32 %v530_v6, %v58_v13  ;;  %v66_v62 = vld [vmem:[%s1240_s1 + $0x188] sm:$0xff]  ;;  %v67_v5 = vld [vmem:[%s1240_s1 + $0x190] sm:$0xff]  ;;  %v69_v12 = vld [vmem:[%s1240_s1 + $0x1a0] sm:$0xff] }
  0x2d   :  { %453 = vst [vmem:[%s1244_s4 + $0x100] sm:$0xff] %v389_v14  ;;  %v395_v33 = vadd.f32 %v331_v25, %v267_v63  ;;  %v133_v34 = vmul.f32 %v537_v9, %v59_v19  ;;  %v134_v35 = vmul.f32 %v541_v11, %v60_v20  ;;  %v135_v36 = vmul.f32 %v523_v3, %v61_v21  ;;  %v276_v18 = vld [vmem:[%s1243_s0 + $0x178] sm:$0xff]  ;;  %v70_v19 = vld [vmem:[%s1240_s1 + $0x1a8] sm:$0xff] }
  0x2e   :  { %454 = vst [vmem:[%s1244_s4 + $0x108] sm:$0xff] %v390_v16  ;;  %v396_v38 = vadd.f32 %v332_v29, %v268_v26  ;;  %v205_v39 = vadd.f32 %v525_v4, %v131_v30  ;;  %v206_v41 = vadd.f32 %v532_v7, %v132_v31  ;;  %v136_v42 = vmul.f32 %v530_v6, %v62_v27  ;;  %v72_v29 = vld [vmem:[%s1240_s1 + $0x1b8] sm:$0xff] }
  0x2f   :  { %455 = vst [vmem:[%s1244_s4 + $0x110] sm:$0xff] %v391_v22  ;;  %v207_v44 = vadd.f32 %v539_v10, %v133_v34  ;;  %v208_v46 = vadd.f32 %v548_v15, %v134_v35  ;;  %v209_v48 = vadd.f32 %v525_v4, %v135_v36  ;;  %v137_v49 = vmul.f32 %v537_v9, %v63_v32  ;;  %v277_v32 = vld [vmem:[%s1243_s0 + $0x180] sm:$0xff]  ;;  %v278_v35 = vld [vmem:[%s1243_s0 + $0x188] sm:$0xff] }
  0x30   :  { %456 = vst [vmem:[%s1244_s4 + $0x118] sm:$0xff] %v392_v23  ;;  %v333_v50 = vmax.f32 %v205_v39, 0.0  ;;  %v334_v51 = vmax.f32 %v206_v41, 0.0  ;;  %v210_v53 = vadd.f32 %v532_v7, %v136_v42  ;;  %v138_v56 = vmul.f32 %v541_v11, %v64_v37  ;;  %v279_v37 = vld [vmem:[%s1243_s0 + $0x190] sm:$0xff]  ;;  %v280_v39 = vld [vmem:[%s1243_s0 + $0x198] sm:$0xff] }
  0x31   :  { %457 = vst [vmem:[%s1244_s4 + $0x120] sm:$0xff] %v393_v24  ;;  %v335_v57 = vmax.f32 %v207_v44, 0.0  ;;  %v336_v58 = vmax.f32 %v208_v46, 0.0  ;;  %v337_v59 = vmax.f32 %v209_v48, 0.0  ;;  %v211_v60 = vadd.f32 %v539_v10, %v137_v49  ;;  %v71_v24 = vld [vmem:[%s1240_s1 + $0x1b0] sm:$0xff]  ;;  %v281_v44 = vld [vmem:[%s1243_s0 + $0x1a0] sm:$0xff] }
  0x32   :  { %458 = vst [vmem:[%s1244_s4 + $0x128] sm:$0xff] %v394_v28  ;;  %v397_v63 = vadd.f32 %v333_v50, %v269_v40  ;;  %v398_v0 = vadd.f32 %v334_v51, %v270_v43  ;;  %v338_v1 = vmax.f32 %v210_v53, 0.0  ;;  %v212_v2 = vadd.f32 %v548_v15, %v138_v56  ;;  %v282_v46 = vld [vmem:[%s1243_s0 + $0x1a8] sm:$0xff]  ;;  %v73_v53 = vld [vmem:[%s1240_s1 + $0x1c0] sm:$0xff] }
  0x33   :  { %459 = vst [vmem:[%s1244_s4 + $0x130] sm:$0xff] %v395_v33  ;;  %v399_v13 = vadd.f32 %v335_v57, %v271_v45  ;;  %v400_v14 = vadd.f32 %v336_v58, %v272_v47  ;;  %v401_v16 = vadd.f32 %v337_v59, %v273_v52  ;;  %v339_v17 = vmax.f32 %v211_v60, 0.0  ;;  %v283_v47 = vld [vmem:[%s1243_s0 + $0x1b0] sm:$0xff]  ;;  %v76_v60 = vld [vmem:[%s1240_s1 + $0x1d8] sm:$0xff] }
  0x34   :  { %460 = vst [vmem:[%s1244_s4 + $0x138] sm:$0xff] %v396_v38  ;;  %v402_v20 = vadd.f32 %v338_v1, %v274_v54  ;;  %v340_v21 = vmax.f32 %v212_v2, 0.0  ;;  %v139_v22 = vmul.f32 %v523_v3, %v65_v61  ;;  %v140_v23 = vmul.f32 %v530_v6, %v66_v62  ;;  %v74_v54 = vld [vmem:[%s1240_s1 + $0x1c8] sm:$0xff]  ;;  %v75_v59 = vld [vmem:[%s1240_s1 + $0x1d0] sm:$0xff]  ;;  %v77_v61 = vld [vmem:[%s1240_s1 + $0x1e0] sm:$0xff] }
  0x35   :  { %461 = vst [vmem:[%s1244_s4 + $0x140] sm:$0xff] %v397_v63  ;;  %v403_v25 = vadd.f32 %v339_v17, %v275_v55  ;;  %v141_v26 = vmul.f32 %v537_v9, %v67_v5  ;;  %v142_v27 = vmul.f32 %v541_v11, %v68_v8  ;;  %v143_v28 = vmul.f32 %v523_v3, %v69_v12  ;;  %v284_v2 = vld [vmem:[%s1243_s0 + $0x1b8] sm:$0xff]  ;;  %v78_v5 = vld [vmem:[%s1240_s1 + $0x1e8] sm:$0xff] }
  0x36   :  { %462 = vst [vmem:[%s1244_s4 + $0x148] sm:$0xff] %v398_v0  ;;  %v404_v30 = vadd.f32 %v340_v21, %v276_v18  ;;  %v213_v31 = vadd.f32 %v525_v4, %v139_v22  ;;  %v214_v33 = vadd.f32 %v532_v7, %v140_v23  ;;  %v144_v34 = vmul.f32 %v530_v6, %v70_v19  ;;  %v80_v21 = vld [vmem:[%s1240_s1 + $0x1f8] sm:$0xff] }
  0x37   :  { %463 = vst [vmem:[%s1244_s4 + $0x150] sm:$0xff] %v399_v13  ;;  %v215_v36 = vadd.f32 %v539_v10, %v141_v26  ;;  %v216_v38 = vadd.f32 %v548_v15, %v142_v27  ;;  %v217_v40 = vadd.f32 %v525_v4, %v143_v28  ;;  %v145_v41 = vmul.f32 %v537_v9, %v71_v24  ;;  %v286_v26 = vld [vmem:[%s1243_s0 + $0x1c8] sm:$0xff] }
  0x38   :  { %464 = vst [vmem:[%s1244_s4 + $0x158] sm:$0xff] %v400_v14  ;;  %v341_v42 = vmax.f32 %v213_v31, 0.0  ;;  %v342_v43 = vmax.f32 %v214_v33, 0.0  ;;  %v218_v45 = vadd.f32 %v532_v7, %v144_v34  ;;  %v146_v48 = vmul.f32 %v541_v11, %v72_v29  ;;  %v288_v33 = vld [vmem:[%s1243_s0 + $0x1d8] sm:$0xff] }
  0x39   :  { %465 = vst [vmem:[%s1244_s4 + $0x160] sm:$0xff] %v401_v16  ;;  %v343_v49 = vmax.f32 %v215_v36, 0.0  ;;  %v344_v50 = vmax.f32 %v216_v38, 0.0  ;;  %v345_v51 = vmax.f32 %v217_v40, 0.0  ;;  %v219_v52 = vadd.f32 %v539_v10, %v145_v41  ;;  %v79_v16 = vld [vmem:[%s1240_s1 + $0x1f0] sm:$0xff]  ;;  %v289_v36 = vld [vmem:[%s1243_s0 + $0x1e0] sm:$0xff] }
  0x3a   :  { %466 = vst [vmem:[%s1244_s4 + $0x168] sm:$0xff] %v402_v20  ;;  %v405_v55 = vadd.f32 %v341_v42, %v277_v32  ;;  %v406_v56 = vadd.f32 %v342_v43, %v278_v35  ;;  %v346_v57 = vmax.f32 %v218_v45, 0.0  ;;  %v220_v58 = vadd.f32 %v548_v15, %v146_v48  ;;  %v287_v32 = vld [vmem:[%s1243_s0 + $0x1d0] sm:$0xff] }
  0x3b   :  { %467 = vst [vmem:[%s1244_s4 + $0x170] sm:$0xff] %v403_v25  ;;  %v407_v62 = vadd.f32 %v343_v49, %v279_v37  ;;  %v408_v63 = vadd.f32 %v344_v50, %v280_v39  ;;  %v409_v0 = vadd.f32 %v345_v51, %v281_v44  ;;  %v347_v1 = vmax.f32 %v219_v52, 0.0 }
  0x3c   :  { %468 = vst [vmem:[%s1244_s4 + $0x178] sm:$0xff] %v404_v30  ;;  %v410_v8 = vadd.f32 %v346_v57, %v282_v46  ;;  %v348_v12 = vmax.f32 %v220_v58, 0.0  ;;  %v147_v13 = vmul.f32 %v523_v3, %v73_v53  ;;  %v148_v14 = vmul.f32 %v530_v6, %v74_v54 }
  0x3d   :  { %469 = vst [vmem:[%s1244_s4 + $0x180] sm:$0xff] %v405_v55  ;;  %v411_v17 = vadd.f32 %v347_v1, %v283_v47  ;;  %v149_v18 = vmul.f32 %v537_v9, %v75_v59  ;;  %v150_v19 = vmul.f32 %v541_v11, %v76_v60  ;;  %v151_v20 = vmul.f32 %v523_v3, %v77_v61  ;;  %v285_v3 = vld [vmem:[%s1243_s0 + $0x1c0] sm:$0xff] }
  0x3e   :  { %470 = vst [vmem:[%s1244_s4 + $0x188] sm:$0xff] %v406_v56  ;;  %v412_v22 = vadd.f32 %v348_v12, %v284_v2  ;;  %v221_v23 = vadd.f32 %v525_v4, %v147_v13  ;;  %v222_v24 = vadd.f32 %v532_v7, %v148_v14  ;;  %v152_v25 = vmul.f32 %v530_v6, %v78_v5 }
  0x3f   :  { %471 = vst [vmem:[%s1244_s4 + $0x190] sm:$0xff] %v407_v62  ;;  %v223_v27 = vadd.f32 %v539_v10, %v149_v18  ;;  %v224_v28 = vadd.f32 %v548_v15, %v150_v19  ;;  %v225_v29 = vadd.f32 %v525_v4, %v151_v20  ;;  %v153_v6 = vmul.f32 %v537_v9, %v79_v16 }
  0x40   :  { %472 = vst [vmem:[%s1244_s4 + $0x198] sm:$0xff] %v408_v63  ;;  %v349_v30 = vmax.f32 %v221_v23, 0.0  ;;  %v350_v31 = vmax.f32 %v222_v24, 0.0  ;;  %v226_v34 = vadd.f32 %v532_v7, %v152_v25  ;;  %v154_v4 = vmul.f32 %v541_v11, %v80_v21  ;;  %v290_v11 = vld [vmem:[%s1243_s0 + $0x1e8] sm:$0xff] }
  0x41   :  { %473 = vst [vmem:[%s1244_s4 + $0x1a0] sm:$0xff] %v409_v0  ;;  %v351_v9 = vmax.f32 %v223_v27, 0.0  ;;  %v352_v35 = vmax.f32 %v224_v28, 0.0  ;;  %v353_v37 = vmax.f32 %v225_v29, 0.0  ;;  %v227_v38 = vadd.f32 %v539_v10, %v153_v6  ;;  %v291_v10 = vld [vmem:[%s1243_s0 + $0x1f0] sm:$0xff] }
  0x42   :  { %474 = vst [vmem:[%s1244_s4 + $0x1a8] sm:$0xff] %v410_v8  ;;  %v413_v7 = vadd.f32 %v349_v30, %v285_v3  ;;  %v414_v39 = vadd.f32 %v350_v31, %v286_v26  ;;  %v354_v40 = vmax.f32 %v226_v34, 0.0  ;;  %v228_v41 = vadd.f32 %v548_v15, %v154_v4  ;;  %v292_v15 = vld [vmem:[%s1243_s0 + $0x1f8] sm:$0xff] }
  0x43   :  { %475 = vst [vmem:[%s1244_s4 + $0x1b0] sm:$0xff] %v411_v17  ;;  %v415_v42 = vadd.f32 %v351_v9, %v287_v32  ;;  %v416_v43 = vadd.f32 %v352_v35, %v288_v33  ;;  %v355_v44 = vmax.f32 %v227_v38, 0.0  ;;  %v417_v45 = vadd.f32 %v353_v37, %v289_v36 }
  0x44   :  { %476 = vst [vmem:[%s1244_s4 + $0x1b8] sm:$0xff] %v412_v22  ;;  %v356_v46 = vmax.f32 %v228_v41, 0.0  ;;  %v418_v47 = vadd.f32 %v354_v40, %v290_v11 }
  0x45   :  { %477 = vst [vmem:[%s1244_s4 + $0x1c0] sm:$0xff] %v413_v7  ;;  %v419_v48 = vadd.f32 %v355_v44, %v291_v10 }
  0x46   :  { %478 = vst [vmem:[%s1244_s4 + $0x1c8] sm:$0xff] %v414_v39  ;;  %v420_v49 = vadd.f32 %v356_v46, %v292_v15 }
  0x47   :  { %479 = vst [vmem:[%s1244_s4 + $0x1d0] sm:$0xff] %v415_v42 }
  0x48   :  { %480 = vst [vmem:[%s1244_s4 + $0x1d8] sm:$0xff] %v416_v43 }
  0x49   :  { %481 = vst [vmem:[%s1244_s4 + $0x1e0] sm:$0xff] %v417_v45 }
  0x4a   :  { %482 = vst [vmem:[%s1244_s4 + $0x1e8] sm:$0xff] %v418_v47 }
  0x4b   :  { %483 = vst [vmem:[%s1244_s4 + $0x1f0] sm:$0xff] %v419_v48 }
  0x4c   :  { %484 = vst [vmem:[%s1244_s4 + $0x1f8] sm:$0xff] %v420_v49 }

// kernel: brain_kitchen_forward.2
= control target key start
LH: loop header
LB: loop body
LE: loop exit
PB: predicated region body
PF: predicated region fallthrough
CT: control target
= control target key end

     0   :  { %s10699_s15 = smov 0   ;;  %s13666_s0 = inlined_call_operand.vmem [shape: f32[16,8,8,64], index: 0, kind: input, shape index: {}]   ;;  %s13667_s1 = inlined_call_operand.vmem [shape: bf16[16,576,64], index: 1, kind: input, shape index: {}]   ;;  %s13668_s2 = inlined_call_operand.vmem [shape: f32[16,64,64], index: 2, kind: output, shape index: {0}]   ;;  %s13669_s3 = inlined_call_operand.vmem [shape: f32[2,1,64], index: 3, kind: output, shape index: {1}]   ;;  %s13670_s4 = inlined_call_operand.vmem [shape: f32[2,1,64], index: 4, kind: output, shape index: {2}]  }
   0x1 LB: > { %s10705_s16 = sadd.s32 4294967295, %s10670_s15   ;;  %p8368_p0 = scmp.ge.s32.totalorder %s10670_s15, 1  ;;  %s10670_s15 = sphi %s10699_s15, %s15_s15  }
   0x2   : > { %p181_p1 = scmp.lt.s32.totalorder %s10670_s15, 3 }
   0x4   : > { %p182_p2 = pnand %p8368_p0, %p181_p1 }
   0x5   : > { %s10673_s17 = smov (!%p182_p2), 64   ;;  %s8369_s18 = sshll.u32 (!%p182_p2), %s10705_s16, 3 }
   0x6   : > { %185 = sbr.rel (%p182_p2) target bundleno = 1147 (0x47b), region = 28  ;;  %p222_p3 = scmp.lt.s32.totalorder (!%p182_p2), %s8369_s18, 15 }
   0x7   : > { %p242_p4 = scmp.lt.s32.totalorder (!%p182_p2), %s10705_s16, 1 }
   0xb   : > { %vm249_vm0 = vcmask 523264   ;;  %vm251_vm1 = vcmask 517120   ;;  %v10672_v0 = vmov 0.0   ;;  %s13672_s18 = smov (!%p222_p3, %s8369_s18), 15  ;;  %vm668_vm2 = vcmask 519168   ;;  %s13674_s16 = smov (!%p242_p4, %s10705_s16), 1 }
   0xc   : > { %250 = vst.msk [vmem:[#allocation2] sm:$0xff] %vm249_vm0, %v10672_v0  ;;  %s10203_s19 = sshll.u32 %s13672_s18, 6  ;;  %s10653_s23 = smul.u32 288, %s13672_s18  ;;  %vm1117_vm3 = vcmask 1043968   ;;  %vm8044_vm4 = vcmask 516096  }
   0xd   : > { %252 = vst.msk [vmem:[#allocation2 + $0x8] sm:$0x3] %vm251_vm1, %v10672_v0  ;;  %s11029_s22 = scalar_lea.vmem %s13666_s0, %s10203_s19  ;;  %s11905_s29 = scalar_lea.vmem %s13668_s2, %s10203_s19 }
   0xe   : > { %253 = vst.msk [vmem:[#allocation2 + $0x10] sm:$0xff] %vm249_vm0, %v10672_v0  ;;  %v411_v3 = vld [vmem:[%s11029_s22] sm:$0xff]  ;;  %v412_v4 = vld [vmem:[%s11029_s22 + $0x8] sm:$0xff]  ;;  %v413_v5 = vld [vmem:[%s11029_s22 + $0x10] sm:$0xff]  ;;  %s11140_s26 = scalar_lea.vmem %s13667_s1, %s10653_s23  ;;  %s244_s6 = scalar_lea.vmem %s13669_s3, %s13674_s16 }
   0xf   : > { %254 = vst.msk [vmem:[#allocation2 + $0x18] sm:$0x3] %vm251_vm1, %v10672_v0  ;;  %v414_v6 = vld [vmem:[%s11029_s22 + $0x18] sm:$0xff]  ;;  %v415_v7 = vld [vmem:[%s11029_s22 + $0x20] sm:$0xff]  ;;  %v417_v24 = vld [vmem:[%s11029_s22 + $0x30] sm:$0xff]  ;;  %s247_s9 = scalar_lea.vmem %s13670_s4, %s13674_s16 }
  0x10   : > { %255 = vst.msk [vmem:[#allocation2 + $0x20] sm:$0xff] %vm249_vm0, %v10672_v0  ;;  %v416_v29 = vld [vmem:[%s11029_s22 + $0x28] sm:$0xff]  ;;  %v418_v30 = vld [vmem:[%s11029_s22 + $0x38] sm:$0xff]  ;;  %v419_v46 = vld [vmem:[%s11029_s22 + $0x40] sm:$0xff] }
  0x11   : > { %256 = vst.msk [vmem:[#allocation2 + $0x28] sm:$0x3] %vm251_vm1, %v10672_v0  ;;  %v420_v45 = vld [vmem:[%s11029_s22 + $0x48] sm:$0xff]  ;;  %v10396_v53 = vld [vmem:[%s11140_s26 + $0xf8] sm:$0xff]  ;;  %v421_v60 = vld [vmem:[%s11029_s22 + $0x50] sm:$0xff] }
  0x12   : > { %257 = vst.msk [vmem:[#allocation2 + $0x30] sm:$0xff] %vm249_vm0, %v10672_v0  ;;  %v10372_v54 = vld [vmem:[%s11140_s26 + $0x38] sm:$0xff]  ;;  %4478 = vmatpush.bf16.msra.mxu3 %v10396_v53  ;;  %v10395_v61 = vld [vmem:[%s11140_s26 + $0xf0] sm:$0xff]  ;;  %v10365_v53 = vld [vmem:[%s11140_s26] sm:$0xff] }
  0x13   : > { %258 = vst.msk [vmem:[#allocation2 + $0x38] sm:$0x3] %vm251_vm1, %v10672_v0  ;;  %4391 = vmatpush.bf16.msra.mxu0 %v10372_v54  ;;  %v422_v59 = vld [vmem:[%s11029_s22 + $0x58] sm:$0xff]  ;;  %v10371_v62 = vld [vmem:[%s11140_s26 + $0x30] sm:$0xff] }
  0x14   : > { %v733_v1 = vld [vmem:[#allocation2 + $0x1] sm:$0xff]  ;;  %259 = vst.msk [vmem:[#allocation2 + $0x40] sm:$0xff] %vm249_vm0, %v10672_v0 }
  0x15   : > { %v797_v2 = vpack.c.bf16 %v733_v1, %v733_v1  ;;  %260 = vst.msk [vmem:[#allocation2 + $0x48] sm:$0x3] %vm251_vm1, %v10672_v0 }
  0x16   : > { %261 = vst.msk [vmem:[#allocation2 + $0x50] sm:$0xff] %vm249_vm0, %v10672_v0  ;;  %4479 = vmatpush.bf16.msra.mxu3 %v10395_v61  ;;  %v425_v61 = vld [vmem:[%s11029_s22 + $0x70] sm:$0xff] }
  0x17   : > { %925 = vrot.lane.b32.xlu1 %v797_v2, %s10673_s17  ;;  %262 = vst.msk [vmem:[#allocation2 + $0x58] sm:$0x3] %vm251_vm1, %v10672_v0  ;;  %4392 = vmatpush.bf16.msra.mxu0 %v10371_v62  ;;  %v10394_v2 = vld [vmem:[%s11140_s26 + $0xe8] sm:$0xff]  ;;  %v10375_v62 = vld [vmem:[%s11140_s26 + $0x50] sm:$0xff] }
  0x18   : > { %263 = vst.msk [vmem:[#allocation2 + $0x60] sm:$0xff] %vm249_vm0, %v10672_v0 }
  0x19   : > { %264 = vst.msk [vmem:[#allocation2 + $0x68] sm:$0x3] %vm251_vm1, %v10672_v0 }
  0x1a   : > { %265 = vst.msk [vmem:[#allocation2 + $0x70] sm:$0xff] %vm249_vm0, %v10672_v0  ;;  %4480 = vmatpush.bf16.msra.mxu3 %v10394_v2 }
  0x1b   : > { %266 = vst.msk [vmem:[#allocation2 + $0x78] sm:$0x3] %vm251_vm1, %v10672_v0 }
  0x1c   : > { %267 = vst.msk [vmem:[#allocation2 + $0x80] sm:$0xff] %vm249_vm0, %v10672_v0 }
  0x1d   : > { %268 = vst.msk [vmem:[#allocation2 + $0x88] sm:$0x3] %vm251_vm1, %v10672_v0 }
  0x1e   : > { %269 = vst.msk [vmem:[#allocation2 + $0x90] sm:$0xff] %vm249_vm0, %v10672_v0 }
  0x1f   : > { %270 = vst.msk [vmem:[#allocation2 + $0x98] sm:$0x3] %vm251_vm1, %v10672_v0 }
  0x20   : > { %271 = vst.msk [vmem:[#allocation2 + $0xa0] sm:$0xff] %vm249_vm0, %v10672_v0 }
  0x21   : > { %272 = vst.msk [vmem:[#allocation2 + $0xa8] sm:$0x3] %vm251_vm1, %v10672_v0 }
  0x22   : > { %273 = vst.msk [vmem:[#allocation2 + $0xb0] sm:$0xff] %vm249_vm0, %v10672_v0 }
  0x23   : > { %274 = vst.msk [vmem:[#allocation2 + $0xb8] sm:$0x3] %vm251_vm1, %v10672_v0 }
  0x24   : > { %275 = vst.msk [vmem:[#allocation2 + $0xc0] sm:$0xff] %vm249_vm0, %v10672_v0 }
  0x25   : > { %276 = vst.msk [vmem:[#allocation2 + $0xc8] sm:$0x3] %vm251_vm1, %v10672_v0 }
  0x26   : > { %277 = vst.msk [vmem:[#allocation2 + $0xd0] sm:$0xff] %vm249_vm0, %v10672_v0  ;;  %v2662_v1 = vld [vmem:[#allocation2 + $0x91] sm:$0xff] }
  0x27   : > { %278 = vst.msk [vmem:[#allocation2 + $0xd8] sm:$0x3] %vm251_vm1, %v10672_v0 }
  0x28   : > { %279 = vst.msk [vmem:[#allocation2 + $0xe0] sm:$0xff] %vm249_vm0, %v10672_v0 }
  0x29   : > { %280 = vst.msk [vmem:[#allocation2 + $0xe8] sm:$0x3] %vm251_vm1, %v10672_v0 }
  0x2a   : > { %281 = vst.msk [vmem:[#allocation2 + $0xf0] sm:$0xff] %vm249_vm0, %v10672_v0 }
  0x2b   : > { %282 = vst.msk [vmem:[#allocation2 + $0xf8] sm:$0x3] %vm251_vm1, %v10672_v0 }
  0x2c   : > { %283 = vst.msk [vmem:[#allocation2 + $0x100] sm:$0xff] %vm249_vm0, %v10672_v0 }
  0x2d   : > { %284 = vst.msk [vmem:[#allocation2 + $0x108] sm:$0x3] %vm251_vm1, %v10672_v0 }
  0x2e   : > { %285 = vst.msk [vmem:[#allocation2 + $0x110] sm:$0xff] %vm249_vm0, %v10672_v0 }
  0x2f   : > { %286 = vst.msk [vmem:[#allocation2 + $0x118] sm:$0x3] %vm251_vm1, %v10672_v0 }
  0x30   : > { %287 = vst.msk [vmem:[#allocation2 + $0x120] sm:$0xff] %vm249_vm0, %v10672_v0 }
  0x31   : > { %288 = vst.msk [vmem:[#allocation2 + $0x128] sm:$0x3] %vm251_vm1, %v10672_v0 }
  0x32   : > { %289 = vst.msk [vmem:[#allocation2 + $0x130] sm:$0xff] %vm249_vm0, %v10672_v0 }
  0x33   : > { %290 = vst.msk [vmem:[#allocation2 + $0x138] sm:$0x3] %vm251_vm1, %v10672_v0 }
  0x34   : > { %291 = vst.msk [vmem:[#allocation2 + $0x140] sm:$0xff] %vm249_vm0, %v10672_v0 }
  0x35   : > { %292 = vst.msk [vmem:[#allocation2 + $0x148] sm:$0x3] %vm251_vm1, %v10672_v0 }
  0x36   : > { %293 = vst.msk [vmem:[#allocation2 + $0x150] sm:$0xff] %vm249_vm0, %v10672_v0 }
  0x37   : > { %294 = vst.msk [vmem:[#allocation2 + $0x158] sm:$0x3] %vm251_vm1, %v10672_v0 }
  0x38   : > { %295 = vst.msk [vmem:[#allocation2 + $0x160] sm:$0xff] %vm249_vm0, %v10672_v0 }
  0x39   : > { %296 = vst.msk [vmem:[#allocation2 + $0x168] sm:$0x3] %vm251_vm1, %v10672_v0 }
  0x3a   : > { %297 = vst.msk [vmem:[#allocation2 + $0x170] sm:$0xff] %vm249_vm0, %v10672_v0 }
  0x3b   : > { %298 = vst.msk [vmem:[#allocation2 + $0x178] sm:$0x3] %vm251_vm1, %v10672_v0 }
  0x3c   : > { %299 = vst.msk [vmem:[#allocation2 + $0x180] sm:$0xff] %vm249_vm0, %v10672_v0 }
  0x3d   : > { %300 = vst.msk [vmem:[#allocation2 + $0x188] sm:$0x3] %vm251_vm1, %v10672_v0 }
  0x3e   : > { %301 = vst.msk [vmem:[#allocation2 + $0x190] sm:$0xff] %vm249_vm0, %v10672_v0 }
  0x3f   : > { %302 = vst.msk [vmem:[#allocation2 + $0x198] sm:$0x3] %vm251_vm1, %v10672_v0 }
  0x40   : > { %303 = vst.msk [vmem:[#allocation2 + $0x1a0] sm:$0xff] %vm249_vm0, %v10672_v0 }
  0x41   : > { %304 = vst.msk [vmem:[#allocation2 + $0x1a8] sm:$0x3] %vm251_vm1, %v10672_v0 }
  0x42   : > { %305 = vst.msk [vmem:[#allocation2 + $0x1b0] sm:$0xff] %vm249_vm0, %v10672_v0 }
  0x43   : > { %306 = vst.msk [vmem:[#allocation2 + $0x1b8] sm:$0x3] %vm251_vm1, %v10672_v0 }
  0x44   : > { %307 = vst.msk [vmem:[#allocation2 + $0x1c0] sm:$0xff] %vm249_vm0, %v10672_v0 }
  0x45   : > { %308 = vst.msk [vmem:[#allocation2 + $0x1c8] sm:$0x3] %vm251_vm1, %v10672_v0 }
  0x46   : > { %309 = vst.msk [vmem:[#allocation2 + $0x1d0] sm:$0xff] %vm249_vm0, %v10672_v0 }
  0x47   : > { %310 = vst.msk [vmem:[#allocation2 + $0x1d8] sm:$0x3] %vm251_vm1, %v10672_v0 }
  0x48   : > { %311 = vst.msk [vmem:[#allocation2 + $0x1e0] sm:$0xff] %vm249_vm0, %v10672_v0 }
  0x49   : > { %312 = vst.msk [vmem:[#allocation2 + $0x1e8] sm:$0x3] %vm251_vm1, %v10672_v0 }
  0x4a   : > { %313 = vst.msk [vmem:[#allocation2 + $0x1f0] sm:$0xff] %vm249_vm0, %v10672_v0 }
  0x4b   : > { %314 = vst.msk [vmem:[#allocation2 + $0x1f8] sm:$0x3] %vm251_vm1, %v10672_v0 }
  0x4c   : > { %315 = vst.msk [vmem:[#allocation2 + $0x200] sm:$0xff] %vm249_vm0, %v10672_v0 }
  0x4d   : > { %316 = vst.msk [vmem:[#allocation2 + $0x208] sm:$0x3] %vm251_vm1, %v10672_v0 }
  0x4e   : > { %317 = vst.msk [vmem:[#allocation2 + $0x210] sm:$0xff] %vm249_vm0, %v10672_v0 }
  0x4f   : > { %318 = vst.msk [vmem:[#allocation2 + $0x218] sm:$0x3] %vm251_vm1, %v10672_v0 }
  0x50   : > { %319 = vst.msk [vmem:[#allocation2 + $0x220] sm:$0xff] %vm249_vm0, %v10672_v0 }
  0x51   : > { %320 = vst.msk [vmem:[#allocation2 + $0x228] sm:$0x3] %vm251_vm1, %v10672_v0 }
  0x52   : > { %321 = vst.msk [vmem:[#allocation2 + $0x230] sm:$0xff] %vm249_vm0, %v10672_v0 }
  0x53   : > { %322 = vst.msk [vmem:[#allocation2 + $0x238] sm:$0x3] %vm251_vm1, %v10672_v0 }
  0x54   : > { %323 = vst.msk [vmem:[#allocation2 + $0x240] sm:$0xff] %vm249_vm0, %v10672_v0 }
  0x55   : > { %324 = vst.msk [vmem:[#allocation2 + $0x248] sm:$0x3] %vm251_vm1, %v10672_v0 }
  0x56   : > { %325 = vst.msk [vmem:[#allocation2 + $0x250] sm:$0xff] %vm249_vm0, %v10672_v0 }
  0x57   : > { %326 = vst.msk [vmem:[#allocation2 + $0x258] sm:$0x3] %vm251_vm1, %v10672_v0 }
  0x58   : > { %327 = vst.msk [vmem:[#allocation2 + $0x260] sm:$0xff] %vm249_vm0, %v10672_v0 }
  0x59   : > { %328 = vst.msk [vmem:[#allocation2 + $0x268] sm:$0x3] %vm251_vm1, %v10672_v0 }
  0x5a   : > { %329 = vst.msk [vmem:[#allocation2 + $0x270] sm:$0xff] %vm249_vm0, %v10672_v0 }
  0x5b   : > { %330 = vst.msk [vmem:[#allocation2 + $0x278] sm:$0x3] %vm251_vm1, %v10672_v0 }
  0x5c   : > { %331 = vst.msk [vmem:[#allocation2 + $0x280] sm:$0xff] %vm249_vm0, %v10672_v0 }
  0x5d   : > { %332 = vst.msk [vmem:[#allocation2 + $0x288] sm:$0x3] %vm251_vm1, %v10672_v0 }
  0x5e   : > { %333 = vst.msk [vmem:[#allocation2 + $0x290] sm:$0xff] %vm249_vm0, %v10672_v0 }
  0x5f   : > { %334 = vst.msk [vmem:[#allocation2 + $0x298] sm:$0x3] %vm251_vm1, %v10672_v0 }
  0x60   : > { %335 = vst.msk [vmem:[#allocation2 + $0x2a0] sm:$0xff] %vm249_vm0, %v10672_v0 }
  0x61   : > { %336 = vst.msk [vmem:[#allocation2 + $0x2a8] sm:$0x3] %vm251_vm1, %v10672_v0 }
  0x62   : > { %337 = vst.msk [vmem:[#allocation2 + $0x2b0] sm:$0xff] %vm249_vm0, %v10672_v0 }
  0x63   : > { %338 = vst.msk [vmem:[#allocation2 + $0x2b8] sm:$0x3] %vm251_vm1, %v10672_v0 }
  0x64   : > { %339 = vst.msk [vmem:[#allocation2 + $0x2c0] sm:$0xff] %vm249_vm0, %v10672_v0 }
  0x65   : > { %340 = vst.msk [vmem:[#allocation2 + $0x2c8] sm:$0x3] %vm251_vm1, %v10672_v0 }
  0x66   : > { %341 = vst.msk [vmem:[#allocation2 + $0x2d0] sm:$0xff] %vm249_vm0, %v10672_v0 }
  0x67   : > { %342 = vst.msk [vmem:[#allocation2 + $0x2d8] sm:$0x3] %vm251_vm1, %v10672_v0 }
  0x68   : > { %343 = vst.msk [vmem:[#allocation2 + $0x2e0] sm:$0xff] %vm249_vm0, %v10672_v0 }
  0x69   : > { %344 = vst.msk [vmem:[#allocation2 + $0x2e8] sm:$0x3] %vm251_vm1, %v10672_v0 }
  0x6a   : > { %345 = vst.msk [vmem:[#allocation2 + $0x2f0] sm:$0xff] %vm249_vm0, %v10672_v0 }
  0x6b   : > { %346 = vst.msk [vmem:[#allocation2 + $0x2f8] sm:$0x3] %vm251_vm1, %v10672_v0 }
  0x6c   : > { %347 = vst.msk [vmem:[#allocation2 + $0x300] sm:$0xff] %vm249_vm0, %v10672_v0 }
  0x6d   : > { %348 = vst.msk [vmem:[#allocation2 + $0x308] sm:$0x3] %vm251_vm1, %v10672_v0 }
  0x6e   : > { %349 = vst.msk [vmem:[#allocation2 + $0x310] sm:$0xff] %vm249_vm0, %v10672_v0 }
  0x6f   : > { %350 = vst.msk [vmem:[#allocation2 + $0x318] sm:$0x3] %vm251_vm1, %v10672_v0 }
  0x70   : > { %351 = vst.msk [vmem:[#allocation2 + $0x320] sm:$0xff] %vm249_vm0, %v10672_v0 }
  0x71   : > { %352 = vst.msk [vmem:[#allocation2 + $0x328] sm:$0x3] %vm251_vm1, %v10672_v0 }
  0x72   : > { %353 = vst.msk [vmem:[#allocation2 + $0x330] sm:$0xff] %vm249_vm0, %v10672_v0 }
  0x73   : > { %354 = vst.msk [vmem:[#allocation2 + $0x338] sm:$0x3] %vm251_vm1, %v10672_v0 }
  0x74   : > { %355 = vst.msk [vmem:[#allocation2 + $0x340] sm:$0xff] %vm249_vm0, %v10672_v0 }
  0x75   : > { %356 = vst.msk [vmem:[#allocation2 + $0x348] sm:$0x3] %vm251_vm1, %v10672_v0 }
  0x76   : > { %357 = vst.msk [vmem:[#allocation2 + $0x350] sm:$0xff] %vm249_vm0, %v10672_v0 }
  0x77   : > { %358 = vst.msk [vmem:[#allocation2 + $0x358] sm:$0x3] %vm251_vm1, %v10672_v0 }
  0x78   : > { %359 = vst.msk [vmem:[#allocation2 + $0x360] sm:$0xff] %vm249_vm0, %v10672_v0 }
  0x79   : > { %360 = vst.msk [vmem:[#allocation2 + $0x368] sm:$0x3] %vm251_vm1, %v10672_v0 }
  0x7a   : > { %361 = vst.msk [vmem:[#allocation2 + $0x370] sm:$0xff] %vm249_vm0, %v10672_v0 }
  0x7b   : > { %362 = vst.msk [vmem:[#allocation2 + $0x378] sm:$0x3] %vm251_vm1, %v10672_v0 }
  0x7c   : > { %363 = vst.msk [vmem:[#allocation2 + $0x380] sm:$0xff] %vm249_vm0, %v10672_v0 }
  0x7d   : > { %364 = vst.msk [vmem:[#allocation2 + $0x388] sm:$0x3] %vm251_vm1, %v10672_v0 }
  0x7e   : > { %365 = vst.msk [vmem:[#allocation2 + $0x390] sm:$0xff] %vm249_vm0, %v10672_v0 }
  0x7f   : > { %366 = vst.msk [vmem:[#allocation2 + $0x398] sm:$0x3] %vm251_vm1, %v10672_v0 }
  0x80   : > { %367 = vst.msk [vmem:[#allocation2 + $0x3a0] sm:$0xff] %vm249_vm0, %v10672_v0 }
  0x81   : > { %368 = vst.msk [vmem:[#allocation2 + $0x3a8] sm:$0x3] %vm251_vm1, %v10672_v0 }
  0x82   : > { %369 = vst.msk [vmem:[#allocation2 + $0x3b0] sm:$0xff] %vm249_vm0, %v10672_v0 }
  0x83   : > { %370 = vst.msk [vmem:[#allocation2 + $0x3b8] sm:$0x3] %vm251_vm1, %v10672_v0 }
  0x84   : > { %371 = vst.msk [vmem:[#allocation2 + $0x3c0] sm:$0xff] %vm249_vm0, %v10672_v0 }
  0x85   : > { %372 = vst.msk [vmem:[#allocation2 + $0x3c8] sm:$0x3] %vm251_vm1, %v10672_v0 }
  0x86   : > { %373 = vst.msk [vmem:[#allocation2 + $0x3d0] sm:$0xff] %vm249_vm0, %v10672_v0 }
  0x87   : > { %374 = vst.msk [vmem:[#allocation2 + $0x3d8] sm:$0x3] %vm251_vm1, %v10672_v0 }
  0x88   : > { %375 = vst.msk [vmem:[#allocation2 + $0x3e0] sm:$0xff] %vm249_vm0, %v10672_v0 }
  0x89   : > { %376 = vst.msk [vmem:[#allocation2 + $0x3e8] sm:$0x3] %vm251_vm1, %v10672_v0 }
  0x8a   : > { %377 = vst.msk [vmem:[#allocation2 + $0x3f0] sm:$0xff] %vm249_vm0, %v10672_v0 }
  0x8b   : > { %378 = vst.msk [vmem:[#allocation2 + $0x3f8] sm:$0x3] %vm251_vm1, %v10672_v0 }
  0x8c   : > { %379 = vst.msk [vmem:[#allocation2 + $0x400] sm:$0xff] %vm249_vm0, %v10672_v0 }
  0x8d   : > { %380 = vst.msk [vmem:[#allocation2 + $0x408] sm:$0x3] %vm251_vm1, %v10672_v0 }
  0x8e   : > { %381 = vst.msk [vmem:[#allocation2 + $0x410] sm:$0xff] %vm249_vm0, %v10672_v0 }
  0x8f   : > { %382 = vst.msk [vmem:[#allocation2 + $0x418] sm:$0x3] %vm251_vm1, %v10672_v0 }
  0x90   : > { %383 = vst.msk [vmem:[#allocation2 + $0x420] sm:$0xff] %vm249_vm0, %v10672_v0 }
  0x91   : > { %384 = vst.msk [vmem:[#allocation2 + $0x428] sm:$0x3] %vm251_vm1, %v10672_v0 }
  0x92   : > { %385 = vst.msk [vmem:[#allocation2 + $0x430] sm:$0xff] %vm249_vm0, %v10672_v0 }
  0x93   : > { %386 = vst.msk [vmem:[#allocation2 + $0x438] sm:$0x3] %vm251_vm1, %v10672_v0 }
  0x94   : > { %387 = vst.msk [vmem:[#allocation2 + $0x440] sm:$0xff] %vm249_vm0, %v10672_v0 }
  0x95   : > { %388 = vst.msk [vmem:[#allocation2 + $0x448] sm:$0x3] %vm251_vm1, %v10672_v0 }
  0x96   : > { %389 = vst.msk [vmem:[#allocation2 + $0x450] sm:$0xff] %vm249_vm0, %v10672_v0 }
  0x97   : > { %390 = vst.msk [vmem:[#allocation2 + $0x458] sm:$0x3] %vm251_vm1, %v10672_v0 }
  0x98   : > { %391 = vst.msk [vmem:[#allocation2 + $0x460] sm:$0xff] %vm249_vm0, %v10672_v0 }
  0x99   : > { %392 = vst.msk [vmem:[#allocation2 + $0x468] sm:$0x3] %vm251_vm1, %v10672_v0 }
  0x9a   : > { %393 = vst.msk [vmem:[#allocation2 + $0x470] sm:$0xff] %vm249_vm0, %v10672_v0 }
  0x9b   : > { %394 = vst.msk [vmem:[#allocation2 + $0x478] sm:$0x3] %vm251_vm1, %v10672_v0 }
  0x9c   : > { %395 = vst.msk [vmem:[#allocation2 + $0x480] sm:$0xff] %vm249_vm0, %v10672_v0 }
  0x9d   : > { %396 = vst.msk [vmem:[#allocation2 + $0x488] sm:$0x3] %vm251_vm1, %v10672_v0 }
  0x9e   : > { %397 = vst.msk [vmem:[#allocation2 + $0x490] sm:$0xff] %vm249_vm0, %v10672_v0 }
  0x9f   : > { %398 = vst.msk [vmem:[#allocation2 + $0x498] sm:$0x3] %vm251_vm1, %v10672_v0 }
  0xa0   : > { %399 = vst.msk [vmem:[#allocation2 + $0x4a0] sm:$0xff] %vm249_vm0, %v10672_v0 }
  0xa1   : > { %400 = vst.msk [vmem:[#allocation2 + $0x4a8] sm:$0x3] %vm251_vm1, %v10672_v0 }
  0xa2   : > { %401 = vst.msk [vmem:[#allocation2 + $0x4b0] sm:$0xff] %vm249_vm0, %v10672_v0 }
  0xa3   : > { %402 = vst.msk [vmem:[#allocation2 + $0x4b8] sm:$0x3] %vm251_vm1, %v10672_v0 }
  0xa4   : > { %403 = vst.msk [vmem:[#allocation2 + $0x4c0] sm:$0xff] %vm249_vm0, %v10672_v0 }
  0xa5   : > { %404 = vst.msk [vmem:[#allocation2 + $0x4c8] sm:$0x3] %vm251_vm1, %v10672_v0 }
  0xa6   : > { %405 = vst.msk [vmem:[#allocation2 + $0x4d0] sm:$0xff] %vm249_vm0, %v10672_v0 }
  0xa7   : > { %406 = vst.msk [vmem:[#allocation2 + $0x4d8] sm:$0x3] %vm251_vm1, %v10672_v0 }
  0xa8   : > { %407 = vst.msk [vmem:[#allocation2 + $0x4e0] sm:$0xff] %vm249_vm0, %v10672_v0 }
  0xa9   : > { %408 = vst.msk [vmem:[#allocation2 + $0x4e8] sm:$0x3] %vm251_vm1, %v10672_v0 }
  0xaa   : > { %409 = vst.msk [vmem:[#allocation2 + $0x4f0] sm:$0xff] %vm249_vm0, %v10672_v0 }
  0xab   : > { %410 = vst.msk [vmem:[#allocation2 + $0x4f8] sm:$0x3] %vm251_vm1, %v10672_v0  ;;  %v10388_v0 = vld [vmem:[%s11140_s26 + $0xb8] sm:$0xff] }
  0xac   : > { %476 = vst.msk [vmem:[#allocation2 + $0x11] sm:$0xff] %vm249_vm0, %v411_v3  ;;  %v10370_v3 = vld [vmem:[%s11140_s26 + $0x28] sm:$0xff]  ;;  %4449 = vmatpush.bf16.msra.mxu2 %v10388_v0 }
  0xad   : > { %477 = vst.msk [vmem:[#allocation2 + $0x21] sm:$0xff] %vm249_vm0, %v412_v4  ;;  %4393 = vmatpush.bf16.msra.mxu0 %v10370_v3 }
  0xae   : > { %478 = vst.msk [vmem:[#allocation2 + $0x31] sm:$0xff] %vm249_vm0, %v413_v5  ;;  %v2726_v5 = vpack.c.bf16 %v2662_v1, %v2662_v1 }
  0xaf   : > { %479 = vst.msk [vmem:[#allocation2 + $0x41] sm:$0xff] %vm249_vm0, %v414_v6 }
  0xb0   : > { %480 = vst.msk [vmem:[#allocation2 + $0x51] sm:$0xff] %vm249_vm0, %v415_v7  ;;  %v10387_v7 = vld [vmem:[%s11140_s26 + $0xb0] sm:$0xff] }
  0xb1   : > { %482 = vst.msk [vmem:[#allocation2 + $0x71] sm:$0xff] %vm249_vm0, %v417_v24  ;;  %4450 = vmatpush.bf16.msra.mxu2 %v10387_v7  ;;  %v10392_v24 = vld [vmem:[%s11140_s26 + $0xd8] sm:$0xff]  ;;  %v10374_v7 = vld [vmem:[%s11140_s26 + $0x48] sm:$0xff] }
  0xb2   : > { %481 = vst.msk [vmem:[#allocation2 + $0x61] sm:$0xff] %vm249_vm0, %v416_v29 }
  0xb3   : > { %v2014_v8 = vld [vmem:[#allocation2 + $0x12] sm:$0xff]  ;;  %483 = vst.msk [vmem:[#allocation2 + $0x81] sm:$0xff] %vm249_vm0, %v418_v30 }
  0xb4   : > { %v734_v9 = vld [vmem:[#allocation2 + $0x11] sm:$0xff]  ;;  %v11051_v10 = vpack.c.bf16 %v2014_v8, %v2014_v8  ;;  %v2655_v12 = vld [vmem:[#allocation2 + $0x21] sm:$0xff]  ;;  %485 = vst.msk [vmem:[#allocation2 + $0xc1] sm:$0xff] %vm249_vm0, %v420_v45 }
  0xb5   : > { %v11053_v11 = vpack.c.bf16 %v734_v9, %v734_v9  ;;  %v11055_v13 = vpack.c.bf16 %v2655_v12, %v2655_v12  ;;  %v2015_v14 = vld [vmem:[#allocation2 + $0x22] sm:$0xff]  ;;  %v2656_v16 = vld [vmem:[#allocation2 + $0x31] sm:$0xff]  ;;  %484 = vst.msk [vmem:[#allocation2 + $0xb1] sm:$0xff] %vm249_vm0, %v419_v46 }
  0xb6   : > { %2206 = vrot.lane.b32.xlu0 %v11051_v10, %s10673_s17  ;;  %v1375_v15 = vld [vmem:[#allocation2 + $0x20] sm:$0xff]  ;;  %v11063_v17 = vpack.c.bf16 %v2015_v14, %v2015_v14  ;;  %v11067_v19 = vpack.c.bf16 %v2656_v16, %v2656_v16  ;;  %v1374_v20 = vld [vmem:[#allocation2 + $0x10] sm:$0xff]  ;;  %487 = vst.msk [vmem:[#allocation2 + $0xe1] sm:$0xff] %vm249_vm0, %v422_v59  ;;  %v10380_v16 = vld [vmem:[%s11140_s26 + $0x78] sm:$0xff] }
  0xb7   : > { %927 = vrot.lane.b32.xlu1 %v11053_v11, %s10673_s17  ;;  %2847 = vrot.lane.b32.xlu2 %v11055_v13, %s10673_s17  ;;  %v11065_v18 = vpack.c.bf16 %v1375_v15, %v1375_v15  ;;  %v2016_v21 = vld [vmem:[#allocation2 + $0x32] sm:$0xff]  ;;  %v11075_v22 = vpack.c.bf16 %v1374_v20, %v1374_v20  ;;  %v2017_v25 = vld [vmem:[#allocation2 + $0x42] sm:$0xff]  ;;  %486 = vst.msk [vmem:[#allocation2 + $0xd1] sm:$0xff] %vm249_vm0, %v421_v60 }
  0xb8   : > { %v11077_v23 = vpack.c.bf16 %v2016_v21, %v2016_v21  ;;  %v2658_v26 = vld [vmem:[#allocation2 + $0x51] sm:$0xff]  ;;  %v11087_v27 = vpack.c.bf16 %v2017_v25, %v2017_v25  ;;  %v2657_v31 = vld [vmem:[#allocation2 + $0x41] sm:$0xff]  ;;  %v926_v25 = vpop.permute.xlu1 %925  ;;  %4420 = vmatpush.bf16.msra.mxu1 %v10380_v16  ;;  %1950 = vst.msk [vmem:[#allocation3 + $0x8] sm:$0xf] %vm668_vm2, %v11053_v11 }
  0xb9   : > { %v11089_v28 = vpack.c.bf16 %v2658_v26, %v2658_v26  ;;  %v2018_v32 = vld [vmem:[#allocation2 + $0x52] sm:$0xff]  ;;  %v11101_v34 = vpack.c.bf16 %v2657_v31, %v2657_v31  ;;  %v1377_v37 = vld [vmem:[#allocation2 + $0x40] sm:$0xff]  ;;  %2591 = vst.msk [vmem:[#allocation3 + $0xc] sm:$0xf] %vm668_vm2, %v11065_v18  ;;  %v10386_v21 = vld [vmem:[%s11140_s26 + $0xa8] sm:$0xff] }
  0xba   : > { %v1376_v33 = vld [vmem:[#allocation2 + $0x30] sm:$0xff]  ;;  %v11103_v35 = vpack.c.bf16 %v2018_v32, %v2018_v32  ;;  %v2019_v38 = vld [vmem:[#allocation2 + $0x62] sm:$0xff]  ;;  %v11113_v39 = vpack.c.bf16 %v1377_v37, %v1377_v37  ;;  %v10368_v26 = vld [vmem:[%s11140_s26 + $0x18] sm:$0xff]  ;;  %4451 = vmatpush.bf16.msra.mxu2 %v10386_v21  ;;  %670 = vst.msk [vmem:[#allocation3 + $0x14] sm:$0xf] %vm668_vm2, %v11075_v22 }
  0xbb   : > { %v11105_v36 = vpack.c.bf16 %v1376_v33, %v1376_v33  ;;  %v2083_v40 = vpack.c.bf16 %v2019_v38, %v2019_v38  ;;  %v1378_v41 = vld [vmem:[#allocation2 + $0x50] sm:$0xff]  ;;  %v2659_v42 = vld [vmem:[#allocation2 + $0x61] sm:$0xff]  ;;  %1951 = vst.msk [vmem:[#allocation3 + $0x1c] sm:$0xf] %vm668_vm2, %v11055_v13 }
  0xbc   : > { %v11120_v43 = vpack.c.bf16 %v1378_v41, %v1378_v41  ;;  %v11122_v44 = vpack.c.bf16 %v2659_v42, %v2659_v42  ;;  %v2660_v47 = vld [vmem:[#allocation2 + $0x71] sm:$0xff]  ;;  %v2021_v48 = vld [vmem:[#allocation2 + $0x82] sm:$0xff]  ;;  %1952 = vst.msk [vmem:[#allocation3 + $0x30] sm:$0xf] %vm668_vm2, %v11067_v19 }
  0xbd   : > { %v1379_v49 = vld [vmem:[#allocation2 + $0x60] sm:$0xff]  ;;  %v11135_v50 = vpack.c.bf16 %v2660_v47, %v2660_v47  ;;  %v2085_v51 = vpack.c.bf16 %v2021_v48, %v2021_v48  ;;  %v2020_v55 = vld [vmem:[#allocation2 + $0x72] sm:$0xff]  ;;  %2592 = vst.msk [vmem:[#allocation3 + $0x20] sm:$0xf] %vm668_vm2, %v11105_v36  ;;  %v424_v32 = vld [vmem:[%s11029_s22 + $0x68] sm:$0xff] }
  0xbe   : > { %2208 = vrot.lane.b32.xlu0 %v11063_v17, %s10673_s17  ;;  %v11142_v52 = vpack.c.bf16 %v1379_v49, %v1379_v49  ;;  %v2661_v56 = vld [vmem:[#allocation2 + $0x81] sm:$0xff]  ;;  %v2084_v57 = vpack.c.bf16 %v2020_v55, %v2020_v55  ;;  %v1380_v6 = vld [vmem:[#allocation2 + $0x70] sm:$0xff]  ;;  %489 = vst.msk [vmem:[#allocation2 + $0x101] sm:$0xff] %vm249_vm0, %v424_v32  ;;  %v10384_v48 = vld [vmem:[%s11140_s26 + $0x98] sm:$0xff] }
  0xbf   : > { %1568 = vrot.lane.b32.xlu1 %v11065_v18, %s10673_s17  ;;  %2849 = vrot.lane.b32.xlu2 %v11067_v19, %s10673_s17  ;;  %v11151_v58 = vpack.c.bf16 %v2661_v56, %v2661_v56  ;;  %v1381_v63 = vld [vmem:[#allocation2 + $0x80] sm:$0xff]  ;;  %v2022_v12 = vld [vmem:[#allocation2 + $0xb2] sm:$0xff]  ;;  %v11186_v29 = vpack.c.bf16 %v1380_v6, %v1380_v6  ;;  %1311 = vst.msk [vmem:[#allocation3 + $0x18] sm:$0xf] %vm668_vm2, %v11051_v10  ;;  %v10378_v47 = vld [vmem:[%s11140_s26 + $0x68] sm:$0xff] }
  0xc0   : > { %v11167_v4 = vpack.c.bf16 %v1381_v63, %v1381_v63  ;;  %v10393_v8 = vld [vmem:[%s11140_s26 + $0xe0] sm:$0xff]  ;;  %v1382_v20 = vld [vmem:[#allocation2 + $0xb0] sm:$0xff]  ;;  %v2086_v30 = vpack.c.bf16 %v2022_v12, %v2022_v12  ;;  %v10390_v49 = vld [vmem:[%s11140_s26 + $0xc8] sm:$0xff]  ;;  %672 = vst.msk [vmem:[#allocation3 + $0x3c] sm:$0xf] %vm668_vm2, %v11105_v36 }
  0xc1   : > { %v540_v9 = vld [vmem:[#allocation2] sm:$0xff]  ;;  %4481 = vmatpush.bf16.msra.mxu3 %v10393_v8  ;;  %v1446_v31 = vpack.c.bf16 %v1382_v20, %v1382_v20  ;;  %v10379_v38 = vld [vmem:[%s11140_s26 + $0x70] sm:$0xff]  ;;  %1953 = vst.msk [vmem:[#allocation3 + $0x44] sm:$0xf] %vm668_vm2, %v11101_v34  ;;  %v10382_v59 = vld [vmem:[%s11140_s26 + $0x88] sm:$0xff] }
  0xc2   : > { %v604_v14 = vpack.c.bf16 %v540_v9, %v540_v9  ;;  %v10369_v15 = vld [vmem:[%s11140_s26 + $0x20] sm:$0xff]  ;;  %v10367_v41 = vld [vmem:[%s11140_s26 + $0x10] sm:$0xff]  ;;  %4421 = vmatpush.bf16.msra.mxu1 %v10379_v38  ;;  %671 = vst.msk [vmem:[#allocation3 + $0x28] sm:$0xf] %vm668_vm2, %v11065_v18 }
  0xc3   : > { %4394 = vmatpush.bf16.msra.mxu0 %v10369_v15  ;;  %v423_v33 = vld [vmem:[%s11029_s22 + $0x60] sm:$0xff]  ;;  %1312 = vst.msk [vmem:[#allocation3 + $0x2c] sm:$0xf] %vm668_vm2, %v11063_v17  ;;  %v1384_v17 = vld [vmem:[#allocation2 + $0xd0] sm:$0xff] }
  0xc4   : > { %669 = vst.msk [vmem:[#allocation3] sm:$0xf] %vm668_vm2, %v604_v14  ;;  %v1383_v37 = vld [vmem:[#allocation2 + $0xc0] sm:$0xff]  ;;  %v1448_v60 = vpack.c.bf16 %v1384_v17, %v1384_v17  ;;  %v744_v1 = vld [vmem:[#allocation2 + $0xd1] sm:$0xff] }
  0xc5   : > { %1118 = vst.msk [vmem:[#allocation3] sm:$0xf] %vm1117_vm3, %v926_v25  ;;  %4482 = vmatpush.bf16.msra.mxu3 %v10392_v24  ;;  %v10385_v11 = vld [vmem:[%s11140_s26 + $0xa0] sm:$0xff]  ;;  %v1447_v45 = vpack.c.bf16 %v1383_v37, %v1383_v37  ;;  %v11259_v6 = vpack.c.bf16 %v744_v1, %v744_v1 }
  0xc6   : > { %1566 = vrot.lane.b32.xlu0 %v11075_v22, %s10673_s17  ;;  %488 = vst.msk [vmem:[#allocation2 + $0xf1] sm:$0xff] %vm249_vm0, %v423_v33  ;;  %v10391_v22 = vld [vmem:[%s11140_s26 + $0xd0] sm:$0xff]  ;;  %v2023_v42 = vld [vmem:[#allocation2 + $0xc2] sm:$0xff]  ;;  %4452 = vmatpush.bf16.msra.mxu2 %v10385_v11 }
  0xc7   : > { %929 = vrot.lane.b32.xlu1 %v11055_v13, %s10673_s17  ;;  %2210 = vrot.lane.b32.xlu2 %v11077_v23, %s10673_s17  ;;  %v2087_v13 = vpack.c.bf16 %v2023_v42, %v2023_v42  ;;  %v741_v10 = vld [vmem:[#allocation2 + $0xa1] sm:$0xff]  ;;  %2593 = vst.msk [vmem:[#allocation3 + $0x34] sm:$0xf] %vm668_vm2, %v11113_v39 }
  0xc8   : > { %4395 = vmatpush.bf16.msra.mxu0 %v10368_v26  ;;  %4422 = vmatpush.bf16.msra.mxu1 %v10378_v47  ;;  %v10389_v18 = vld [vmem:[%s11140_s26 + $0xc0] sm:$0xff]  ;;  %2594 = vst.msk [vmem:[#allocation3 + $0x48] sm:$0xf] %vm668_vm2, %v11120_v43  ;;  %v805_v55 = vpack.c.bf16 %v741_v10, %v741_v10 }
  0xc9   : > { %4483 = vmatpush.bf16.msra.mxu3 %v10391_v22  ;;  %1955 = vst.msk [vmem:[#allocation3 + $0x6c] sm:$0xf] %vm668_vm2, %v11122_v44  ;;  %v10381_v63 = vld [vmem:[%s11140_s26 + $0x80] sm:$0xff] }
  0xca   : > { %4453 = vmatpush.bf16.msra.mxu2 %v10384_v48  ;;  %1313 = vst.msk [vmem:[#allocation3 + $0x40] sm:$0xf] %vm668_vm2, %v11077_v23  ;;  %v1182_v23 = vld [vmem:[#allocation2 + $0x2] sm:$0xff] }
  0xcb   : > { %1954 = vst.msk [vmem:[#allocation3 + $0x58] sm:$0xf] %vm668_vm2, %v11089_v28  ;;  %v1246_v0 = vpack.c.bf16 %v1182_v23, %v1182_v23  ;;  %v2025_v2 = vld [vmem:[#allocation2 + $0xe2] sm:$0xff] }
  0xcc   : > { %4396 = vmatpush.bf16.msra.mxu0 %v10367_v41  ;;  %2595 = vst.msk [vmem:[#allocation3 + $0x5c] sm:$0xf] %vm668_vm2, %v11142_v52  ;;  %v2089_v8 = vpack.c.bf16 %v2025_v2, %v2025_v2  ;;  %v745_v14 = vld [vmem:[#allocation2 + $0xe1] sm:$0xff] }
  0xcd   : > { %4484 = vmatpush.bf16.msra.mxu3 %v10390_v49  ;;  %490 = vst.msk [vmem:[#allocation2 + $0x111] sm:$0xff] %vm249_vm0, %v425_v61  ;;  %v2026_v9 = vld [vmem:[#allocation2 + $0xf2] sm:$0xff]  ;;  %v11287_v24 = vpack.c.bf16 %v745_v14, %v745_v14  ;;  %v8379_v11 = vld [vmem:[#allocation3] sm:$0xf] }
  0xce   : > { %2212 = vrot.lane.b32.xlu0 %v11087_v27, %s10673_s17  ;;  %673 = vst.msk [vmem:[#allocation3 + $0x50] sm:$0xf] %vm668_vm2, %v11113_v39  ;;  %v2090_v16 = vpack.c.bf16 %v2026_v9, %v2026_v9  ;;  %v746_v26 = vld [vmem:[#allocation2 + $0xf1] sm:$0xff] }
  0xcf   : > { %2853 = vrot.lane.b32.xlu1 %v11089_v28, %s10673_s17  ;;  %931 = vrot.lane.b32.xlu2 %v11067_v19, %s10673_s17  ;;  %v10377_v19 = vld [vmem:[%s11140_s26 + $0x60] sm:$0xff]  ;;  %1310 = vst.msk [vmem:[#allocation3 + $0x4] sm:$0xf] %vm668_vm2, %v1246_v0  ;;  %v11305_v37 = vpack.c.bf16 %v746_v26, %v746_v26  ;;  %v430_v26 = vld [vmem:[%s11029_s22 + $0x98] sm:$0xff] }
  0xd0   : > { %4423 = vmatpush.bf16.msra.mxu1 %v10377_v19  ;;  %674 = vst.msk [vmem:[#allocation3 + $0x64] sm:$0xf] %vm668_vm2, %v11120_v43  ;;  %v749_v0 = vld [vmem:[#allocation2 + $0x141] sm:$0xff] }
  0xd1   : > { %4485 = vmatpush.bf16.msra.mxu3 %v10389_v18  ;;  %1315 = vst.msk [vmem:[#allocation3 + $0x68] sm:$0xf] %vm668_vm2, %v11103_v35 }
  0xd2   : > { %2596 = vst.msk [vmem:[#allocation3 + $0x70] sm:$0xf] %vm668_vm2, %v11186_v29 }
  0xd3   : > { %1314 = vst.msk [vmem:[#allocation3 + $0x54] sm:$0xf] %vm668_vm2, %v11087_v27 }
  0xd4   : > { %675 = vst.msk [vmem:[#allocation3 + $0x78] sm:$0xf] %vm668_vm2, %v11142_v52  ;;  %v1388_v42 = vld [vmem:[#allocation2 + $0x110] sm:$0xff] }
  0xd5   : > { %1956 = vst.msk [vmem:[#allocation3 + $0x80] sm:$0xf] %vm668_vm2, %v11135_v50  ;;  %v1452_v49 = vpack.c.bf16 %v1388_v42, %v1388_v42  ;;  %v748_v10 = vld [vmem:[#allocation2 + $0x111] sm:$0xff] }
  0xd6   : > { %2851 = vrot.lane.b32.xlu0 %v11101_v34, %s10673_s17  ;;  %1957 = vst.msk [vmem:[#allocation3 + $0x94] sm:$0xf] %vm668_vm2, %v11151_v58 }
  0xd7   : > { %2214 = vrot.lane.b32.xlu1 %v11103_v35, %s10673_s17  ;;  %1570 = vrot.lane.b32.xlu2 %v11105_v36, %s10673_s17  ;;  %v10383_v36 = vld [vmem:[%s11140_s26 + $0x90] sm:$0xff]  ;;  %676 = vst.msk [vmem:[#allocation3 + $0x8c] sm:$0xf] %vm668_vm2, %v11186_v29 }
  0xd8   : > { %4454 = vmatpush.bf16.msra.mxu2 %v10383_v36  ;;  %v1386_v35 = vld [vmem:[#allocation2 + $0xf0] sm:$0xff]  ;;  %2597 = vst.msk [vmem:[#allocation3 + $0x84] sm:$0xf] %vm668_vm2, %v11167_v4 }
  0xd9   : > { %v1450_v21 = vpack.c.bf16 %v1386_v35, %v1386_v35  ;;  %1961 = vst.msk [vmem:[#allocation3 + $0xe4] sm:$0xf] %vm668_vm2, %v11287_v24 }
  0xda   : > { %495 = vst.msk [vmem:[#allocation2 + $0x181] sm:$0xff] %vm249_vm0, %v430_v26 }
  0xdc   : > { %4455 = vmatpush.bf16.msra.mxu2 %v10382_v59  ;;  %v428_v59 = vld [vmem:[%s11029_s22 + $0x88] sm:$0xff] }
  0xdd   : > { %493 = vst.msk [vmem:[#allocation2 + $0x161] sm:$0xff] %vm249_vm0, %v428_v59 }
  0xde   : > { %1572 = vrot.lane.b32.xlu0 %v11113_v39, %s10673_s17  ;;  %v10373_v39 = vld [vmem:[%s11140_s26 + $0x40] sm:$0xff] }
  0xdf   : > { %935 = vrot.lane.b32.xlu1 %v11089_v28, %s10673_s17  ;;  %2216 = vrot.lane.b32.xlu2 %v2083_v40, %s10673_s17  ;;  %v742_v40 = vld [vmem:[#allocation2 + $0xb1] sm:$0xff]  ;;  %v1385_v28 = vld [vmem:[#allocation2 + $0xe0] sm:$0xff] }
  0xe0   : > { %v806_v46 = vpack.c.bf16 %v742_v40, %v742_v40  ;;  %4456 = vmatpush.bf16.msra.mxu2 %v10381_v63  ;;  %v2028_v40 = vld [vmem:[#allocation2 + $0x112] sm:$0xff] }
  0xe1   : > { %v2092_v48 = vpack.c.bf16 %v2028_v40, %v2028_v40 }
  0xe6   : > { %933 = vrot.lane.b32.xlu0 %v11101_v34, %s10673_s17  ;;  %v2024_v34 = vld [vmem:[#allocation2 + $0xd2] sm:$0xff] }
  0xe7   : > { %1574 = vrot.lane.b32.xlu1 %v11120_v43, %s10673_s17  ;;  %2855 = vrot.lane.b32.xlu2 %v11122_v44, %s10673_s17  ;;  %v2088_v56 = vpack.c.bf16 %v2024_v34, %v2024_v34  ;;  %v743_v43 = vld [vmem:[#allocation2 + $0xc1] sm:$0xff] }
  0xee   : > { %2857 = vrot.lane.b32.xlu0 %v11135_v50, %s10673_s17 }
  0xef   : > { %2220 = vrot.lane.b32.xlu1 %v2085_v51, %s10673_s17  ;;  %1576 = vrot.lane.b32.xlu2 %v11142_v52, %s10673_s17  ;;  %v10366_v51 = vld [vmem:[%s11140_s26 + $0x8] sm:$0xff]  ;;  %v11282_v52 = vpack.c.bf16 %v743_v43, %v743_v43 }
  0xf0   : > { %4397 = vmatpush.bf16.msra.mxu0 %v10366_v51 }
  0xf1   : > { %1959 = vst.msk [vmem:[#allocation3 + $0xbc] sm:$0xf] %vm668_vm2, %v11282_v52 }
  0xf4   : > { %4398 = vmatpush.bf16.msra.mxu0 %v10365_v53 }
  0xf6   : > { %2218 = vrot.lane.b32.xlu0 %v2084_v57, %s10673_s17  ;;  %v10376_v57 = vld [vmem:[%s11140_s26 + $0x58] sm:$0xff] }
  0xf7   : > { %2859 = vrot.lane.b32.xlu1 %v11151_v58, %s10673_s17  ;;  %937 = vrot.lane.b32.xlu2 %v11122_v44, %s10673_s17  ;;  %v426_v44 = vld [vmem:[%s11029_s22 + $0x78] sm:$0xff]  ;;  %v427_v58 = vld [vmem:[%s11029_s22 + $0x80] sm:$0xff] }
  0xf8   : > { %4424 = vmatpush.bf16.msra.mxu1 %v10376_v57  ;;  %491 = vst.msk [vmem:[#allocation2 + $0x121] sm:$0xff] %vm249_vm0, %v426_v44 }
  0xf9   : > { %492 = vst.msk [vmem:[#allocation2 + $0x151] sm:$0xff] %vm249_vm0, %v427_v58  ;;  %v10400_v58 = vld [vmem:[%s11140_s26 + $0x118] sm:$0xff] }
  0xfa   : > { %4511 = vmatpush.bf16.msrb.mxu0 %v10400_v58  ;;  %v753_v58 = vld [vmem:[#allocation2 + $0x181] sm:$0xff] }
  0xfc   : > { %4425 = vmatpush.bf16.msra.mxu1 %v10375_v62 }
  0xfe   : > { %939 = vrot.lane.b32.xlu0 %v11135_v50, %s10673_s17  ;;  %v747_v50 = vld [vmem:[#allocation2 + $0x101] sm:$0xff] }
  0xff   : > { %1580 = vrot.lane.b32.xlu1 %v11167_v4, %s10673_s17  ;;  %2861 = vrot.lane.b32.xlu2 %v2726_v5, %s10673_s17  ;;  %v1449_v5 = vpack.c.bf16 %v1385_v28, %v1385_v28  ;;  %v11292_v25 = vpack.c.bf16 %v747_v50, %v747_v50  ;;  %v1387_v4 = vld [vmem:[#allocation2 + $0x100] sm:$0xff] }
 0x100   : > { %4426 = vmatpush.bf16.msra.mxu1 %v10374_v7  ;;  %v1451_v33 = vpack.c.bf16 %v1387_v4, %v1387_v4  ;;  %v1389_v51 = vld [vmem:[#allocation2 + $0x120] sm:$0xff]  ;;  %v1390_v61 = vld [vmem:[#allocation2 + $0x150] sm:$0xff]  ;;  %v813_v7 = vpack.c.bf16 %v749_v0, %v749_v0  ;;  %v10408_v4 = vld [vmem:[%s11140_s26 + $0x158] sm:$0xff] }
 0x101   : > { %1963 = vst.msk [vmem:[#allocation3 + $0x10c] sm:$0xf] %vm668_vm2, %v11292_v25  ;;  %v2029_v53 = vld [vmem:[#allocation2 + $0x122] sm:$0xff]  ;;  %v750_v43 = vld [vmem:[#allocation2 + $0x151] sm:$0xff] }
 0x102   : > { %v2093_v57 = vpack.c.bf16 %v2029_v53, %v2029_v53  ;;  %v10421_v53 = vld [vmem:[%s11140_s26 + $0x1c0] sm:$0xff] }
 0x104   : > { %4427 = vmatpush.bf16.msra.mxu1 %v10373_v39 }
 0x106   : > { %1578 = vrot.lane.b32.xlu0 %v11186_v29, %s10673_s17 }
 0x107   : > { %2222 = vrot.lane.b32.xlu1 %v2086_v30, %s10673_s17  ;;  %1582 = vrot.lane.b32.xlu2 %v1446_v31, %s10673_s17  ;;  %v2027_v31 = vld [vmem:[#allocation2 + $0x102] sm:$0xff] }
 0x108   : > { %v2091_v38 = vpack.c.bf16 %v2027_v31, %v2027_v31  ;;  %4864 = vmatpush.bf16.msrb.mxu1 %v10408_v4  ;;  %v10415_v31 = vld [vmem:[%s11140_s26 + $0x190] sm:$0xff] }
 0x10e   : > { %1584 = vrot.lane.b32.xlu0 %v1447_v45, %s10673_s17 }
 0x10f   : > { %943 = vrot.lane.b32.xlu1 %v806_v46, %s10673_s17  ;;  %2224 = vrot.lane.b32.xlu2 %v2087_v13, %s10673_s17  ;;  %v429_v13 = vld [vmem:[%s11029_s22 + $0x90] sm:$0xff] }
 0x110   : > { %494 = vst.msk [vmem:[#allocation2 + $0x171] sm:$0xff] %vm249_vm0, %v429_v13  ;;  %v433_v13 = vld [vmem:[%s11029_s22 + $0xb0] sm:$0xff] }
 0x111   : > { %v2848_v54 = vpop.permute.xlu2 %2847  ;;  %498 = vst.msk [vmem:[#allocation2 + $0x1b1] sm:$0xff] %vm249_vm0, %v433_v13  ;;  %v1192_v13 = vld [vmem:[#allocation2 + $0xc2] sm:$0xff] }
 0x112   : > { %3039 = vst.msk [vmem:[#allocation3 + $0xc] sm:$0xf] %vm1117_vm3, %v2848_v54 }
 0x116   : > { %941 = vrot.lane.b32.xlu0 %v805_v55, %s10673_s17  ;;  %v1453_v55 = vpack.c.bf16 %v1389_v51, %v1389_v51 }
 0x117   : > { %2226 = vrot.lane.b32.xlu1 %v2088_v56, %s10673_s17  ;;  %1586 = vrot.lane.b32.xlu2 %v1448_v60, %s10673_s17  ;;  %v11323_v56 = vpack.c.bf16 %v748_v10, %v748_v10 }
 0x119   : > { %v2850_v3 = vpop.permute.xlu2 %2849  ;;  %v10206_v12 = vld [vmem:[#allocation3 + $0xc] sm:$0xf] }
 0x11a   : > { %3040 = vst.msk [vmem:[#allocation3 + $0x20] sm:$0xf] %vm1117_vm3, %v2850_v3 }
 0x11e   : > { %1588 = vrot.lane.b32.xlu0 %v1449_v5, %s10673_s17  ;;  %v1454_v5 = vpack.c.bf16 %v1390_v61, %v1390_v61  ;;  %v1393_v61 = vld [vmem:[#allocation2 + $0x180] sm:$0xff] }
 0x11f   : > { %947 = vrot.lane.b32.xlu1 %v11259_v6, %s10673_s17  ;;  %2228 = vrot.lane.b32.xlu2 %v2089_v8, %s10673_s17  ;;  %v431_v8 = vld [vmem:[%s11029_s22 + $0xa0] sm:$0xff] }
 0x120   : > { %496 = vst.msk [vmem:[#allocation2 + $0x191] sm:$0xff] %vm249_vm0, %v431_v8 }
 0x121   : > { %v8389_v27 = vld [vmem:[#allocation3 + $0x1c] sm:$0xf0]  ;;  %v2211_v15 = vpop.permute.xlu2 %2210 }
 0x122   : > { %v8392_v20 = vor.u32 %v10206_v12, %v8389_v27  ;;  %2400 = vst.msk [vmem:[#allocation3 + $0x30] sm:$0xf] %vm1117_vm3, %v2211_v15  ;;  %v1391_v27 = vld [vmem:[#allocation2 + $0x160] sm:$0xff] }
 0x123   : > { %v1455_v50 = vpack.c.bf16 %v1391_v27, %v1391_v27  ;;  %v3103_v27 = vld [vmem:[#allocation2 + $0x22] sm:$0xff] }
 0x124   : > { %4486 = vmatmul.bf16.vlgmr.msra.gmra.mxu3 %v8392_v20  ;;  %v814_v20 = vpack.c.bf16 %v750_v43, %v750_v43  ;;  %v1830_v43 = vld [vmem:[#allocation2 + $0xb1] sm:$0xff] }
 0x126   : > { %945 = vrot.lane.b32.xlu0 %v11282_v52, %s10673_s17 }
 0x127   : > { %2230 = vrot.lane.b32.xlu1 %v2090_v16, %s10673_s17  ;;  %1590 = vrot.lane.b32.xlu2 %v1450_v21, %s10673_s17  ;;  %v10416_v16 = vld [vmem:[%s11140_s26 + $0x198] sm:$0xff] }
 0x128   : > { %v2207_v29 = vpop.permute.xlu0 %2206  ;;  %v10424_v21 = vld [vmem:[%s11140_s26 + $0x1d8] sm:$0xff]  ;;  %4893 = vmatpush.bf16.msrb.mxu2 %v10416_v16 }
 0x129   : > { %v928_v30 = vpop.permute.xlu1 %927  ;;  %2398 = vst.msk [vmem:[#allocation3 + $0x8] sm:$0xf] %vm1117_vm3, %v2207_v29  ;;  %v932_v32 = vpop.permute.xlu2 %931  ;;  %v8407_v39 = vld [vmem:[#allocation3 + $0x30] sm:$0xf]  ;;  %4922 = vmatpush.bf16.msrb.mxu3 %v10424_v21 }
 0x12a   : > { %1119 = vst.msk [vmem:[#allocation3 + $0x14] sm:$0xf] %vm1117_vm3, %v928_v30  ;;  %v2470_v29 = vld [vmem:[#allocation2 + $0x90] sm:$0xff] }
 0x12b   : > { %1121 = vst.msk [vmem:[#allocation3 + $0x3c] sm:$0xf] %vm1117_vm3, %v932_v32  ;;  %v10423_v32 = vld [vmem:[%s11140_s26 + $0x1d0] sm:$0xff] }
 0x12c   : > { %4894 = vmatpush.bf16.msrb.mxu2 %v10415_v31  ;;  %v3104_v16 = vld [vmem:[#allocation2 + $0x32] sm:$0xff]  ;;  %v10398_v31 = vld [vmem:[%s11140_s26 + $0x108] sm:$0xff] }
 0x12d   : > { %4923 = vmatpush.bf16.msrb.mxu3 %v10423_v32  ;;  %v10404_v32 = vld [vmem:[%s11140_s26 + $0x138] sm:$0xff] }
 0x12e   : > { %1592 = vrot.lane.b32.xlu0 %v1451_v33, %s10673_s17  ;;  %v2534_v33 = vpack.c.bf16 %v2470_v29, %v2470_v29  ;;  %v3167_v29 = vpack.c.bf16 %v3103_v27, %v3103_v27 }
 0x12f   : > { %951 = vrot.lane.b32.xlu1 %v11305_v37, %s10673_s17  ;;  %2232 = vrot.lane.b32.xlu2 %v2091_v38, %s10673_s17  ;;  %v1392_v38 = vld [vmem:[#allocation2 + $0x170] sm:$0xff] }
 0x130   : > { %v2209_v22 = vpop.permute.xlu0 %2208  ;;  %v8387_v36 = vld [vmem:[#allocation3 + $0x8] sm:$0xf]  ;;  %2598 = vst.msk [vmem:[#allocation3 + $0x98] sm:$0xf] %vm668_vm2, %v2534_v33  ;;  %v3168_v33 = vpack.c.bf16 %v3104_v16, %v3104_v16 }
 0x131   : > { %v1569_v41 = vpop.permute.xlu1 %1568  ;;  %2399 = vst.msk [vmem:[#allocation3 + $0x1c] sm:$0xf] %vm1117_vm3, %v2209_v22  ;;  %v10207_v45 = vld [vmem:[#allocation3 + $0x10] sm:$0xf0]  ;;  %v1571_v46 = vpop.permute.xlu2 %1570 }
 0x132   : > { %v8380_v47 = vor.u32 %v10207_v45, %v8379_v11  ;;  %1759 = vst.msk [vmem:[#allocation3 + $0x18] sm:$0xf] %vm1117_vm3, %v1569_v41  ;;  %v10212_v44 = vld [vmem:[#allocation3 + $0x38] sm:$0xf0]  ;;  %v751_v41 = vld [vmem:[#allocation2 + $0x161] sm:$0xff]  ;;  %v1456_v45 = vpack.c.bf16 %v1392_v38, %v1392_v38 }
 0x133   : > { %1760 = vst.msk [vmem:[#allocation3 + $0x2c] sm:$0xf] %vm1117_vm3, %v1571_v46  ;;  %v10414_v46 = vld [vmem:[%s11140_s26 + $0x188] sm:$0xff] }
 0x134   : > { %4399 = vmatmul.bf16.vlgmr.msra.gmra.mxu0 %v8380_v47  ;;  %v10422_v47 = vld [vmem:[%s11140_s26 + $0x1c8] sm:$0xff]  ;;  %4895 = vmatpush.bf16.msrb.mxu2 %v10414_v46  ;;  %v549_v46 = vld [vmem:[#allocation2 + $0xb0] sm:$0xff]  ;;  %3231 = vst.msk [vmem:[#allocation3 + $0x10] sm:$0xf] %vm668_vm2, %v3167_v29 }
 0x135   : > { %4924 = vmatpush.bf16.msrb.mxu3 %v10422_v47  ;;  %v10397_v47 = vld [vmem:[%s11140_s26 + $0x100] sm:$0xff]  ;;  %3232 = vst.msk [vmem:[#allocation3 + $0x24] sm:$0xf] %vm668_vm2, %v3168_v33 }
 0x136   : > { %949 = vrot.lane.b32.xlu0 %v11287_v24, %s10673_s17 }
 0x137   : > { %2234 = vrot.lane.b32.xlu1 %v2092_v48, %s10673_s17  ;;  %1594 = vrot.lane.b32.xlu2 %v1452_v49, %s10673_s17  ;;  %v11362_v48 = vpack.c.bf16 %v751_v41, %v751_v41  ;;  %v10407_v49 = vld [vmem:[%s11140_s26 + $0x150] sm:$0xff] }
 0x138   : > { %v1567_v19 = vpop.permute.xlu0 %1566  ;;  %v10208_v34 = vld [vmem:[#allocation3 + $0x18] sm:$0xf0]  ;;  %4865 = vmatpush.bf16.msrb.mxu1 %v10407_v49  ;;  %v10403_v49 = vld [vmem:[%s11140_s26 + $0x130] sm:$0xff] }
 0x139   : > { %v930_v18 = vpop.permute.xlu1 %929  ;;  %1758 = vst.msk [vmem:[#allocation3 + $0x4] sm:$0xf] %vm1117_vm3, %v1567_v19  ;;  %v8388_v17 = vor.u32 %v10208_v34, %v8387_v36  ;;  %v2217_v54 = vpop.permute.xlu2 %2216  ;;  %v8381_v60 = vld [vmem:[#allocation3 + $0x14] sm:$0xf0]  ;;  %v1188_v36 = vld [vmem:[#allocation2 + $0x62] sm:$0xff]  ;;  %4925 = vmatpush.bf16.msrb.mxu3 %v10421_v53 }
 0x13a   : > { %1120 = vst.msk [vmem:[#allocation3 + $0x28] sm:$0xf] %vm1117_vm3, %v930_v18  ;;  %v10210_v19 = vld [vmem:[#allocation3 + $0x2c] sm:$0xf]  ;;  %v1189_v34 = vld [vmem:[#allocation2 + $0x72] sm:$0xff]  ;;  %v10413_v18 = vld [vmem:[%s11140_s26 + $0x180] sm:$0xff] }
 0x13b   : > { %4457 = vmatmul.bf16.vlgmr.msra.gmra.mxu2 %v8388_v17  ;;  %2403 = vst.msk [vmem:[#allocation3 + $0x6c] sm:$0xf] %vm1117_vm3, %v2217_v54  ;;  %v1190_v17 = vld [vmem:[#allocation2 + $0xa2] sm:$0xff]  ;;  %v1252_v54 = vpack.c.bf16 %v1188_v36, %v1188_v36 }
 0x13c   : > { %4896 = vmatpush.bf16.msrb.mxu2 %v10413_v18  ;;  %v10409_v36 = vld [vmem:[%s11140_s26 + $0x160] sm:$0xff] }
 0x13d   : > { %1316 = vst.msk [vmem:[#allocation3 + $0x7c] sm:$0xf] %vm668_vm2, %v1252_v54 }
 0x13e   : > { %1596 = vrot.lane.b32.xlu0 %v1453_v55, %s10673_s17  ;;  %3235 = vst.msk [vmem:[#allocation3 + $0x60] sm:$0xf] %vm668_vm2, %v1252_v54  ;;  %v11424_v54 = vpack.c.bf16 %v1192_v13, %v1192_v13 }
 0x13f   : > { %955 = vrot.lane.b32.xlu1 %v11323_v56, %s10673_s17  ;;  %2236 = vrot.lane.b32.xlu2 %v2093_v57, %s10673_s17  ;;  %v752_v57 = vld [vmem:[#allocation2 + $0x171] sm:$0xff] }
 0x140   : > { %v2213_v23 = vpop.permute.xlu0 %2212  ;;  %v10205_v62 = vld [vmem:[#allocation3 + $0x4] sm:$0xf]  ;;  %v11378_v0 = vpack.c.bf16 %v752_v57, %v752_v57  ;;  %1320 = vst.msk [vmem:[#allocation3 + $0xcc] sm:$0xf] %vm668_vm2, %v11424_v54 }
 0x141   : > { %v2854_v63 = vpop.permute.xlu1 %2853  ;;  %2401 = vst.msk [vmem:[#allocation3 + $0x44] sm:$0xf] %vm1117_vm3, %v2213_v23  ;;  %v8384_v28 = vor.u32 %v10205_v62, %v8381_v60  ;;  %v8399_v1 = vld [vmem:[#allocation3 + $0x28] sm:$0xf]  ;;  %v2856_v2 = vpop.permute.xlu2 %2855 }
 0x142   : > { %3042 = vst.msk [vmem:[#allocation3 + $0x48] sm:$0xf] %vm1117_vm3, %v2854_v63  ;;  %v8400_v3 = vor.u32 %v10212_v44, %v8399_v1  ;;  %v10218_v10 = vld [vmem:[#allocation3 + $0x68] sm:$0xf0]  ;;  %v11376_v63 = vpack.c.bf16 %v1189_v34, %v1189_v34  ;;  %v10412_v1 = vld [vmem:[%s11140_s26 + $0x178] sm:$0xff]  ;;  %v10417_v34 = vld [vmem:[%s11140_s26 + $0x1a0] sm:$0xff] }
 0x143   : > { %4428 = vmatmul.bf16.vlgmr.msra.gmra.mxu1 %v8384_v28  ;;  %3043 = vst.msk [vmem:[#allocation3 + $0x5c] sm:$0xf] %vm1117_vm3, %v2856_v2  ;;  %v10406_v28 = vld [vmem:[%s11140_s26 + $0x148] sm:$0xff]  ;;  %v1457_v2 = vpack.c.bf16 %v1393_v61, %v1393_v61  ;;  %4897 = vmatpush.bf16.msrb.mxu2 %v10412_v1  ;;  %v10401_v1 = vld [vmem:[%s11140_s26 + $0x120] sm:$0xff] }
 0x144   : > { %4404 = vmatmul.bf16.gmra.mxu0 %v8400_v3  ;;  %v10399_v3 = vld [vmem:[%s11140_s26 + $0x110] sm:$0xff]  ;;  %4866 = vmatpush.bf16.msrb.mxu1 %v10406_v28  ;;  %1317 = vst.msk [vmem:[#allocation3 + $0x90] sm:$0xf] %vm668_vm2, %v11376_v63  ;;  %v2669_v61 = vld [vmem:[#allocation2 + $0x121] sm:$0xff] }
 0x145   : > { %4512 = vmatpush.bf16.msrb.mxu0 %v10399_v3  ;;  %v11441_v28 = vpack.c.bf16 %v2669_v61, %v2669_v61  ;;  %v1396_v3 = vld [vmem:[#allocation2 + $0x1b0] sm:$0xff]  ;;  %3236 = vst.msk [vmem:[#allocation3 + $0x74] sm:$0xf] %vm668_vm2, %v11376_v63 }
 0x146   : > { %953 = vrot.lane.b32.xlu0 %v11292_v25, %s10673_s17  ;;  %v1460_v63 = vpack.c.bf16 %v1396_v3, %v1396_v3  ;;  %3239 = vst.msk [vmem:[#allocation3 + $0xb0] sm:$0xf] %vm668_vm2, %v11424_v54 }
 0x147   : > { %1598 = vrot.lane.b32.xlu1 %v1454_v5, %s10673_s17  ;;  %957 = vrot.lane.b32.xlu2 %v813_v7, %s10673_s17  ;;  %v10420_v5 = vld [vmem:[%s11140_s26 + $0x1b8] sm:$0xff]  ;;  %v432_v7 = vld [vmem:[%s11029_s22 + $0xa8] sm:$0xff]  ;;  %1965 = vst.msk [vmem:[#allocation3 + $0x134] sm:$0xf] %vm668_vm2, %v11441_v28 }
 0x148   : > { %v2852_v9 = vpop.permute.xlu0 %2851  ;;  %v10213_v12 = vld [vmem:[#allocation3 + $0x40] sm:$0xf0]  ;;  %4926 = vmatpush.bf16.msrb.mxu3 %v10420_v5  ;;  %497 = vst.msk [vmem:[#allocation2 + $0x1a1] sm:$0xff] %vm249_vm0, %v432_v7  ;;  %v1832_v5 = vld [vmem:[#allocation2 + $0xd1] sm:$0xff] }
 0x149   : > { %v2215_v35 = vpop.permute.xlu1 %2214  ;;  %3041 = vst.msk [vmem:[#allocation3 + $0x34] sm:$0xf] %vm1117_vm3, %v2852_v9  ;;  %v8408_v14 = vor.u32 %v10213_v12, %v8407_v39  ;;  %v1577_v15 = vpop.permute.xlu2 %1576  ;;  %v8409_v30 = vld [vmem:[#allocation3 + $0x44] sm:$0xf0]  ;;  %v1191_v39 = vld [vmem:[#allocation2 + $0xb2] sm:$0xff]  ;;  %v10405_v9 = vld [vmem:[%s11140_s26 + $0x140] sm:$0xff]  ;;  %4513 = vmatpush.bf16.msrb.mxu0 %v10398_v31 }
 0x14a   : > { %2402 = vst.msk [vmem:[#allocation3 + $0x58] sm:$0xf] %vm1117_vm3, %v2215_v35  ;;  %v10411_v12 = vld [vmem:[%s11140_s26 + $0x170] sm:$0xff]  ;;  %v1255_v35 = vpack.c.bf16 %v1191_v39, %v1191_v39  ;;  %4867 = vmatpush.bf16.msrb.mxu1 %v10405_v9  ;;  %v3105_v7 = vld [vmem:[#allocation2 + $0x42] sm:$0xff] }
 0x14b   : > { %4462 = vmatmul.bf16.gmra.mxu2 %v8408_v14  ;;  %1763 = vst.msk [vmem:[#allocation3 + $0x68] sm:$0xf] %vm1117_vm3, %v1577_v15  ;;  %v1394_v14 = vld [vmem:[#allocation2 + $0x190] sm:$0xff] }
 0x14c   : > { %v10419_v15 = vld [vmem:[%s11140_s26 + $0x1b0] sm:$0xff]  ;;  %4898 = vmatpush.bf16.msrb.mxu2 %v10411_v12  ;;  %1319 = vst.msk [vmem:[#allocation3 + $0xb8] sm:$0xf] %vm668_vm2, %v1255_v35 }
 0x14d   : > { %4927 = vmatpush.bf16.msrb.mxu3 %v10419_v15  ;;  %4514 = vmatpush.bf16.msrb.mxu0 %v10397_v47  ;;  %v3169_v15 = vpack.c.bf16 %v3105_v7, %v3105_v7  ;;  %v2670_v31 = vld [vmem:[#allocation2 + $0x131] sm:$0xff]  ;;  %v552_v7 = vld [vmem:[#allocation2 + $0xe0] sm:$0xff] }
 0x14e   : > { %959 = vrot.lane.b32.xlu0 %v814_v20, %s10673_s17  ;;  %4868 = vmatpush.bf16.msrb.mxu1 %v10404_v32  ;;  %v551_v32 = vld [vmem:[#allocation2 + $0xd0] sm:$0xff] }
 0x14f   : > { %2865 = vrot.lane.b32.xlu1 %v11259_v6, %s10673_s17  ;;  %1600 = vrot.lane.b32.xlu2 %v1455_v50, %s10673_s17  ;;  %v755_v9 = vld [vmem:[#allocation2 + $0x1a1] sm:$0xff]  ;;  %3233 = vst.msk [vmem:[#allocation3 + $0x38] sm:$0xf] %vm668_vm2, %v3169_v15  ;;  %v2030_v47 = vld [vmem:[#allocation2 + $0x152] sm:$0xff] }
 0x150   : > { %v1573_v11 = vpop.permute.xlu0 %1572  ;;  %v10211_v40 = vld [vmem:[#allocation3 + $0x34] sm:$0xf]  ;;  %v11455_v16 = vpack.c.bf16 %v755_v9, %v755_v9 }
 0x151   : > { %v936_v22 = vpop.permute.xlu1 %935  ;;  %1761 = vst.msk [vmem:[#allocation3 + $0x40] sm:$0xf] %vm1117_vm3, %v1573_v11  ;;  %v8412_v6 = vor.u32 %v10211_v40, %v8409_v30  ;;  %v938_v42 = vpop.permute.xlu2 %937  ;;  %v8427_v51 = vld [vmem:[#allocation3 + $0x58] sm:$0xf]  ;;  %v1458_v30 = vpack.c.bf16 %v1394_v14, %v1394_v14  ;;  %v11406_v11 = vpack.c.bf16 %v753_v58, %v753_v58  ;;  %v10410_v40 = vld [vmem:[%s11140_s26 + $0x168] sm:$0xff]  ;;  %v1896_v14 = vpack.c.bf16 %v1832_v5, %v1832_v5  ;;  %v437_v58 = vld [vmem:[%s11029_s22 + $0xd0] sm:$0xff] }
 0x152   : > { %1123 = vst.msk [vmem:[#allocation3 + $0x64] sm:$0xf] %vm1117_vm3, %v936_v22  ;;  %v8428_v55 = vor.u32 %v10218_v10, %v8427_v51  ;;  %v8421_v38 = vld [vmem:[#allocation3 + $0x64] sm:$0xf0]  ;;  %4899 = vmatpush.bf16.msrb.mxu2 %v10410_v40  ;;  %4869 = vmatpush.bf16.msrb.mxu1 %v10403_v49  ;;  %v615_v49 = vpack.c.bf16 %v551_v32, %v551_v32 }
 0x153   : > { %4491 = vmatmul.bf16.gmra.mxu3 %v8412_v6  ;;  %1124 = vst.msk [vmem:[#allocation3 + $0x78] sm:$0xf] %vm1117_vm3, %v938_v42  ;;  %v10418_v22 = vld [vmem:[%s11140_s26 + $0x1a8] sm:$0xff]  ;;  %v435_v6 = vld [vmem:[%s11029_s22 + $0xc0] sm:$0xff]  ;;  %v10216_v42 = vld [vmem:[#allocation3 + $0x5c] sm:$0xf] }
 0x154   : > { %4928 = vmatpush.bf16.msrb.mxu3 %v10418_v22  ;;  %500 = vst.msk [vmem:[#allocation2 + $0x1f1] sm:$0xff] %vm249_vm0, %v435_v6  ;;  %v1196_v5 = vld [vmem:[#allocation2 + $0x102] sm:$0xff] }
 0x155   : > { %1960 = vst.msk [vmem:[#allocation3 + $0xd0] sm:$0xf] %vm668_vm2, %v1896_v14  ;;  %v11502_v14 = vpack.c.bf16 %v1196_v5, %v1196_v5  ;;  %v555_v5 = vld [vmem:[#allocation2 + $0x110] sm:$0xff] }
 0x156   : > { %2863 = vrot.lane.b32.xlu0 %v11282_v52, %s10673_s17  ;;  %v1254_v52 = vpack.c.bf16 %v1190_v17, %v1190_v17  ;;  %v1395_v17 = vld [vmem:[#allocation2 + $0x1a0] sm:$0xff]  ;;  %4900 = vmatpush.bf16.msrb.mxu2 %v10409_v36  ;;  %502 = vst.msk [vmem:[#allocation2 + $0x211] sm:$0xff] %vm249_vm0, %v437_v58  ;;  %v1834_v36 = vld [vmem:[#allocation2 + $0xf1] sm:$0xff] }
 0x157   : > { %1602 = vrot.lane.b32.xlu1 %v1456_v45, %s10673_s17  ;;  %961 = vrot.lane.b32.xlu2 %v11362_v48, %s10673_s17  ;;  %v548_v45 = vld [vmem:[#allocation2 + $0xa0] sm:$0xff]  ;;  %680 = vst.msk [vmem:[#allocation3 + $0xdc] sm:$0xf] %vm668_vm2, %v615_v49  ;;  %v2032_v58 = vld [vmem:[#allocation2 + $0x172] sm:$0xff] }
 0x158   : > { %v934_v59 = vpop.permute.xlu0 %933  ;;  %v8401_v60 = vld [vmem:[#allocation3 + $0x3c] sm:$0xf0]  ;;  %1318 = vst.msk [vmem:[#allocation3 + $0xa4] sm:$0xf] %vm668_vm2, %v1254_v52  ;;  %v612_v51 = vpack.c.bf16 %v548_v45, %v548_v45  ;;  %4929 = vmatpush.bf16.msrb.mxu3 %v10417_v34  ;;  %v10402_v52 = vld [vmem:[%s11140_s26 + $0x128] sm:$0xff] }
 0x159   : > { %v1575_v44 = vpop.permute.xlu1 %1574  ;;  %1122 = vst.msk [vmem:[#allocation3 + $0x50] sm:$0xf] %vm1117_vm3, %v934_v59  ;;  %v8404_v23 = vor.u32 %v10210_v19, %v8401_v60  ;;  %v2862_v62 = vpop.permute.xlu2 %2861  ;;  %v10217_v8 = vld [vmem:[#allocation3 + $0x60] sm:$0xf0]  ;;  %v754_v19 = vld [vmem:[#allocation2 + $0x191] sm:$0xff]  ;;  %v613_v59 = vpack.c.bf16 %v549_v46, %v549_v46  ;;  %4870 = vmatpush.bf16.msrb.mxu1 %v10402_v52  ;;  %v2734_v46 = vpack.c.bf16 %v2670_v31, %v2670_v31 }
 0x15a   : > { %1762 = vst.msk [vmem:[#allocation3 + $0x54] sm:$0xf] %vm1117_vm3, %v1575_v44  ;;  %v11428_v60 = vpack.c.bf16 %v754_v19, %v754_v19  ;;  %v1459_v44 = vpack.c.bf16 %v1395_v17, %v1395_v17  ;;  %v1195_v19 = vld [vmem:[#allocation2 + $0xf2] sm:$0xff]  ;;  %v10209_v52 = vld [vmem:[#allocation3 + $0x20] sm:$0xf0]  ;;  %v2096_v31 = vpack.c.bf16 %v2032_v58, %v2032_v58 }
 0x15b   : > { %4433 = vmatmul.bf16.gmra.mxu1 %v8404_v23  ;;  %4467 = vmatmul.bf16.gmra.mxu2 %v8428_v55  ;;  %3046 = vst.msk [vmem:[#allocation3 + $0x98] sm:$0xf] %vm1117_vm3, %v2862_v62  ;;  %v434_v23 = vld [vmem:[%s11029_s22 + $0xb8] sm:$0xff]  ;;  %v11485_v17 = vpack.c.bf16 %v1195_v19, %v1195_v19 }
 0x15c   : > { %677 = vst.msk [vmem:[#allocation3 + $0xa0] sm:$0xf] %vm668_vm2, %v612_v51  ;;  %v2094_v51 = vpack.c.bf16 %v2030_v47, %v2030_v47  ;;  %v8415_v19 = vld [vmem:[#allocation3 + $0x38] sm:$0xf] }
 0x15d   : > { %678 = vst.msk [vmem:[#allocation3 + $0xb4] sm:$0xf] %vm668_vm2, %v613_v59  ;;  %4871 = vmatpush.bf16.msrb.mxu1 %v10401_v1  ;;  %v1898_v59 = vpack.c.bf16 %v1834_v36, %v1834_v36  ;;  %v10440_v58 = vld [vmem:[%s11140_s26 + $0x258] sm:$0xff] }
 0x15e   : > { %963 = vrot.lane.b32.xlu0 %v11378_v0, %s10673_s17  ;;  %499 = vst.msk [vmem:[#allocation2 + $0x1c1] sm:$0xff] %vm249_vm0, %v434_v23  ;;  %v436_v23 = vld [vmem:[%s11029_s22 + $0xc8] sm:$0xff] }
 0x15f   : > { %2869 = vrot.lane.b32.xlu1 %v11305_v37, %s10673_s17  ;;  %1604 = vrot.lane.b32.xlu2 %v1457_v2, %s10673_s17  ;;  %v1894_v37 = vpack.c.bf16 %v1830_v43, %v1830_v43  ;;  %v1193_v2 = vld [vmem:[#allocation2 + $0xd2] sm:$0xff]  ;;  %1327 = vst.msk [vmem:[#allocation3 + $0x158] sm:$0xf] %vm668_vm2, %v2094_v51 }
 0x160   : > { %v2858_v20 = vpop.permute.xlu0 %2857  ;;  %v8419_v21 = vld [vmem:[#allocation3 + $0x50] sm:$0xf]  ;;  %v11448_v12 = vpack.c.bf16 %v1193_v2, %v1193_v2  ;;  %1323 = vst.msk [vmem:[#allocation3 + $0x108] sm:$0xf] %vm668_vm2, %v11485_v17 }
 0x161   : > { %v2221_v50 = vpop.permute.xlu1 %2220  ;;  %3044 = vst.msk [vmem:[#allocation3 + $0x70] sm:$0xf] %vm1117_vm3, %v2858_v20  ;;  %v8420_v4 = vor.u32 %v10217_v8, %v8419_v21  ;;  %v1583_v26 = vpop.permute.xlu2 %1582  ;;  %v10215_v41 = vld [vmem:[#allocation3 + $0x54] sm:$0xf] }
 0x162   : > { %2405 = vst.msk [vmem:[#allocation3 + $0x94] sm:$0xf] %vm1117_vm3, %v2221_v50  ;;  %v8424_v10 = vor.u32 %v10215_v41, %v8421_v38  ;;  %v8449_v50 = vld [vmem:[#allocation3 + $0x94] sm:$0xf0] }
 0x163   : > { %4409 = vmatmul.bf16.gmra.mxu0 %v8420_v4  ;;  %1766 = vst.msk [vmem:[#allocation3 + $0xa4] sm:$0xf] %vm1117_vm3, %v1583_v26  ;;  %v1194_v4 = vld [vmem:[#allocation2 + $0xe2] sm:$0xff] }
 0x164   : > { %1958 = vst.msk [vmem:[#allocation3 + $0xa8] sm:$0xf] %vm668_vm2, %v1894_v37  ;;  %v8439_v37 = vld [vmem:[#allocation3 + $0x78] sm:$0xf]  ;;  %v550_v26 = vld [vmem:[#allocation2 + $0xc0] sm:$0xff]  ;;  %v11468_v22 = vpack.c.bf16 %v1194_v4, %v1194_v4 }
 0x165   : > { %1321 = vst.msk [vmem:[#allocation3 + $0xe0] sm:$0xf] %vm668_vm2, %v11448_v12 }
 0x166   : > { %2867 = vrot.lane.b32.xlu0 %v11287_v24, %s10673_s17  ;;  %1322 = vst.msk [vmem:[#allocation3 + $0xf4] sm:$0xf] %vm668_vm2, %v11468_v22 }
 0x167   : > { %1606 = vrot.lane.b32.xlu1 %v1458_v30, %s10673_s17  ;;  %965 = vrot.lane.b32.xlu2 %v11406_v11, %s10673_s17  ;;  %v756_v30 = vld [vmem:[#allocation2 + $0x1b1] sm:$0xff]  ;;  %1962 = vst.msk [vmem:[#allocation3 + $0xf8] sm:$0xf] %vm668_vm2, %v1898_v59 }
 0x168   : > { %v2219_v18 = vpop.permute.xlu0 %2218  ;;  %v8429_v53 = vld [vmem:[#allocation3 + $0x6c] sm:$0xf0]  ;;  %v11472_v45 = vpack.c.bf16 %v756_v30, %v756_v30  ;;  %501 = vst.msk [vmem:[#allocation2 + $0x201] sm:$0xff] %vm249_vm0, %v436_v23  ;;  %v10436_v30 = vld [vmem:[%s11140_s26 + $0x238] sm:$0xff]  ;;  %v556_v23 = vld [vmem:[#allocation2 + $0x140] sm:$0xff] }
 0x169   : > { %v2860_v24 = vpop.permute.xlu1 %2859  ;;  %2404 = vst.msk [vmem:[#allocation3 + $0x80] sm:$0xf] %vm1117_vm3, %v2219_v18  ;;  %v8432_v55 = vor.u32 %v10216_v42, %v8429_v53  ;;  %v2225_v57 = vpop.permute.xlu2 %2224  ;;  %v10223_v62 = vld [vmem:[#allocation3 + $0x90] sm:$0xf0]  ;;  %v614_v42 = vpack.c.bf16 %v550_v26, %v550_v26  ;;  %v10452_v26 = vld [vmem:[%s11140_s26 + $0x2b8] sm:$0xff]  ;;  %4984 = vmatpush.bf16.msra.mxu1 %v10436_v30 }
 0x16a   : > { %3045 = vst.msk [vmem:[#allocation3 + $0x84] sm:$0xf] %vm1117_vm3, %v2860_v24  ;;  %v757_v24 = vld [vmem:[#allocation2 + $0x1e1] sm:$0xff]  ;;  %5366 = vmatpush.bf16.msra.mxu3 %v10452_v26  ;;  %v441_v26 = vld [vmem:[%s11029_s22 + $0xf0] sm:$0xff] }
 0x16b   : > { %4438 = vmatmul.bf16.gmra.mxu1 %v8424_v10  ;;  %4496 = vmatmul.bf16.gmra.mxu3 %v8432_v55  ;;  %2407 = vst.msk [vmem:[#allocation3 + $0xbc] sm:$0xf] %vm1117_vm3, %v2225_v57  ;;  %v821_v61 = vpack.c.bf16 %v757_v24, %v757_v24  ;;  %v10225_v3 = vld [vmem:[#allocation3 + $0xa4] sm:$0xf]  ;;  %v10450_v24 = vld [vmem:[%s11140_s26 + $0x2a8] sm:$0xff] }
 0x16c   : > { %679 = vst.msk [vmem:[#allocation3 + $0xc8] sm:$0xf] %vm668_vm2, %v614_v42 }
 0x16d   : > { %2599 = vst.msk [vmem:[#allocation3 + $0xac] sm:$0xf] %vm668_vm2, %v614_v42 }
 0x16e   : > { %967 = vrot.lane.b32.xlu0 %v11428_v60, %s10673_s17  ;;  %2600 = vst.msk [vmem:[#allocation3 + $0xc0] sm:$0xf] %vm668_vm2, %v615_v49  ;;  %v3110_v49 = vld [vmem:[#allocation2 + $0x92] sm:$0xff] }
 0x16f   : > { %2873 = vrot.lane.b32.xlu1 %v11323_v56, %s10673_s17  ;;  %1608 = vrot.lane.b32.xlu2 %v1459_v44, %s10673_s17  ;;  %v3106_v56 = vld [vmem:[#allocation2 + $0x52] sm:$0xff]  ;;  %1324 = vst.msk [vmem:[#allocation3 + $0x11c] sm:$0xf] %vm668_vm2, %v11502_v14  ;;  %v759_v47 = vld [vmem:[#allocation2 + $0x201] sm:$0xff] }
 0x170   : > { %v940_v8 = vpop.permute.xlu0 %939  ;;  %v8447_v39 = vld [vmem:[#allocation3 + $0x80] sm:$0xf]  ;;  %v3170_v20 = vpack.c.bf16 %v3106_v56, %v3106_v56  ;;  %v8395_v44 = vld [vmem:[#allocation3 + $0x10] sm:$0xf]  ;;  %1329 = vst.msk [vmem:[#allocation3 + $0x180] sm:$0xf] %vm668_vm2, %v2096_v31 }
 0x171   : > { %v1581_v43 = vpop.permute.xlu1 %1580  ;;  %1125 = vst.msk [vmem:[#allocation3 + $0x8c] sm:$0xf] %vm1117_vm3, %v940_v8  ;;  %v8448_v35 = vor.u32 %v10223_v62, %v8447_v39  ;;  %v1587_v27 = vpop.permute.xlu2 %1586  ;;  %v10221_v21 = vld [vmem:[#allocation3 + $0x84] sm:$0xf]  ;;  %v8396_v8 = vor.u32 %v10209_v52, %v8395_v44  ;;  %v758_v39 = vld [vmem:[#allocation2 + $0x1f1] sm:$0xff] }
 0x172   : > { %1765 = vst.msk [vmem:[#allocation3 + $0x90] sm:$0xf] %vm1117_vm3, %v1581_v43  ;;  %v8452_v29 = vor.u32 %v10221_v21, %v8449_v50  ;;  %v439_v62 = vld [vmem:[%s11029_s22 + $0xe0] sm:$0xff]  ;;  %v10228_v2 = vld [vmem:[#allocation3 + $0xb8] sm:$0xf0]  ;;  %v553_v43 = vld [vmem:[#allocation2 + $0xf0] sm:$0xff]  ;;  %v822_v50 = vpack.c.bf16 %v758_v39, %v758_v39 }
 0x173   : > { %4472 = vmatmul.bf16.gmra.mxu2 %v8448_v35  ;;  %1768 = vst.msk [vmem:[#allocation3 + $0xcc] sm:$0xf] %vm1117_vm3, %v1587_v27  ;;  %v10444_v21 = vld [vmem:[%s11140_s26 + $0x278] sm:$0xff] }
 0x174   : > { %3234 = vst.msk [vmem:[#allocation3 + $0x4c] sm:$0xf] %vm668_vm2, %v3170_v20  ;;  %v11506_v20 = vpack.c.bf16 %v552_v7, %v552_v7  ;;  %5337 = vmatpush.bf16.msra.mxu2 %v10444_v21 }
 0x175   : > { %504 = vst.msk [vmem:[#allocation2 + $0x231] sm:$0xff] %vm249_vm0, %v439_v62  ;;  %v10441_v62 = vld [vmem:[%s11140_s26 + $0x260] sm:$0xff] }
 0x176   : > { %2871 = vrot.lane.b32.xlu0 %v11292_v25, %s10673_s17  ;;  %v1397_v25 = vld [vmem:[#allocation2 + $0x1c0] sm:$0xff]  ;;  %681 = vst.msk [vmem:[#allocation3 + $0xf0] sm:$0xf] %vm668_vm2, %v11506_v20 }
 0x177   : > { %1610 = vrot.lane.b32.xlu1 %v1460_v63, %s10673_s17  ;;  %969 = vrot.lane.b32.xlu2 %v11455_v16, %s10673_s17  ;;  %v1461_v13 = vpack.c.bf16 %v1397_v25, %v1397_v25  ;;  %v1836_v25 = vld [vmem:[#allocation2 + $0x111] sm:$0xff]  ;;  %506 = vst.msk [vmem:[#allocation2 + $0x251] sm:$0xff] %vm249_vm0, %v441_v26 }
 0x178   : > { %v1579_v33 = vpop.permute.xlu0 %1578  ;;  %v10222_v38 = vld [vmem:[#allocation3 + $0x88] sm:$0xf0]  ;;  %3240 = vst.msk [vmem:[#allocation3 + $0xc4] sm:$0xf] %vm668_vm2, %v11448_v12  ;;  %v10445_v12 = vld [vmem:[%s11140_s26 + $0x280] sm:$0xff] }
 0x179   : > { %v2223_v40 = vpop.permute.xlu1 %2222  ;;  %1764 = vst.msk [vmem:[#allocation3 + $0x7c] sm:$0xf] %vm1117_vm3, %v1579_v33  ;;  %v8440_v41 = vor.u32 %v10222_v38, %v8439_v37  ;;  %v2229_v6 = vpop.permute.xlu2 %2228  ;;  %v8441_v10 = vld [vmem:[#allocation3 + $0x8c] sm:$0xf0]  ;;  %v11510_v37 = vpack.c.bf16 %v553_v43, %v553_v43  ;;  %v2033_v43 = vld [vmem:[#allocation2 + $0x182] sm:$0xff] }
 0x17a   : > { %2406 = vst.msk [vmem:[#allocation3 + $0xa8] sm:$0xf] %vm1117_vm3, %v2223_v40  ;;  %v10443_v33 = vld [vmem:[%s11140_s26 + $0x270] sm:$0xff]  ;;  %v10230_v52 = vld [vmem:[#allocation3 + $0xcc] sm:$0xf]  ;;  %v11565_v21 = vpack.c.bf16 %v2033_v43, %v2033_v43 }
 0x17b   : > { %4414 = vmatmul.bf16.gmra.mxu0 %v8440_v41  ;;  %4501 = vmatmul.bf16.gmra.mxu3 %v8452_v29  ;;  %2409 = vst.msk [vmem:[#allocation3 + $0xe4] sm:$0xf] %vm1117_vm3, %v2229_v6  ;;  %v10432_v29 = vld [vmem:[%s11140_s26 + $0x218] sm:$0xff]  ;;  %v10451_v38 = vld [vmem:[%s11140_s26 + $0x2b0] sm:$0xff]  ;;  %v3109_v41 = vld [vmem:[#allocation2 + $0x82] sm:$0xff] }
 0x17c   : > { %682 = vst.msk [vmem:[#allocation3 + $0x104] sm:$0xf] %vm668_vm2, %v11510_v37  ;;  %4951 = vmatpush.bf16.msra.mxu0 %v10432_v29  ;;  %v1197_v40 = vld [vmem:[#allocation2 + $0x112] sm:$0xff]  ;;  %5338 = vmatpush.bf16.msra.mxu2 %v10443_v33  ;;  %v3173_v36 = vpack.c.bf16 %v3109_v41, %v3109_v41 }
 0x17d   : > { %5367 = vmatpush.bf16.msra.mxu3 %v10451_v38  ;;  %v10448_v29 = vld [vmem:[%s11140_s26 + $0x298] sm:$0xff]  ;;  %v557_v33 = vld [vmem:[#allocation2 + $0x150] sm:$0xff]  ;;  %v1198_v38 = vld [vmem:[#allocation2 + $0x142] sm:$0xff]  ;;  %2601 = vst.msk [vmem:[#allocation3 + $0xd4] sm:$0xf] %vm668_vm2, %v11506_v20 }
 0x17e   : > { %971 = vrot.lane.b32.xlu0 %v11472_v45, %s10673_s17  ;;  %3237 = vst.msk [vmem:[#allocation3 + $0x88] sm:$0xf] %vm668_vm2, %v3173_v36  ;;  %v10428_v36 = vld [vmem:[%s11140_s26 + $0x1f8] sm:$0xff]  ;;  %v10434_v20 = vld [vmem:[%s11140_s26 + $0x228] sm:$0xff] }
 0x17f   : > { %2877 = vrot.lane.b32.xlu1 %v2734_v46, %s10673_s17  ;;  %1612 = vrot.lane.b32.xlu2 %v1461_v13, %s10673_s17  ;;  %2602 = vst.msk [vmem:[#allocation3 + $0xe8] sm:$0xf] %vm668_vm2, %v11510_v37 }
 0x180   : > { %v1585_v34 = vpop.permute.xlu0 %1584  ;;  %v10220_v18 = vld [vmem:[#allocation3 + $0x7c] sm:$0xf]  ;;  %1330 = vst.msk [vmem:[#allocation3 + $0x194] sm:$0xf] %vm668_vm2, %v11565_v21 }
 0x181   : > { %v944_v53 = vpop.permute.xlu1 %943  ;;  %1767 = vst.msk [vmem:[#allocation3 + $0xb8] sm:$0xf] %vm1117_vm3, %v1585_v34  ;;  %v8444_v55 = vor.u32 %v10220_v18, %v8441_v10  ;;  %v1591_v57 = vpop.permute.xlu2 %1590  ;;  %v8615_v1 = vld [vmem:[#allocation3 + $0xa8] sm:$0xf]  ;;  %v1900_v10 = vpack.c.bf16 %v1836_v25, %v1836_v25  ;;  %v11536_v34 = vpack.c.bf16 %v759_v47, %v759_v47  ;;  %v10431_v18 = vld [vmem:[%s11140_s26 + $0x210] sm:$0xff]  ;;  %5368 = vmatpush.bf16.msra.mxu3 %v10450_v24 }
 0x182   : > { %1127 = vst.msk [vmem:[#allocation3 + $0xb4] sm:$0xf] %vm1117_vm3, %v944_v53  ;;  %v8616_v35 = vor.u32 %v10228_v2, %v8615_v1  ;;  %v10442_v53 = vld [vmem:[%s11140_s26 + $0x268] sm:$0xff]  ;;  %v10233_v59 = vld [vmem:[#allocation3 + $0xe0] sm:$0xf0]  ;;  %4952 = vmatpush.bf16.msra.mxu0 %v10431_v18  ;;  %v760_v2 = vld [vmem:[#allocation2 + $0x211] sm:$0xff] }
 0x183   : > { %4443 = vmatmul.bf16.gmra.mxu1 %v8444_v55  ;;  %1770 = vst.msk [vmem:[#allocation3 + $0xf4] sm:$0xf] %vm1117_vm3, %v1591_v57  ;;  %v3174_v55 = vpack.c.bf16 %v3110_v49, %v3110_v49  ;;  %v10214_v57 = vld [vmem:[#allocation3 + $0x48] sm:$0xf0]  ;;  %5339 = vmatpush.bf16.msra.mxu2 %v10442_v53  ;;  %v10447_v49 = vld [vmem:[%s11140_s26 + $0x290] sm:$0xff] }
 0x184   : > { %1964 = vst.msk [vmem:[#allocation3 + $0x120] sm:$0xf] %vm668_vm2, %v1900_v10  ;;  %v8416_v1 = vor.u32 %v10214_v57, %v8415_v19  ;;  %v10219_v19 = vld [vmem:[#allocation3 + $0x70] sm:$0xf0]  ;;  %v10438_v53 = vld [vmem:[%s11140_s26 + $0x248] sm:$0xff] }
 0x185   : > { %3238 = vst.msk [vmem:[#allocation3 + $0x9c] sm:$0xf] %vm668_vm2, %v3174_v55  ;;  %v10446_v55 = vld [vmem:[%s11140_s26 + $0x288] sm:$0xff] }
 0x186   : > { %2875 = vrot.lane.b32.xlu0 %v11441_v28, %s10673_s17  ;;  %v2031_v28 = vld [vmem:[#allocation2 + $0x162] sm:$0xff]  ;;  %3241 = vst.msk [vmem:[#allocation3 + $0xd8] sm:$0xf] %vm668_vm2, %v11468_v22 }
 0x187   : > { %2238 = vrot.lane.b32.xlu1 %v2094_v51, %s10673_s17  ;;  %973 = vrot.lane.b32.xlu2 %v821_v61, %s10673_s17  ;;  %v2095_v4 = vpack.c.bf16 %v2031_v28, %v2031_v28  ;;  %v438_v61 = vld [vmem:[%s11029_s22 + $0xd8] sm:$0xff]  ;;  %v440_v57 = vld [vmem:[%s11029_s22 + $0xe8] sm:$0xff]  ;;  %3242 = vst.msk [vmem:[#allocation3 + $0xec] sm:$0xf] %vm668_vm2, %v11485_v17 }
 0x188   : > { %v942_v9 = vpop.permute.xlu0 %941  ;;  %v8609_v56 = vld [vmem:[#allocation3 + $0xb4] sm:$0xf0]  ;;  %503 = vst.msk [vmem:[#allocation2 + $0x221] sm:$0xff] %vm249_vm0, %v438_v61  ;;  %5340 = vmatpush.bf16.msra.mxu2 %v10441_v62 }
 0x189   : > { %v2227_v27 = vpop.permute.xlu1 %2226  ;;  %1126 = vst.msk [vmem:[#allocation3 + $0xa0] sm:$0xf] %vm1117_vm3, %v942_v9  ;;  %v8612_v63 = vor.u32 %v10225_v3, %v8609_v56  ;;  %v2233_v15 = vpop.permute.xlu2 %2232  ;;  %v10227_v32 = vld [vmem:[#allocation3 + $0xb0] sm:$0xf0]  ;;  %v554_v3 = vld [vmem:[#allocation2 + $0x100] sm:$0xff]  ;;  %v620_v9 = vpack.c.bf16 %v556_v23, %v556_v23 }
 0x18a   : > { %2408 = vst.msk [vmem:[#allocation3 + $0xd0] sm:$0xf] %vm1117_vm3, %v2227_v27  ;;  %v10449_v27 = vld [vmem:[%s11140_s26 + $0x2a0] sm:$0xff]  ;;  %v11556_v28 = vpack.c.bf16 %v554_v3, %v554_v3 }
 0x18b   : > { %8601 = vmatmul.msk.bf16.vlgmr.msrb.gmra.mxu0 %vm249_vm0, %v8396_v8  ;;  %4901 = vmatmul.bf16.vlgmr.msrb.gmra.mxu2 %v8612_v63  ;;  %2411 = vst.msk [vmem:[#allocation3 + $0x10c] sm:$0xf] %vm1117_vm3, %v2233_v15  ;;  %v11558_v63 = vpack.c.bf16 %v760_v2, %v760_v2  ;;  %v11561_v15 = vpack.c.bf16 %v555_v5, %v555_v5  ;;  %v2035_v2 = vld [vmem:[#allocation2 + $0x1a2] sm:$0xff] }
 0x18c   : > { %4930 = vmatmul.bf16.vlgmr.msrb.gmra.mxu3 %v8616_v35  ;;  %1328 = vst.msk [vmem:[#allocation3 + $0x16c] sm:$0xf] %vm668_vm2, %v2095_v4  ;;  %5341 = vmatpush.bf16.msra.mxu2 %v10440_v58  ;;  %v10437_v5 = vld [vmem:[%s11140_s26 + $0x240] sm:$0xff]  ;;  %v11621_v43 = vpack.c.bf16 %v2035_v2, %v2035_v2 }
 0x18d   : > { %685 = vst.msk [vmem:[#allocation3 + $0x140] sm:$0xf] %vm668_vm2, %v620_v9  ;;  %5369 = vmatpush.bf16.msra.mxu3 %v10449_v27  ;;  %v10426_v9 = vld [vmem:[%s11140_s26 + $0x1e8] sm:$0xff]  ;;  %v2036_v27 = vld [vmem:[#allocation2 + $0x1b2] sm:$0xff] }
 0x18e   : > { %975 = vrot.lane.b32.xlu0 %v822_v50, %s10673_s17  ;;  %v10430_v50 = vld [vmem:[%s11140_s26 + $0x208] sm:$0xff]  ;;  %683 = vst.msk [vmem:[#allocation3 + $0x118] sm:$0xf] %vm668_vm2, %v11556_v28 }
 0x18f   : > { %2881 = vrot.lane.b32.xlu1 %v11378_v0, %s10673_s17  ;;  %2240 = vrot.lane.b32.xlu2 %v2095_v4, %s10673_s17  ;;  %v11530_v0 = vpack.c.bf16 %v1197_v40, %v1197_v40  ;;  %v10435_v4 = vld [vmem:[%s11140_s26 + $0x230] sm:$0xff]  ;;  %684 = vst.msk [vmem:[#allocation3 + $0x12c] sm:$0xf] %vm668_vm2, %v11561_v15 }
 0x190   : > { %v1589_v6 = vpop.permute.xlu0 %1588  ;;  %v8607_v42 = vld [vmem:[#allocation3 + $0xa0] sm:$0xf]  ;;  %4953 = vmatpush.bf16.msra.mxu0 %v10430_v50  ;;  %4985 = vmatpush.bf16.msra.mxu1 %v10435_v4  ;;  %505 = vst.msk [vmem:[#allocation2 + $0x241] sm:$0xff] %vm249_vm0, %v440_v57 }
 0x191   : > { %v948_v46 = vpop.permute.xlu1 %947  ;;  %1769 = vst.msk [vmem:[#allocation3 + $0xe0] sm:$0xf] %vm1117_vm3, %v1589_v6  ;;  %v8608_v13 = vor.u32 %v10227_v32, %v8607_v42  ;;  %v1595_v51 = vpop.permute.xlu2 %1594  ;;  %v8635_v44 = vld [vmem:[#allocation3 + $0xd0] sm:$0xf]  ;;  %v761_v6 = vld [vmem:[#allocation2 + $0x221] sm:$0xff]  ;;  %5370 = vmatpush.bf16.msra.mxu3 %v10448_v29 }
 0x192   : > { %1129 = vst.msk [vmem:[#allocation3 + $0xdc] sm:$0xf] %vm1117_vm3, %v948_v46  ;;  %v8636_v8 = vor.u32 %v10233_v59, %v8635_v44  ;;  %v10439_v32 = vld [vmem:[%s11140_s26 + $0x250] sm:$0xff]  ;;  %v10429_v42 = vld [vmem:[%s11140_s26 + $0x200] sm:$0xff]  ;;  %v11592_v54 = vpack.c.bf16 %v761_v6, %v761_v6  ;;  %v10238_v18 = vld [vmem:[#allocation3 + $0x108] sm:$0xf0] }
 0x193   : > { %4872 = vmatmul.bf16.vlgmr.msrb.gmra.mxu1 %v8608_v13  ;;  %1772 = vst.msk [vmem:[#allocation3 + $0x11c] sm:$0xf] %vm1117_vm3, %v1595_v51  ;;  %v1262_v13 = vpack.c.bf16 %v1198_v38, %v1198_v38  ;;  %v8435_v51 = vld [vmem:[#allocation3 + $0x60] sm:$0xf]  ;;  %5342 = vmatpush.bf16.msra.mxu2 %v10439_v32  ;;  %v10235_v59 = vld [vmem:[#allocation3 + $0xf4] sm:$0xf]  ;;  %v2100_v32 = vpack.c.bf16 %v2036_v27, %v2036_v27 }
 0x194   : > { %1325 = vst.msk [vmem:[#allocation3 + $0x130] sm:$0xf] %vm668_vm2, %v11530_v0  ;;  %4954 = vmatpush.bf16.msra.mxu0 %v10429_v42  ;;  %v558_v44 = vld [vmem:[#allocation2 + $0x160] sm:$0xff]  ;;  %v8436_v61 = vor.u32 %v10219_v19, %v8435_v51  ;;  %4986 = vmatpush.bf16.msra.mxu1 %v10434_v20  ;;  %v10224_v38 = vld [vmem:[#allocation3 + $0x98] sm:$0xf0]  ;;  %v2678_v42 = vld [vmem:[#allocation2 + $0x1d1] sm:$0xff] }
 0x195   : > { %5371 = vmatpush.bf16.msra.mxu3 %v10447_v49  ;;  %1326 = vst.msk [vmem:[#allocation3 + $0x144] sm:$0xf] %vm668_vm2, %v1262_v13  ;;  %v11608_v3 = vpack.c.bf16 %v558_v44, %v558_v44  ;;  %v10433_v29 = vld [vmem:[%s11140_s26 + $0x220] sm:$0xff]  ;;  %v2742_v19 = vpack.c.bf16 %v2678_v42, %v2678_v42 }
 0x196   : > { %2879 = vrot.lane.b32.xlu0 %v11362_v48, %s10673_s17  ;;  %2603 = vst.msk [vmem:[#allocation3 + $0xfc] sm:$0xf] %vm668_vm2, %v11556_v28  ;;  %v2037_v49 = vld [vmem:[#allocation2 + $0x1c2] sm:$0xff] }
 0x197   : > { %2242 = vrot.lane.b32.xlu1 %v2096_v31, %s10673_s17  ;;  %977 = vrot.lane.b32.xlu2 %v11536_v34, %s10673_s17  ;;  %v2034_v31 = vld [vmem:[#allocation2 + $0x192] sm:$0xff]  ;;  %687 = vst.msk [vmem:[#allocation3 + $0x168] sm:$0xf] %vm668_vm2, %v11608_v3  ;;  %v763_v4 = vld [vmem:[#allocation2 + $0x241] sm:$0xff] }
 0x198   : > { %v946_v7 = vpop.permute.xlu0 %945  ;;  %v8629_v48 = vld [vmem:[#allocation3 + $0xdc] sm:$0xf0]  ;;  %v2098_v10 = vpack.c.bf16 %v2034_v31, %v2034_v31  ;;  %4955 = vmatpush.bf16.msra.mxu0 %v10428_v36  ;;  %5343 = vmatpush.bf16.msra.mxu2 %v10438_v53  ;;  %2604 = vst.msk [vmem:[#allocation3 + $0x110] sm:$0xf] %vm668_vm2, %v11561_v15  ;;  %v1398_v15 = vld [vmem:[#allocation2 + $0x1f0] sm:$0xff]  ;;  %v2101_v36 = vpack.c.bf16 %v2037_v49, %v2037_v49 }
 0x199   : > { %v2231_v39 = vpop.permute.xlu1 %2230  ;;  %1128 = vst.msk [vmem:[#allocation3 + $0xc8] sm:$0xf] %vm1117_vm3, %v946_v7  ;;  %v8632_v56 = vor.u32 %v10230_v52, %v8629_v48  ;;  %v2237_v35 = vpop.permute.xlu2 %2236  ;;  %v10232_v30 = vld [vmem:[#allocation3 + $0xd8] sm:$0xf0]  ;;  %v762_v52 = vld [vmem:[#allocation2 + $0x231] sm:$0xff]  ;;  %5372 = vmatpush.bf16.msra.mxu3 %v10446_v55  ;;  %v10425_v31 = vld [vmem:[%s11140_s26 + $0x1e0] sm:$0xff]  ;;  %4987 = vmatpush.bf16.msra.mxu1 %v10433_v29  ;;  %v1462_v53 = vpack.c.bf16 %v1398_v15, %v1398_v15 }
 0x19a   : > { %2410 = vst.msk [vmem:[#allocation3 + $0xf8] sm:$0xf] %vm1117_vm3, %v2231_v39  ;;  %v11616_v39 = vpack.c.bf16 %v762_v52, %v762_v52  ;;  %v2677_v55 = vld [vmem:[#allocation2 + $0x1c1] sm:$0xff] }
 0x19b   : > { %8602 = vmatmul.msk.bf16.gmra.mxu0 %vm249_vm0, %v8416_v1  ;;  %4906 = vmatmul.bf16.gmra.mxu2 %v8632_v56  ;;  %2413 = vst.msk [vmem:[#allocation3 + $0x134] sm:$0xf] %vm1117_vm3, %v2237_v35  ;;  %v559_v35 = vld [vmem:[#allocation2 + $0x170] sm:$0xff]  ;;  %v2039_v20 = vld [vmem:[#allocation2 + $0x202] sm:$0xff] }
 0x19c   : > { %4935 = vmatmul.bf16.gmra.mxu3 %v8636_v8  ;;  %v10427_v8 = vld [vmem:[%s11140_s26 + $0x1f0] sm:$0xff]  ;;  %5344 = vmatpush.bf16.msra.mxu2 %v10437_v5  ;;  %1331 = vst.msk [vmem:[#allocation3 + $0x1a8] sm:$0xf] %vm668_vm2, %v2098_v10  ;;  %v11638_v26 = vpack.c.bf16 %v559_v35, %v559_v35  ;;  %v10229_v29 = vld [vmem:[#allocation3 + $0xc0] sm:$0xf0] }
 0x19d   : > { %5373 = vmatpush.bf16.msra.mxu3 %v10445_v12  ;;  %4956 = vmatpush.bf16.msra.mxu0 %v10427_v8  ;;  %1333 = vst.msk [vmem:[#allocation3 + $0x1d0] sm:$0xf] %vm668_vm2, %v2100_v32  ;;  %v562_v8 = vld [vmem:[#allocation2 + $0x1a0] sm:$0xff] }
 0x19e   : > { %979 = vrot.lane.b32.xlu0 %v11558_v63, %s10673_s17  ;;  %688 = vst.msk [vmem:[#allocation3 + $0x17c] sm:$0xf] %vm668_vm2, %v11638_v26  ;;  %v626_v35 = vpack.c.bf16 %v562_v8, %v562_v8 }
 0x19f   : > { %2885 = vrot.lane.b32.xlu1 %v11428_v60, %s10673_s17  ;;  %2244 = vrot.lane.b32.xlu2 %v11565_v21, %s10673_s17  ;;  %v621_v60 = vpack.c.bf16 %v557_v33, %v557_v33  ;;  %v11647_v21 = vpack.c.bf16 %v763_v4, %v763_v4  ;;  %v8455_v33 = vld [vmem:[#allocation3 + $0x88] sm:$0xf]  ;;  %1332 = vst.msk [vmem:[#allocation3 + $0x1bc] sm:$0xf] %vm668_vm2, %v11621_v43 }
 0x1a0   : > { %v1593_v40 = vpop.permute.xlu0 %1592  ;;  %v8627_v25 = vld [vmem:[#allocation3 + $0xc8] sm:$0xf]  ;;  %v8456_v6 = vor.u32 %v10224_v38, %v8455_v33  ;;  %3243 = vst.msk [vmem:[#allocation3 + $0x100] sm:$0xf] %vm668_vm2, %v11502_v14  ;;  %v2741_v14 = vpack.c.bf16 %v2677_v55, %v2677_v55  ;;  %v2103_v4 = vpack.c.bf16 %v2039_v20, %v2039_v20  ;;  %v10468_v33 = vld [vmem:[%s11140_s26 + $0x338] sm:$0xff]  ;;  %v1402_v38 = vld [vmem:[#allocation2 + $0x230] sm:$0xff] }
 0x1a1   : > { %v952_v41 = vpop.permute.xlu1 %951  ;;  %1771 = vst.msk [vmem:[#allocation3 + $0x108] sm:$0xf] %vm1117_vm3, %v1593_v40  ;;  %v8628_v46 = vor.u32 %v10232_v30, %v8627_v25  ;;  %v958_v47 = vpop.permute.xlu2 %957  ;;  %v8655_v24 = vld [vmem:[#allocation3 + $0xf8] sm:$0xf]  ;;  %4957 = vmatpush.bf16.msra.mxu0 %v10426_v9  ;;  %v10240_v25 = vld [vmem:[#allocation3 + $0x11c] sm:$0xf]  ;;  %5424 = vmatpush.bf16.msrb.mxu1 %v10468_v33 }
 0x1a2   : > { %1131 = vst.msk [vmem:[#allocation3 + $0x104] sm:$0xf] %vm1117_vm3, %v952_v41  ;;  %v8656_v62 = vor.u32 %v10238_v18, %v8655_v24  ;;  %v10243_v40 = vld [vmem:[#allocation3 + $0x130] sm:$0xf0]  ;;  %v560_v41 = vld [vmem:[#allocation2 + $0x180] sm:$0xff] }
 0x1a3   : > { %4877 = vmatmul.bf16.gmra.mxu1 %v8628_v46  ;;  %1134 = vst.msk [vmem:[#allocation3 + $0x140] sm:$0xf] %vm1117_vm3, %v958_v47  ;;  %v11662_v13 = vpack.c.bf16 %v560_v41, %v560_v41  ;;  %v561_v24 = vld [vmem:[#allocation2 + $0x190] sm:$0xff] }
 0x1a4   : > { %686 = vst.msk [vmem:[#allocation3 + $0x154] sm:$0xf] %vm668_vm2, %v621_v60  ;;  %v764_v60 = vld [vmem:[#allocation2 + $0x251] sm:$0xff]  ;;  %v625_v44 = vpack.c.bf16 %v561_v24, %v561_v24 }
 0x1a5   : > { %4958 = vmatpush.bf16.msra.mxu0 %v10425_v31  ;;  %689 = vst.msk [vmem:[#allocation3 + $0x190] sm:$0xf] %vm668_vm2, %v11662_v13  ;;  %v10471_v20 = vld [vmem:[%s11140_s26 + $0x350] sm:$0xff] }
 0x1a6   : > { %2883 = vrot.lane.b32.xlu0 %v11406_v11, %s10673_s17  ;;  %3244 = vst.msk [vmem:[#allocation3 + $0x114] sm:$0xf] %vm668_vm2, %v11530_v0  ;;  %v1400_v0 = vld [vmem:[#allocation2 + $0x210] sm:$0xff] }
 0x1a7   : > { %2246 = vrot.lane.b32.xlu1 %v2098_v10, %s10673_s17  ;;  %981 = vrot.lane.b32.xlu2 %v11592_v54, %s10673_s17  ;;  %v11666_v10 = vpack.c.bf16 %v764_v60, %v764_v60  ;;  %694 = vst.msk [vmem:[#allocation3 + $0x1f4] sm:$0xf] %vm668_vm2, %v1462_v53  ;;  %v11696_v12 = vpack.c.bf16 %v1400_v0, %v1400_v0  ;;  %v10479_v60 = vld [vmem:[%s11140_s26 + $0x390] sm:$0xff] }
 0x1a8   : > { %v950_v23 = vpop.permute.xlu0 %949  ;;  %v8649_v11 = vld [vmem:[#allocation3 + $0x104] sm:$0xf0]  ;;  %690 = vst.msk [vmem:[#allocation3 + $0x1a4] sm:$0xf] %vm668_vm2, %v625_v44 }
 0x1a9   : > { %v2235_v1 = vpop.permute.xlu1 %2234  ;;  %1130 = vst.msk [vmem:[#allocation3 + $0xf0] sm:$0xf] %vm1117_vm3, %v950_v23  ;;  %v8652_v7 = vor.u32 %v10235_v59, %v8649_v11  ;;  %v1601_v48 = vpop.permute.xlu2 %1600  ;;  %v10237_v56 = vld [vmem:[#allocation3 + $0x100] sm:$0xf0] }
 0x1aa   : > { %2412 = vst.msk [vmem:[#allocation3 + $0x120] sm:$0xf] %vm1117_vm3, %v2235_v1  ;;  %v1399_v1 = vld [vmem:[#allocation2 + $0x200] sm:$0xff] }
 0x1ab   : > { %8603 = vmatmul.msk.bf16.gmra.mxu0 %vm249_vm0, %v8436_v61  ;;  %4911 = vmatmul.bf16.gmra.mxu2 %v8652_v7  ;;  %1775 = vst.msk [vmem:[#allocation3 + $0x158] sm:$0xf] %vm1117_vm3, %v1601_v48  ;;  %v1463_v2 = vpack.c.bf16 %v1399_v1, %v1399_v1  ;;  %v8835_v48 = vld [vmem:[#allocation3 + $0x140] sm:$0xf] }
 0x1ac   : > { %4940 = vmatmul.bf16.gmra.mxu3 %v8656_v62  ;;  %2607 = vst.msk [vmem:[#allocation3 + $0x14c] sm:$0xf] %vm668_vm2, %v11608_v3 }
 0x1ad   : > { %695 = vst.msk [vmem:[#allocation3 + $0x208] sm:$0xf] %vm668_vm2, %v1463_v2 }
 0x1ae   : > { %983 = vrot.lane.b32.xlu0 %v11616_v39, %s10673_s17  ;;  %2608 = vst.msk [vmem:[#allocation3 + $0x160] sm:$0xf] %vm668_vm2, %v11638_v26 }
 0x1af   : > { %2889 = vrot.lane.b32.xlu1 %v11472_v45, %s10673_s17  ;;  %2248 = vrot.lane.b32.xlu2 %v11621_v43, %s10673_s17  ;;  %696 = vst.msk [vmem:[#allocation3 + $0x21c] sm:$0xf] %vm668_vm2, %v11696_v12 }
 0x1b0   : > { %v1597_v37 = vpop.permute.xlu0 %1596  ;;  %v8647_v50 = vld [vmem:[#allocation3 + $0xf0] sm:$0xf]  ;;  %691 = vst.msk [vmem:[#allocation3 + $0x1b8] sm:$0xf] %vm668_vm2, %v626_v35 }
 0x1b1   : > { %v956_v58 = vpop.permute.xlu1 %955  ;;  %1773 = vst.msk [vmem:[#allocation3 + $0x130] sm:$0xf] %vm1117_vm3, %v1597_v37  ;;  %v8648_v45 = vor.u32 %v10237_v56, %v8647_v50  ;;  %v962_v30 = vpop.permute.xlu2 %961  ;;  %v8675_v22 = vld [vmem:[#allocation3 + $0x120] sm:$0xf]  ;;  %v10472_v50 = vld [vmem:[%s11140_s26 + $0x358] sm:$0xff] }
 0x1b2   : > { %1133 = vst.msk [vmem:[#allocation3 + $0x12c] sm:$0xf] %vm1117_vm3, %v956_v58  ;;  %v8676_v47 = vor.u32 %v10243_v40, %v8675_v22  ;;  %v11684_v61 = vpop.f32.mrf.mxu0  ;;  %v8837_v7 = vld [vmem:[#allocation3 + $0x154] sm:$0xf0]  ;;  %v11709_v58 = vpop.f32.mrf.mxu3  ;;  %5457 = vmatpush.bf16.msrb.mxu2 %v10472_v50  ;;  %v11721_v22 = vpack.c.bf16 %v1402_v38, %v1402_v38  ;;  %v1839_v38 = vld [vmem:[#allocation2 + $0x161] sm:$0xff] }
 0x1b3   : > { %4882 = vmatmul.bf16.gmra.mxu1 %v8648_v45  ;;  %1136 = vst.msk [vmem:[#allocation3 + $0x168] sm:$0xf] %vm1117_vm3, %v962_v30  ;;  %v10480_v45 = vld [vmem:[%s11140_s26 + $0x398] sm:$0xff] }
 0x1b4   : > { %5810 = vmatpush.bf16.msrb.mxu3 %v10480_v45  ;;  %2609 = vst.msk [vmem:[#allocation3 + $0x174] sm:$0xf] %vm668_vm2, %v11662_v13  ;;  %v10476_v50 = vld [vmem:[%s11140_s26 + $0x378] sm:$0xff] }
 0x1b5   : > { %2610 = vst.msk [vmem:[#allocation3 + $0x188] sm:$0xf] %vm668_vm2, %v625_v44  ;;  %v2041_v44 = vld [vmem:[#allocation2 + $0x222] sm:$0xff] }
 0x1b6   : > { %2887 = vrot.lane.b32.xlu0 %v11455_v16, %s10673_s17  ;;  %698 = vst.msk [vmem:[#allocation3 + $0x244] sm:$0xf] %vm668_vm2, %v11721_v22  ;;  %5458 = vmatpush.bf16.msrb.mxu2 %v10471_v20 }
 0x1b7   : > { %2250 = vrot.lane.b32.xlu1 %v2100_v32, %s10673_s17  ;;  %985 = vrot.lane.b32.xlu2 %v11647_v21, %s10673_s17  ;;  %v10460_v32 = vld [vmem:[%s11140_s26 + $0x2f8] sm:$0xff]  ;;  %2611 = vst.msk [vmem:[#allocation3 + $0x19c] sm:$0xf] %vm668_vm2, %v626_v35 }
 0x1b8   : > { %v954_v17 = vpop.permute.xlu0 %953  ;;  %v8669_v46 = vld [vmem:[#allocation3 + $0x12c] sm:$0xf0]  ;;  %5395 = vmatpush.bf16.msrb.mxu0 %v10460_v32  ;;  %5811 = vmatpush.bf16.msrb.mxu3 %v10479_v60 }
 0x1b9   : > { %v1599_v16 = vpop.permute.xlu1 %1598  ;;  %1132 = vst.msk [vmem:[#allocation3 + $0x118] sm:$0xf] %vm1117_vm3, %v954_v17  ;;  %v8672_v28 = vor.u32 %v10240_v25, %v8669_v46  ;;  %v1605_v51 = vpop.permute.xlu2 %1604  ;;  %v10242_v18 = vld [vmem:[#allocation3 + $0x128] sm:$0xf0]  ;;  %v563_v25 = vld [vmem:[#allocation2 + $0x1b0] sm:$0xff] }
 0x1ba   : > { %1774 = vst.msk [vmem:[#allocation3 + $0x144] sm:$0xf] %vm1117_vm3, %v1599_v16  ;;  %v11714_v30 = vpop.f32.mrf.mxu0  ;;  %v11743_v15 = vpop.f32.mrf.mxu3 }
 0x1bb   : > { %8604 = vmatmul.msk.bf16.gmra.mxu0 %vm249_vm0, %v8456_v6  ;;  %4916 = vmatmul.bf16.gmra.mxu2 %v8672_v28  ;;  %1777 = vst.msk [vmem:[#allocation3 + $0x180] sm:$0xf] %vm1117_vm3, %v1605_v51  ;;  %v2038_v6 = vld [vmem:[#allocation2 + $0x1f2] sm:$0xff]  ;;  %v10478_v51 = vld [vmem:[%s11140_s26 + $0x388] sm:$0xff] }
 0x1bc   : > { %4945 = vmatmul.bf16.gmra.mxu3 %v8676_v47  ;;  %v2102_v49 = vpack.c.bf16 %v2038_v6, %v2038_v6  ;;  %v10459_v28 = vld [vmem:[%s11140_s26 + $0x2f0] sm:$0xff]  ;;  %v10457_v6 = vld [vmem:[%s11140_s26 + $0x2e0] sm:$0xff] }
 0x1bd   : > { %5396 = vmatpush.bf16.msrb.mxu0 %v10459_v28  ;;  %5812 = vmatpush.bf16.msrb.mxu3 %v10478_v51 }
 0x1be   : > { %987 = vrot.lane.b32.xlu0 %v11666_v10, %s10673_s17  ;;  %v11687_v11 = vpop.f32.mrf.mxu2 }
 0x1bf   : > { %2893 = vrot.lane.b32.xlu1 %v2742_v19, %s10673_s17  ;;  %2252 = vrot.lane.b32.xlu2 %v2101_v36, %s10673_s17  ;;  %v10467_v19 = vld [vmem:[%s11140_s26 + $0x330] sm:$0xff] }
 0x1c0   : > { %v960_v57 = vpop.permute.xlu0 %959  ;;  %v8667_v59 = vld [vmem:[#allocation3 + $0x118] sm:$0xf]  ;;  %v11699_v43 = vpop.f32.mrf.mxu1  ;;  %5425 = vmatpush.bf16.msrb.mxu1 %v10467_v19 }
 0x1c1   : > { %1135 = vst.msk [vmem:[#allocation3 + $0x154] sm:$0xf] %vm1117_vm3, %v960_v57  ;;  %v8668_v52 = vor.u32 %v10242_v18, %v8667_v59  ;;  %v2866_v23 = vpop.permute.xlu1 %2865  ;;  %v966_v62 = vpop.permute.xlu2 %965  ;;  %v10245_v5 = vld [vmem:[#allocation3 + $0x144] sm:$0xf]  ;;  %v8855_v59 = vld [vmem:[#allocation3 + $0x168] sm:$0xf] }
 0x1c2   : > { %3048 = vst.msk [vmem:[#allocation3 + $0xc0] sm:$0xf] %vm1117_vm3, %v2866_v23  ;;  %v8840_v56 = vor.u32 %v10245_v5, %v8837_v7  ;;  %v11745_v36 = vpop.f32.mrf.mxu0  ;;  %v1401_v18 = vld [vmem:[#allocation2 + $0x220] sm:$0xff]  ;;  %v442_v19 = vld [vmem:[%s11029_s22 + $0xf8] sm:$0xff] }
 0x1c3   : > { %4887 = vmatmul.bf16.gmra.mxu1 %v8668_v52  ;;  %1138 = vst.msk [vmem:[#allocation3 + $0x190] sm:$0xf] %vm1117_vm3, %v966_v62  ;;  %v8857_v24 = vld [vmem:[#allocation3 + $0x17c] sm:$0xf0]  ;;  %v1465_v55 = vpack.c.bf16 %v1401_v18, %v1401_v18  ;;  %v2478_v62 = vld [vmem:[#allocation2 + $0x130] sm:$0xff] }
 0x1c4   : > { %v2477_v52 = vld [vmem:[#allocation2 + $0x120] sm:$0xff]  ;;  %v2542_v35 = vpack.c.bf16 %v2478_v62, %v2478_v62  ;;  %507 = vst.msk [vmem:[#allocation2 + $0x261] sm:$0xff] %vm249_vm0, %v442_v19 }
 0x1c5   : > { %v564_v23 = vld [vmem:[#allocation2 + $0x1e0] sm:$0xff]  ;;  %697 = vst.msk [vmem:[#allocation3 + $0x230] sm:$0xf] %vm668_vm2, %v1465_v55  ;;  %v2541_v8 = vpack.c.bf16 %v2477_v52, %v2477_v52  ;;  %v10470_v52 = vld [vmem:[%s11140_s26 + $0x348] sm:$0xff] }
 0x1c6   : > { %2891 = vrot.lane.b32.xlu0 %v2741_v14, %s10673_s17  ;;  %v11716_v31 = vpop.f32.mrf.mxu2  ;;  %v10477_v14 = vld [vmem:[%s11140_s26 + $0x380] sm:$0xff]  ;;  %v628_v5 = vpack.c.bf16 %v564_v23, %v564_v23  ;;  %2606 = vst.msk [vmem:[#allocation3 + $0x138] sm:$0xf] %vm668_vm2, %v2542_v35  ;;  %v10474_v23 = vld [vmem:[%s11140_s26 + $0x368] sm:$0xff]  ;;  %5459 = vmatpush.bf16.msrb.mxu2 %v10470_v52 }
 0x1c7   : > { %1614 = vrot.lane.b32.xlu1 %v1462_v53, %s10673_s17  ;;  %2895 = vrot.lane.b32.xlu2 %v11536_v34, %s10673_s17  ;;  %v8623_v34 = vld [vmem:[#allocation3 + $0xb0] sm:$0xf]  ;;  %v3117_v7 = vld [vmem:[#allocation2 + $0x122] sm:$0xff]  ;;  %2605 = vst.msk [vmem:[#allocation3 + $0x124] sm:$0xf] %vm668_vm2, %v2541_v8 }
 0x1c8   : > { %v2864_v3 = vpop.permute.xlu0 %2863  ;;  %v10247_v9 = vld [vmem:[#allocation3 + $0x150] sm:$0xf0]  ;;  %v8624_v41 = vor.u32 %v10229_v29, %v8623_v34  ;;  %v11734_v46 = vpop.f32.mrf.mxu1  ;;  %5813 = vmatpush.bf16.msrb.mxu3 %v10477_v14  ;;  %v3181_v34 = vpack.c.bf16 %v3117_v7, %v3117_v7  ;;  %v10234_v29 = vld [vmem:[#allocation3 + $0xe8] sm:$0xf0]  ;;  %693 = vst.msk [vmem:[#allocation3 + $0x1e0] sm:$0xf] %vm668_vm2, %v628_v5 }
 0x1c9   : > { %3047 = vst.msk [vmem:[#allocation3 + $0xac] sm:$0xf] %vm1117_vm3, %v2864_v3  ;;  %v8836_v27 = vor.u32 %v10247_v9, %v8835_v48  ;;  %v1603_v37 = vpop.permute.xlu1 %1602  ;;  %v1609_v26 = vpop.permute.xlu2 %1608  ;;  %v8617_v40 = vld [vmem:[#allocation3 + $0xbc] sm:$0xf0]  ;;  %v3118_v3 = vld [vmem:[#allocation2 + $0x132] sm:$0xff]  ;;  %v2105_v9 = vpack.c.bf16 %v2041_v44, %v2041_v44 }
 0x1ca   : > { %1776 = vst.msk [vmem:[#allocation3 + $0x16c] sm:$0xf] %vm1117_vm3, %v1603_v37  ;;  %v10466_v37 = vld [vmem:[%s11140_s26 + $0x328] sm:$0xff]  ;;  %v3182_v45 = vpack.c.bf16 %v3118_v3, %v3118_v3  ;;  %v11771_v32 = vpop.f32.mrf.mxu0  ;;  %v8875_v5 = vld [vmem:[#allocation3 + $0x190] sm:$0xf]  ;;  %v10473_v35 = vld [vmem:[%s11140_s26 + $0x360] sm:$0xff] }
 0x1cb   : > { %5345 = vmatmul.bf16.vlgmr.msra.gmra.mxu2 %v8836_v27  ;;  %1779 = vst.msk [vmem:[#allocation3 + $0x1a8] sm:$0xf] %vm1117_vm3, %v1609_v26  ;;  %v10458_v27 = vld [vmem:[%s11140_s26 + $0x2e8] sm:$0xff]  ;;  %v8643_v26 = vld [vmem:[#allocation3 + $0xd8] sm:$0xf]  ;;  %5426 = vmatpush.bf16.msrb.mxu1 %v10466_v37  ;;  %v10453_v19 = vld [vmem:[%s11140_s26 + $0x2c0] sm:$0xff] }
 0x1cc   : > { %5374 = vmatmul.bf16.vlgmr.msra.gmra.mxu3 %v8840_v56  ;;  %5397 = vmatpush.bf16.msrb.mxu0 %v10458_v27  ;;  %3245 = vst.msk [vmem:[#allocation3 + $0x128] sm:$0xf] %vm668_vm2, %v3181_v34  ;;  %v2043_v7 = vld [vmem:[#allocation2 + $0x242] sm:$0xff]  ;;  %v1404_v34 = vld [vmem:[#allocation2 + $0x250] sm:$0xff] }
 0x1cd   : > { %5814 = vmatpush.bf16.msrb.mxu3 %v10476_v50  ;;  %3246 = vst.msk [vmem:[#allocation3 + $0x13c] sm:$0xf] %vm668_vm2, %v3182_v45  ;;  %v444_v27 = vld [vmem:[%s11029_s22 + $0x108] sm:$0xff]  ;;  %v2107_v50 = vpack.c.bf16 %v2043_v7, %v2043_v7 }
 0x1ce   : > { %2897 = vrot.lane.b32.xlu0 %v11558_v63, %s10673_s17  ;;  %v627_v63 = vpack.c.bf16 %v563_v25, %v563_v25  ;;  %v11749_v57 = vpop.f32.mrf.mxu2  ;;  %v2040_v25 = vld [vmem:[#allocation2 + $0x212] sm:$0xff]  ;;  %v10454_v45 = vld [vmem:[%s11140_s26 + $0x2c8] sm:$0xff]  ;;  %509 = vst.msk [vmem:[#allocation2 + $0x2a1] sm:$0xff] %vm249_vm0, %v444_v27 }
 0x1cf   : > { %2256 = vrot.lane.b32.xlu1 %v2103_v4, %s10673_s17  ;;  %1616 = vrot.lane.b32.xlu2 %v1463_v2, %s10673_s17  ;;  %v2104_v28 = vpack.c.bf16 %v2040_v25, %v2040_v25 }
 0x1d0   : > { %v964_v42 = vpop.permute.xlu0 %963  ;;  %v10226_v17 = vld [vmem:[#allocation3 + $0xac] sm:$0xf]  ;;  %692 = vst.msk [vmem:[#allocation3 + $0x1cc] sm:$0xf] %vm668_vm2, %v627_v63  ;;  %5398 = vmatpush.bf16.msrb.mxu0 %v10457_v6  ;;  %v445_v6 = vld [vmem:[%s11029_s22 + $0x110] sm:$0xff] }
 0x1d1   : > { %1137 = vst.msk [vmem:[#allocation3 + $0x17c] sm:$0xf] %vm1117_vm3, %v964_v42  ;;  %v8620_v47 = vor.u32 %v10226_v17, %v8617_v40  ;;  %v2870_v16 = vpop.permute.xlu1 %2869  ;;  %v970_v13 = vpop.permute.xlu2 %969  ;;  %v10250_v53 = vld [vmem:[#allocation3 + $0x16c] sm:$0xf]  ;;  %v8644_v40 = vor.u32 %v10234_v29, %v8643_v26  ;;  %v1903_v17 = vpack.c.bf16 %v1839_v38, %v1839_v38  ;;  %v8663_v38 = vld [vmem:[#allocation3 + $0x100] sm:$0xf] }
 0x1d2   : > { %3050 = vst.msk [vmem:[#allocation3 + $0xe8] sm:$0xf] %vm1117_vm3, %v2870_v16  ;;  %v8860_v2 = vor.u32 %v10250_v53, %v8857_v24  ;;  %v1838_v53 = vld [vmem:[#allocation2 + $0x151] sm:$0xff] }
 0x1d3   : > { %4959 = vmatmul.bf16.vlgmr.msra.gmra.mxu0 %v8620_v47  ;;  %8829 = vmatmul.msk.bf16.vlgmr.msra.gmra.mxu1 %vm249_vm0, %v8624_v41  ;;  %1140 = vst.msk [vmem:[#allocation3 + $0x1b8] sm:$0xf] %vm1117_vm3, %v970_v13  ;;  %v10465_v41 = vld [vmem:[%s11140_s26 + $0x320] sm:$0xff]  ;;  %v3120_v13 = vld [vmem:[#allocation2 + $0x172] sm:$0xff]  ;;  %v1902_v44 = vpack.c.bf16 %v1838_v53, %v1838_v53 }
 0x1d4   : > { %2612 = vst.msk [vmem:[#allocation3 + $0x1b0] sm:$0xf] %vm668_vm2, %v627_v63  ;;  %v10475_v63 = vld [vmem:[%s11140_s26 + $0x370] sm:$0xff]  ;;  %v3119_v47 = vld [vmem:[#allocation2 + $0x162] sm:$0xff]  ;;  %5427 = vmatpush.bf16.msrb.mxu1 %v10465_v41  ;;  %v10456_v24 = vld [vmem:[%s11140_s26 + $0x2d8] sm:$0xff]  ;;  %v3184_v14 = vpack.c.bf16 %v3120_v13, %v3120_v13  ;;  %v1468_v41 = vpack.c.bf16 %v1404_v34, %v1404_v34 }
 0x1d5   : > { %1967 = vst.msk [vmem:[#allocation3 + $0x15c] sm:$0xf] %vm668_vm2, %v1903_v17  ;;  %5815 = vmatpush.bf16.msrb.mxu3 %v10475_v63  ;;  %5399 = vmatpush.bf16.msrb.mxu0 %v10456_v24  ;;  %v2042_v17 = vld [vmem:[#allocation2 + $0x232] sm:$0xff]  ;;  %v3121_v53 = vld [vmem:[#allocation2 + $0x182] sm:$0xff] }
 0x1d6   : > { %2254 = vrot.lane.b32.xlu0 %v2102_v49, %s10673_s17  ;;  %v11767_v4 = vpop.f32.mrf.mxu3  ;;  %v11781_v60 = vpop.f32.mrf.mxu2  ;;  %1966 = vst.msk [vmem:[#allocation3 + $0x148] sm:$0xf] %vm668_vm2, %v1902_v44  ;;  %v3122_v44 = vld [vmem:[#allocation2 + $0x192] sm:$0xff]  ;;  %v2106_v52 = vpack.c.bf16 %v2042_v17, %v2042_v17  ;;  %v1405_v34 = vld [vmem:[#allocation2 + $0x260] sm:$0xff] }
 0x1d7   : > { %1618 = vrot.lane.b32.xlu1 %v11696_v12, %s10673_s17  ;;  %2899 = vrot.lane.b32.xlu2 %v11592_v54, %s10673_s17  ;;  %3248 = vst.msk [vmem:[#allocation3 + $0x164] sm:$0xf] %vm668_vm2, %v3184_v14 }
 0x1d8   : > { %v2868_v0 = vpop.permute.xlu0 %2867  ;;  %v10252_v1 = vld [vmem:[#allocation3 + $0x178] sm:$0xf0]  ;;  %v11759_v48 = vpop.f32.mrf.mxu1  ;;  %510 = vst.msk [vmem:[#allocation2 + $0x2b1] sm:$0xff] %vm249_vm0, %v445_v6  ;;  %v8683_v6 = vld [vmem:[#allocation3 + $0x128] sm:$0xf] }
 0x1d9   : > { %3049 = vst.msk [vmem:[#allocation3 + $0xd4] sm:$0xf] %vm1117_vm3, %v2868_v0  ;;  %v8856_v54 = vor.u32 %v10252_v1, %v8855_v59  ;;  %v1607_v12 = vpop.permute.xlu1 %1606  ;;  %v1613_v56 = vpop.permute.xlu2 %1612  ;;  %v8637_v33 = vld [vmem:[#allocation3 + $0xe4] sm:$0xf0]  ;;  %v3183_v59 = vpack.c.bf16 %v3119_v47, %v3119_v47  ;;  %5816 = vmatpush.bf16.msrb.mxu3 %v10474_v23 }
 0x1da   : > { %1778 = vst.msk [vmem:[#allocation3 + $0x194] sm:$0xf] %vm1117_vm3, %v1607_v12  ;;  %v8877_v0 = vld [vmem:[#allocation3 + $0x1a4] sm:$0xf0]  ;;  %v10463_v12 = vld [vmem:[%s11140_s26 + $0x310] sm:$0xff] }
 0x1db   : > { %5350 = vmatmul.bf16.gmra.mxu2 %v8856_v54  ;;  %1781 = vst.msk [vmem:[#allocation3 + $0x1d0] sm:$0xf] %vm1117_vm3, %v1613_v56  ;;  %v1403_v54 = vld [vmem:[#allocation2 + $0x240] sm:$0xff]  ;;  %v10455_v56 = vld [vmem:[%s11140_s26 + $0x2d0] sm:$0xff] }
 0x1dc   : > { %5379 = vmatmul.bf16.gmra.mxu3 %v8860_v2  ;;  %3247 = vst.msk [vmem:[#allocation3 + $0x150] sm:$0xf] %vm668_vm2, %v3183_v59  ;;  %5400 = vmatpush.bf16.msrb.mxu0 %v10455_v56  ;;  %v1467_v29 = vpack.c.bf16 %v1403_v54, %v1403_v54  ;;  %v2685_v47 = vld [vmem:[#allocation2 + $0x261] sm:$0xff]  ;;  %v1840_v59 = vld [vmem:[#allocation2 + $0x171] sm:$0xff] }
 0x1dd   : > { %5817 = vmatpush.bf16.msrb.mxu3 %v10473_v35  ;;  %700 = vst.msk [vmem:[#allocation3 + $0x26c] sm:$0xf] %vm668_vm2, %v1468_v41  ;;  %v1904_v14 = vpack.c.bf16 %v1840_v59, %v1840_v59  ;;  %v2686_v56 = vld [vmem:[#allocation2 + $0x271] sm:$0xff] }
 0x1de   : > { %2901 = vrot.lane.b32.xlu0 %v11616_v39, %s10673_s17  ;;  %v11798_v1 = vpop.f32.mrf.mxu3  ;;  %v11816_v37 = vpop.f32.mrf.mxu2  ;;  %699 = vst.msk [vmem:[#allocation3 + $0x258] sm:$0xf] %vm668_vm2, %v1467_v29 }
 0x1df   : > { %2260 = vrot.lane.b32.xlu1 %v2105_v9, %s10673_s17  ;;  %1620 = vrot.lane.b32.xlu2 %v1465_v55, %s10673_s17  ;;  %v10464_v55 = vld [vmem:[%s11140_s26 + $0x318] sm:$0xff]  ;;  %v10469_v9 = vld [vmem:[%s11140_s26 + $0x340] sm:$0xff]  ;;  %1968 = vst.msk [vmem:[#allocation3 + $0x170] sm:$0xf] %vm668_vm2, %v1904_v14 }
 0x1e0   : > { %v968_v39 = vpop.permute.xlu0 %967  ;;  %v10231_v42 = vld [vmem:[#allocation3 + $0xd4] sm:$0xf]  ;;  %v11788_v18 = vpop.f32.mrf.mxu1  ;;  %5428 = vmatpush.bf16.msrb.mxu1 %v10464_v55  ;;  %5460 = vmatpush.bf16.msrb.mxu2 %v10469_v9 }
 0x1e1   : > { %1139 = vst.msk [vmem:[#allocation3 + $0x1a4] sm:$0xf] %vm1117_vm3, %v968_v39  ;;  %v8640_v16 = vor.u32 %v10231_v42, %v8637_v33  ;;  %v2874_v49 = vpop.permute.xlu1 %2873  ;;  %v974_v51 = vpop.permute.xlu2 %973  ;;  %v10255_v62 = vld [vmem:[#allocation3 + $0x194] sm:$0xf]  ;;  %v10462_v33 = vld [vmem:[%s11140_s26 + $0x308] sm:$0xff]  ;;  %5401 = vmatpush.bf16.msrb.mxu0 %v10454_v45  ;;  %v2750_v45 = vpack.c.bf16 %v2686_v56, %v2686_v56 }
 0x1e2   : > { %3052 = vst.msk [vmem:[#allocation3 + $0x110] sm:$0xf] %vm1117_vm3, %v2874_v49  ;;  %v11800_v2 = vpop.f32.mrf.mxu0  ;;  %v8880_v3 = vor.u32 %v10255_v62, %v8877_v0  ;;  %v10461_v49 = vld [vmem:[%s11140_s26 + $0x300] sm:$0xff]  ;;  %v3185_v62 = vpack.c.bf16 %v3121_v53, %v3121_v53  ;;  %v2749_v0 = vpack.c.bf16 %v2685_v47, %v2685_v47  ;;  %v8897_v54 = vld [vmem:[#allocation3 + $0x1cc] sm:$0xf0] }
 0x1e3   : > { %4964 = vmatmul.bf16.gmra.mxu0 %v8640_v16  ;;  %8830 = vmatmul.msk.bf16.gmra.mxu1 %vm249_vm0, %v8644_v40  ;;  %1142 = vst.msk [vmem:[#allocation3 + $0x1e0] sm:$0xf] %vm1117_vm3, %v974_v51  ;;  %v10239_v40 = vld [vmem:[#allocation3 + $0x110] sm:$0xf0]  ;;  %v1841_v16 = vld [vmem:[#allocation2 + $0x181] sm:$0xff] }
 0x1e4   : > { %5429 = vmatpush.bf16.msrb.mxu1 %v10463_v12  ;;  %v8664_v63 = vor.u32 %v10239_v40, %v8663_v38  ;;  %v1905_v51 = vpack.c.bf16 %v1841_v16, %v1841_v16  ;;  %3249 = vst.msk [vmem:[#allocation3 + $0x178] sm:$0xf] %vm668_vm2, %v3185_v62  ;;  %v1469_v40 = vpack.c.bf16 %v1405_v34, %v1405_v34  ;;  %v2044_v47 = vld [vmem:[#allocation2 + $0x252] sm:$0xff] }
 0x1e5   : > { %5402 = vmatpush.bf16.msrb.mxu0 %v10453_v19  ;;  %v1842_v62 = vld [vmem:[#allocation2 + $0x191] sm:$0xff] }
 0x1e6   : > { %2258 = vrot.lane.b32.xlu0 %v2104_v28, %s10673_s17  ;;  %v11843_v7 = vpop.f32.mrf.mxu2  ;;  %1969 = vst.msk [vmem:[#allocation3 + $0x184] sm:$0xf] %vm668_vm2, %v1905_v51  ;;  %v4430_v51 = vadd.f32 %v11699_v43, %v11684_v61  ;;  %v1906_v43 = vpack.c.bf16 %v1842_v62, %v1842_v62  ;;  %v8851_v56 = vld [vmem:[#allocation3 + $0x150] sm:$0xf] }
 0x1e7   : > { %1622 = vrot.lane.b32.xlu1 %v11721_v22, %s10673_s17  ;;  %2903 = vrot.lane.b32.xlu2 %v11647_v21, %s10673_s17 }
 0x1e8   : > { %v2872_v8 = vpop.permute.xlu0 %2871  ;;  %v10257_v20 = vld [vmem:[#allocation3 + $0x1a0] sm:$0xf0]  ;;  %v11823_v25 = vpop.f32.mrf.mxu1  ;;  %5430 = vmatpush.bf16.msrb.mxu1 %v10462_v33  ;;  %1970 = vst.msk [vmem:[#allocation3 + $0x198] sm:$0xf] %vm668_vm2, %v1906_v43 }
 0x1e9   : > { %3051 = vst.msk [vmem:[#allocation3 + $0xfc] sm:$0xf] %vm1117_vm3, %v2872_v8  ;;  %v8876_v21 = vor.u32 %v10257_v20, %v8875_v5  ;;  %v1611_v22 = vpop.permute.xlu1 %1610  ;;  %v2241_v26 = vpop.permute.xlu2 %2240  ;;  %v8657_v42 = vld [vmem:[#allocation3 + $0x10c] sm:$0xf0]  ;;  %v3186_v5 = vpack.c.bf16 %v3122_v44, %v3122_v44  ;;  %v443_v8 = vld [vmem:[%s11029_s22 + $0x100] sm:$0xff] }
 0x1ea   : > { %1780 = vst.msk [vmem:[#allocation3 + $0x1bc] sm:$0xf] %vm1117_vm3, %v1611_v22  ;;  %v11836_v13 = vpop.f32.mrf.mxu0  ;;  %v3124_v44 = vld [vmem:[#allocation2 + $0x1b2] sm:$0xff]  ;;  %v9063_v34 = vld [vmem:[#allocation3 + $0x1e0] sm:$0xf] }
 0x1eb   : > { %5355 = vmatmul.bf16.gmra.mxu2 %v8876_v21  ;;  %2415 = vst.msk [vmem:[#allocation3 + $0x15c] sm:$0xf] %vm1117_vm3, %v2241_v26  ;;  %v2045_v21 = vld [vmem:[#allocation2 + $0x262] sm:$0xff] }
 0x1ec   : > { %5384 = vmatmul.bf16.gmra.mxu3 %v8880_v3  ;;  %5431 = vmatpush.bf16.msrb.mxu1 %v10461_v49  ;;  %v8895_v3 = vld [vmem:[#allocation3 + $0x1b8] sm:$0xf]  ;;  %3250 = vst.msk [vmem:[#allocation3 + $0x18c] sm:$0xf] %vm668_vm2, %v3186_v5  ;;  %v2109_v33 = vpack.c.bf16 %v2045_v21, %v2045_v21  ;;  %v765_v49 = vld [vmem:[#allocation2 + $0x281] sm:$0xff] }
 0x1ed   : > { %508 = vst.msk [vmem:[#allocation2 + $0x291] sm:$0xff] %vm249_vm0, %v443_v8  ;;  %v829_v5 = vpack.c.bf16 %v765_v49, %v765_v49  ;;  %v3188_v8 = vpack.c.bf16 %v3124_v44, %v3124_v44  ;;  %v10249_v21 = vld [vmem:[#allocation3 + $0x160] sm:$0xf0]  ;;  %v448_v44 = vld [vmem:[%s11029_s22 + $0x128] sm:$0xff] }
 0x1ee   : > { %2905 = vrot.lane.b32.xlu0 %v11666_v10, %s10673_s17  ;;  %v11829_v39 = vpop.f32.mrf.mxu3  ;;  %513 = vst.msk [vmem:[#allocation2 + $0x2e1] sm:$0xff] %vm249_vm0, %v448_v44 }
 0x1ef   : > { %2264 = vrot.lane.b32.xlu1 %v2107_v50, %s10673_s17  ;;  %1624 = vrot.lane.b32.xlu2 %v1467_v29, %s10673_s17  ;;  %3252 = vst.msk [vmem:[#allocation3 + $0x1b4] sm:$0xf] %vm668_vm2, %v3188_v8 }
 0x1f0   : > { %v972_v10 = vpop.permute.xlu0 %971  ;;  %v10236_v28 = vld [vmem:[#allocation3 + $0xfc] sm:$0xf]  ;;  %v11853_v9 = vpop.f32.mrf.mxu1 }
 0x1f1   : > { %1141 = vst.msk [vmem:[#allocation3 + $0x1cc] sm:$0xf] %vm1117_vm3, %v972_v10  ;;  %v8660_v24 = vor.u32 %v10236_v28, %v8657_v42  ;;  %v2878_v55 = vpop.permute.xlu1 %2877  ;;  %v978_v23 = vpop.permute.xlu2 %977  ;;  %v10260_v12 = vld [vmem:[#allocation3 + $0x1bc] sm:$0xf]  ;;  %v1843_v10 = vld [vmem:[#allocation2 + $0x1a1] sm:$0xff] }
 0x1f2   : > { %3054 = vst.msk [vmem:[#allocation3 + $0x138] sm:$0xf] %vm1117_vm3, %v2878_v55  ;;  %v8900_v50 = vor.u32 %v10260_v12, %v8897_v54  ;;  %v10244_v42 = vld [vmem:[#allocation3 + $0x138] sm:$0xf0]  ;;  %v3123_v28 = vld [vmem:[#allocation2 + $0x1a2] sm:$0xff]  ;;  %v1907_v59 = vpack.c.bf16 %v1843_v10, %v1843_v10 }
 0x1f3   : > { %4969 = vmatmul.bf16.gmra.mxu0 %v8660_v24  ;;  %8831 = vmatmul.msk.bf16.gmra.mxu1 %vm249_vm0, %v8664_v63  ;;  %1144 = vst.msk [vmem:[#allocation3 + $0x208] sm:$0xf] %vm1117_vm3, %v978_v23  ;;  %v8684_v16 = vor.u32 %v10244_v42, %v8683_v6  ;;  %v3187_v54 = vpack.c.bf16 %v3123_v28, %v3123_v28  ;;  %v10504_v28 = vld [vmem:[%s11140_s26 + $0x458] sm:$0xff] }
 0x1f4   : > { %v2046_v55 = vld [vmem:[#allocation2 + $0x292] sm:$0xff]  ;;  %1971 = vst.msk [vmem:[#allocation3 + $0x1ac] sm:$0xf] %vm668_vm2, %v1907_v59  ;;  %5897 = vmatpush.bf16.msra.mxu2 %v10504_v28 }
 0x1f5   : > { %v2110_v12 = vpack.c.bf16 %v2046_v55, %v2046_v55  ;;  %3251 = vst.msk [vmem:[#allocation3 + $0x1a0] sm:$0xf] %vm668_vm2, %v3187_v54  ;;  %v766_v42 = vld [vmem:[#allocation2 + $0x291] sm:$0xff]  ;;  %v10248_v55 = vld [vmem:[#allocation3 + $0x158] sm:$0xf0] }
 0x1f6   : > { %2262 = vrot.lane.b32.xlu0 %v2106_v52, %s10673_s17  ;;  %v11849_v20 = vpop.f32.mrf.mxu3  ;;  %v830_v10 = vpack.c.bf16 %v766_v42, %v766_v42  ;;  %v446_v59 = vld [vmem:[%s11029_s22 + $0x118] sm:$0xff]  ;;  %v3125_v42 = vld [vmem:[#allocation2 + $0x1c2] sm:$0xff] }
 0x1f7   : > { %1626 = vrot.lane.b32.xlu1 %v1468_v41, %s10673_s17  ;;  %2907 = vrot.lane.b32.xlu2 %v2749_v0, %s10673_s17  ;;  %v11863_v41 = vpop.f32.mrf.mxu2  ;;  %v2108_v0 = vpack.c.bf16 %v2044_v47, %v2044_v47  ;;  %511 = vst.msk [vmem:[#allocation2 + $0x2c1] sm:$0xff] %vm249_vm0, %v446_v59 }
 0x1f8   : > { %v2876_v22 = vpop.permute.xlu0 %2875  ;;  %v11857_v35 = vpop.f32.mrf.mxu0  ;;  %v10262_v27 = vld [vmem:[#allocation3 + $0x1c8] sm:$0xf0] }
 0x1f9   : > { %3053 = vst.msk [vmem:[#allocation3 + $0x124] sm:$0xf] %vm1117_vm3, %v2876_v22  ;;  %v8896_v26 = vor.u32 %v10262_v27, %v8895_v3  ;;  %v2239_v29 = vpop.permute.xlu1 %2238  ;;  %v2245_v38 = vpop.permute.xlu2 %2244  ;;  %v8677_v63 = vld [vmem:[#allocation3 + $0x134] sm:$0xf0]  ;;  %v4459_v3 = vadd.f32 %v11687_v11, %v4430_v51  ;;  %v447_v22 = vld [vmem:[%s11029_s22 + $0x120] sm:$0xff]  ;;  %v8852_v11 = vor.u32 %v10249_v21, %v8851_v56  ;;  %v1406_v56 = vld [vmem:[#allocation2 + $0x290] sm:$0xff] }
 0x1fa   : > { %2414 = vst.msk [vmem:[#allocation3 + $0x148] sm:$0xf] %vm1117_vm3, %v2239_v29  ;;  %v2688_v29 = vld [vmem:[#allocation2 + $0x2b1] sm:$0xff]  ;;  %v1845_v21 = vld [vmem:[#allocation2 + $0x1c1] sm:$0xff] }
 0x1fb   : > { %5360 = vmatmul.bf16.gmra.mxu2 %v8896_v26  ;;  %2417 = vst.msk [vmem:[#allocation3 + $0x184] sm:$0xf] %vm1117_vm3, %v2245_v38  ;;  %v2047_v26 = vld [vmem:[#allocation2 + $0x2a2] sm:$0xff] }
 0x1fc   : > { %5389 = vmatmul.bf16.gmra.mxu3 %v8900_v50  ;;  %512 = vst.msk [vmem:[#allocation2 + $0x2d1] sm:$0xff] %vm249_vm0, %v447_v22  ;;  %v9083_v44 = vld [vmem:[#allocation3 + $0x208] sm:$0xf] }
 0x1fe   : > { %2909 = vrot.lane.b32.xlu0 %v2750_v45, %s10673_s17  ;;  %v11866_v17 = vpop.f32.mrf.mxu3  ;;  %v4432_v45 = vadd.f32 %v11734_v46, %v11714_v30 }
 0x1ff   : > { %2268 = vrot.lane.b32.xlu1 %v2109_v33, %s10673_s17  ;;  %1628 = vrot.lane.b32.xlu2 %v1469_v40, %s10673_s17  ;;  %v11884_v27 = vpop.f32.mrf.mxu2  ;;  %v4488_v40 = vadd.f32 %v11709_v58, %v4459_v3  ;;  %v2111_v58 = vpack.c.bf16 %v2047_v26, %v2047_v26 }
 0x200   : > { %v976_v19 = vpop.permute.xlu0 %975  ;;  %v11872_v53 = vpop.f32.mrf.mxu1  ;;  %v10241_v24 = vld [vmem:[#allocation3 + $0x124] sm:$0xf]  ;;  %v4461_v51 = vadd.f32 %v11716_v31, %v4432_v45  ;;  %v1844_v45 = vld [vmem:[#allocation2 + $0x1b1] sm:$0xff] }
 0x201   : > { %1143 = vst.msk [vmem:[#allocation3 + $0x1f4] sm:$0xf] %vm1117_vm3, %v976_v19  ;;  %v11875_v52 = vpop.f32.mrf.mxu0  ;;  %v8680_v23 = vor.u32 %v10241_v24, %v8677_v63  ;;  %v2882_v14 = vpop.permute.xlu1 %2881  ;;  %v4435_v19 = vadd.f32 %v11759_v48, %v11745_v36  ;;  %v8843_v24 = vld [vmem:[#allocation3 + $0x148] sm:$0xf]  ;;  %v2048_v48 = vld [vmem:[#allocation2 + $0x2b2] sm:$0xff] }
 0x202   : > { %3056 = vst.msk [vmem:[#allocation3 + $0x160] sm:$0xf] %vm1117_vm3, %v2882_v14  ;;  %v982_v61 = vpop.permute.xlu2 %981  ;;  %v2687_v36 = vld [vmem:[#allocation2 + $0x2a1] sm:$0xff]  ;;  %v8844_v62 = vor.u32 %v10248_v55, %v8843_v24  ;;  %v4490_v8 = vadd.f32 %v11743_v15, %v4461_v51 }
 0x203   : > { %4974 = vmatmul.bf16.gmra.mxu0 %v8680_v23  ;;  %8832 = vmatmul.msk.bf16.gmra.mxu1 %vm249_vm0, %v8684_v16  ;;  %1146 = vst.msk [vmem:[#allocation3 + $0x230] sm:$0xf] %vm1117_vm3, %v982_v61  ;;  %v11910_v16 = vpack.c.bf16 %v2688_v29, %v2688_v29  ;;  %v10496_v61 = vld [vmem:[%s11140_s26 + $0x418] sm:$0xff]  ;;  %v11937_v43 = vadd.f32 %v11749_v57, %v4435_v19  ;;  %v10503_v57 = vld [vmem:[%s11140_s26 + $0x450] sm:$0xff]  ;;  %v10254_v19 = vld [vmem:[#allocation3 + $0x188] sm:$0xf0] }
 0x204   : > { %v2112_v29 = vpack.c.bf16 %v2048_v48, %v2048_v48  ;;  %5868 = vmatpush.bf16.msra.mxu1 %v10496_v61  ;;  %5898 = vmatpush.bf16.msra.mxu2 %v10503_v57  ;;  %v10502_v24 = vld [vmem:[%s11140_s26 + $0x448] sm:$0xff]  ;;  %v10501_v57 = vld [vmem:[%s11140_s26 + $0x440] sm:$0xff] }
 0x206   : > { %2266 = vrot.lane.b32.xlu0 %v2108_v0, %s10673_s17  ;;  %v11887_v50 = vpop.f32.mrf.mxu3  ;;  %v10488_v0 = vld [vmem:[%s11140_s26 + $0x3d8] sm:$0xff] }
 0x207   : > { %989 = vrot.lane.b32.xlu1 %v829_v5, %s10673_s17  ;;  %2270 = vrot.lane.b32.xlu2 %v2110_v12, %s10673_s17  ;;  %v10508_v5 = vld [vmem:[%s11140_s26 + $0x478] sm:$0xff] }
 0x208   : > { %v2880_v33 = vpop.permute.xlu0 %2879  ;;  %v11895_v38 = vpop.f32.mrf.mxu1  ;;  %v10267_v6 = vld [vmem:[#allocation3 + $0x1f0] sm:$0xf0]  ;;  %5839 = vmatpush.bf16.msra.mxu0 %v10488_v0  ;;  %5930 = vmatpush.bf16.msra.mxu3 %v10508_v5  ;;  %v2485_v0 = vld [vmem:[#allocation2 + $0x1c0] sm:$0xff] }
 0x209   : > { %3055 = vst.msk [vmem:[#allocation3 + $0x14c] sm:$0xf] %vm1117_vm3, %v2880_v33  ;;  %v4516_v30 = vpop.f32.mrf.mxu0  ;;  %v9064_v46 = vor.u32 %v10267_v6, %v9063_v34  ;;  %v2243_v63 = vpop.permute.xlu1 %2242  ;;  %v8845_v23 = vld [vmem:[#allocation3 + $0x15c] sm:$0xf0]  ;;  %v1909_v6 = vpack.c.bf16 %v1845_v21, %v1845_v21  ;;  %v4437_v21 = vadd.f32 %v11788_v18, %v11771_v32  ;;  %5899 = vmatpush.bf16.msra.mxu2 %v10502_v24 }
 0x20a   : > { %v11907_v47 = vadd.f32 %v4516_v30, %v4488_v40  ;;  %2416 = vst.msk [vmem:[#allocation3 + $0x170] sm:$0xf] %vm1117_vm3, %v2243_v63  ;;  %v2249_v49 = vpop.permute.xlu2 %2248  ;;  %v3126_v30 = vld [vmem:[#allocation2 + $0x1d2] sm:$0xff]  ;;  %v1470_v63 = vpack.c.bf16 %v1406_v56, %v1406_v56  ;;  %v2487_v56 = vld [vmem:[#allocation2 + $0x200] sm:$0xff] }
 0x20b   : > { %9057 = vmatmul.msk.bf16.vlgmr.msrb.gmra.mxu2 %vm249_vm0, %v8852_v11  ;;  %2419 = vst.msk [vmem:[#allocation3 + $0x1ac] sm:$0xf] %vm1117_vm3, %v2249_v49  ;;  %v11943_v11 = vpack.c.bf16 %v2687_v36, %v2687_v36  ;;  %v3189_v49 = vpack.c.bf16 %v3125_v42, %v3125_v42  ;;  %v3190_v55 = vpack.c.bf16 %v3126_v30, %v3126_v30  ;;  %v10253_v42 = vld [vmem:[#allocation3 + $0x180] sm:$0xf0] }
 0x20c   : > { %7847 = vst.msk [vmem:[%s11905_s29] sm:$0xff] %vm249_vm0, %v11907_v47  ;;  %5818 = vmatmul.bf16.vlgmr.msrb.gmra.mxu3 %v9064_v46  ;;  %v8046_v33 = vmul.f32 %v11907_v47, %v11907_v47  ;;  %v8871_v46 = vld [vmem:[#allocation3 + $0x178] sm:$0xf]  ;;  %v2551_v32 = vpack.c.bf16 %v2487_v56, %v2487_v56 }
 0x20d   : > { %1973 = vst.msk [vmem:[#allocation3 + $0x1d4] sm:$0xf] %vm668_vm2, %v1909_v6  ;;  %5900 = vmatpush.bf16.msra.mxu2 %v10501_v57 }
 0x20e   : > { %2272 = vrot.lane.b32.xlu0 %v2111_v58, %s10673_s17  ;;  %v11925_v31 = vpop.f32.mrf.mxu2  ;;  %v1908_v58 = vpack.c.bf16 %v1844_v45, %v1844_v45  ;;  %v8110_v36 = vsel %vm249_vm0, %v8046_v33, 0.0  ;;  %3253 = vst.msk [vmem:[#allocation3 + $0x1c8] sm:$0xf] %vm668_vm2, %v3189_v49  ;;  %v2486_v45 = vld [vmem:[#allocation2 + $0x1d0] sm:$0xff]  ;;  %v4466_v49 = vadd.f32 %v11781_v60, %v4437_v21 }
 0x20f   : > { %2913 = vrot.lane.b32.xlu1 %v11910_v16, %s10673_s17  ;;  %v11930_v14 = vpop.f32.mrf.mxu3  ;;  %991 = vrot.lane.b32.xlu2 %v830_v10, %s10673_s17  ;;  %v7911_v10 = vsel %vm249_vm0, %v11907_v47, 0.0  ;;  %3254 = vst.msk [vmem:[#allocation3 + $0x1dc] sm:$0xf] %vm668_vm2, %v3190_v55  ;;  %v11990_v55 = vld [vmem:[#allocation2 + $0x2b0] sm:$0xff] }
 0x210   : > { %v980_v54 = vpop.permute.xlu0 %979  ;;  %v11939_v12 = vpop.f32.mrf.mxu1  ;;  %v10246_v3 = vld [vmem:[#allocation3 + $0x14c] sm:$0xf]  ;;  %1972 = vst.msk [vmem:[#allocation3 + $0x1c0] sm:$0xf] %vm668_vm2, %v1908_v58 }
 0x211   : > { %1145 = vst.msk [vmem:[#allocation3 + $0x21c] sm:$0xf] %vm1117_vm3, %v980_v54  ;;  %v4518_v22 = vpop.f32.mrf.mxu0  ;;  %v8848_v34 = vor.u32 %v10246_v3, %v8845_v23  ;;  %v2886_v26 = vpop.permute.xlu1 %2885  ;;  %v1407_v23 = vld [vmem:[#allocation2 + $0x2a0] sm:$0xff]  ;;  %v8872_v54 = vor.u32 %v10254_v19, %v8871_v46  ;;  %v10495_v3 = vld [vmem:[%s11140_s26 + $0x410] sm:$0xff]  ;;  %v2550_v46 = vpack.c.bf16 %v2486_v45, %v2486_v45  ;;  %v10494_v58 = vld [vmem:[%s11140_s26 + $0x408] sm:$0xff] }
 0x212   : > { %v4519_v15 = vadd.f32 %v4518_v22, %v4490_v8  ;;  %3058 = vst.msk [vmem:[#allocation3 + $0x188] sm:$0xf] %vm1117_vm3, %v2886_v26  ;;  %v986_v40 = vpop.permute.xlu2 %985  ;;  %v10487_v8 = vld [vmem:[%s11140_s26 + $0x3d0] sm:$0xff]  ;;  %v4493_v26 = vadd.f32 %v11767_v4, %v11937_v43  ;;  %5869 = vmatpush.bf16.msra.mxu1 %v10495_v3  ;;  %v1471_v6 = vpack.c.bf16 %v1407_v23, %v1407_v23  ;;  %v10500_v19 = vld [vmem:[%s11140_s26 + $0x438] sm:$0xff] }
 0x213   : > { %5403 = vmatmul.bf16.vlgmr.msrb.gmra.mxu0 %v8844_v62  ;;  %5432 = vmatmul.bf16.vlgmr.msrb.gmra.mxu1 %v8848_v34  ;;  %1148 = vst.msk [vmem:[#allocation3 + $0x258] sm:$0xf] %vm1117_vm3, %v986_v40  ;;  %v2049_v62 = vld [vmem:[#allocation2 + $0x2c2] sm:$0xff]  ;;  %v2549_v43 = vpack.c.bf16 %v2485_v0, %v2485_v0  ;;  %v10507_v0 = vld [vmem:[%s11140_s26 + $0x470] sm:$0xff] }
 0x214   : > { %7848 = vst.msk [vmem:[%s11905_s29 + $0x8] sm:$0xff] %vm249_vm0, %v4519_v15  ;;  %v7912_v28 = vsel %vm249_vm0, %v4519_v15, 0.0  ;;  %v8047_v51 = vmul.f32 %v4519_v15, %v4519_v15  ;;  %5840 = vmatpush.bf16.msra.mxu0 %v10487_v8  ;;  %v2113_v30 = vpack.c.bf16 %v2049_v62, %v2049_v62  ;;  %v2488_v8 = vld [vmem:[#allocation2 + $0x210] sm:$0xff]  ;;  %5901 = vmatpush.bf16.msra.mxu2 %v10500_v19 }
 0x215   : > { %v7913_v59 = vadd.f32 %v7912_v28, %v7911_v10  ;;  %2615 = vst.msk [vmem:[#allocation3 + $0x1ec] sm:$0xf] %vm668_vm2, %v2551_v32  ;;  %5931 = vmatpush.bf16.msra.mxu3 %v10507_v0  ;;  %v1846_v0 = vld [vmem:[#allocation2 + $0x1f1] sm:$0xff] }
 0x216   : > { %v8111_v47 = vsel %vm249_vm0, %v8047_v51, 0.0  ;;  %2911 = vrot.lane.b32.xlu0 %v11943_v11, %s10673_s17  ;;  %v11961_v48 = vpop.f32.mrf.mxu2  ;;  %v8863_v51 = vld [vmem:[#allocation3 + $0x170] sm:$0xf]  ;;  %5870 = vmatpush.bf16.msra.mxu1 %v10494_v58  ;;  %2613 = vst.msk [vmem:[#allocation3 + $0x1c4] sm:$0xf] %vm668_vm2, %v2549_v43  ;;  %v10492_v43 = vld [vmem:[%s11140_s26 + $0x3f8] sm:$0xff] }
 0x217   : > { %2274 = vrot.lane.b32.xlu1 %v2112_v29, %s10673_s17  ;;  %v8112_v5 = vadd.f32 %v8111_v47, %v8110_v36  ;;  %v11965_v61 = vpop.f32.mrf.mxu3  ;;  %1630 = vrot.lane.b32.xlu2 %v1470_v63, %s10673_s17  ;;  %v10486_v63 = vld [vmem:[%s11140_s26 + $0x3c8] sm:$0xff]  ;;  %v8864_v62 = vor.u32 %v10253_v42, %v8863_v51  ;;  %2614 = vst.msk [vmem:[#allocation3 + $0x1d8] sm:$0xf] %vm668_vm2, %v2550_v46  ;;  %v10259_v46 = vld [vmem:[#allocation3 + $0x1b0] sm:$0xf0] }
 0x218   : > { %v2884_v22 = vpop.permute.xlu0 %2883  ;;  %v11973_v34 = vpop.f32.mrf.mxu1  ;;  %v10272_v29 = vld [vmem:[#allocation3 + $0x218] sm:$0xf0]  ;;  %5841 = vmatpush.bf16.msra.mxu0 %v10486_v63  ;;  %v10498_v58 = vld [vmem:[%s11140_s26 + $0x428] sm:$0xff] }
 0x219   : > { %3057 = vst.msk [vmem:[#allocation3 + $0x174] sm:$0xf] %vm1117_vm3, %v2884_v22  ;;  %v4521_v33 = vpop.f32.mrf.mxu0  ;;  %v9084_v15 = vor.u32 %v10272_v29, %v9083_v44  ;;  %v2247_v40 = vpop.permute.xlu1 %2246  ;;  %v8865_v23 = vld [vmem:[#allocation3 + $0x184] sm:$0xf0]  ;;  %v10493_v22 = vld [vmem:[%s11140_s26 + $0x400] sm:$0xff]  ;;  %v10484_v63 = vld [vmem:[%s11140_s26 + $0x3b8] sm:$0xff] }
 0x21a   : > { %v4522_v18 = vadd.f32 %v4521_v33, %v4493_v26  ;;  %2418 = vst.msk [vmem:[#allocation3 + $0x198] sm:$0xf] %vm1117_vm3, %v2247_v40  ;;  %v2253_v4 = vpop.permute.xlu2 %2252  ;;  %v4440_v26 = vadd.f32 %v11823_v25, %v11800_v2  ;;  %v10485_v40 = vld [vmem:[%s11140_s26 + $0x3c0] sm:$0xff]  ;;  %v2552_v2 = vpack.c.bf16 %v2488_v8, %v2488_v8  ;;  %5871 = vmatpush.bf16.msra.mxu1 %v10493_v22 }
 0x21b   : > { %9058 = vmatmul.msk.bf16.gmra.mxu2 %vm249_vm0, %v8872_v54  ;;  %2421 = vst.msk [vmem:[#allocation3 + $0x1d4] sm:$0xf] %vm1117_vm3, %v2253_v4  ;;  %v1207_v54 = vld [vmem:[#allocation2 + $0x1f2] sm:$0xff]  ;;  %v8891_v25 = vld [vmem:[#allocation3 + $0x1a0] sm:$0xf] }
 0x21c   : > { %7849 = vst.msk [vmem:[%s11905_s29 + $0x10] sm:$0xff] %vm249_vm0, %v4522_v18  ;;  %v7914_v10 = vsel %vm249_vm0, %v4522_v18, 0.0  ;;  %v8048_v28 = vmul.f32 %v4522_v18, %v4522_v18  ;;  %5823 = vmatmul.bf16.gmra.mxu3 %v9084_v15  ;;  %v1271_v33 = vpack.c.bf16 %v1207_v54, %v1207_v54  ;;  %v1206_v15 = vld [vmem:[#allocation2 + $0x1e2] sm:$0xff]  ;;  %5842 = vmatpush.bf16.msra.mxu0 %v10485_v40  ;;  %v10491_v54 = vld [vmem:[%s11140_s26 + $0x3f0] sm:$0xff] }
 0x21d   : > { %v7915_v24 = vadd.f32 %v7914_v10, %v7913_v59  ;;  %v2689_v59 = vld [vmem:[#allocation2 + $0x2c1] sm:$0xff]  ;;  %v1270_v4 = vpack.c.bf16 %v1206_v15, %v1206_v15  ;;  %v9103_v10 = vld [vmem:[#allocation3 + $0x230] sm:$0xf]  ;;  %v4469_v51 = vadd.f32 %v11816_v37, %v4440_v26  ;;  %2616 = vst.msk [vmem:[#allocation3 + $0x200] sm:$0xf] %vm668_vm2, %v2552_v2  ;;  %v8892_v37 = vor.u32 %v10259_v46, %v8891_v25 }
 0x21e   : > { %v8113_v44 = vsel %vm249_vm0, %v8048_v28, 0.0  ;;  %1632 = vrot.lane.b32.xlu0 %v1471_v6, %s10673_s17  ;;  %v11995_v60 = vpop.f32.mrf.mxu2  ;;  %v12018_v6 = vpack.c.bf16 %v2689_v59, %v2689_v59  ;;  %1335 = vst.msk [vmem:[#allocation3 + $0x1f8] sm:$0xf] %vm668_vm2, %v1271_v33  ;;  %v450_v28 = vld [vmem:[%s11029_s22 + $0x138] sm:$0xff]  ;;  %5872 = vmatpush.bf16.msra.mxu1 %v10492_v43  ;;  %v1847_v22 = vld [vmem:[#allocation2 + $0x201] sm:$0xff] }
 0x21f   : > { %995 = vrot.lane.b32.xlu1 %v11910_v16, %s10673_s17  ;;  %v8114_v36 = vadd.f32 %v8113_v44, %v8112_v5  ;;  %v12000_v47 = vpop.f32.mrf.mxu3  ;;  %2276 = vrot.lane.b32.xlu2 %v2113_v30, %s10673_s17  ;;  %v4495_v16 = vadd.f32 %v11798_v1, %v4466_v49  ;;  %v10499_v5 = vld [vmem:[%s11140_s26 + $0x430] sm:$0xff]  ;;  %v1472_v1 = vpack.c.bf16 %v11990_v55, %v11990_v55  ;;  %v10490_v2 = vld [vmem:[%s11140_s26 + $0x3e8] sm:$0xff] }
 0x220   : > { %v984_v3 = vpop.permute.xlu0 %983  ;;  %v12005_v56 = vpop.f32.mrf.mxu1  ;;  %v10251_v21 = vld [vmem:[#allocation3 + $0x174] sm:$0xf]  ;;  %5902 = vmatpush.bf16.msra.mxu2 %v10499_v5  ;;  %1334 = vst.msk [vmem:[#allocation3 + $0x1e4] sm:$0xf] %vm668_vm2, %v1270_v4  ;;  %v4498_v8 = vadd.f32 %v11829_v39, %v4469_v51  ;;  %5843 = vmatpush.bf16.msra.mxu0 %v10484_v63  ;;  %v4442_v5 = vadd.f32 %v11853_v9, %v11836_v13  ;;  %v10482_v63 = vld [vmem:[%s11140_s26 + $0x3a8] sm:$0xff] }
 0x221   : > { %1147 = vst.msk [vmem:[#allocation3 + $0x244] sm:$0xf] %vm1117_vm3, %v984_v3  ;;  %v4523_v29 = vpop.f32.mrf.mxu0  ;;  %v8868_v57 = vor.u32 %v10251_v21, %v8865_v23  ;;  %v2890_v45 = vpop.permute.xlu1 %2889  ;;  %v2690_v44 = vld [vmem:[#allocation2 + $0x2d1] sm:$0xff]  ;;  %v2051_v23 = vld [vmem:[#allocation2 + $0x2e2] sm:$0xff]  ;;  %v1911_v9 = vpack.c.bf16 %v1847_v22, %v1847_v22 }
 0x222   : > { %v4524_v32 = vadd.f32 %v4523_v29, %v4495_v16  ;;  %3060 = vst.msk [vmem:[#allocation3 + $0x1b0] sm:$0xf] %vm1117_vm3, %v2890_v45  ;;  %v2896_v18 = vpop.permute.xlu2 %2895  ;;  %v10483_v45 = vld [vmem:[%s11140_s26 + $0x3b0] sm:$0xff]  ;;  %v12053_v15 = vpack.c.bf16 %v2690_v44, %v2690_v44  ;;  %v2115_v40 = vpack.c.bf16 %v2051_v23, %v2051_v23  ;;  %5873 = vmatpush.bf16.msra.mxu1 %v10491_v54 }
 0x223   : > { %5408 = vmatmul.bf16.gmra.mxu0 %v8864_v62  ;;  %5437 = vmatmul.bf16.gmra.mxu1 %v8868_v57  ;;  %3063 = vst.msk [vmem:[#allocation3 + $0x1ec] sm:$0xf] %vm1117_vm3, %v2896_v18  ;;  %v10506_v18 = vld [vmem:[%s11140_s26 + $0x468] sm:$0xff]  ;;  %v1209_v25 = vld [vmem:[#allocation2 + $0x212] sm:$0xff]  ;;  %v4445_v54 = vadd.f32 %v11872_v53, %v11857_v35 }
 0x224   : > { %7850 = vst.msk [vmem:[%s11905_s29 + $0x18] sm:$0xff] %vm249_vm0, %v4524_v32  ;;  %v7916_v42 = vsel %vm249_vm0, %v4524_v32, 0.0  ;;  %v8049_v30 = vmul.f32 %v4524_v32, %v4524_v32  ;;  %5903 = vmatpush.bf16.msra.mxu2 %v10498_v58  ;;  %5844 = vmatpush.bf16.msra.mxu0 %v10483_v45  ;;  %v4471_v58 = vadd.f32 %v11843_v7, %v4442_v5 }
 0x225   : > { %v7917_v49 = vadd.f32 %v7916_v42, %v7915_v24  ;;  %v12036_v24 = vld [vmem:[#allocation2 + $0x2c0] sm:$0xff]  ;;  %515 = vst.msk [vmem:[#allocation2 + $0x301] sm:$0xff] %vm249_vm0, %v450_v28  ;;  %v8883_v42 = vld [vmem:[#allocation3 + $0x198] sm:$0xf]  ;;  %5932 = vmatpush.bf16.msra.mxu3 %v10506_v18 }
 0x226   : > { %v8115_v19 = vsel %vm249_vm0, %v8049_v30, 0.0  ;;  %993 = vrot.lane.b32.xlu0 %v11943_v11, %s10673_s17  ;;  %v12032_v55 = vpop.f32.mrf.mxu2  ;;  %v2489_v11 = vld [vmem:[#allocation2 + $0x220] sm:$0xff]  ;;  %v1473_v13 = vpack.c.bf16 %v12036_v24, %v12036_v24  ;;  %v10258_v30 = vld [vmem:[#allocation3 + $0x1a8] sm:$0xf0]  ;;  %v2050_v24 = vld [vmem:[#allocation2 + $0x2d2] sm:$0xff]  ;;  %5874 = vmatpush.bf16.msra.mxu1 %v10490_v2 }
 0x227   : > { %1634 = vrot.lane.b32.xlu1 %v1472_v1, %s10673_s17  ;;  %v8116_v59 = vadd.f32 %v8115_v19, %v8114_v36  ;;  %v12038_v62 = vpop.f32.mrf.mxu3  ;;  %2915 = vrot.lane.b32.xlu2 %v12018_v6, %s10673_s17  ;;  %v10497_v36 = vld [vmem:[%s11140_s26 + $0x420] sm:$0xff]  ;;  %v2553_v57 = vpack.c.bf16 %v2489_v11, %v2489_v11  ;;  %v1910_v1 = vpack.c.bf16 %v1846_v0, %v1846_v0  ;;  %v2490_v19 = vld [vmem:[#allocation2 + $0x230] sm:$0xff] }
 0x228   : > { %v2888_v3 = vpop.permute.xlu0 %2887  ;;  %v12045_v16 = vpop.f32.mrf.mxu1  ;;  %v10277_v21 = vld [vmem:[#allocation3 + $0x240] sm:$0xf0]  ;;  %5904 = vmatpush.bf16.msra.mxu2 %v10497_v36  ;;  %v8884_v7 = vor.u32 %v10258_v30, %v8883_v42  ;;  %1975 = vst.msk [vmem:[#allocation3 + $0x1fc] sm:$0xf] %vm668_vm2, %v1911_v9  ;;  %v4500_v0 = vadd.f32 %v11849_v20, %v4471_v58  ;;  %5845 = vmatpush.bf16.msra.mxu0 %v10482_v63 }
 0x229   : > { %3059 = vst.msk [vmem:[#allocation3 + $0x19c] sm:$0xf] %vm1117_vm3, %v2888_v3  ;;  %v4526_v26 = vpop.f32.mrf.mxu0  ;;  %v9104_v29 = vor.u32 %v10277_v21, %v9103_v10  ;;  %v2251_v39 = vpop.permute.xlu1 %2250  ;;  %v8885_v51 = vld [vmem:[#allocation3 + $0x1ac] sm:$0xf0]  ;;  %v10505_v11 = vld [vmem:[%s11140_s26 + $0x460] sm:$0xff]  ;;  %v2554_v20 = vpack.c.bf16 %v2490_v19, %v2490_v19  ;;  %v2114_v53 = vpack.c.bf16 %v2050_v24, %v2050_v24  ;;  %v4447_v30 = vadd.f32 %v11895_v38, %v11875_v52 }
 0x22a   : > { %v4527_v33 = vadd.f32 %v4526_v26, %v4498_v8  ;;  %2420 = vst.msk [vmem:[#allocation3 + $0x1c0] sm:$0xf] %vm1117_vm3, %v2251_v39  ;;  %v1617_v32 = vpop.permute.xlu2 %1616  ;;  %v10489_v21 = vld [vmem:[%s11140_s26 + $0x3e0] sm:$0xff]  ;;  %5933 = vmatpush.bf16.msra.mxu3 %v10505_v11  ;;  %v449_v11 = vld [vmem:[%s11029_s22 + $0x130] sm:$0xff] }
 0x22b   : > { %9059 = vmatmul.msk.bf16.gmra.mxu2 %vm249_vm0, %v8892_v37  ;;  %1783 = vst.msk [vmem:[#allocation3 + $0x1f8] sm:$0xf] %vm1117_vm3, %v1617_v32  ;;  %v2691_v37 = vld [vmem:[#allocation2 + $0x2e1] sm:$0xff]  ;;  %5875 = vmatpush.bf16.msra.mxu1 %v10489_v21  ;;  %v10263_v21 = vld [vmem:[#allocation3 + $0x1d0] sm:$0xf0] }
 0x22c   : > { %7851 = vst.msk [vmem:[%s11905_s29 + $0x20] sm:$0xff] %vm249_vm0, %v4527_v33  ;;  %v7918_v4 = vsel %vm249_vm0, %v4527_v33, 0.0  ;;  %v8050_v43 = vmul.f32 %v4527_v33, %v4527_v33  ;;  %5828 = vmatmul.bf16.gmra.mxu3 %v9104_v29  ;;  %v1208_v36 = vld [vmem:[#allocation2 + $0x202] sm:$0xff]  ;;  %v12093_v39 = vpack.c.bf16 %v2691_v37, %v2691_v37  ;;  %v4474_v33 = vadd.f32 %v11863_v41, %v4445_v54 }
 0x22d   : > { %v7919_v46 = vadd.f32 %v7918_v4, %v7917_v49  ;;  %2617 = vst.msk [vmem:[#allocation3 + $0x214] sm:$0xf] %vm668_vm2, %v2553_v57  ;;  %v12075_v49 = vpack.c.bf16 %v1209_v25, %v1209_v25  ;;  %v10481_v29 = vld [vmem:[%s11140_s26 + $0x3a0] sm:$0xff]  ;;  %v1272_v45 = vpack.c.bf16 %v1208_v36, %v1208_v36  ;;  %v9123_v25 = vld [vmem:[#allocation3 + $0x258] sm:$0xf] }
 0x22e   : > { %v8117_v10 = vsel %vm249_vm0, %v8050_v43, 0.0  ;;  %2917 = vrot.lane.b32.xlu0 %v12053_v15, %s10673_s17  ;;  %v12071_v28 = vpop.f32.mrf.mxu2  ;;  %1974 = vst.msk [vmem:[#allocation3 + $0x1e8] sm:$0xf] %vm668_vm2, %v1910_v1  ;;  %v8911_v1 = vld [vmem:[#allocation3 + $0x1c8] sm:$0xf]  ;;  %5846 = vmatpush.bf16.msra.mxu0 %v10481_v29  ;;  %v1411_v42 = vld [vmem:[#allocation2 + $0x2e0] sm:$0xff]  ;;  %v4503_v58 = vadd.f32 %v11866_v17, %v4474_v33 }
 0x22f   : > { %2280 = vrot.lane.b32.xlu1 %v2115_v40, %s10673_s17  ;;  %v8118_v44 = vadd.f32 %v8117_v10, %v8116_v59  ;;  %v12077_v23 = vpop.f32.mrf.mxu3  ;;  %1636 = vrot.lane.b32.xlu2 %v1473_v13, %s10673_s17  ;;  %1337 = vst.msk [vmem:[#allocation3 + $0x220] sm:$0xf] %vm668_vm2, %v12075_v49  ;;  %v10264_v13 = vld [vmem:[#allocation3 + $0x1d8] sm:$0xf0]  ;;  %v1849_v24 = vld [vmem:[#allocation2 + $0x221] sm:$0xff]  ;;  %v1475_v38 = vpack.c.bf16 %v1411_v42, %v1411_v42 }
 0x230   : > { %v988_v8 = vpop.permute.xlu0 %987  ;;  %v12085_v3 = vpop.f32.mrf.mxu1  ;;  %v10256_v59 = vld [vmem:[#allocation3 + $0x19c] sm:$0xf]  ;;  %2618 = vst.msk [vmem:[#allocation3 + $0x228] sm:$0xf] %vm668_vm2, %v2554_v20  ;;  %v8912_v43 = vor.u32 %v10264_v13, %v8911_v1  ;;  %v1913_v36 = vpack.c.bf16 %v1849_v24, %v1849_v24  ;;  %v1210_v42 = vld [vmem:[#allocation2 + $0x222] sm:$0xff] }
 0x231   : > { %1149 = vst.msk [vmem:[#allocation3 + $0x26c] sm:$0xf] %vm1117_vm3, %v988_v8  ;;  %v4528_v22 = vpop.f32.mrf.mxu0  ;;  %v8888_v5 = vor.u32 %v10256_v59, %v8885_v51  ;;  %v2894_v26 = vpop.permute.xlu1 %2893  ;;  %v1848_v51 = vld [vmem:[#allocation2 + $0x211] sm:$0xff]  ;;  %v8903_v59 = vld [vmem:[#allocation3 + $0x1c0] sm:$0xf] }
 0x232   : > { %v4529_v35 = vadd.f32 %v4528_v22, %v4500_v0  ;;  %3062 = vst.msk [vmem:[#allocation3 + $0x1d8] sm:$0xf] %vm1117_vm3, %v2894_v26  ;;  %v2900_v57 = vpop.permute.xlu2 %2899  ;;  %v4476_v0 = vadd.f32 %v11884_v27, %v4447_v30 }
 0x233   : > { %5413 = vmatmul.bf16.gmra.mxu0 %v8884_v7  ;;  %5442 = vmatmul.bf16.gmra.mxu1 %v8888_v5  ;;  %3065 = vst.msk [vmem:[#allocation3 + $0x214] sm:$0xf] %vm1117_vm3, %v2900_v57  ;;  %v2491_v7 = vld [vmem:[#allocation2 + $0x240] sm:$0xff] }
 0x234   : > { %7852 = vst.msk [vmem:[%s11905_s29 + $0x28] sm:$0xff] %vm249_vm0, %v4529_v35  ;;  %v7920_v40 = vsel %vm249_vm0, %v4529_v35, 0.0  ;;  %v8051_v32 = vmul.f32 %v4529_v35, %v4529_v35  ;;  %v2555_v17 = vpack.c.bf16 %v2491_v7, %v2491_v7  ;;  %v8904_v35 = vor.u32 %v10263_v21, %v8903_v59 }
 0x235   : > { %v7921_v9 = vadd.f32 %v7920_v40, %v7919_v46  ;;  %1336 = vst.msk [vmem:[#allocation3 + $0x20c] sm:$0xf] %vm668_vm2, %v1272_v45  ;;  %v2492_v40 = vld [vmem:[#allocation2 + $0x250] sm:$0xff] }
 0x236   : > { %v8119_v18 = vsel %vm249_vm0, %v8051_v32, 0.0  ;;  %2278 = vrot.lane.b32.xlu0 %v2114_v53, %s10673_s17  ;;  %v12103_v2 = vpop.f32.mrf.mxu2  ;;  %3255 = vst.msk [vmem:[#allocation3 + $0x1f0] sm:$0xf] %vm668_vm2, %v1272_v45  ;;  %v1410_v53 = vld [vmem:[#allocation2 + $0x2d0] sm:$0xff] }
 0x237   : > { %2919 = vrot.lane.b32.xlu1 %v12093_v39, %s10673_s17  ;;  %v8120_v41 = vadd.f32 %v8119_v18, %v8118_v44  ;;  %v12108_v4 = vpop.f32.mrf.mxu3  ;;  %997 = vrot.lane.b32.xlu2 %v12018_v6, %s10673_s17  ;;  %3256 = vst.msk [vmem:[#allocation3 + $0x204] sm:$0xf] %vm668_vm2, %v12075_v49  ;;  %v1912_v49 = vpack.c.bf16 %v1848_v51, %v1848_v51 }
 0x238   : > { %v2892_v46 = vpop.permute.xlu0 %2891  ;;  %v12115_v63 = vpop.f32.mrf.mxu1  ;;  %v10282_v10 = vld [vmem:[#allocation3 + $0x268] sm:$0xf0]  ;;  %514 = vst.msk [vmem:[#allocation2 + $0x2f1] sm:$0xff] %vm249_vm0, %v449_v11 }
 0x239   : > { %3061 = vst.msk [vmem:[#allocation3 + $0x1c4] sm:$0xf] %vm1117_vm3, %v2892_v46  ;;  %v4531_v6 = vpop.f32.mrf.mxu0  ;;  %v9124_v19 = vor.u32 %v10282_v10, %v9123_v25  ;;  %v1615_v44 = vpop.permute.xlu1 %1614  ;;  %v8905_v27 = vld [vmem:[#allocation3 + $0x1d4] sm:$0xf0]  ;;  %v1474_v25 = vpack.c.bf16 %v1410_v53, %v1410_v53 }
 0x23a   : > { %v4532_v52 = vadd.f32 %v4531_v6, %v4503_v58  ;;  %1782 = vst.msk [vmem:[#allocation3 + $0x1e4] sm:$0xf] %vm1117_vm3, %v1615_v44  ;;  %v1621_v37 = vpop.permute.xlu2 %1620 }
 0x23b   : > { %9060 = vmatmul.msk.bf16.gmra.mxu2 %vm249_vm0, %v8912_v43  ;;  %1785 = vst.msk [vmem:[#allocation3 + $0x220] sm:$0xf] %vm1117_vm3, %v1621_v37  ;;  %v451_v43 = vld [vmem:[%s11029_s22 + $0x140] sm:$0xff] }
 0x23c   : > { %7853 = vst.msk [vmem:[%s11905_s29 + $0x30] sm:$0xff] %vm249_vm0, %v4532_v52  ;;  %v7922_v54 = vsel %vm249_vm0, %v4532_v52, 0.0  ;;  %v8052_v8 = vmul.f32 %v4532_v52, %v4532_v52  ;;  %5833 = vmatmul.bf16.gmra.mxu3 %v9124_v19  ;;  %v10266_v52 = vld [vmem:[#allocation3 + $0x1ec] sm:$0xf] }
 0x23d   : > { %v7923_v22 = vadd.f32 %v7922_v54, %v7921_v9  ;;  %2619 = vst.msk [vmem:[#allocation3 + $0x23c] sm:$0xf] %vm668_vm2, %v2555_v17  ;;  %v1211_v9 = vld [vmem:[#allocation2 + $0x232] sm:$0xff]  ;;  %v2053_v17 = vld [vmem:[#allocation2 + $0x302] sm:$0xff] }
 0x23e   : > { %v8121_v5 = vsel %vm249_vm0, %v8052_v8, 0.0  ;;  %999 = vrot.lane.b32.xlu0 %v12053_v15, %s10673_s17  ;;  %v12133_v26 = vpop.f32.mrf.mxu2  ;;  %1976 = vst.msk [vmem:[#allocation3 + $0x210] sm:$0xf] %vm668_vm2, %v1912_v49  ;;  %v4505_v15 = vadd.f32 %v11887_v50, %v4476_v0  ;;  %v2556_v50 = vpack.c.bf16 %v2492_v40, %v2492_v40  ;;  %v1275_v10 = vpack.c.bf16 %v1211_v9, %v1211_v9  ;;  %v9079_v6 = vld [vmem:[#allocation3 + $0x1f0] sm:$0xf]  ;;  %v1851_v9 = vld [vmem:[#allocation2 + $0x241] sm:$0xff] }
 0x23f   : > { %1640 = vrot.lane.b32.xlu1 %v1475_v38, %s10673_s17  ;;  %v8122_v20 = vadd.f32 %v8121_v5, %v8120_v41  ;;  %v12137_v29 = vpop.f32.mrf.mxu3  ;;  %1977 = vst.msk [vmem:[#allocation3 + $0x224] sm:$0xf] %vm668_vm2, %v1913_v36  ;;  %v2692_v58 = vld [vmem:[#allocation2 + $0x2f1] sm:$0xff]  ;;  %v10269_v19 = vld [vmem:[#allocation3 + $0x200] sm:$0xf0]  ;;  %v1274_v38 = vpack.c.bf16 %v1210_v42, %v1210_v42  ;;  %v4903_v40 = vadd.f32 %v11925_v31, %v11939_v12 }
 0x240   : > { %v2898_v57 = vpop.permute.xlu0 %2897  ;;  %v12140_v45 = vpop.f32.mrf.mxu1  ;;  %v10261_v33 = vld [vmem:[#allocation3 + $0x1c4] sm:$0xf]  ;;  %v12153_v44 = vpack.c.bf16 %v2692_v58, %v2692_v58  ;;  %516 = vst.msk [vmem:[#allocation2 + $0x331] sm:$0xff] %vm249_vm0, %v451_v43  ;;  %v2694_v49 = vld [vmem:[#allocation2 + $0x311] sm:$0xff] }
 0x241   : > { %3064 = vst.msk [vmem:[#allocation3 + $0x200] sm:$0xf] %vm1117_vm3, %v2898_v57  ;;  %v4533_v32 = vpop.f32.mrf.mxu0  ;;  %v8908_v1 = vor.u32 %v10261_v33, %v8905_v27  ;;  %v2257_v13 = vpop.permute.xlu1 %2256  ;;  %v2052_v59 = vld [vmem:[#allocation2 + $0x2f2] sm:$0xff]  ;;  %v2117_v27 = vpack.c.bf16 %v2053_v17, %v2053_v17  ;;  %v452_v57 = vld [vmem:[%s11029_s22 + $0x148] sm:$0xff] }
 0x242   : > { %v4534_v18 = vadd.f32 %v4533_v32, %v4505_v15  ;;  %2423 = vst.msk [vmem:[#allocation3 + $0x1fc] sm:$0xf] %vm1117_vm3, %v2257_v13  ;;  %v2904_v41 = vpop.permute.xlu2 %2903  ;;  %2921 = vrot.lane.b32.xlu2 %v12153_v44, %s10673_s17  ;;  %v1850_v5 = vld [vmem:[#allocation2 + $0x231] sm:$0xff]  ;;  %v2116_v53 = vpack.c.bf16 %v2052_v59, %v2052_v59  ;;  %v10265_v32 = vld [vmem:[#allocation3 + $0x1e4] sm:$0xf] }
 0x243   : > { %5418 = vmatmul.bf16.gmra.mxu0 %v8904_v35  ;;  %5447 = vmatmul.bf16.gmra.mxu1 %v8908_v1  ;;  %3067 = vst.msk [vmem:[#allocation3 + $0x23c] sm:$0xf] %vm1117_vm3, %v2904_v41  ;;  %v10532_v33 = vld [vmem:[%s11140_s26 + $0x538] sm:$0xff]  ;;  %v1914_v13 = vpack.c.bf16 %v1850_v5, %v1850_v5  ;;  %v2693_v41 = vld [vmem:[#allocation2 + $0x301] sm:$0xff]  ;;  %v2494_v17 = vld [vmem:[#allocation2 + $0x270] sm:$0xff] }
 0x244   : > { %7854 = vst.msk [vmem:[%s11905_s29 + $0x38] sm:$0xff] %vm249_vm0, %v4534_v18  ;;  %v7924_v30 = vsel %vm249_vm0, %v4534_v18, 0.0  ;;  %v8053_v46 = vmul.f32 %v4534_v18, %v4534_v18  ;;  %v9065_v1 = vld [vmem:[#allocation3 + $0x1f4] sm:$0xf0]  ;;  %6341 = vmatpush.bf16.msrb.mxu2 %v10532_v33  ;;  %v453_v59 = vld [vmem:[%s11029_s22 + $0x150] sm:$0xff]  ;;  %v1413_v33 = vld [vmem:[#allocation2 + $0x300] sm:$0xff] }
 0x245   : > { %v12151_v51 = vadd.f32 %v7924_v30, %v7923_v22  ;;  %1339 = vst.msk [vmem:[#allocation3 + $0x248] sm:$0xf] %vm668_vm2, %v1275_v10  ;;  %v2493_v22 = vld [vmem:[#allocation2 + $0x260] sm:$0xff]  ;;  %v9068_v12 = vor.u32 %v10265_v32, %v9065_v1 }
 0x246   : > { %v8123_v7 = vsel %vm249_vm0, %v8053_v46, 0.0  ;;  %1638 = vrot.lane.b32.xlu0 %v1474_v25, %s10673_s17  ;;  %v12158_v24 = vpop.f32.mrf.mxu2  ;;  %2620 = vst.msk [vmem:[#allocation3 + $0x250] sm:$0xf] %vm668_vm2, %v2556_v50  ;;  %v2557_v15 = vpack.c.bf16 %v2493_v22, %v2493_v22  ;;  %v10531_v50 = vld [vmem:[%s11140_s26 + $0x530] sm:$0xff]  ;;  %v4932_v46 = vadd.f32 %v11930_v14, %v4903_v40  ;;  %v4905_v22 = vadd.f32 %v11961_v48, %v11973_v34  ;;  %v1212_v32 = vld [vmem:[#allocation2 + $0x242] sm:$0xff] }
 0x247   : > { %1001 = vrot.lane.b32.xlu1 %v12093_v39, %s10673_s17  ;;  %v12163_v37 = vadd.f32 %v8123_v7, %v8122_v20  ;;  %v12165_v11 = vpop.f32.mrf.mxu3  ;;  %v9080_v39 = vor.u32 %v10269_v19, %v9079_v6  ;;  %1338 = vst.msk [vmem:[#allocation3 + $0x234] sm:$0xf] %vm668_vm2, %v1274_v38  ;;  %v2758_v20 = vpack.c.bf16 %v2694_v49, %v2694_v49  ;;  %v1414_v43 = vld [vmem:[#allocation2 + $0x330] sm:$0xff] }
 0x248   : > { %v2255_v0 = vpop.permute.xlu0 %2254  ;;  %v12170_v54 = vpop.f32.mrf.mxu1  ;;  %v9073_v8 = vld [vmem:[#allocation3 + $0x1fc] sm:$0xf0]  ;;  %3257 = vst.msk [vmem:[#allocation3 + $0x218] sm:$0xf] %vm668_vm2, %v1274_v38  ;;  %v10540_v38 = vld [vmem:[%s11140_s26 + $0x578] sm:$0xff]  ;;  %6342 = vmatpush.bf16.msrb.mxu2 %v10531_v50  ;;  %v1478_v14 = vpack.c.bf16 %v1414_v43, %v1414_v43 }
 0x249   : > { %2422 = vst.msk [vmem:[#allocation3 + $0x1e8] sm:$0xf] %vm1117_vm3, %v2255_v0  ;;  %v9076_v21 = vor.u32 %v10266_v52, %v9073_v8  ;;  %v1619_v36 = vpop.permute.xlu1 %1618  ;;  %v10268_v25 = vld [vmem:[#allocation3 + $0x1f8] sm:$0xf0]  ;;  %v2757_v0 = vpack.c.bf16 %v2693_v41, %v2693_v41  ;;  %6370 = vmatpush.bf16.msrb.mxu3 %v10540_v38  ;;  %v12233_v38 = vld [vmem:[#allocation3 + $0x21c] sm:$0xf0] }
 0x24a   : > { %1784 = vst.msk [vmem:[#allocation3 + $0x20c] sm:$0xf] %vm1117_vm3, %v1619_v36  ;;  %v1625_v35 = vpop.permute.xlu2 %1624  ;;  %2282 = vrot.lane.b32.xlu2 %v2116_v53, %s10673_s17  ;;  %v10516_v52 = vld [vmem:[%s11140_s26 + $0x4b8] sm:$0xff]  ;;  %v10530_v36 = vld [vmem:[%s11140_s26 + $0x528] sm:$0xff] }
 0x24b   : > { %5905 = vmatmul.bf16.vlgmr.msra.gmra.mxu2 %v9076_v21  ;;  %1787 = vst.msk [vmem:[#allocation3 + $0x248] sm:$0xf] %vm1117_vm3, %v1625_v35  ;;  %v1213_v21 = vld [vmem:[#allocation2 + $0x252] sm:$0xff]  ;;  %6283 = vmatpush.bf16.msrb.mxu0 %v10516_v52  ;;  %v1477_v52 = vpack.c.bf16 %v1413_v33, %v1413_v33 }
 0x24c   : > { %9285 = vmatmul.msk.bf16.vlgmr.msra.gmra.mxu3 %vm249_vm0, %v9080_v39  ;;  %3258 = vst.msk [vmem:[#allocation3 + $0x22c] sm:$0xf] %vm668_vm2, %v1275_v10  ;;  %v1915_v10 = vpack.c.bf16 %v1851_v9, %v1851_v9  ;;  %v10524_v39 = vld [vmem:[%s11140_s26 + $0x4f8] sm:$0xff]  ;;  %6343 = vmatpush.bf16.msrb.mxu2 %v10530_v36  ;;  %v10515_v9 = vld [vmem:[%s11140_s26 + $0x4b0] sm:$0xff] }
 0x24d   : > { %517 = vst.msk [vmem:[#allocation2 + $0x341] sm:$0xff] %vm249_vm0, %v452_v57  ;;  %6312 = vmatpush.bf16.msrb.mxu1 %v10524_v39  ;;  %v12207_v57 = vpack.c.bf16 %v1213_v21, %v1213_v21  ;;  %v4908_v39 = vadd.f32 %v11995_v60, %v12005_v56  ;;  %v1854_v36 = vld [vmem:[#allocation2 + $0x291] sm:$0xff] }
 0x24e   : > { %2284 = vrot.lane.b32.xlu0 %v2117_v27, %s10673_s17  ;;  %v12184_v18 = vpop.f32.mrf.mxu2  ;;  %2621 = vst.msk [vmem:[#allocation3 + $0x264] sm:$0xf] %vm668_vm2, %v2557_v15  ;;  %v10271_v27 = vld [vmem:[#allocation3 + $0x214] sm:$0xf] }
 0x24f   : > { %2925 = vrot.lane.b32.xlu1 %v2758_v20, %s10673_s17  ;;  %v12188_v31 = vpop.f32.mrf.mxu3  ;;  %1978 = vst.msk [vmem:[#allocation3 + $0x238] sm:$0xf] %vm668_vm2, %v1914_v13  ;;  %v2558_v20 = vpack.c.bf16 %v2494_v17, %v2494_v17  ;;  %v9099_v35 = vld [vmem:[#allocation3 + $0x218] sm:$0xf]  ;;  %6284 = vmatpush.bf16.msrb.mxu0 %v10515_v9  ;;  %v10537_v9 = vld [vmem:[%s11140_s26 + $0x560] sm:$0xff] }
 0x250   : > { %v2902_v42 = vpop.permute.xlu0 %2901  ;;  %v4989_v30 = vpop.f32.mrf.mxu1  ;;  %v9071_v58 = vld [vmem:[#allocation3 + $0x1e8] sm:$0xf]  ;;  %1979 = vst.msk [vmem:[#allocation3 + $0x24c] sm:$0xf] %vm668_vm2, %v1915_v10 }
 0x251   : > { %3066 = vst.msk [vmem:[#allocation3 + $0x228] sm:$0xf] %vm1117_vm3, %v2902_v42  ;;  %v4960_v6 = vpop.f32.mrf.mxu0  ;;  %v9072_v19 = vor.u32 %v10268_v25, %v9071_v58  ;;  %v2261_v7 = vpop.permute.xlu1 %2260  ;;  %v10539_v25 = vld [vmem:[%s11140_s26 + $0x570] sm:$0xff]  ;;  %v4934_v42 = vadd.f32 %v11965_v61, %v4905_v22  ;;  %v10270_v21 = vld [vmem:[#allocation3 + $0x20c] sm:$0xf] }
 0x252   : > { %v4961_v49 = vadd.f32 %v4960_v6, %v4932_v46  ;;  %2425 = vst.msk [vmem:[#allocation3 + $0x224] sm:$0xf] %vm1117_vm3, %v2261_v7  ;;  %v2908_v8 = vpop.permute.xlu2 %2907  ;;  %1003 = vrot.lane.b32.xlu2 %v12153_v44, %s10673_s17  ;;  %v1412_v46 = vld [vmem:[#allocation2 + $0x2f0] sm:$0xff]  ;;  %6371 = vmatpush.bf16.msrb.mxu3 %v10539_v25  ;;  %v9088_v33 = vor.u32 %v10270_v21, %v12233_v38  ;;  %v10513_v25 = vld [vmem:[%s11140_s26 + $0x4a0] sm:$0xff]  ;;  %v10512_v38 = vld [vmem:[%s11140_s26 + $0x498] sm:$0xff] }
 0x253   : > { %5847 = vmatmul.bf16.vlgmr.msra.gmra.mxu0 %v9068_v12  ;;  %5876 = vmatmul.bf16.vlgmr.msra.gmra.mxu1 %v9072_v19  ;;  %3069 = vst.msk [vmem:[#allocation3 + $0x264] sm:$0xf] %vm1117_vm3, %v2908_v8  ;;  %v10274_v53 = vld [vmem:[#allocation3 + $0x228] sm:$0xf0]  ;;  %v10529_v12 = vld [vmem:[%s11140_s26 + $0x520] sm:$0xff]  ;;  %v1276_v19 = vpack.c.bf16 %v1212_v32, %v1212_v32  ;;  %v10523_v7 = vld [vmem:[%s11140_s26 + $0x4f0] sm:$0xff]  ;;  %v1918_v32 = vpack.c.bf16 %v1854_v36, %v1854_v36 }
 0x254   : > { %v4990_v5 = vadd.f32 %v4989_v30, %v4961_v49  ;;  %518 = vst.msk [vmem:[#allocation2 + $0x351] sm:$0xff] %vm249_vm0, %v453_v59  ;;  %v2055_v40 = vld [vmem:[#allocation2 + $0x342] sm:$0xff]  ;;  %6344 = vmatpush.bf16.msrb.mxu2 %v10529_v12  ;;  %v1476_v49 = vpack.c.bf16 %v1412_v46, %v1412_v46  ;;  %6313 = vmatpush.bf16.msrb.mxu1 %v10523_v7  ;;  %v10528_v8 = vld [vmem:[%s11140_s26 + $0x518] sm:$0xff] }
 0x255   : > { %1341 = vst.msk [vmem:[#allocation3 + $0x270] sm:$0xf] %vm668_vm2, %v12207_v57  ;;  %v2119_v17 = vpack.c.bf16 %v2055_v40, %v2055_v40  ;;  %v12243_v22 = vld [vmem:[#allocation2 + $0x332] sm:$0xff]  ;;  %v455_v21 = vld [vmem:[%s11029_s22 + $0x160] sm:$0xff] }
 0x256   : > { %7855 = vst.msk [vmem:[%s11905_s29 + $0x40] sm:$0xff] %vm249_vm0, %v4990_v5  ;;  %v7926_v48 = vsel %vm249_vm0, %v4990_v5, 0.0  ;;  %v8054_v34 = vmul.f32 %v4990_v5, %v4990_v5  ;;  %2923 = vrot.lane.b32.xlu0 %v2757_v0, %s10673_s17  ;;  %v12213_v15 = vpop.f32.mrf.mxu2  ;;  %v10514_v0 = vld [vmem:[%s11140_s26 + $0x4a8] sm:$0xff]  ;;  %v454_v5 = vld [vmem:[%s11029_s22 + $0x158] sm:$0xff] }
 0x257   : > { %1646 = vrot.lane.b32.xlu1 %v1478_v14, %s10673_s17  ;;  %v7927_v1 = vadd.f32 %v7926_v48, %v12151_v51  ;;  %v12217_v13 = vpop.f32.mrf.mxu3  ;;  %v9100_v51 = vor.u32 %v10274_v53, %v9099_v35  ;;  %2622 = vst.msk [vmem:[#allocation3 + $0x278] sm:$0xf] %vm668_vm2, %v2558_v20  ;;  %v10538_v14 = vld [vmem:[%s11140_s26 + $0x568] sm:$0xff]  ;;  %6285 = vmatpush.bf16.msrb.mxu0 %v10514_v0  ;;  %v12254_v35 = vld [vmem:[#allocation2 + $0x340] sm:$0xff]  ;;  %v1852_v53 = vld [vmem:[#allocation2 + $0x251] sm:$0xff] }
 0x258   : > { %v8125_v41 = vsel %vm249_vm0, %v8054_v34, 0.0  ;;  %v2259_v43 = vpop.permute.xlu0 %2258  ;;  %v4991_v50 = vpop.f32.mrf.mxu1  ;;  %v9093_v30 = vld [vmem:[#allocation3 + $0x224] sm:$0xf0]  ;;  %1340 = vst.msk [vmem:[#allocation3 + $0x25c] sm:$0xf] %vm668_vm2, %v1276_v19  ;;  %6372 = vmatpush.bf16.msrb.mxu3 %v10538_v14  ;;  %6345 = vmatpush.bf16.msrb.mxu2 %v10528_v8  ;;  %v573_v14 = vld [vmem:[#allocation2 + $0x290] sm:$0xff] }
 0x259   : > { %v8126_v44 = vadd.f32 %v8125_v41, %v12163_v37  ;;  %2424 = vst.msk [vmem:[#allocation3 + $0x210] sm:$0xf] %vm1117_vm3, %v2259_v43  ;;  %v4962_v58 = vpop.f32.mrf.mxu0  ;;  %v9096_v10 = vor.u32 %v10271_v27, %v9093_v30  ;;  %v1623_v6 = vpop.permute.xlu1 %1622  ;;  %v10273_v20 = vld [vmem:[#allocation3 + $0x220] sm:$0xf0]  ;;  %v4937_v43 = vadd.f32 %v12000_v47, %v4908_v39  ;;  %v10527_v30 = vld [vmem:[%s11140_s26 + $0x510] sm:$0xff]  ;;  %v2118_v47 = vpack.c.bf16 %v12243_v22, %v12243_v22  ;;  %v10526_v8 = vld [vmem:[%s11140_s26 + $0x508] sm:$0xff] }
 0x25a   : > { %v4963_v61 = vadd.f32 %v4962_v58, %v4934_v42  ;;  %1786 = vst.msk [vmem:[#allocation3 + $0x234] sm:$0xf] %vm1117_vm3, %v1623_v6  ;;  %v1629_v37 = vpop.permute.xlu2 %1628  ;;  %1642 = vrot.lane.b32.xlu2 %v1476_v49, %s10673_s17  ;;  %v1853_v42 = vld [vmem:[#allocation2 + $0x261] sm:$0xff]  ;;  %v10276_v0 = vld [vmem:[#allocation3 + $0x23c] sm:$0xf]  ;;  %v12282_v39 = vld [vmem:[#allocation2 + $0x331] sm:$0xff] }
 0x25b   : > { %5910 = vmatmul.bf16.gmra.mxu2 %v9096_v10  ;;  %1789 = vst.msk [vmem:[#allocation3 + $0x270] sm:$0xf] %vm1117_vm3, %v1629_v37  ;;  %v1416_v40 = vld [vmem:[#allocation2 + $0x350] sm:$0xff]  ;;  %v1916_v10 = vpack.c.bf16 %v1852_v53, %v1852_v53  ;;  %v10522_v6 = vld [vmem:[%s11140_s26 + $0x4e8] sm:$0xff]  ;;  %6286 = vmatpush.bf16.msrb.mxu0 %v10513_v25  ;;  %v4910_v37 = vadd.f32 %v12032_v55, %v12045_v16 }
 0x25c   : > { %v4992_v59 = vadd.f32 %v4991_v50, %v4963_v61  ;;  %9286 = vmatmul.msk.bf16.gmra.mxu3 %vm249_vm0, %v9100_v51  ;;  %3259 = vst.msk [vmem:[#allocation3 + $0x240] sm:$0xf] %vm668_vm2, %v1276_v19  ;;  %v1480_v7 = vpack.c.bf16 %v1416_v40, %v1416_v40  ;;  %v1479_v61 = vpack.c.bf16 %v12254_v35, %v12254_v35  ;;  %v10521_v40 = vld [vmem:[%s11140_s26 + $0x4e0] sm:$0xff] }
 0x25d   : > { %3260 = vst.msk [vmem:[#allocation3 + $0x254] sm:$0xf] %vm668_vm2, %v12207_v57  ;;  %6373 = vmatpush.bf16.msrb.mxu3 %v10537_v9  ;;  %6314 = vmatpush.bf16.msrb.mxu1 %v10522_v6  ;;  %v637_v53 = vpack.c.bf16 %v573_v14, %v573_v14  ;;  %v838_v6 = vpack.c.bf16 %v12282_v39, %v12282_v39  ;;  %v10534_v14 = vld [vmem:[%s11140_s26 + $0x548] sm:$0xff] }
 0x25e   : > { %7856 = vst.msk [vmem:[%s11905_s29 + $0x48] sm:$0xff] %vm249_vm0, %v4992_v59  ;;  %v7928_v27 = vsel %vm249_vm0, %v4992_v59, 0.0  ;;  %v8055_v60 = vmul.f32 %v4992_v59, %v4992_v59  ;;  %1644 = vrot.lane.b32.xlu0 %v1477_v52, %s10673_s17  ;;  %v12251_v56 = vpop.f32.mrf.mxu2  ;;  %v1917_v52 = vpack.c.bf16 %v1853_v42, %v1853_v42  ;;  %6346 = vmatpush.bf16.msrb.mxu2 %v10527_v30 }
 0x25f   : > { %2288 = vrot.lane.b32.xlu1 %v2119_v17, %s10673_s17  ;;  %v7929_v48 = vadd.f32 %v7928_v27, %v7927_v1  ;;  %v12256_v34 = vpop.f32.mrf.mxu3  ;;  %519 = vst.msk [vmem:[#allocation2 + $0x361] sm:$0xff] %vm249_vm0, %v454_v5  ;;  %v10536_v17 = vld [vmem:[%s11140_s26 + $0x558] sm:$0xff]  ;;  %6287 = vmatpush.bf16.msrb.mxu0 %v10512_v38  ;;  %v12293_v5 = vld [vmem:[#allocation2 + $0x321] sm:$0xff]  ;;  %v4913_v38 = vadd.f32 %v12071_v28, %v12085_v3 }
 0x260   : > { %v8127_v12 = vsel %vm249_vm0, %v8055_v60, 0.0  ;;  %v2906_v41 = vpop.permute.xlu0 %2905  ;;  %v4994_v1 = vpop.f32.mrf.mxu1  ;;  %v9091_v50 = vld [vmem:[#allocation3 + $0x210] sm:$0xf]  ;;  %1982 = vst.msk [vmem:[#allocation3 + $0x288] sm:$0xf] %vm668_vm2, %v1918_v32  ;;  %v1855_v27 = vld [vmem:[#allocation2 + $0x2a1] sm:$0xff] }
 0x261   : > { %v8128_v51 = vadd.f32 %v8127_v12, %v8126_v44  ;;  %3068 = vst.msk [vmem:[#allocation3 + $0x250] sm:$0xf] %vm1117_vm3, %v2906_v41  ;;  %v4965_v57 = vpop.f32.mrf.mxu0  ;;  %v9092_v46 = vor.u32 %v10273_v20, %v9091_v50  ;;  %v2265_v58 = vpop.permute.xlu1 %2264  ;;  %6374 = vmatpush.bf16.msrb.mxu3 %v10536_v17  ;;  %v4939_v12 = vadd.f32 %v12038_v62, %v4910_v37  ;;  %v10275_v37 = vld [vmem:[#allocation3 + $0x234] sm:$0xf] }
 0x262   : > { %v4966_v19 = vadd.f32 %v4965_v57, %v4937_v43  ;;  %2427 = vst.msk [vmem:[#allocation3 + $0x24c] sm:$0xf] %vm1117_vm3, %v2265_v58  ;;  %v2271_v44 = vpop.permute.xlu2 %2270  ;;  %1648 = vrot.lane.b32.xlu2 %v1479_v61, %s10673_s17  ;;  %6347 = vmatpush.bf16.msrb.mxu2 %v10526_v8  ;;  %v10535_v43 = vld [vmem:[%s11140_s26 + $0x550] sm:$0xff]  ;;  %v3133_v58 = vld [vmem:[#allocation2 + $0x262] sm:$0xff] }
 0x263   : > { %5852 = vmatmul.bf16.gmra.mxu0 %v9088_v33  ;;  %5881 = vmatmul.bf16.gmra.mxu1 %v9092_v46  ;;  %2430 = vst.msk [vmem:[#allocation3 + $0x288] sm:$0xf] %vm1117_vm3, %v2271_v44  ;;  %v9119_v59 = vld [vmem:[#allocation3 + $0x240] sm:$0xf]  ;;  %v1919_v46 = vpack.c.bf16 %v1855_v27, %v1855_v27  ;;  %v10510_v61 = vld [vmem:[%s11140_s26 + $0x488] sm:$0xff] }
 0x264   : > { %v4995_v49 = vadd.f32 %v4994_v1, %v4966_v19  ;;  %1980 = vst.msk [vmem:[#allocation3 + $0x260] sm:$0xf] %vm668_vm2, %v1916_v10  ;;  %v10279_v22 = vld [vmem:[#allocation3 + $0x250] sm:$0xf0]  ;;  %v572_v33 = vld [vmem:[#allocation2 + $0x280] sm:$0xff]  ;;  %6315 = vmatpush.bf16.msrb.mxu1 %v10521_v40 }
 0x265   : > { %1981 = vst.msk [vmem:[#allocation3 + $0x274] sm:$0xf] %vm668_vm2, %v1917_v52  ;;  %v9120_v41 = vor.u32 %v10279_v22, %v9119_v59  ;;  %v10525_v1 = vld [vmem:[%s11140_s26 + $0x500] sm:$0xff]  ;;  %v10511_v10 = vld [vmem:[%s11140_s26 + $0x490] sm:$0xff]  ;;  %6375 = vmatpush.bf16.msrb.mxu3 %v10535_v43  ;;  %v636_v44 = vpack.c.bf16 %v572_v33, %v572_v33  ;;  %v10520_v52 = vld [vmem:[%s11140_s26 + $0x4d8] sm:$0xff] }
 0x266   : > { %7857 = vst.msk [vmem:[%s11905_s29 + $0x50] sm:$0xff] %vm249_vm0, %v4995_v49  ;;  %v7930_v55 = vsel %vm249_vm0, %v4995_v49, 0.0  ;;  %v8056_v16 = vmul.f32 %v4995_v49, %v4995_v49  ;;  %2286 = vrot.lane.b32.xlu0 %v2118_v47, %s10673_s17  ;;  %v12290_v36 = vpop.f32.mrf.mxu2  ;;  %v2057_v35 = vld [vmem:[#allocation2 + $0x362] sm:$0xff]  ;;  %6288 = vmatpush.bf16.msrb.mxu0 %v10511_v10  ;;  %v3134_v49 = vld [vmem:[#allocation2 + $0x272] sm:$0xff] }
 0x267   : > { %1650 = vrot.lane.b32.xlu1 %v1480_v7, %s10673_s17  ;;  %v7931_v60 = vadd.f32 %v7930_v55, %v7929_v48  ;;  %v12295_v20 = vpop.f32.mrf.mxu3  ;;  %520 = vst.msk [vmem:[#allocation2 + $0x371] sm:$0xff] %vm249_vm0, %v455_v21  ;;  %v2121_v19 = vpack.c.bf16 %v2057_v35, %v2057_v35  ;;  %v837_v7 = vpack.c.bf16 %v12293_v5, %v12293_v5  ;;  %v2056_v59 = vld [vmem:[#allocation2 + $0x352] sm:$0xff]  ;;  %v1214_v21 = vld [vmem:[#allocation2 + $0x282] sm:$0xff] }
 0x268   : > { %v8129_v32 = vsel %vm249_vm0, %v8056_v16, 0.0  ;;  %v2263_v9 = vpop.permute.xlu0 %2262  ;;  %v4996_v25 = vpop.f32.mrf.mxu1  ;;  %v9113_v48 = vld [vmem:[#allocation3 + $0x24c] sm:$0xf0]  ;;  %702 = vst.msk [vmem:[#allocation3 + $0x294] sm:$0xf] %vm668_vm2, %v637_v53  ;;  %6348 = vmatpush.bf16.msrb.mxu2 %v10525_v1  ;;  %6316 = vmatpush.bf16.msrb.mxu1 %v10520_v52  ;;  %v3198_v27 = vpack.c.bf16 %v3134_v49, %v3134_v49  ;;  %v1417_v35 = vld [vmem:[#allocation2 + $0x360] sm:$0xff]  ;;  %v1278_v43 = vpack.c.bf16 %v1214_v21, %v1214_v21 }
 0x269   : > { %v8130_v50 = vadd.f32 %v8129_v32, %v8128_v51  ;;  %2426 = vst.msk [vmem:[#allocation3 + $0x238] sm:$0xf] %vm1117_vm3, %v2263_v9  ;;  %v4967_v42 = vpop.f32.mrf.mxu0  ;;  %v9116_v30 = vor.u32 %v10276_v0, %v9113_v48  ;;  %v1627_v57 = vpop.permute.xlu1 %1626  ;;  %v9105_v51 = vld [vmem:[#allocation3 + $0x244] sm:$0xf0]  ;;  %v3197_v0 = vpack.c.bf16 %v3133_v58, %v3133_v58  ;;  %v10278_v3 = vld [vmem:[#allocation3 + $0x248] sm:$0xf0]  ;;  %6376 = vmatpush.bf16.msrb.mxu3 %v10534_v14 }
 0x26a   : > { %v4968_v62 = vadd.f32 %v4967_v42, %v4939_v12  ;;  %1788 = vst.msk [vmem:[#allocation3 + $0x25c] sm:$0xf] %vm1117_vm3, %v1627_v57  ;;  %v992_v47 = vpop.permute.xlu2 %991  ;;  %v9108_v22 = vor.u32 %v10275_v37, %v9105_v51  ;;  %1005 = vrot.lane.b32.xlu2 %v837_v7, %s10673_s17  ;;  %v456_v53 = vld [vmem:[%s11029_s22 + $0x168] sm:$0xff]  ;;  %6289 = vmatpush.bf16.msrb.mxu0 %v10510_v61  ;;  %v2495_v42 = vld [vmem:[#allocation2 + $0x2a0] sm:$0xff]  ;;  %v2496_v51 = vld [vmem:[#allocation2 + $0x2b0] sm:$0xff] }
 0x26b   : > { %5915 = vmatmul.bf16.gmra.mxu2 %v9116_v30  ;;  %1151 = vst.msk [vmem:[#allocation3 + $0x294] sm:$0xf] %vm1117_vm3, %v992_v47  ;;  %v10533_v30 = vld [vmem:[%s11140_s26 + $0x540] sm:$0xff]  ;;  %v2120_v58 = vpack.c.bf16 %v2056_v59, %v2056_v59  ;;  %v12346_v47 = vpack.c.bf16 %v2495_v42, %v2495_v42  ;;  %v12360_v49 = vpack.c.bf16 %v2496_v51, %v2496_v51 }
 0x26c   : > { %v4997_v17 = vadd.f32 %v4996_v25, %v4968_v62  ;;  %9287 = vmatmul.msk.bf16.gmra.mxu3 %vm249_vm0, %v9120_v41  ;;  %1983 = vst.msk [vmem:[#allocation3 + $0x29c] sm:$0xf] %vm668_vm2, %v1919_v46  ;;  %v10519_v25 = vld [vmem:[%s11140_s26 + $0x4d0] sm:$0xff]  ;;  %v10509_v57 = vld [vmem:[%s11140_s26 + $0x480] sm:$0xff]  ;;  %v10518_v62 = vld [vmem:[%s11140_s26 + $0x4c8] sm:$0xff] }
 0x26d   : > { %701 = vst.msk [vmem:[#allocation3 + $0x280] sm:$0xf] %vm668_vm2, %v636_v44  ;;  %6317 = vmatpush.bf16.msrb.mxu1 %v10519_v25  ;;  %6377 = vmatpush.bf16.msrb.mxu3 %v10533_v30  ;;  %v775_v21 = vld [vmem:[#allocation2 + $0x341] sm:$0xff] }
 0x26e   : > { %7858 = vst.msk [vmem:[%s11905_s29 + $0x58] sm:$0xff] %vm249_vm0, %v4997_v17  ;;  %v7932_v8 = vsel %vm249_vm0, %v4997_v17, 0.0  ;;  %v8057_v39 = vmul.f32 %v4997_v17, %v4997_v17  ;;  %1007 = vrot.lane.b32.xlu0 %v838_v6, %s10673_s17  ;;  %v12325_v28 = vpop.f32.mrf.mxu2  ;;  %v1418_v5 = vld [vmem:[#allocation2 + $0x370] sm:$0xff]  ;;  %v4915_v6 = vadd.f32 %v12103_v2, %v12115_v63  ;;  %6290 = vmatpush.bf16.msrb.mxu0 %v10509_v57  ;;  %v10281_v2 = vld [vmem:[#allocation3 + $0x264] sm:$0xf] }
 0x26f   : > { %2292 = vrot.lane.b32.xlu1 %v2121_v19, %s10673_s17  ;;  %v7933_v55 = vadd.f32 %v7932_v8, %v7931_v60  ;;  %v12328_v16 = vpop.f32.mrf.mxu3  ;;  %v4942_v60 = vadd.f32 %v12077_v23, %v4913_v38  ;;  %3261 = vst.msk [vmem:[#allocation3 + $0x268] sm:$0xf] %vm668_vm2, %v3197_v0  ;;  %v1482_v23 = vpack.c.bf16 %v1418_v5, %v1418_v5  ;;  %v1857_v63 = vld [vmem:[#allocation2 + $0x2c1] sm:$0xff]  ;;  %v776_v17 = vld [vmem:[#allocation2 + $0x351] sm:$0xff] }
 0x270   : > { %v8131_v33 = vsel %vm249_vm0, %v8057_v39, 0.0  ;;  %v2910_v40 = vpop.permute.xlu0 %2909  ;;  %v4999_v32 = vpop.f32.mrf.mxu1  ;;  %v9111_v9 = vld [vmem:[#allocation3 + $0x238] sm:$0xf]  ;;  %3262 = vst.msk [vmem:[#allocation3 + $0x27c] sm:$0xf] %vm668_vm2, %v3198_v27  ;;  %v10517_v0 = vld [vmem:[%s11140_s26 + $0x4c0] sm:$0xff] }
 0x271   : > { %v8132_v12 = vadd.f32 %v8131_v33, %v8130_v50  ;;  %3070 = vst.msk [vmem:[#allocation3 + $0x278] sm:$0xf] %vm1117_vm3, %v2910_v40  ;;  %v4970_v48 = vpop.f32.mrf.mxu0  ;;  %v9112_v41 = vor.u32 %v10278_v3, %v9111_v9  ;;  %v2269_v1 = vpop.permute.xlu1 %2268  ;;  %v1481_v50 = vpack.c.bf16 %v1417_v35, %v1417_v35  ;;  %6318 = vmatpush.bf16.msrb.mxu1 %v10518_v62  ;;  %v457_v35 = vld [vmem:[%s11029_s22 + $0x170] sm:$0xff] }
 0x272   : > { %v4971_v46 = vadd.f32 %v4970_v48, %v4942_v60  ;;  %2429 = vst.msk [vmem:[#allocation3 + $0x274] sm:$0xf] %vm1117_vm3, %v2269_v1  ;;  %v1631_v10 = vpop.permute.xlu2 %1630  ;;  %v4944_v3 = vadd.f32 %v12108_v4, %v4915_v6  ;;  %v1215_v33 = vld [vmem:[#allocation2 + $0x292] sm:$0xff]  ;;  %v4918_v48 = vadd.f32 %v12133_v26, %v12140_v45  ;;  %v10280_v1 = vld [vmem:[#allocation3 + $0x25c] sm:$0xf] }
 0x273   : > { %5857 = vmatmul.bf16.gmra.mxu0 %v9108_v22  ;;  %5886 = vmatmul.bf16.gmra.mxu1 %v9112_v41  ;;  %521 = vst.msk [vmem:[#allocation2 + $0x381] sm:$0xff] %vm249_vm0, %v456_v53  ;;  %v1921_v53 = vpack.c.bf16 %v1857_v63, %v1857_v63  ;;  %v1279_v30 = vpack.c.bf16 %v1215_v33, %v1215_v33  ;;  %v1856_v57 = vld [vmem:[#allocation2 + $0x2b1] sm:$0xff] }
 0x274   : > { %v5000_v19 = vadd.f32 %v4999_v32, %v4971_v46  ;;  %1342 = vst.msk [vmem:[#allocation3 + $0x284] sm:$0xf] %vm668_vm2, %v1278_v43  ;;  %1652 = vrot.lane.b32.xlu2 %v1481_v50, %s10673_s17  ;;  %v12369_v32 = vpack.c.bf16 %v776_v17, %v776_v17  ;;  %v9125_v43 = vld [vmem:[#allocation3 + $0x26c] sm:$0xf0] }
 0x275   : > { %1790 = vst.msk [vmem:[#allocation3 + $0x284] sm:$0xf] %vm1117_vm3, %v1631_v10  ;;  %6319 = vmatpush.bf16.msrb.mxu1 %v10517_v0  ;;  %v9128_v62 = vor.u32 %v10280_v1, %v9125_v43  ;;  %v2058_v6 = vld [vmem:[#allocation2 + $0x372] sm:$0xff] }
 0x276   : > { %7859 = vst.msk [vmem:[%s11905_s29 + $0x60] sm:$0xff] %vm249_vm0, %v5000_v19  ;;  %v7934_v7 = vsel %vm249_vm0, %v5000_v19, 0.0  ;;  %v8058_v44 = vmul.f32 %v5000_v19, %v5000_v19  ;;  %2290 = vrot.lane.b32.xlu0 %v2120_v58, %s10673_s17  ;;  %v12353_v61 = vpop.f32.mrf.mxu2  ;;  %v9139_v37 = vld [vmem:[#allocation3 + $0x268] sm:$0xf]  ;;  %v1920_v19 = vpack.c.bf16 %v1856_v57, %v1856_v57 }
 0x277   : > { %1654 = vrot.lane.b32.xlu1 %v1482_v23, %s10673_s17  ;;  %v7935_v52 = vadd.f32 %v7934_v7, %v7933_v55  ;;  %v12356_v38 = vpop.f32.mrf.mxu3  ;;  %2623 = vst.msk [vmem:[#allocation3 + $0x28c] sm:$0xf] %vm668_vm2, %v12346_v47  ;;  %v10284_v4 = vld [vmem:[#allocation3 + $0x278] sm:$0xf0]  ;;  %v2497_v23 = vld [vmem:[#allocation2 + $0x2c0] sm:$0xff] }
 0x278   : > { %v8133_v14 = vsel %vm249_vm0, %v8058_v44, 0.0  ;;  %v2267_v8 = vpop.permute.xlu0 %2266  ;;  %v5001_v39 = vpop.f32.mrf.mxu1  ;;  %v9133_v59 = vld [vmem:[#allocation3 + $0x274] sm:$0xf0]  ;;  %v9140_v9 = vor.u32 %v10284_v4, %v9139_v37  ;;  %2624 = vst.msk [vmem:[#allocation3 + $0x2a0] sm:$0xf] %vm668_vm2, %v12360_v49 }
 0x279   : > { %v8134_v55 = vadd.f32 %v8133_v14, %v8132_v12  ;;  %2428 = vst.msk [vmem:[#allocation3 + $0x260] sm:$0xf] %vm1117_vm3, %v2267_v8  ;;  %v4972_v22 = vpop.f32.mrf.mxu0  ;;  %v9136_v5 = vor.u32 %v10281_v2, %v9133_v59  ;;  %v990_v27 = vpop.permute.xlu1 %989  ;;  %v12374_v12 = vpack.c.bf16 %v775_v21, %v775_v21  ;;  %v10283_v45 = vld [vmem:[#allocation3 + $0x270] sm:$0xf0]  ;;  %v4947_v2 = vadd.f32 %v12137_v29, %v4918_v48  ;;  %v458_v8 = vld [vmem:[%s11029_s22 + $0x178] sm:$0xff] }
 0x27a   : > { %v4973_v40 = vadd.f32 %v4972_v22, %v4944_v3  ;;  %1150 = vst.msk [vmem:[#allocation3 + $0x280] sm:$0xf] %vm1117_vm3, %v990_v27  ;;  %v2277_v60 = vpop.permute.xlu2 %2276  ;;  %v2059_v25 = vld [vmem:[#allocation2 + $0x382] sm:$0xff]  ;;  %v2122_v59 = vpack.c.bf16 %v2058_v6, %v2058_v6  ;;  %v4920_v22 = vadd.f32 %v12158_v24, %v12170_v54 }
 0x27b   : > { %5920 = vmatmul.bf16.gmra.mxu2 %v9136_v5  ;;  %v2123_v42 = vpack.c.bf16 %v2059_v25, %v2059_v25  ;;  %522 = vst.msk [vmem:[#allocation2 + $0x391] sm:$0xff] %vm249_vm0, %v457_v35  ;;  %v1217_v35 = vld [vmem:[#allocation2 + $0x2b2] sm:$0xff]  ;;  %v9299_v4 = vld [vmem:[#allocation3 + $0x288] sm:$0xf] }
 0x27c   : > { %v5002_v41 = vadd.f32 %v5001_v39, %v4973_v40  ;;  %9288 = vmatmul.msk.bf16.gmra.mxu3 %vm249_vm0, %v9140_v9  ;;  %1985 = vst.msk [vmem:[#allocation3 + $0x2c4] sm:$0xf] %vm668_vm2, %v1921_v53  ;;  %1009 = vrot.lane.b32.xlu2 %v12374_v12, %s10673_s17  ;;  %v12399_v39 = vpack.c.bf16 %v2497_v23, %v2497_v23  ;;  %v777_v9 = vld [vmem:[#allocation2 + $0x361] sm:$0xff] }
 0x27d   : > { %2433 = vst.msk [vmem:[#allocation3 + $0x2c4] sm:$0xf] %vm1117_vm3, %v2277_v60  ;;  %v778_v60 = vld [vmem:[#allocation2 + $0x371] sm:$0xff]  ;;  %v4949_v1 = vadd.f32 %v12165_v11, %v4920_v22  ;;  %v1216_v23 = vld [vmem:[#allocation2 + $0x2a2] sm:$0xff] }
 0x27e   : > { %7860 = vst.msk [vmem:[%s11905_s29 + $0x68] sm:$0xff] %vm249_vm0, %v5002_v41  ;;  %v7936_v46 = vsel %vm249_vm0, %v5002_v41, 0.0  ;;  %v8059_v58 = vmul.f32 %v5002_v41, %v5002_v41  ;;  %1011 = vrot.lane.b32.xlu0 %v12369_v32, %s10673_s17  ;;  %v12386_v26 = vpop.f32.mrf.mxu2 }
 0x27f   : > { %2296 = vrot.lane.b32.xlu1 %v2123_v42, %s10673_s17  ;;  %v7937_v10 = vadd.f32 %v7936_v46, %v7935_v52  ;;  %v12389_v50 = vpop.f32.mrf.mxu3  ;;  %1343 = vst.msk [vmem:[#allocation3 + $0x298] sm:$0xf] %vm668_vm2, %v1279_v30  ;;  %v1419_v52 = vld [vmem:[#allocation2 + $0x380] sm:$0xff]  ;;  %v12423_v42 = vpack.c.bf16 %v1217_v35, %v1217_v35  ;;  %v2498_v30 = vld [vmem:[#allocation2 + $0x2d0] sm:$0xff] }
 0x280   : > { %v8135_v51 = vsel %vm249_vm0, %v8059_v58, 0.0  ;;  %v2273_v7 = vpop.permute.xlu0 %2272  ;;  %v5004_v44 = vpop.f32.mrf.mxu1  ;;  %v9131_v63 = vld [vmem:[#allocation3 + $0x260] sm:$0xf]  ;;  %1984 = vst.msk [vmem:[#allocation3 + $0x2b0] sm:$0xf] %vm668_vm2, %v1920_v19  ;;  %v12433_v19 = vpack.c.bf16 %v2498_v30, %v2498_v30  ;;  %v10544_v30 = vld [vmem:[%s11140_s26 + $0x598] sm:$0xff] }
 0x281   : > { %v8136_v17 = vadd.f32 %v8135_v51, %v8134_v55  ;;  %2431 = vst.msk [vmem:[#allocation3 + $0x29c] sm:$0xf] %vm1117_vm3, %v2273_v7  ;;  %v4975_v37 = vpop.f32.mrf.mxu0  ;;  %v9132_v0 = vor.u32 %v10283_v45, %v9131_v63  ;;  %v2914_v14 = vpop.permute.xlu1 %2913  ;;  %v1483_v55 = vpack.c.bf16 %v1419_v52, %v1419_v52  ;;  %v9291_v7 = vld [vmem:[#allocation3 + $0x280] sm:$0xf]  ;;  %v12437_v63 = vpack.c.bf16 %v1216_v23, %v1216_v23  ;;  %v10552_v23 = vld [vmem:[%s11140_s26 + $0x5d8] sm:$0xff] }
 0x282   : > { %v4976_v3 = vadd.f32 %v4975_v37, %v4947_v2  ;;  %3072 = vst.msk [vmem:[#allocation3 + $0x2a0] sm:$0xf] %vm1117_vm3, %v2914_v14  ;;  %v2916_v21 = vpop.permute.xlu2 %2915  ;;  %v1420_v29 = vld [vmem:[#allocation2 + $0x390] sm:$0xff]  ;;  %6403 = vmatpush.bf16.msra.mxu0 %v10544_v30  ;;  %6756 = vmatpush.bf16.msra.mxu1 %v10552_v23 }
 0x283   : > { %5862 = vmatmul.bf16.gmra.mxu0 %v9128_v62  ;;  %5891 = vmatmul.bf16.gmra.mxu1 %v9132_v0  ;;  %v1484_v27 = vpack.c.bf16 %v1420_v29, %v1420_v29  ;;  %523 = vst.msk [vmem:[#allocation2 + $0x3a1] sm:$0xff] %vm249_vm0, %v458_v8  ;;  %v12426_v62 = vpack.c.bf16 %v778_v60, %v778_v60  ;;  %v781_v0 = vld [vmem:[#allocation2 + $0x3c1] sm:$0xff]  ;;  %v1858_v29 = vld [vmem:[#allocation2 + $0x2d1] sm:$0xff] }
 0x284   : > { %v5005_v5 = vadd.f32 %v5004_v44, %v4976_v3  ;;  %2625 = vst.msk [vmem:[#allocation3 + $0x2b4] sm:$0xf] %vm668_vm2, %v12399_v39  ;;  %1656 = vrot.lane.b32.xlu2 %v1483_v55, %s10673_s17  ;;  %v10287_v44 = vld [vmem:[#allocation3 + $0x290] sm:$0xf0]  ;;  %v5376_v55 = vadd.f32 %v12188_v31, %v12184_v18  ;;  %v460_v18 = vld [vmem:[%s11029_s22 + $0x188] sm:$0xff] }
 0x285   : > { %3073 = vst.msk [vmem:[#allocation3 + $0x2b4] sm:$0xf] %vm1117_vm3, %v2916_v21  ;;  %v9292_v3 = vor.u32 %v10287_v44, %v9291_v7  ;;  %v459_v21 = vld [vmem:[%s11029_s22 + $0x180] sm:$0xff]  ;;  %v1860_v30 = vld [vmem:[#allocation2 + $0x2f1] sm:$0xff] }
 0x286   : > { %7861 = vst.msk [vmem:[%s11905_s29 + $0x70] sm:$0xff] %vm249_vm0, %v5005_v5  ;;  %v7938_v53 = vsel %vm249_vm0, %v5005_v5, 0.0  ;;  %v8060_v33 = vmul.f32 %v5005_v5, %v5005_v5  ;;  %2294 = vrot.lane.b32.xlu0 %v2122_v59, %s10673_s17  ;;  %v12412_v40 = vpop.f32.mrf.mxu2  ;;  %v2060_v59 = vld [vmem:[#allocation2 + $0x392] sm:$0xff]  ;;  %v10285_v7 = vld [vmem:[#allocation3 + $0x284] sm:$0xf] }
 0x287   : > { %1658 = vrot.lane.b32.xlu1 %v1484_v27, %s10673_s17  ;;  %v7939_v24 = vadd.f32 %v7938_v53, %v7937_v10  ;;  %v12415_v54 = vpop.f32.mrf.mxu3  ;;  %703 = vst.msk [vmem:[#allocation3 + $0x2a8] sm:$0xf] %vm668_vm2, %v12346_v47  ;;  %v12431_v47 = vpack.c.bf16 %v777_v9, %v777_v9  ;;  %v2124_v9 = vpack.c.bf16 %v2060_v59, %v2060_v59 }
 0x288   : > { %v8137_v25 = vsel %vm249_vm0, %v8060_v33, 0.0  ;;  %v2912_v48 = vpop.permute.xlu0 %2911  ;;  %v5006_v41 = vpop.f32.mrf.mxu1  ;;  %v10288_v43 = vld [vmem:[#allocation3 + $0x298] sm:$0xf0]  ;;  %704 = vst.msk [vmem:[#allocation3 + $0x2bc] sm:$0xf] %vm668_vm2, %v12360_v49 }
 0x289   : > { %v8138_v57 = vadd.f32 %v8137_v25, %v8136_v17  ;;  %3071 = vst.msk [vmem:[#allocation3 + $0x28c] sm:$0xf] %vm1117_vm3, %v2912_v48  ;;  %v4977_v46 = vpop.f32.mrf.mxu0  ;;  %v9300_v58 = vor.u32 %v10288_v43, %v9299_v4  ;;  %v2275_v45 = vpop.permute.xlu1 %2274  ;;  %v9301_v37 = vld [vmem:[#allocation3 + $0x29c] sm:$0xf0]  ;;  %v10293_v25 = vld [vmem:[#allocation3 + $0x2c0] sm:$0xf0]  ;;  %v845_v48 = vpack.c.bf16 %v781_v0, %v781_v0 }
 0x28a   : > { %v4978_v10 = vadd.f32 %v4977_v46, %v4949_v1  ;;  %2432 = vst.msk [vmem:[#allocation3 + $0x2b0] sm:$0xf] %vm1117_vm3, %v2275_v45  ;;  %v1637_v11 = vpop.permute.xlu2 %1636  ;;  %v2061_v6 = vld [vmem:[#allocation2 + $0x3a2] sm:$0xff]  ;;  %v1922_v1 = vpack.c.bf16 %v1858_v29, %v1858_v29  ;;  %v10560_v43 = vld [vmem:[%s11140_s26 + $0x618] sm:$0xff] }
 0x28b   : > { %6349 = vmatmul.bf16.vlgmr.msrb.gmra.mxu2 %v9300_v58  ;;  %v2125_v2 = vpack.c.bf16 %v2061_v6, %v2061_v6  ;;  %1345 = vst.msk [vmem:[#allocation3 + $0x2c0] sm:$0xf] %vm668_vm2, %v12423_v42  ;;  %v1421_v53 = vld [vmem:[#allocation2 + $0x3a0] sm:$0xff] }
 0x28c   : > { %v5007_v51 = vadd.f32 %v5006_v41, %v4978_v10  ;;  %1793 = vst.msk [vmem:[#allocation3 + $0x2c0] sm:$0xf] %vm1117_vm3, %v1637_v11  ;;  %1013 = vrot.lane.b32.xlu2 %v12431_v47, %s10673_s17  ;;  %v1485_v41 = vpack.c.bf16 %v1421_v53, %v1421_v53  ;;  %v1859_v45 = vld [vmem:[#allocation2 + $0x2e1] sm:$0xff]  ;;  %6785 = vmatpush.bf16.msra.mxu2 %v10560_v43  ;;  %v2500_v11 = vld [vmem:[#allocation2 + $0x2f0] sm:$0xff] }
 0x28d   : > { %2626 = vst.msk [vmem:[#allocation3 + $0x2c8] sm:$0xf] %vm668_vm2, %v12433_v19  ;;  %v779_v29 = vld [vmem:[#allocation2 + $0x381] sm:$0xff] }
 0x28e   : > { %7862 = vst.msk [vmem:[%s11905_s29 + $0x78] sm:$0xff] %vm249_vm0, %v5007_v51  ;;  %v7940_v49 = vsel %vm249_vm0, %v5007_v51, 0.0  ;;  %v8061_v52 = vmul.f32 %v5007_v51, %v5007_v51  ;;  %1015 = vrot.lane.b32.xlu0 %v12426_v62, %s10673_s17  ;;  %v5462_v17 = vpop.f32.mrf.mxu2 }
 0x28f   : > { %2300 = vrot.lane.b32.xlu1 %v2125_v2, %s10673_s17  ;;  %v12446_v14 = vadd.f32 %v7940_v49, %v7939_v24  ;;  %v12448_v8 = vpop.f32.mrf.mxu3  ;;  %1344 = vst.msk [vmem:[#allocation3 + $0x2ac] sm:$0xf] %vm668_vm2, %v12437_v63  ;;  %v780_v49 = vld [vmem:[#allocation2 + $0x391] sm:$0xff] }
 0x290   : > { %v8139_v22 = vsel %vm249_vm0, %v8061_v52, 0.0  ;;  %v1633_v5 = vpop.permute.xlu0 %1632  ;;  %v5433_v27 = vpop.f32.mrf.mxu1  ;;  %v10286_v35 = vld [vmem:[#allocation3 + $0x28c] sm:$0xf]  ;;  %524 = vst.msk [vmem:[#allocation2 + $0x3d1] sm:$0xff] %vm249_vm0, %v459_v21  ;;  %v2499_v52 = vld [vmem:[#allocation2 + $0x2e0] sm:$0xff]  ;;  %v12490_v53 = vpack.c.bf16 %v780_v49, %v780_v49 }
 0x291   : > { %v12460_v33 = vadd.f32 %v8139_v22, %v8138_v57  ;;  %1791 = vst.msk [vmem:[#allocation3 + $0x298] sm:$0xf] %vm1117_vm3, %v1633_v5  ;;  %v5404_v4 = vpop.f32.mrf.mxu0  ;;  %v9304_v24 = vor.u32 %v10286_v35, %v9301_v37  ;;  %v996_v60 = vpop.permute.xlu1 %995  ;;  %v10568_v57 = vld [vmem:[%s11140_s26 + $0x658] sm:$0xff]  ;;  %v9319_v58 = vld [vmem:[#allocation3 + $0x2b0] sm:$0xf] }
 0x292   : > { %v5405_v31 = vadd.f32 %v5404_v4, %v5376_v55  ;;  %1153 = vst.msk [vmem:[#allocation3 + $0x2bc] sm:$0xf] %vm1117_vm3, %v996_v60  ;;  %v998_v10 = vpop.permute.xlu2 %997  ;;  %v9320_v2 = vor.u32 %v10293_v25, %v9319_v58  ;;  %6814 = vmatpush.bf16.msra.mxu3 %v10568_v57  ;;  %v12485_v55 = vpack.c.bf16 %v2500_v11, %v2500_v11  ;;  %v10567_v25 = vld [vmem:[%s11140_s26 + $0x650] sm:$0xff]  ;;  %v1218_v57 = vld [vmem:[#allocation2 + $0x2c2] sm:$0xff] }
 0x293   : > { %6291 = vmatmul.bf16.vlgmr.msrb.gmra.mxu0 %v9292_v3  ;;  %6378 = vmatmul.bf16.vlgmr.msrb.gmra.mxu3 %v9304_v24  ;;  %525 = vst.msk [vmem:[#allocation2 + $0x3e1] sm:$0xff] %vm249_vm0, %v460_v18  ;;  %v12493_v4 = vpack.c.bf16 %v2499_v52, %v2499_v52  ;;  %v12497_v60 = vpack.c.bf16 %v779_v29, %v779_v29  ;;  %v10559_v18 = vld [vmem:[%s11140_s26 + $0x610] sm:$0xff] }
 0x294   : > { %v5434_v46 = vadd.f32 %v5433_v27, %v5405_v31  ;;  %705 = vst.msk [vmem:[#allocation3 + $0x2d0] sm:$0xf] %vm668_vm2, %v12399_v39  ;;  %1660 = vrot.lane.b32.xlu2 %v1485_v41, %s10673_s17  ;;  %v1923_v39 = vpack.c.bf16 %v1859_v45, %v1859_v45  ;;  %v461_v41 = vld [vmem:[%s11029_s22 + $0x190] sm:$0xff]  ;;  %6786 = vmatpush.bf16.msra.mxu2 %v10559_v18 }
 0x295   : > { %1154 = vst.msk [vmem:[#allocation3 + $0x2d0] sm:$0xf] %vm1117_vm3, %v998_v10  ;;  %v5381_v45 = vadd.f32 %v12256_v34, %v12251_v56  ;;  %v462_v56 = vld [vmem:[%s11029_s22 + $0x198] sm:$0xff]  ;;  %v1924_v34 = vpack.c.bf16 %v1860_v30, %v1860_v30  ;;  %v5383_v30 = vadd.f32 %v12295_v20, %v12290_v36 }
 0x296   : > { %v5463_v6 = vadd.f32 %v5462_v17, %v5434_v46  ;;  %2298 = vrot.lane.b32.xlu0 %v2124_v9, %s10673_s17  ;;  %v5464_v51 = vpop.f32.mrf.mxu2  ;;  %1986 = vst.msk [vmem:[#allocation3 + $0x2d8] sm:$0xf] %vm668_vm2, %v1922_v1  ;;  %v5378_v17 = vadd.f32 %v12217_v13, %v12213_v15  ;;  %6815 = vmatpush.bf16.msra.mxu3 %v10567_v25 }
 0x297   : > { %1021 = vrot.lane.b32.xlu1 %v845_v48, %s10673_s17  ;;  %v12476_v44 = vpop.f32.mrf.mxu3  ;;  %1987 = vst.msk [vmem:[#allocation3 + $0x2ec] sm:$0xf] %vm668_vm2, %v1923_v39  ;;  %v10551_v48 = vld [vmem:[%s11140_s26 + $0x5d0] sm:$0xff] }
 0x298   : > { %7863 = vst.msk [vmem:[%s11905_s29 + $0x80] sm:$0xff] %vm249_vm0, %v5463_v6  ;;  %v7942_v37 = vsel %vm249_vm0, %v5463_v6, 0.0  ;;  %v8062_v0 = vmul.f32 %v5463_v6, %v5463_v6  ;;  %v994_v3 = vpop.permute.xlu0 %993  ;;  %v5435_v59 = vpop.f32.mrf.mxu1  ;;  %v9293_v21 = vld [vmem:[#allocation3 + $0x294] sm:$0xf0]  ;;  %v1422_v58 = vld [vmem:[#allocation2 + $0x3d0] sm:$0xff]  ;;  %6757 = vmatpush.bf16.msra.mxu1 %v10551_v48 }
 0x299   : > { %v7943_v22 = vadd.f32 %v7942_v37, %v12446_v14  ;;  %1152 = vst.msk [vmem:[#allocation3 + $0x2a8] sm:$0xf] %vm1117_vm3, %v994_v3  ;;  %v5406_v5 = vpop.f32.mrf.mxu0  ;;  %v9296_v27 = vor.u32 %v10285_v7, %v9293_v21  ;;  %v1635_v15 = vpop.permute.xlu1 %1634  ;;  %v10292_v43 = vld [vmem:[#allocation3 + $0x2b8] sm:$0xf0]  ;;  %v782_v7 = vld [vmem:[#allocation2 + $0x3d1] sm:$0xff]  ;;  %v12524_v37 = vpack.c.bf16 %v1218_v57, %v1218_v57 }
 0x29a   : > { %v8141_v13 = vsel %vm249_vm0, %v8062_v0, 0.0  ;;  %v5407_v35 = vadd.f32 %v5406_v5, %v5378_v17  ;;  %1792 = vst.msk [vmem:[#allocation3 + $0x2ac] sm:$0xf] %vm1117_vm3, %v1635_v15  ;;  %v1423_v24 = vld [vmem:[#allocation2 + $0x3e0] sm:$0xff]  ;;  %v846_v5 = vpack.c.bf16 %v782_v7, %v782_v7  ;;  %v10558_v15 = vld [vmem:[%s11140_s26 + $0x608] sm:$0xff] }
 0x29b   : > { %v8142_v14 = vadd.f32 %v8141_v13, %v12460_v33  ;;  %6320 = vmatmul.bf16.vlgmr.msrb.gmra.mxu1 %v9296_v27  ;;  %6354 = vmatmul.bf16.gmra.mxu2 %v9320_v2  ;;  %v1487_v9 = vpack.c.bf16 %v1423_v24, %v1423_v24  ;;  %2628 = vst.msk [vmem:[#allocation3 + $0x2f0] sm:$0xf] %vm668_vm2, %v12485_v55  ;;  %v1219_v2 = vld [vmem:[#allocation2 + $0x2d2] sm:$0xff] }
 0x29c   : > { %v5436_v31 = vadd.f32 %v5435_v59, %v5407_v35  ;;  %706 = vst.msk [vmem:[#allocation3 + $0x2e4] sm:$0xf] %vm668_vm2, %v12433_v19  ;;  %1017 = vrot.lane.b32.xlu2 %v12497_v60, %s10673_s17  ;;  %v783_v19 = vld [vmem:[#allocation2 + $0x3e1] sm:$0xff]  ;;  %v1486_v59 = vpack.c.bf16 %v1422_v58, %v1422_v58  ;;  %v2922_v29 = vpop.permute.xlu2 %2921  ;;  %v12529_v27 = vpack.c.bf16 %v1219_v2, %v1219_v2  ;;  %v10543_v13 = vld [vmem:[%s11140_s26 + $0x590] sm:$0xff] }
 0x29d   : > { %2627 = vst.msk [vmem:[#allocation3 + $0x2dc] sm:$0xf] %vm668_vm2, %v12493_v4  ;;  %v847_v21 = vpack.c.bf16 %v783_v19, %v783_v19  ;;  %v10566_v35 = vld [vmem:[%s11140_s26 + $0x648] sm:$0xff]  ;;  %6787 = vmatpush.bf16.msra.mxu2 %v10558_v15  ;;  %6404 = vmatpush.bf16.msra.mxu0 %v10543_v13  ;;  %v10291_v48 = vld [vmem:[#allocation3 + $0x2b4] sm:$0xf]  ;;  %v2501_v15 = vld [vmem:[#allocation2 + $0x300] sm:$0xff] }
 0x29e   : > { %v5465_v33 = vadd.f32 %v5464_v51, %v5436_v31  ;;  %1019 = vrot.lane.b32.xlu0 %v12490_v53, %s10673_s17  ;;  %v5467_v1 = vpop.f32.mrf.mxu2  ;;  %526 = vst.msk [vmem:[#allocation2 + $0x3f1] sm:$0xff] %vm249_vm0, %v461_v41  ;;  %v9313_v31 = vld [vmem:[#allocation3 + $0x2bc] sm:$0xf0]  ;;  %6816 = vmatpush.bf16.msra.mxu3 %v10566_v35 }
 0x29f   : > { %1664 = vrot.lane.b32.xlu1 %v1487_v9, %s10673_s17  ;;  %v12512_v46 = vpop.f32.mrf.mxu3  ;;  %3076 = vst.msk [vmem:[#allocation3 + $0x2f0] sm:$0xf] %vm1117_vm3, %v2922_v29  ;;  %v10550_v9 = vld [vmem:[%s11140_s26 + $0x5c8] sm:$0xff] }
 0x2a0   : > { %7864 = vst.msk [vmem:[%s11905_s29 + $0x88] sm:$0xff] %vm249_vm0, %v5465_v33  ;;  %v7944_v23 = vsel %vm249_vm0, %v5465_v33, 0.0  ;;  %v8063_v10 = vmul.f32 %v5465_v33, %v5465_v33  ;;  %v2918_v11 = vpop.permute.xlu0 %2917  ;;  %v5438_v6 = vpop.f32.mrf.mxu1  ;;  %v9311_v51 = vld [vmem:[#allocation3 + $0x2a8] sm:$0xf]  ;;  %6758 = vmatpush.bf16.msra.mxu1 %v10550_v9 }
 0x2a1   : > { %v7945_v49 = vadd.f32 %v7944_v23, %v7943_v22  ;;  %3074 = vst.msk [vmem:[#allocation3 + $0x2c8] sm:$0xf] %vm1117_vm3, %v2918_v11  ;;  %v5409_v39 = vpop.f32.mrf.mxu0  ;;  %v9312_v52 = vor.u32 %v10292_v43, %v9311_v51  ;;  %v2281_v17 = vpop.permute.xlu1 %2280  ;;  %v10290_v18 = vld [vmem:[#allocation3 + $0x2ac] sm:$0xf]  ;;  %v1861_v41 = vld [vmem:[#allocation2 + $0x301] sm:$0xff] }
 0x2a2   : > { %v8143_v0 = vsel %vm249_vm0, %v8063_v10, 0.0  ;;  %v5410_v3 = vadd.f32 %v5409_v39, %v5381_v45  ;;  %2435 = vst.msk [vmem:[#allocation3 + $0x2ec] sm:$0xf] %vm1117_vm3, %v2281_v17  ;;  %v9316_v43 = vor.u32 %v10290_v18, %v9313_v31  ;;  %v1925_v7 = vpack.c.bf16 %v1861_v41, %v1861_v41  ;;  %v10565_v39 = vld [vmem:[%s11140_s26 + $0x640] sm:$0xff]  ;;  %v10564_v41 = vld [vmem:[%s11140_s26 + $0x638] sm:$0xff] }
 0x2a3   : > { %v8144_v22 = vadd.f32 %v8143_v0, %v8142_v14  ;;  %6296 = vmatmul.bf16.gmra.mxu0 %v9312_v52  ;;  %527 = vst.msk [vmem:[#allocation2 + $0x401] sm:$0xff] %vm249_vm0, %v462_v56  ;;  %v10549_v17 = vld [vmem:[%s11140_s26 + $0x5c0] sm:$0xff]  ;;  %6817 = vmatpush.bf16.msra.mxu3 %v10565_v39  ;;  %v10563_v39 = vld [vmem:[%s11140_s26 + $0x630] sm:$0xff] }
 0x2a4   : > { %v5439_v24 = vadd.f32 %v5438_v6, %v5410_v3  ;;  %1988 = vst.msk [vmem:[#allocation3 + $0x300] sm:$0xf] %vm668_vm2, %v1924_v34  ;;  %1023 = vrot.lane.b32.xlu2 %v846_v5, %s10673_s17  ;;  %v2283_v2 = vpop.permute.xlu2 %2282  ;;  %v463_v0 = vld [vmem:[%s11029_s22 + $0x1a0] sm:$0xff]  ;;  %v10556_v3 = vld [vmem:[%s11140_s26 + $0x5f8] sm:$0xff]  ;;  %6759 = vmatpush.bf16.msra.mxu1 %v10549_v17  ;;  %v10547_v17 = vld [vmem:[%s11140_s26 + $0x5b0] sm:$0xff] }
 0x2a5   : > { %1346 = vst.msk [vmem:[#allocation3 + $0x2d4] sm:$0xf] %vm668_vm2, %v12524_v37  ;;  %v1220_v5 = vld [vmem:[#allocation2 + $0x2e2] sm:$0xff] }
 0x2a6   : > { %v5468_v14 = vadd.f32 %v5467_v1, %v5439_v24  ;;  %1662 = vrot.lane.b32.xlu0 %v1486_v59, %s10673_s17  ;;  %v5469_v25 = vpop.f32.mrf.mxu2  ;;  %1347 = vst.msk [vmem:[#allocation3 + $0x2e8] sm:$0xf] %vm668_vm2, %v12529_v27  ;;  %v10557_v1 = vld [vmem:[%s11140_s26 + $0x600] sm:$0xff]  ;;  %v1424_v59 = vld [vmem:[#allocation2 + $0x3f0] sm:$0xff] }
 0x2a7   : > { %1025 = vrot.lane.b32.xlu1 %v847_v21, %s10673_s17  ;;  %v12541_v33 = vpop.f32.mrf.mxu3  ;;  %6788 = vmatpush.bf16.msra.mxu2 %v10557_v1  ;;  %2436 = vst.msk [vmem:[#allocation3 + $0x300] sm:$0xf] %vm1117_vm3, %v2283_v2  ;;  %v10555_v24 = vld [vmem:[%s11140_s26 + $0x5f0] sm:$0xff] }
 0x2a8   : > { %7865 = vst.msk [vmem:[%s11905_s29 + $0x90] sm:$0xff] %vm249_vm0, %v5468_v14  ;;  %v7946_v57 = vsel %vm249_vm0, %v5468_v14, 0.0  ;;  %v8064_v58 = vmul.f32 %v5468_v14, %v5468_v14  ;;  %v2279_v19 = vpop.permute.xlu0 %2278  ;;  %v5440_v45 = vpop.f32.mrf.mxu1  ;;  %v9321_v23 = vld [vmem:[#allocation3 + $0x2c4] sm:$0xf0]  ;;  %6818 = vmatpush.bf16.msra.mxu3 %v10564_v41 }
 0x2a9   : > { %v7947_v10 = vadd.f32 %v7946_v57, %v7945_v49  ;;  %2434 = vst.msk [vmem:[#allocation3 + $0x2d8] sm:$0xf] %vm1117_vm3, %v2279_v19  ;;  %v5411_v11 = vpop.f32.mrf.mxu0  ;;  %v9324_v6 = vor.u32 %v10291_v48, %v9321_v23  ;;  %v2920_v51 = vpop.permute.xlu1 %2919  ;;  %v10542_v48 = vld [vmem:[%s11140_s26 + $0x588] sm:$0xff]  ;;  %v10548_v19 = vld [vmem:[%s11140_s26 + $0x5b8] sm:$0xff] }
 0x2aa   : > { %v8145_v36 = vsel %vm249_vm0, %v8064_v58, 0.0  ;;  %v5412_v20 = vadd.f32 %v5411_v11, %v5383_v30  ;;  %3075 = vst.msk [vmem:[#allocation3 + $0x2dc] sm:$0xf] %vm1117_vm3, %v2920_v51  ;;  %v1425_v49 = vld [vmem:[#allocation2 + $0x400] sm:$0xff]  ;;  %v464_v58 = vld [vmem:[%s11029_s22 + $0x1a8] sm:$0xff]  ;;  %6405 = vmatpush.bf16.msra.mxu0 %v10542_v48  ;;  %6760 = vmatpush.bf16.msra.mxu1 %v10548_v19 }
 0x2ab   : > { %v8146_v52 = vadd.f32 %v8145_v36, %v8144_v22  ;;  %6325 = vmatmul.bf16.gmra.mxu1 %v9316_v43  ;;  %6383 = vmatmul.bf16.gmra.mxu3 %v9324_v6  ;;  %v1489_v34 = vpack.c.bf16 %v1425_v49, %v1425_v49  ;;  %708 = vst.msk [vmem:[#allocation3 + $0x30c] sm:$0xf] %vm668_vm2, %v12485_v55  ;;  %v10298_v22 = vld [vmem:[#allocation3 + $0x2e8] sm:$0xf0]  ;;  %v784_v55 = vld [vmem:[#allocation2 + $0x3f1] sm:$0xff]  ;;  %v785_v35 = vld [vmem:[#allocation2 + $0x401] sm:$0xff] }
 0x2ac   : > { %v5441_v56 = vadd.f32 %v5440_v45, %v5412_v20  ;;  %1989 = vst.msk [vmem:[#allocation3 + $0x314] sm:$0xf] %vm668_vm2, %v1925_v7  ;;  %2927 = vrot.lane.b32.xlu2 %v12374_v12, %s10673_s17  ;;  %6789 = vmatpush.bf16.msra.mxu2 %v10556_v3  ;;  %v1488_v12 = vpack.c.bf16 %v1424_v59, %v1424_v59  ;;  %v1004_v6 = vpop.permute.xlu2 %1003  ;;  %v9341_v7 = vld [vmem:[#allocation3 + $0x2ec] sm:$0xf0]  ;;  %v10554_v49 = vld [vmem:[%s11140_s26 + $0x5e8] sm:$0xff] }
 0x2ad   : > { %707 = vst.msk [vmem:[#allocation3 + $0x2f8] sm:$0xf] %vm668_vm2, %v12493_v4  ;;  %v5386_v4 = vadd.f32 %v12328_v16, %v12325_v28  ;;  %v12583_v28 = vpack.c.bf16 %v1220_v5, %v1220_v5  ;;  %v2565_v16 = vpack.c.bf16 %v2501_v15, %v2501_v15  ;;  %v849_v11 = vpack.c.bf16 %v785_v35, %v785_v35  ;;  %v1221_v3 = vld [vmem:[#allocation2 + $0x2f2] sm:$0xff] }
 0x2ae   : > { %v5470_v21 = vadd.f32 %v5469_v25, %v5441_v56  ;;  %2929 = vrot.lane.b32.xlu0 %v12369_v32, %s10673_s17  ;;  %v5472_v29 = vpop.f32.mrf.mxu2  ;;  %528 = vst.msk [vmem:[#allocation2 + $0x411] sm:$0xff] %vm249_vm0, %v463_v0  ;;  %v2502_v32 = vld [vmem:[#allocation2 + $0x310] sm:$0xff]  ;;  %v12589_v36 = vpack.c.bf16 %v784_v55, %v784_v55  ;;  %v5388_v59 = vadd.f32 %v12356_v38, %v12353_v61  ;;  %v10541_v55 = vld [vmem:[%s11140_s26 + $0x580] sm:$0xff] }
 0x2af   : > { %1668 = vrot.lane.b32.xlu1 %v1489_v34, %s10673_s17  ;;  %v12568_v13 = vpop.f32.mrf.mxu3  ;;  %1157 = vst.msk [vmem:[#allocation3 + $0x30c] sm:$0xf] %vm1117_vm3, %v1004_v6  ;;  %v2566_v20 = vpack.c.bf16 %v2502_v32, %v2502_v32  ;;  %v9331_v0 = vld [vmem:[#allocation3 + $0x2d0] sm:$0xf]  ;;  %6819 = vmatpush.bf16.msra.mxu3 %v10563_v39 }
 0x2b0   : > { %7866 = vst.msk [vmem:[%s11905_s29 + $0x98] sm:$0xff] %vm249_vm0, %v5470_v21  ;;  %v7948_v18 = vsel %vm249_vm0, %v5470_v21, 0.0  ;;  %v8065_v31 = vmul.f32 %v5470_v21, %v5470_v21  ;;  %v1000_v9 = vpop.permute.xlu0 %999  ;;  %v5443_v14 = vpop.f32.mrf.mxu1  ;;  %v9339_v25 = vld [vmem:[#allocation3 + $0x2d8] sm:$0xf]  ;;  %6790 = vmatpush.bf16.msra.mxu2 %v10555_v24  ;;  %6761 = vmatpush.bf16.msra.mxu1 %v10547_v17  ;;  %v10553_v24 = vld [vmem:[%s11140_s26 + $0x5e0] sm:$0xff] }
 0x2b1   : > { %v7949_v43 = vadd.f32 %v7948_v18, %v7947_v10  ;;  %1155 = vst.msk [vmem:[#allocation3 + $0x2e4] sm:$0xf] %vm1117_vm3, %v1000_v9  ;;  %v5414_v1 = vpop.f32.mrf.mxu0  ;;  %v9340_v30 = vor.u32 %v10298_v22, %v9339_v25  ;;  %v1641_v57 = vpop.permute.xlu1 %1640  ;;  %v10296_v51 = vld [vmem:[#allocation3 + $0x2dc] sm:$0xf]  ;;  %6406 = vmatpush.bf16.msra.mxu0 %v10541_v55 }
 0x2b2   : > { %v8147_v45 = vsel %vm249_vm0, %v8065_v31, 0.0  ;;  %v5415_v23 = vadd.f32 %v5414_v1, %v5386_v4  ;;  %1795 = vst.msk [vmem:[#allocation3 + $0x2e8] sm:$0xf] %vm1117_vm3, %v1641_v57  ;;  %v9344_v22 = vor.u32 %v10296_v51, %v9341_v7  ;;  %v466_v55 = vld [vmem:[%s11029_s22 + $0x1b8] sm:$0xff] }
 0x2b3   : > { %v8148_v10 = vadd.f32 %v8147_v45, %v8146_v52  ;;  %6359 = vmatmul.bf16.gmra.mxu2 %v9340_v30  ;;  %529 = vst.msk [vmem:[#allocation2 + $0x421] sm:$0xff] %vm249_vm0, %v464_v58  ;;  %v1223_v52 = vld [vmem:[#allocation2 + $0x332] sm:$0xff]  ;;  %v10562_v30 = vld [vmem:[%s11140_s26 + $0x628] sm:$0xff] }
 0x2b4   : > { %v5444_v2 = vadd.f32 %v5443_v14, %v5415_v23  ;;  %1348 = vst.msk [vmem:[#allocation3 + $0x2fc] sm:$0xf] %vm668_vm2, %v12583_v28  ;;  %1027 = vrot.lane.b32.xlu2 %v12589_v36, %s10673_s17  ;;  %v1287_v38 = vpack.c.bf16 %v1223_v52, %v1223_v52  ;;  %6791 = vmatpush.bf16.msra.mxu2 %v10554_v49  ;;  %v1643_v48 = vpop.permute.xlu2 %1642  ;;  %v10546_v45 = vld [vmem:[%s11140_s26 + $0x5a8] sm:$0xff] }
 0x2b5   : > { %2629 = vst.msk [vmem:[#allocation3 + $0x304] sm:$0xf] %vm668_vm2, %v2565_v16  ;;  %v12613_v14 = vpack.c.bf16 %v1221_v3, %v1221_v3  ;;  %v465_v16 = vld [vmem:[%s11029_s22 + $0x1b0] sm:$0xff]  ;;  %6820 = vmatpush.bf16.msra.mxu3 %v10562_v30  ;;  %6762 = vmatpush.bf16.msra.mxu1 %v10546_v45  ;;  %v5393_v30 = vadd.f32 %v12415_v54, %v12412_v40 }
 0x2b6   : > { %v5473_v56 = vadd.f32 %v5472_v29, %v5444_v2  ;;  %1666 = vrot.lane.b32.xlu0 %v1488_v12, %s10673_s17  ;;  %v5474_v34 = vpop.f32.mrf.mxu2  ;;  %2630 = vst.msk [vmem:[#allocation3 + $0x318] sm:$0xf] %vm668_vm2, %v2566_v20  ;;  %v1222_v29 = vld [vmem:[#allocation2 + $0x322] sm:$0xff]  ;;  %v1426_v19 = vld [vmem:[#allocation2 + $0x410] sm:$0xff] }
 0x2b7   : > { %1029 = vrot.lane.b32.xlu1 %v849_v11, %s10673_s17  ;;  %v12602_v21 = vpop.f32.mrf.mxu3  ;;  %v1286_v41 = vpack.c.bf16 %v1222_v29, %v1222_v29  ;;  %1796 = vst.msk [vmem:[#allocation3 + $0x2fc] sm:$0xf] %vm1117_vm3, %v1643_v48  ;;  %v1862_v20 = vld [vmem:[#allocation2 + $0x331] sm:$0xff]  ;;  %v10561_v2 = vld [vmem:[%s11140_s26 + $0x620] sm:$0xff] }
 0x2b8   : > { %7867 = vst.msk [vmem:[%s11905_s29 + $0xa0] sm:$0xff] %vm249_vm0, %v5473_v56  ;;  %v7950_v5 = vsel %vm249_vm0, %v5473_v56, 0.0  ;;  %v8066_v15 = vmul.f32 %v5473_v56, %v5473_v56  ;;  %v1639_v35 = vpop.permute.xlu0 %1638  ;;  %v5445_v32 = vpop.f32.mrf.mxu1  ;;  %v10297_v61 = vld [vmem:[#allocation3 + $0x2e0] sm:$0xf0]  ;;  %6792 = vmatpush.bf16.msra.mxu2 %v10553_v24  ;;  %v9359_v48 = vld [vmem:[#allocation3 + $0x300] sm:$0xf] }
 0x2b9   : > { %v7951_v4 = vadd.f32 %v7950_v5, %v7949_v43  ;;  %1794 = vst.msk [vmem:[#allocation3 + $0x2d4] sm:$0xf] %vm1117_vm3, %v1639_v35  ;;  %v5416_v18 = vpop.f32.mrf.mxu0  ;;  %v9332_v31 = vor.u32 %v10297_v61, %v9331_v0  ;;  %v1002_v9 = vpop.permute.xlu1 %1001  ;;  %v9333_v6 = vld [vmem:[#allocation3 + $0x2e4] sm:$0xf0]  ;;  %6821 = vmatpush.bf16.msra.mxu3 %v10561_v2 }
 0x2ba   : > { %v8149_v25 = vsel %vm249_vm0, %v8066_v15, 0.0  ;;  %v5417_v12 = vadd.f32 %v5416_v18, %v5388_v59  ;;  %1156 = vst.msk [vmem:[#allocation3 + $0x2f8] sm:$0xf] %vm1117_vm3, %v1002_v9  ;;  %v1427_v43 = vld [vmem:[#allocation2 + $0x420] sm:$0xff] }
 0x2bb   : > { %v8150_v1 = vadd.f32 %v8149_v25, %v8148_v10  ;;  %6301 = vmatmul.bf16.gmra.mxu0 %v9332_v31  ;;  %6388 = vmatmul.bf16.gmra.mxu3 %v9344_v22  ;;  %v1491_v58 = vpack.c.bf16 %v1427_v43, %v1427_v43  ;;  %1351 = vst.msk [vmem:[#allocation3 + $0x338] sm:$0xf] %vm668_vm2, %v1287_v38  ;;  %v580_v10 = vld [vmem:[#allocation2 + $0x320] sm:$0xff]  ;;  %v10302_v31 = vld [vmem:[#allocation3 + $0x308] sm:$0xf0]  ;;  %v1225_v43 = vld [vmem:[#allocation2 + $0x352] sm:$0xff] }
 0x2bc   : > { %v5446_v57 = vadd.f32 %v5445_v32, %v5417_v12  ;;  %1349 = vst.msk [vmem:[#allocation3 + $0x310] sm:$0xf] %vm668_vm2, %v12613_v14  ;;  %2931 = vrot.lane.b32.xlu2 %v12431_v47, %s10673_s17  ;;  %v787_v7 = vld [vmem:[#allocation2 + $0x421] sm:$0xff]  ;;  %v786_v47 = vld [vmem:[#allocation2 + $0x411] sm:$0xff]  ;;  %v644_v5 = vpack.c.bf16 %v580_v10, %v580_v10  ;;  %v1649_v35 = vpop.permute.xlu2 %1648  ;;  %v1926_v32 = vpack.c.bf16 %v1862_v20, %v1862_v20 }
 0x2bd   : > { %1350 = vst.msk [vmem:[#allocation3 + $0x324] sm:$0xf] %vm668_vm2, %v1286_v41  ;;  %v1863_v0 = vld [vmem:[#allocation2 + $0x341] sm:$0xff]  ;;  %v851_v15 = vpack.c.bf16 %v787_v7, %v787_v7  ;;  %v12644_v38 = vpack.c.bf16 %v786_v47, %v786_v47  ;;  %v1289_v54 = vpack.c.bf16 %v1225_v43, %v1225_v43 }
 0x2be   : > { %v5475_v23 = vadd.f32 %v5474_v34, %v5446_v57  ;;  %2933 = vrot.lane.b32.xlu0 %v12426_v62, %s10673_s17  ;;  %v5477_v11 = vpop.f32.mrf.mxu2  ;;  %530 = vst.msk [vmem:[#allocation2 + $0x431] sm:$0xff] %vm249_vm0, %v465_v16  ;;  %v5391_v62 = vadd.f32 %v12389_v50, %v12386_v26  ;;  %v1490_v34 = vpack.c.bf16 %v1426_v19, %v1426_v19  ;;  %v10545_v9 = vld [vmem:[%s11140_s26 + $0x5a0] sm:$0xff] }
 0x2bf   : > { %1672 = vrot.lane.b32.xlu1 %v1491_v58, %s10673_s17  ;;  %v12628_v51 = vpop.f32.mrf.mxu3  ;;  %1799 = vst.msk [vmem:[#allocation3 + $0x338] sm:$0xf] %vm1117_vm3, %v1649_v35  ;;  %v1927_v24 = vpack.c.bf16 %v1863_v0, %v1863_v0  ;;  %6763 = vmatpush.bf16.msra.mxu1 %v10545_v9  ;;  %v10588_v0 = vld [vmem:[%s11140_s26 + $0x6f8] sm:$0xff] }
 0x2c0   : > { %7868 = vst.msk [vmem:[%s11905_s29 + $0xa8] sm:$0xff] %vm249_vm0, %v5475_v23  ;;  %v7952_v39 = vsel %vm249_vm0, %v5475_v23, 0.0  ;;  %v8067_v49 = vmul.f32 %v5475_v23, %v5475_v23  ;;  %v2285_v17 = vpop.permute.xlu0 %2284  ;;  %v5448_v52 = vpop.f32.mrf.mxu1  ;;  %v10295_v56 = vld [vmem:[#allocation3 + $0x2d4] sm:$0xf]  ;;  %7229 = vmatpush.bf16.msrb.mxu2 %v10588_v0 }
 0x2c1   : > { %v7953_v3 = vadd.f32 %v7952_v39, %v7951_v4  ;;  %2437 = vst.msk [vmem:[#allocation3 + $0x314] sm:$0xf] %vm1117_vm3, %v2285_v17  ;;  %v5419_v59 = vpop.f32.mrf.mxu0  ;;  %v9336_v22 = vor.u32 %v10295_v56, %v9333_v6  ;;  %v2926_v29 = vpop.permute.xlu1 %2925  ;;  %v9351_v18 = vld [vmem:[#allocation3 + $0x2f8] sm:$0xf]  ;;  %v581_v23 = vld [vmem:[#allocation2 + $0x330] sm:$0xff]  ;;  %v12668_v56 = vld [vmem:[#allocation2 + $0x461] sm:$0xff] }
 0x2c2   : > { %v8151_v26 = vsel %vm249_vm0, %v8067_v49, 0.0  ;;  %v5420_v50 = vadd.f32 %v5419_v59, %v5391_v62  ;;  %3078 = vst.msk [vmem:[#allocation3 + $0x318] sm:$0xf] %vm1117_vm3, %v2926_v29  ;;  %v645_v49 = vpack.c.bf16 %v581_v23, %v581_v23  ;;  %v10596_v29 = vld [vmem:[%s11140_s26 + $0x738] sm:$0xff] }
 0x2c3   : > { %v8152_v61 = vadd.f32 %v8151_v26, %v8150_v1  ;;  %6330 = vmatmul.bf16.gmra.mxu1 %v9336_v22  ;;  %531 = vst.msk [vmem:[#allocation2 + $0x441] sm:$0xff] %vm249_vm0, %v466_v55  ;;  %v9352_v1 = vor.u32 %v10302_v31, %v9351_v18  ;;  %v10580_v55 = vld [vmem:[%s11140_s26 + $0x6b8] sm:$0xff]  ;;  %v1865_v18 = vld [vmem:[#allocation2 + $0x361] sm:$0xff]  ;;  %7258 = vmatpush.bf16.msrb.mxu3 %v10596_v29 }
 0x2c4   : > { %v5449_v4 = vadd.f32 %v5448_v52, %v5420_v50  ;;  %709 = vst.msk [vmem:[#allocation3 + $0x320] sm:$0xf] %vm668_vm2, %v644_v5  ;;  %1031 = vrot.lane.b32.xlu2 %v12644_v38, %s10673_s17  ;;  %v1006_v40 = vpop.permute.xlu2 %1005  ;;  %v1864_v50 = vld [vmem:[#allocation2 + $0x351] sm:$0xff]  ;;  %6876 = vmatpush.bf16.msrb.mxu1 %v10580_v55  ;;  %v1929_v23 = vpack.c.bf16 %v1865_v18, %v1865_v18 }
 0x2c5   : > { %1990 = vst.msk [vmem:[#allocation3 + $0x328] sm:$0xf] %vm668_vm2, %v1926_v32  ;;  %v1428_v5 = vld [vmem:[#allocation2 + $0x430] sm:$0xff] }
 0x2c6   : > { %v5478_v25 = vadd.f32 %v5477_v11, %v5449_v4  ;;  %1670 = vrot.lane.b32.xlu0 %v1490_v34, %s10673_s17  ;;  %v5479_v12 = vpop.f32.mrf.mxu2  ;;  %1991 = vst.msk [vmem:[#allocation3 + $0x33c] sm:$0xf] %vm668_vm2, %v1927_v24  ;;  %v1224_v34 = vld [vmem:[#allocation2 + $0x342] sm:$0xff]  ;;  %v788_v4 = vld [vmem:[#allocation2 + $0x431] sm:$0xff] }
 0x2c7   : > { %1033 = vrot.lane.b32.xlu1 %v851_v15, %s10673_s17  ;;  %v12652_v41 = vpop.f32.mrf.mxu3  ;;  %1158 = vst.msk [vmem:[#allocation3 + $0x320] sm:$0xf] %vm1117_vm3, %v1006_v40  ;;  %v1288_v24 = vpack.c.bf16 %v1224_v34, %v1224_v34 }
 0x2c8   : > { %7869 = vst.msk [vmem:[%s11905_s29 + $0xb0] sm:$0xff] %vm249_vm0, %v5478_v25  ;;  %v7954_v57 = vsel %vm249_vm0, %v5478_v25, 0.0  ;;  %v8068_v58 = vmul.f32 %v5478_v25, %v5478_v25  ;;  %v2924_v16 = vpop.permute.xlu0 %2923  ;;  %v5450_v19 = vpop.f32.mrf.mxu1  ;;  %v10303_v45 = vld [vmem:[#allocation3 + $0x310] sm:$0xf0] }
 0x2c9   : > { %3077 = vst.msk [vmem:[#allocation3 + $0x304] sm:$0xf] %vm1117_vm3, %v2924_v16  ;;  %v5421_v11 = vpop.f32.mrf.mxu0  ;;  %v9360_v6 = vor.u32 %v10303_v45, %v9359_v48  ;;  %v1647_v10 = vpop.permute.xlu1 %1646  ;;  %v7955_v7 = vadd.f32 %v7954_v57, %v7953_v3  ;;  %v9361_v47 = vld [vmem:[#allocation3 + $0x314] sm:$0xf0]  ;;  %v1928_v57 = vpack.c.bf16 %v1864_v50, %v1864_v50  ;;  %v12695_v45 = vpack.c.bf16 %v788_v4, %v788_v4 }
 0x2ca   : > { %v8153_v20 = vsel %vm249_vm0, %v8068_v58, 0.0  ;;  %v5422_v2 = vadd.f32 %v5421_v11, %v5393_v30  ;;  %1798 = vst.msk [vmem:[#allocation3 + $0x324] sm:$0xf] %vm1117_vm3, %v1647_v10  ;;  %v1429_v62 = vld [vmem:[#allocation2 + $0x440] sm:$0xff]  ;;  %v10576_v3 = vld [vmem:[%s11140_s26 + $0x698] sm:$0xff]  ;;  %v10587_v10 = vld [vmem:[%s11140_s26 + $0x6f0] sm:$0xff] }
 0x2cb   : > { %6306 = vmatmul.bf16.gmra.mxu0 %v9352_v1  ;;  %6364 = vmatmul.bf16.gmra.mxu2 %v9360_v6  ;;  %v8154_v39 = vadd.f32 %v8153_v20, %v8152_v61  ;;  %v1493_v52 = vpack.c.bf16 %v1429_v62, %v1429_v62  ;;  %3263 = vst.msk [vmem:[#allocation3 + $0x290] sm:$0xf] %vm668_vm2, %v12437_v63  ;;  %v582_v63 = vld [vmem:[#allocation2 + $0x340] sm:$0xff]  ;;  %v10595_v20 = vld [vmem:[%s11140_s26 + $0x730] sm:$0xff] }
 0x2cc   : > { %v5451_v17 = vadd.f32 %v5450_v19, %v5422_v2  ;;  %3264 = vst.msk [vmem:[#allocation3 + $0x2a4] sm:$0xf] %vm668_vm2, %v12423_v42  ;;  %2935 = vrot.lane.b32.xlu2 %v12497_v60, %s10673_s17  ;;  %v853_v42 = vpack.c.bf16 %v12668_v56, %v12668_v56  ;;  %6843 = vmatpush.bf16.msrb.mxu0 %v10576_v3  ;;  %v9521_v19 = vld [vmem:[#allocation3 + $0x334] sm:$0xf0]  ;;  %v2701_v3 = vld [vmem:[#allocation2 + $0x3a1] sm:$0xff] }
 0x2cd   : > { %1353 = vst.msk [vmem:[#allocation3 + $0x360] sm:$0xf] %vm668_vm2, %v1289_v54  ;;  %v1492_v1 = vpack.c.bf16 %v1428_v5, %v1428_v5  ;;  %v10300_v54 = vld [vmem:[#allocation3 + $0x2fc] sm:$0xf]  ;;  %v2702_v62 = vld [vmem:[#allocation2 + $0x3b1] sm:$0xff]  ;;  %7230 = vmatpush.bf16.msrb.mxu2 %v10587_v10  ;;  %7259 = vmatpush.bf16.msrb.mxu3 %v10595_v20 }
 0x2ce   : > { %v5480_v59 = vadd.f32 %v5479_v12, %v5451_v17  ;;  %2937 = vrot.lane.b32.xlu0 %v12490_v53, %s10673_s17  ;;  %v5906_v22 = vpop.f32.mrf.mxu2  ;;  %710 = vst.msk [vmem:[#allocation3 + $0x334] sm:$0xf] %vm668_vm2, %v645_v49  ;;  %v12689_v12 = vpack.c.bf16 %v582_v63, %v582_v63  ;;  %v1653_v30 = vpop.permute.xlu2 %1652  ;;  %v2063_v17 = vld [vmem:[#allocation2 + $0x3e2] sm:$0xff]  ;;  %v2766_v29 = vpack.c.bf16 %v2702_v62, %v2702_v62  ;;  %v583_v5 = vld [vmem:[#allocation2 + $0x350] sm:$0xff] }
 0x2cf   : > { %1676 = vrot.lane.b32.xlu1 %v1493_v52, %s10673_s17  ;;  %v5935_v26 = vpop.f32.mrf.mxu3  ;;  %1801 = vst.msk [vmem:[#allocation3 + $0x360] sm:$0xf] %vm1117_vm3, %v1653_v30  ;;  %v10579_v30 = vld [vmem:[%s11140_s26 + $0x6b0] sm:$0xff] }
 0x2d0   : > { %7870 = vst.msk [vmem:[%s11905_s29 + $0xb8] sm:$0xff] %vm249_vm0, %v5480_v59  ;;  %v8069_v53 = vmul.f32 %v5480_v59, %v5480_v59  ;;  %v1645_v15 = vpop.permute.xlu0 %1644  ;;  %v5877_v35 = vpop.f32.mrf.mxu1  ;;  %v10301_v32 = vld [vmem:[#allocation3 + $0x304] sm:$0xf]  ;;  %v7956_v61 = vsel %vm249_vm0, %v5480_v59, 0.0  ;;  %v1227_v59 = vld [vmem:[#allocation2 + $0x372] sm:$0xff]  ;;  %6877 = vmatpush.bf16.msrb.mxu1 %v10579_v30 }
 0x2d1   : > { %1797 = vst.msk [vmem:[#allocation3 + $0x310] sm:$0xf] %vm1117_vm3, %v1645_v15  ;;  %v5848_v60 = vpop.f32.mrf.mxu0  ;;  %v9364_v31 = vor.u32 %v10301_v32, %v9361_v47  ;;  %v7957_v9 = vadd.f32 %v7956_v61, %v7955_v7  ;;  %v2289_v25 = vpop.permute.xlu1 %2288  ;;  %v10305_v16 = vld [vmem:[#allocation3 + $0x324] sm:$0xf]  ;;  %v10575_v7 = vld [vmem:[%s11140_s26 + $0x690] sm:$0xff]  ;;  %v468_v32 = vld [vmem:[%s11029_s22 + $0x1c8] sm:$0xff]  ;;  %v1291_v61 = vpack.c.bf16 %v1227_v59, %v1227_v59 }
 0x2d2   : > { %v5849_v48 = vadd.f32 %v5848_v60, %v12448_v8  ;;  %v8155_v43 = vsel %vm249_vm0, %v8069_v53, 0.0  ;;  %2439 = vst.msk [vmem:[#allocation3 + $0x33c] sm:$0xf] %vm1117_vm3, %v2289_v25  ;;  %v9307_v11 = vld [vmem:[#allocation3 + $0x290] sm:$0xf]  ;;  %v9524_v0 = vor.u32 %v10305_v16, %v9521_v19  ;;  %6844 = vmatpush.bf16.msrb.mxu0 %v10575_v7  ;;  %v1226_v60 = vld [vmem:[#allocation2 + $0x362] sm:$0xff] }
 0x2d3   : > { %6393 = vmatmul.bf16.gmra.mxu3 %v9364_v31  ;;  %v8156_v58 = vadd.f32 %v8155_v43, %v8154_v39  ;;  %v10289_v6 = vld [vmem:[#allocation3 + $0x2a0] sm:$0xf0]  ;;  %1352 = vst.msk [vmem:[#allocation3 + $0x34c] sm:$0xf] %vm668_vm2, %v1288_v24  ;;  %v10586_v31 = vld [vmem:[%s11140_s26 + $0x6e8] sm:$0xff]  ;;  %v1290_v7 = vpack.c.bf16 %v1226_v60, %v1226_v60  ;;  %v1866_v20 = vld [vmem:[#allocation2 + $0x371] sm:$0xff] }
 0x2d4   : > { %v5878_v8 = vadd.f32 %v5877_v35, %v5849_v48  ;;  %711 = vst.msk [vmem:[#allocation3 + $0x348] sm:$0xf] %vm668_vm2, %v12689_v12  ;;  %v9308_v39 = vor.u32 %v10289_v6, %v9307_v11  ;;  %1035 = vrot.lane.b32.xlu2 %v12695_v45, %s10673_s17  ;;  %v12720_v35 = vpack.c.bf16 %v2701_v3, %v2701_v3  ;;  %v10594_v43 = vld [vmem:[%s11140_s26 + $0x728] sm:$0xff] }
 0x2d5   : > { %1992 = vst.msk [vmem:[#allocation3 + $0x350] sm:$0xf] %vm668_vm2, %v1928_v57  ;;  %v2062_v57 = vld [vmem:[#allocation2 + $0x3d2] sm:$0xff]  ;;  %7231 = vmatpush.bf16.msrb.mxu2 %v10586_v31  ;;  %7260 = vmatpush.bf16.msrb.mxu3 %v10594_v43  ;;  %v1930_v59 = vpack.c.bf16 %v1866_v20, %v1866_v20 }
 0x2d6   : > { %1674 = vrot.lane.b32.xlu0 %v1492_v1, %s10673_s17  ;;  %v5908_v2 = vpop.f32.mrf.mxu2  ;;  %v5907_v40 = vadd.f32 %v5906_v22, %v5878_v8  ;;  %1993 = vst.msk [vmem:[#allocation3 + $0x364] sm:$0xf] %vm668_vm2, %v1929_v23  ;;  %v1010_v53 = vpop.permute.xlu2 %1009  ;;  %v584_v8 = vld [vmem:[#allocation2 + $0x360] sm:$0xff]  ;;  %v12747_v62 = vpack.c.bf16 %v2062_v57, %v2062_v57 }
 0x2d7   : > { %1037 = vrot.lane.b32.xlu1 %v853_v42, %s10673_s17  ;;  %v5937_v49 = vpop.f32.mrf.mxu3  ;;  %3265 = vst.msk [vmem:[#allocation3 + $0x2b8] sm:$0xf] %vm668_vm2, %v12524_v37  ;;  %v12716_v37 = vpack.c.bf16 %v2063_v17, %v2063_v17 }
 0x2d8   : > { %v5936_v52 = vadd.f32 %v5935_v26, %v5907_v40  ;;  %v2287_v56 = vpop.permute.xlu0 %2286  ;;  %v5879_v34 = vpop.f32.mrf.mxu1  ;;  %v9353_v47 = vld [vmem:[#allocation3 + $0x30c] sm:$0xf0]  ;;  %1160 = vst.msk [vmem:[#allocation3 + $0x348] sm:$0xf] %vm1117_vm3, %v1010_v53  ;;  %v1867_v53 = vld [vmem:[#allocation2 + $0x381] sm:$0xff] }
 0x2d9   : > { %2438 = vst.msk [vmem:[#allocation3 + $0x328] sm:$0xf] %vm1117_vm3, %v2287_v56  ;;  %v5850_v22 = vpop.f32.mrf.mxu0  ;;  %v9356_v63 = vor.u32 %v10300_v54, %v9353_v47  ;;  %v1651_v55 = vpop.permute.xlu1 %1650  ;;  %v10308_v1 = vld [vmem:[#allocation3 + $0x338] sm:$0xf0]  ;;  %v12751_v47 = vpack.c.bf16 %v584_v8, %v584_v8  ;;  %v1931_v43 = vpack.c.bf16 %v1867_v53, %v1867_v53 }
 0x2da   : > { %7871 = vst.msk [vmem:[%s11905_s29 + $0xc0] sm:$0xff] %vm249_vm0, %v5936_v52  ;;  %v7958_v26 = vsel %vm249_vm0, %v5936_v52, 0.0  ;;  %v8070_v42 = vmul.f32 %v5936_v52, %v5936_v52  ;;  %v5851_v50 = vadd.f32 %v5850_v22, %v12476_v44  ;;  %v12725_v44 = vpack.c.bf16 %v583_v5, %v583_v5 }
 0x2db   : > { %v7959_v15 = vadd.f32 %v7958_v26, %v7957_v9  ;;  %6335 = vmatmul.bf16.gmra.mxu1 %v9356_v63  ;;  %9513 = vmatmul.msk.bf16.vlgmr.msra.gmra.mxu0 %vm249_vm0, %v9308_v39  ;;  %1800 = vst.msk [vmem:[#allocation3 + $0x34c] sm:$0xf] %vm1117_vm3, %v1651_v55  ;;  %v10574_v9 = vld [vmem:[%s11140_s26 + $0x688] sm:$0xff]  ;;  %v10573_v55 = vld [vmem:[%s11140_s26 + $0x680] sm:$0xff] }
 0x2dc   : > { %v8157_v24 = vsel %vm249_vm0, %v8070_v42, 0.0  ;;  %v5880_v4 = vadd.f32 %v5879_v34, %v5851_v50  ;;  %6793 = vmatmul.bf16.vlgmr.msra.gmra.mxu2 %v9524_v0  ;;  %3266 = vst.msk [vmem:[#allocation3 + $0x2cc] sm:$0xf] %vm668_vm2, %v12529_v27  ;;  %2939 = vrot.lane.b32.xlu2 %v12720_v35, %s10673_s17  ;;  %v9541_v34 = vld [vmem:[#allocation3 + $0x35c] sm:$0xf0] }
 0x2dd   : > { %v8158_v18 = vadd.f32 %v8157_v24, %v8156_v58  ;;  %533 = vst.msk [vmem:[#allocation2 + $0x481] sm:$0xff] %vm249_vm0, %v468_v32  ;;  %6845 = vmatpush.bf16.msrb.mxu0 %v10574_v9  ;;  %v9519_v42 = vld [vmem:[#allocation3 + $0x320] sm:$0xf] }
 0x2de   : > { %2941 = vrot.lane.b32.xlu0 %v2766_v29, %s10673_s17  ;;  %v5911_v25 = vpop.f32.mrf.mxu2  ;;  %v5909_v48 = vadd.f32 %v5908_v2, %v5880_v4  ;;  %1355 = vst.msk [vmem:[#allocation3 + $0x388] sm:$0xf] %vm668_vm2, %v1291_v61  ;;  %v1657_v39 = vpop.permute.xlu2 %1656  ;;  %v9327_v52 = vld [vmem:[#allocation3 + $0x2b8] sm:$0xf]  ;;  %v10585_v29 = vld [vmem:[%s11140_s26 + $0x6e0] sm:$0xff] }
 0x2df   : > { %2304 = vrot.lane.b32.xlu1 %v12716_v37, %s10673_s17  ;;  %v5940_v58 = vpop.f32.mrf.mxu3  ;;  %712 = vst.msk [vmem:[#allocation3 + $0x35c] sm:$0xf] %vm668_vm2, %v12725_v44  ;;  %7232 = vmatpush.bf16.msrb.mxu2 %v10585_v29 }
 0x2e0   : > { %v5938_v27 = vadd.f32 %v5937_v49, %v5909_v48  ;;  %v1008_v16 = vpop.permute.xlu0 %1007  ;;  %v5882_v19 = vpop.f32.mrf.mxu1  ;;  %v9527_v23 = vld [vmem:[#allocation3 + $0x328] sm:$0xf]  ;;  %v467_v49 = vld [vmem:[%s11029_s22 + $0x1c0] sm:$0xff]  ;;  %1803 = vst.msk [vmem:[#allocation3 + $0x388] sm:$0xf] %vm1117_vm3, %v1657_v39 }
 0x2e1   : > { %1159 = vst.msk [vmem:[#allocation3 + $0x334] sm:$0xf] %vm1117_vm3, %v1008_v16  ;;  %v5853_v11 = vpop.f32.mrf.mxu0  ;;  %v9528_v6 = vor.u32 %v10308_v1, %v9527_v23  ;;  %v2293_v10 = vpop.permute.xlu1 %2292  ;;  %6846 = vmatpush.bf16.msrb.mxu0 %v10573_v55  ;;  %v2065_v1 = vld [vmem:[#allocation2 + $0x402] sm:$0xff] }
 0x2e2   : > { %7872 = vst.msk [vmem:[%s11905_s29 + $0xc8] sm:$0xff] %vm249_vm0, %v5938_v27  ;;  %v7960_v2 = vsel %vm249_vm0, %v5938_v27, 0.0  ;;  %v8071_v40 = vmul.f32 %v5938_v27, %v5938_v27  ;;  %v5854_v54 = vadd.f32 %v5853_v11, %v12512_v46  ;;  %v10310_v56 = vld [vmem:[#allocation3 + $0x34c] sm:$0xf]  ;;  %v2064_v11 = vld [vmem:[#allocation2 + $0x3f2] sm:$0xff]  ;;  %v2703_v55 = vld [vmem:[#allocation2 + $0x3e1] sm:$0xff] }
 0x2e3   : > { %v7961_v17 = vadd.f32 %v7960_v2, %v7959_v15  ;;  %6822 = vmatmul.bf16.vlgmr.msra.gmra.mxu3 %v9528_v6  ;;  %2441 = vst.msk [vmem:[#allocation3 + $0x364] sm:$0xf] %vm1117_vm3, %v2293_v10  ;;  %v10294_v46 = vld [vmem:[#allocation3 + $0x2c8] sm:$0xf0]  ;;  %v10593_v15 = vld [vmem:[%s11140_s26 + $0x720] sm:$0xff]  ;;  %v9544_v31 = vor.u32 %v10310_v56, %v9541_v34  ;;  %v12778_v6 = vpack.c.bf16 %v2065_v1, %v2065_v1  ;;  %v1229_v2 = vld [vmem:[#allocation2 + $0x392] sm:$0xff] }
 0x2e4   : > { %v8159_v0 = vsel %vm249_vm0, %v8071_v40, 0.0  ;;  %v5883_v3 = vadd.f32 %v5882_v19, %v5854_v54  ;;  %v791_v63 = vld [vmem:[#allocation2 + $0x481] sm:$0xff]  ;;  %1354 = vst.msk [vmem:[#allocation3 + $0x374] sm:$0xf] %vm668_vm2, %v1290_v7  ;;  %v9328_v32 = vor.u32 %v10294_v46, %v9327_v52  ;;  %7261 = vmatpush.bf16.msrb.mxu3 %v10593_v15  ;;  %v10584_v19 = vld [vmem:[%s11140_s26 + $0x6d8] sm:$0xff]  ;;  %v585_v34 = vld [vmem:[#allocation2 + $0x370] sm:$0xff] }
 0x2e5   : > { %v8160_v22 = vadd.f32 %v8159_v0, %v8158_v18  ;;  %v12760_v50 = vpack.c.bf16 %v791_v63, %v791_v63  ;;  %532 = vst.msk [vmem:[#allocation2 + $0x471] sm:$0xff] %vm249_vm0, %v467_v49  ;;  %7233 = vmatpush.bf16.msrb.mxu2 %v10584_v19  ;;  %v10572_v49 = vld [vmem:[%s11140_s26 + $0x678] sm:$0xff]  ;;  %v10578_v52 = vld [vmem:[%s11140_s26 + $0x6a8] sm:$0xff]  ;;  %v12797_v63 = vpack.c.bf16 %v2064_v11, %v2064_v11 }
 0x2e6   : > { %2302 = vrot.lane.b32.xlu0 %v12747_v62, %s10673_s17  ;;  %v5913_v5 = vpop.f32.mrf.mxu2  ;;  %v5912_v26 = vadd.f32 %v5911_v25, %v5883_v3  ;;  %713 = vst.msk [vmem:[#allocation3 + $0x370] sm:$0xf] %vm668_vm2, %v12751_v47  ;;  %v1014_v27 = vpop.permute.xlu2 %1013  ;;  %6847 = vmatpush.bf16.msrb.mxu0 %v10572_v49  ;;  %v10582_v19 = vld [vmem:[%s11140_s26 + $0x6c8] sm:$0xff] }
 0x2e7   : > { %v5942_v61 = vpop.f32.mrf.mxu3  ;;  %1041 = vrot.lane.b32.xlu1 %v12760_v50, %s10673_s17  ;;  %1994 = vst.msk [vmem:[#allocation3 + $0x378] sm:$0xf] %vm668_vm2, %v1930_v59  ;;  %v1228_v59 = vld [vmem:[#allocation2 + $0x382] sm:$0xff]  ;;  %6878 = vmatpush.bf16.msrb.mxu1 %v10578_v52 }
 0x2e8   : > { %v5941_v24 = vadd.f32 %v5940_v58, %v5912_v26  ;;  %v2291_v4 = vpop.permute.xlu0 %2290  ;;  %v5884_v18 = vpop.f32.mrf.mxu1  ;;  %v10307_v60 = vld [vmem:[#allocation3 + $0x330] sm:$0xf0]  ;;  %1162 = vst.msk [vmem:[#allocation3 + $0x370] sm:$0xf] %vm1117_vm3, %v1014_v27 }
 0x2e9   : > { %2440 = vst.msk [vmem:[#allocation3 + $0x350] sm:$0xf] %vm1117_vm3, %v2291_v4  ;;  %v5855_v9 = vpop.f32.mrf.mxu0  ;;  %v9520_v25 = vor.u32 %v10307_v60, %v9519_v42  ;;  %v1655_v48 = vpop.permute.xlu1 %1654  ;;  %v12807_v4 = vpack.c.bf16 %v1228_v59, %v1228_v59 }
 0x2ea   : > { %7873 = vst.msk [vmem:[%s11905_s29 + $0xd0] sm:$0xff] %vm249_vm0, %v5941_v24  ;;  %v7962_v30 = vsel %vm249_vm0, %v5941_v24, 0.0  ;;  %v8072_v57 = vmul.f32 %v5941_v24, %v5941_v24  ;;  %v5856_v58 = vadd.f32 %v5855_v9, %v12541_v33  ;;  %v470_v33 = vld [vmem:[%s11029_s22 + $0x1d8] sm:$0xff]  ;;  %v10313_v7 = vld [vmem:[#allocation3 + $0x360] sm:$0xf0] }
 0x2eb   : > { %v7963_v16 = vadd.f32 %v7962_v30, %v7961_v17  ;;  %9514 = vmatmul.msk.bf16.gmra.mxu0 %vm249_vm0, %v9328_v32  ;;  %6764 = vmatmul.bf16.vlgmr.msra.gmra.mxu1 %v9520_v25  ;;  %1802 = vst.msk [vmem:[#allocation3 + $0x374] sm:$0xf] %vm1117_vm3, %v1655_v48  ;;  %v10592_v17 = vld [vmem:[%s11140_s26 + $0x718] sm:$0xff]  ;;  %v12804_v32 = vpack.c.bf16 %v585_v34, %v585_v34  ;;  %v9561_v24 = vld [vmem:[#allocation3 + $0x384] sm:$0xf0]  ;;  %v586_v48 = vld [vmem:[#allocation2 + $0x380] sm:$0xff] }
 0x2ec   : > { %v8161_v23 = vsel %vm249_vm0, %v8072_v57, 0.0  ;;  %v5885_v8 = vadd.f32 %v5884_v18, %v5856_v58  ;;  %6798 = vmatmul.bf16.gmra.mxu2 %v9544_v31  ;;  %v790_v20 = vld [vmem:[#allocation2 + $0x471] sm:$0xff]  ;;  %1995 = vst.msk [vmem:[#allocation3 + $0x38c] sm:$0xf] %vm668_vm2, %v1931_v43  ;;  %7262 = vmatpush.bf16.msrb.mxu3 %v10592_v17  ;;  %v2767_v25 = vpack.c.bf16 %v2703_v55, %v2703_v55  ;;  %v3141_v34 = vld [vmem:[#allocation2 + $0x302] sm:$0xff] }
 0x2ed   : > { %v8162_v10 = vadd.f32 %v8161_v23, %v8160_v22  ;;  %v854_v39 = vpack.c.bf16 %v790_v20, %v790_v20  ;;  %3267 = vst.msk [vmem:[#allocation3 + $0x2e0] sm:$0xf] %vm668_vm2, %v12583_v28  ;;  %v1293_v28 = vpack.c.bf16 %v1229_v2, %v1229_v2  ;;  %v469_v18 = vld [vmem:[%s11029_s22 + $0x1d0] sm:$0xff] }
 0x2ee   : > { %2945 = vrot.lane.b32.xlu0 %v12589_v36, %s10673_s17  ;;  %v5916_v40 = vpop.f32.mrf.mxu2  ;;  %v5914_v54 = vadd.f32 %v5913_v5, %v5885_v8  ;;  %3268 = vst.msk [vmem:[#allocation3 + $0x2f4] sm:$0xf] %vm668_vm2, %v12613_v14  ;;  %v10583_v5 = vld [vmem:[%s11140_s26 + $0x6d0] sm:$0xff]  ;;  %v1661_v15 = vpop.permute.xlu2 %1660 }
 0x2ef   : > { %v5945_v56 = vpop.f32.mrf.mxu3  ;;  %1039 = vrot.lane.b32.xlu2 %v854_v39, %s10673_s17  ;;  %2308 = vrot.lane.b32.xlu1 %v12778_v6, %s10673_s17  ;;  %535 = vst.msk [vmem:[#allocation2 + $0x4a1] sm:$0xff] %vm249_vm0, %v470_v33  ;;  %v10571_v30 = vld [vmem:[%s11140_s26 + $0x670] sm:$0xff]  ;;  %v12822_v33 = vpack.c.bf16 %v586_v48, %v586_v48 }
 0x2f0   : > { %v5943_v0 = vadd.f32 %v5942_v61, %v5914_v54  ;;  %v1012_v3 = vpop.permute.xlu0 %1011  ;;  %v5887_v46 = vpop.f32.mrf.mxu1  ;;  %v9547_v36 = vld [vmem:[#allocation3 + $0x350] sm:$0xf]  ;;  %7234 = vmatpush.bf16.msrb.mxu2 %v10583_v5  ;;  %1357 = vst.msk [vmem:[#allocation3 + $0x3b0] sm:$0xf] %vm668_vm2, %v1293_v28  ;;  %6848 = vmatpush.bf16.msrb.mxu0 %v10571_v30  ;;  %v10590_v5 = vld [vmem:[%s11140_s26 + $0x708] sm:$0xff] }
 0x2f1   : > { %1161 = vst.msk [vmem:[#allocation3 + $0x35c] sm:$0xf] %vm1117_vm3, %v1012_v3  ;;  %v5858_v22 = vpop.f32.mrf.mxu0  ;;  %v9548_v14 = vor.u32 %v10313_v7, %v9547_v36  ;;  %v2297_v29 = vpop.permute.xlu1 %2296  ;;  %v10591_v57 = vld [vmem:[%s11140_s26 + $0x710] sm:$0xff] }
 0x2f2   : > { %7874 = vst.msk [vmem:[%s11905_s29 + $0xd8] sm:$0xff] %vm249_vm0, %v5943_v0  ;;  %v7964_v26 = vsel %vm249_vm0, %v5943_v0, 0.0  ;;  %v8073_v42 = vmul.f32 %v5943_v0, %v5943_v0  ;;  %v5859_v53 = vadd.f32 %v5858_v22, %v12568_v13  ;;  %v9539_v13 = vld [vmem:[#allocation3 + $0x348] sm:$0xf]  ;;  %v10315_v9 = vld [vmem:[#allocation3 + $0x374] sm:$0xf]  ;;  %7263 = vmatpush.bf16.msrb.mxu3 %v10591_v57 }
 0x2f3   : > { %v7965_v61 = vadd.f32 %v7964_v26, %v7963_v16  ;;  %6827 = vmatmul.bf16.gmra.mxu3 %v9548_v14  ;;  %2443 = vst.msk [vmem:[#allocation3 + $0x38c] sm:$0xf] %vm1117_vm3, %v2297_v29  ;;  %v9564_v54 = vor.u32 %v10315_v9, %v9561_v24  ;;  %v10581_v0 = vld [vmem:[%s11140_s26 + $0x6c0] sm:$0xff]  ;;  %v10570_v14 = vld [vmem:[%s11140_s26 + $0x668] sm:$0xff]  ;;  %v2066_v24 = vld [vmem:[#allocation2 + $0x412] sm:$0xff] }
 0x2f4   : > { %v8163_v60 = vsel %vm249_vm0, %v8073_v42, 0.0  ;;  %v5888_v31 = vadd.f32 %v5887_v46, %v5859_v53  ;;  %v9347_v43 = vld [vmem:[#allocation3 + $0x2e0] sm:$0xf]  ;;  %1805 = vst.msk [vmem:[#allocation3 + $0x3b0] sm:$0xf] %vm1117_vm3, %v1661_v15  ;;  %7235 = vmatpush.bf16.msrb.mxu2 %v10582_v19  ;;  %v3142_v42 = vld [vmem:[#allocation2 + $0x312] sm:$0xff]  ;;  %6849 = vmatpush.bf16.msrb.mxu0 %v10570_v14 }
 0x2f5   : > { %v8164_v1 = vadd.f32 %v8163_v60, %v8162_v10  ;;  %v10299_v16 = vld [vmem:[#allocation3 + $0x2f0] sm:$0xf0]  ;;  %714 = vst.msk [vmem:[#allocation3 + $0x384] sm:$0xf] %vm668_vm2, %v12804_v32  ;;  %v2067_v22 = vld [vmem:[#allocation2 + $0x422] sm:$0xff] }
 0x2f6   : > { %2306 = vrot.lane.b32.xlu0 %v12797_v63, %s10673_s17  ;;  %v5918_v58 = vpop.f32.mrf.mxu2  ;;  %v5917_v27 = vadd.f32 %v5916_v40, %v5888_v31  ;;  %v9348_v23 = vor.u32 %v10299_v16, %v9347_v43  ;;  %v793_v8 = vld [vmem:[#allocation2 + $0x4a1] sm:$0xff]  ;;  %1356 = vst.msk [vmem:[#allocation3 + $0x39c] sm:$0xf] %vm668_vm2, %v12807_v4  ;;  %v1868_v10 = vld [vmem:[#allocation2 + $0x391] sm:$0xff]  ;;  %v1018_v36 = vpop.permute.xlu2 %1017  ;;  %7264 = vmatpush.bf16.msrb.mxu3 %v10590_v5 }
 0x2f7   : > { %v5947_v11 = vpop.f32.mrf.mxu3  ;;  %2943 = vrot.lane.b32.xlu2 %v2767_v25, %s10673_s17  ;;  %v12825_v39 = vpack.c.bf16 %v793_v8, %v793_v8  ;;  %534 = vst.msk [vmem:[#allocation2 + $0x491] sm:$0xff] %vm249_vm0, %v469_v18  ;;  %v1932_v28 = vpack.c.bf16 %v1868_v10, %v1868_v10  ;;  %v10577_v53 = vld [vmem:[%s11140_s26 + $0x6a0] sm:$0xff]  ;;  %v12847_v18 = vpack.c.bf16 %v2067_v22, %v2067_v22  ;;  %v589_v60 = vld [vmem:[#allocation2 + $0x3d0] sm:$0xff]  ;;  %v472_v10 = vld [vmem:[%s11029_s22 + $0x1e8] sm:$0xff] }
 0x2f8   : > { %v5946_v7 = vadd.f32 %v5945_v56, %v5917_v27  ;;  %v2295_v20 = vpop.permute.xlu0 %2294  ;;  %v5889_v2 = vpop.f32.mrf.mxu1  ;;  %v10312_v40 = vld [vmem:[#allocation3 + $0x358] sm:$0xf0]  ;;  %715 = vst.msk [vmem:[#allocation3 + $0x398] sm:$0xf] %vm668_vm2, %v12822_v33  ;;  %7236 = vmatpush.bf16.msrb.mxu2 %v10581_v0  ;;  %6879 = vmatpush.bf16.msrb.mxu1 %v10577_v53  ;;  %v587_v27 = vld [vmem:[#allocation2 + $0x390] sm:$0xff]  ;;  %v10589_v16 = vld [vmem:[%s11140_s26 + $0x700] sm:$0xff] }
 0x2f9   : > { %2442 = vst.msk [vmem:[#allocation3 + $0x378] sm:$0xf] %vm1117_vm3, %v2295_v20  ;;  %v5860_v49 = vpop.f32.mrf.mxu0  ;;  %v9540_v17 = vor.u32 %v10312_v40, %v9539_v13  ;;  %v1659_v52 = vpop.permute.xlu1 %1658  ;;  %1045 = vrot.lane.b32.xlu1 %v12825_v39, %s10673_s17  ;;  %v2705_v40 = vld [vmem:[#allocation2 + $0x401] sm:$0xff] }
 0x2fa   : > { %7875 = vst.msk [vmem:[%s11905_s29 + $0xe0] sm:$0xff] %vm249_vm0, %v5946_v7  ;;  %v7966_v56 = vsel %vm249_vm0, %v5946_v7, 0.0  ;;  %v8074_v3 = vmul.f32 %v5946_v7, %v5946_v7  ;;  %v5861_v46 = vadd.f32 %v5860_v49, %v12602_v21  ;;  %v3205_v21 = vpack.c.bf16 %v3141_v34, %v3141_v34  ;;  %7265 = vmatpush.bf16.msrb.mxu3 %v10589_v16 }
 0x2fb   : > { %v7967_v59 = vadd.f32 %v7966_v56, %v7965_v61  ;;  %9515 = vmatmul.msk.bf16.gmra.mxu0 %vm249_vm0, %v9348_v23  ;;  %6769 = vmatmul.bf16.gmra.mxu1 %v9540_v17  ;;  %1804 = vst.msk [vmem:[#allocation3 + $0x39c] sm:$0xf] %vm1117_vm3, %v1659_v52  ;;  %v10318_v61 = vld [vmem:[#allocation3 + $0x388] sm:$0xf0]  ;;  %v588_v52 = vld [vmem:[#allocation2 + $0x3c0] sm:$0xff] }
 0x2fc   : > { %v8165_v29 = vsel %vm249_vm0, %v8074_v3, 0.0  ;;  %v5890_v55 = vadd.f32 %v5889_v2, %v5861_v46  ;;  %6803 = vmatmul.bf16.gmra.mxu2 %v9564_v54  ;;  %1164 = vst.msk [vmem:[#allocation3 + $0x398] sm:$0xf] %vm1117_vm3, %v1018_v36  ;;  %v10569_v54 = vld [vmem:[%s11140_s26 + $0x660] sm:$0xff]  ;;  %v9581_v56 = vld [vmem:[#allocation3 + $0x3ac] sm:$0xf0]  ;;  %v2769_v36 = vpack.c.bf16 %v2705_v40, %v2705_v40 }
 0x2fd   : > { %v8166_v26 = vadd.f32 %v8165_v29, %v8164_v1  ;;  %1996 = vst.msk [vmem:[#allocation3 + $0x3a0] sm:$0xf] %vm668_vm2, %v1932_v28  ;;  %v3206_v1 = vpack.c.bf16 %v3142_v42, %v3142_v42  ;;  %6850 = vmatpush.bf16.msrb.mxu0 %v10569_v54  ;;  %v9559_v46 = vld [vmem:[#allocation3 + $0x370] sm:$0xf]  ;;  %v652_v28 = vpack.c.bf16 %v588_v52, %v588_v52  ;;  %v10616_v42 = vld [vmem:[%s11140_s26 + $0x7d8] sm:$0xff]  ;;  %v590_v52 = vld [vmem:[#allocation2 + $0x3e0] sm:$0xff] }
 0x2fe   : > { %2949 = vrot.lane.b32.xlu0 %v12644_v38, %s10673_s17  ;;  %v5919_v15 = vadd.f32 %v5918_v58, %v5890_v55  ;;  %v792_v31 = vld [vmem:[#allocation2 + $0x491] sm:$0xff]  ;;  %1997 = vst.msk [vmem:[#allocation3 + $0x3b4] sm:$0xf] %vm668_vm2, %v12720_v35  ;;  %v5921_v13 = vpop.f32.mrf.mxu2  ;;  %v12856_v58 = vpack.c.bf16 %v2066_v24, %v2066_v24  ;;  %v653_v35 = vpack.c.bf16 %v589_v60, %v589_v60  ;;  %v1024_v7 = vpop.permute.xlu2 %1023  ;;  %v471_v60 = vld [vmem:[%s11029_s22 + $0x1e0] sm:$0xff] }
 0x2ff   : > { %v12852_v48 = vpack.c.bf16 %v792_v31, %v792_v31  ;;  %3269 = vst.msk [vmem:[#allocation3 + $0x308] sm:$0xf] %vm668_vm2, %v3205_v21  ;;  %v5950_v2 = vpop.f32.mrf.mxu3  ;;  %7349 = vmatpush.bf16.msra.mxu2 %v10616_v42 }
 0x300   : > { %v5948_v9 = vadd.f32 %v5947_v11, %v5919_v15  ;;  %v1016_v25 = vpop.permute.xlu0 %1015  ;;  %v9567_v38 = vld [vmem:[#allocation3 + $0x378] sm:$0xf]  ;;  %v5892_v43 = vpop.f32.mrf.mxu1  ;;  %3270 = vst.msk [vmem:[#allocation3 + $0x31c] sm:$0xf] %vm668_vm2, %v3206_v1 }
 0x301   : > { %1163 = vst.msk [vmem:[#allocation3 + $0x384] sm:$0xf] %vm1117_vm3, %v1016_v25  ;;  %v5863_v30 = vpop.f32.mrf.mxu0  ;;  %v9568_v57 = vor.u32 %v10318_v61, %v9567_v38  ;;  %1043 = vrot.lane.b32.xlu2 %v12852_v48, %s10673_s17  ;;  %2312 = vrot.lane.b32.xlu1 %v12847_v18, %s10673_s17  ;;  %v2301_v11 = vpop.permute.xlu1 %2300 }
 0x302   : > { %7876 = vst.msk [vmem:[%s11905_s29 + $0xe8] sm:$0xff] %vm249_vm0, %v5948_v9  ;;  %v7968_v19 = vsel %vm249_vm0, %v5948_v9, 0.0  ;;  %v8075_v23 = vmul.f32 %v5948_v9, %v5948_v9  ;;  %v5864_v8 = vadd.f32 %v5863_v30, %v12628_v51  ;;  %v12872_v51 = vpack.c.bf16 %v587_v27, %v587_v27  ;;  %v10320_v0 = vld [vmem:[#allocation3 + $0x39c] sm:$0xf] }
 0x303   : > { %v7969_v20 = vadd.f32 %v7968_v19, %v7967_v59  ;;  %6832 = vmatmul.bf16.gmra.mxu3 %v9568_v57  ;;  %2445 = vst.msk [vmem:[#allocation3 + $0x3b4] sm:$0xf] %vm1117_vm3, %v2301_v11  ;;  %v9584_v29 = vor.u32 %v10320_v0, %v9581_v56  ;;  %v10624_v27 = vld [vmem:[%s11140_s26 + $0x818] sm:$0xff] }
 0x304   : > { %v8167_v49 = vsel %vm249_vm0, %v8075_v23, 0.0  ;;  %v5893_v17 = vadd.f32 %v5892_v43, %v5864_v8  ;;  %537 = vst.msk [vmem:[#allocation2 + $0x4c1] sm:$0xff] %vm249_vm0, %v472_v10  ;;  %v10612_v8 = vld [vmem:[%s11140_s26 + $0x7b8] sm:$0xff]  ;;  %7702 = vmatpush.bf16.msra.mxu3 %v10624_v27 }
 0x305   : > { %v8168_v34 = vadd.f32 %v8167_v49, %v8166_v26  ;;  %718 = vst.msk [vmem:[#allocation3 + $0x3d4] sm:$0xf] %vm668_vm2, %v653_v35  ;;  %v1230_v26 = vld [vmem:[#allocation2 + $0x3c2] sm:$0xff]  ;;  %v10604_v35 = vld [vmem:[%s11140_s26 + $0x778] sm:$0xff]  ;;  %7316 = vmatpush.bf16.msra.mxu1 %v10612_v8 }
 0x306   : > { %2310 = vrot.lane.b32.xlu0 %v12856_v58, %s10673_s17  ;;  %v5922_v3 = vadd.f32 %v5921_v13, %v5893_v17  ;;  %1167 = vst.msk [vmem:[#allocation3 + $0x3d4] sm:$0xf] %vm1117_vm3, %v1024_v7  ;;  %v9367_v21 = vld [vmem:[#allocation3 + $0x308] sm:$0xf]  ;;  %v2928_v31 = vpop.permute.xlu2 %2927  ;;  %v5923_v13 = vpop.f32.mrf.mxu2  ;;  %v1294_v57 = vpack.c.bf16 %v1230_v26, %v1230_v26  ;;  %v591_v7 = vld [vmem:[#allocation2 + $0x3f0] sm:$0xff]  ;;  %7287 = vmatpush.bf16.msra.mxu0 %v10604_v35 }
 0x307   : > { %716 = vst.msk [vmem:[#allocation3 + $0x3ac] sm:$0xf] %vm668_vm2, %v12872_v51  ;;  %v10304_v38 = vld [vmem:[#allocation3 + $0x318] sm:$0xf0]  ;;  %v5952_v19 = vpop.f32.mrf.mxu3  ;;  %v2069_v49 = vld [vmem:[#allocation2 + $0x442] sm:$0xff]  ;;  %v12910_v17 = vpack.c.bf16 %v591_v7, %v591_v7  ;;  %v3144_v35 = vld [vmem:[#allocation2 + $0x352] sm:$0xff] }
 0x308   : > { %v5951_v59 = vadd.f32 %v5950_v2, %v5922_v3  ;;  %v2299_v22 = vpop.permute.xlu0 %2298  ;;  %v10317_v14 = vld [vmem:[#allocation3 + $0x380] sm:$0xf0]  ;;  %v5894_v25 = vpop.f32.mrf.mxu1  ;;  %717 = vst.msk [vmem:[#allocation3 + $0x3c0] sm:$0xf] %vm668_vm2, %v652_v28  ;;  %v2133_v28 = vpack.c.bf16 %v2069_v49, %v2069_v49  ;;  %v10610_v8 = vld [vmem:[%s11140_s26 + $0x7a8] sm:$0xff] }
 0x309   : > { %2444 = vst.msk [vmem:[#allocation3 + $0x3a0] sm:$0xf] %vm1117_vm3, %v2299_v22  ;;  %v5865_v55 = vpop.f32.mrf.mxu0  ;;  %v9560_v5 = vor.u32 %v10317_v14, %v9559_v46  ;;  %2947 = vrot.lane.b32.xlu2 %v2769_v36, %s10673_s17  ;;  %v1022_v24 = vpop.permute.xlu1 %1021  ;;  %v10623_v22 = vld [vmem:[%s11140_s26 + $0x810] sm:$0xff] }
 0x30a   : > { %7877 = vst.msk [vmem:[%s11905_s29 + $0xf0] sm:$0xff] %vm249_vm0, %v5951_v59  ;;  %v7970_v53 = vsel %vm249_vm0, %v5951_v59, 0.0  ;;  %v8076_v15 = vmul.f32 %v5951_v59, %v5951_v59  ;;  %v5866_v61 = vadd.f32 %v5865_v55, %v12652_v41  ;;  %v9368_v41 = vor.u32 %v10304_v38, %v9367_v21  ;;  %v10323_v10 = vld [vmem:[#allocation3 + $0x3b0] sm:$0xf0]  ;;  %7703 = vmatpush.bf16.msra.mxu3 %v10623_v22  ;;  %v3143_v38 = vld [vmem:[#allocation2 + $0x342] sm:$0xff] }
 0x30b   : > { %v7971_v9 = vadd.f32 %v7970_v53, %v7969_v20  ;;  %6774 = vmatmul.bf16.gmra.mxu1 %v9560_v5  ;;  %v795_v30 = vld [vmem:[#allocation2 + $0x4c1] sm:$0xff]  ;;  %1166 = vst.msk [vmem:[#allocation3 + $0x3c0] sm:$0xf] %vm1117_vm3, %v1022_v24  ;;  %v2068_v20 = vld [vmem:[#allocation2 + $0x432] sm:$0xff]  ;;  %v12925_v55 = vpack.c.bf16 %v590_v52, %v590_v52  ;;  %v3207_v27 = vpack.c.bf16 %v3143_v38, %v3143_v38 }
 0x30c   : > { %v8169_v1 = vsel %vm249_vm0, %v8076_v15, 0.0  ;;  %v5895_v43 = vadd.f32 %v5894_v25, %v5866_v61  ;;  %6808 = vmatmul.bf16.gmra.mxu2 %v9584_v29  ;;  %v12894_v23 = vpack.c.bf16 %v795_v30, %v795_v30  ;;  %536 = vst.msk [vmem:[#allocation2 + $0x4b1] sm:$0xff] %vm249_vm0, %v471_v60  ;;  %9516 = vmatmul.msk.bf16.gmra.mxu0 %vm249_vm0, %v9368_v41  ;;  %v10603_v59 = vld [vmem:[%s11140_s26 + $0x770] sm:$0xff]  ;;  %v592_v52 = vld [vmem:[#allocation2 + $0x400] sm:$0xff] }
 0x30d   : > { %v8170_v16 = vadd.f32 %v8169_v1, %v8168_v34  ;;  %2631 = vst.msk [vmem:[#allocation3 + $0x32c] sm:$0xf] %vm668_vm2, %v12689_v12  ;;  %v12915_v56 = vpack.c.bf16 %v2068_v20, %v2068_v20  ;;  %v10611_v21 = vld [vmem:[%s11140_s26 + $0x7b0] sm:$0xff]  ;;  %7288 = vmatpush.bf16.msra.mxu0 %v10603_v59  ;;  %v3208_v20 = vpack.c.bf16 %v3144_v35, %v3144_v35  ;;  %v10601_v22 = vld [vmem:[%s11140_s26 + $0x760] sm:$0xff] }
 0x30e   : > { %2953 = vrot.lane.b32.xlu0 %v12695_v45, %s10673_s17  ;;  %v5924_v11 = vadd.f32 %v5923_v13, %v5895_v43  ;;  %1049 = vrot.lane.b32.xlu1 %v12894_v23, %s10673_s17  ;;  %3079 = vst.msk [vmem:[#allocation3 + $0x32c] sm:$0xf] %vm1117_vm3, %v2928_v31  ;;  %v1028_v46 = vpop.permute.xlu2 %1027  ;;  %v12930_v26 = vpop.f32.mrf.mxu2  ;;  %v10327_v15 = vld [vmem:[#allocation3 + $0x3d0] sm:$0xf0]  ;;  %v12985_v59 = vpack.c.bf16 %v592_v52, %v592_v52  ;;  %v2709_v38 = vld [vmem:[#allocation2 + $0x441] sm:$0xff] }
 0x30f   : > { %1358 = vst.msk [vmem:[#allocation3 + $0x3c4] sm:$0xf] %vm668_vm2, %v1294_v57  ;;  %7317 = vmatpush.bf16.msra.mxu1 %v10611_v21  ;;  %v2710_v61 = vld [vmem:[#allocation2 + $0x451] sm:$0xff] }
 0x310   : > { %v5953_v2 = vadd.f32 %v5952_v19, %v5924_v11  ;;  %v1020_v40 = vpop.permute.xlu0 %1019  ;;  %v9587_v54 = vld [vmem:[#allocation3 + $0x3a0] sm:$0xf]  ;;  %1359 = vst.msk [vmem:[#allocation3 + $0x3d8] sm:$0xf] %vm668_vm2, %v12747_v62  ;;  %v9579_v62 = vld [vmem:[#allocation3 + $0x398] sm:$0xf]  ;;  %v2774_v43 = vpack.c.bf16 %v2710_v61, %v2710_v61 }
 0x311   : > { %1165 = vst.msk [vmem:[#allocation3 + $0x3ac] sm:$0xf] %vm1117_vm3, %v1020_v40  ;;  %v12908_v12 = vpop.f32.mrf.mxu0  ;;  %v9588_v45 = vor.u32 %v10323_v10, %v9587_v54  ;;  %v1665_v3 = vpop.permute.xlu1 %1664  ;;  %v473_v24 = vld [vmem:[%s11029_s22 + $0x1f0] sm:$0xff]  ;;  %v10622_v19 = vld [vmem:[%s11140_s26 + $0x808] sm:$0xff] }
 0x312   : > { %7878 = vst.msk [vmem:[%s11905_s29 + $0xf8] sm:$0xff] %vm249_vm0, %v5953_v2  ;;  %v7972_v34 = vsel %vm249_vm0, %v5953_v2, 0.0  ;;  %v8077_v0 = vmul.f32 %v5953_v2, %v5953_v2  ;;  %v9747_v53 = vld [vmem:[#allocation3 + $0x3c0] sm:$0xf]  ;;  %v10615_v1 = vld [vmem:[%s11140_s26 + $0x7d0] sm:$0xff]  ;;  %7704 = vmatpush.bf16.msra.mxu3 %v10622_v19 }
 0x313   : > { %v12917_v36 = vadd.f32 %v7972_v34, %v7971_v9  ;;  %6837 = vmatmul.bf16.gmra.mxu3 %v9588_v45  ;;  %v794_v29 = vld [vmem:[#allocation2 + $0x4b1] sm:$0xff]  ;;  %1807 = vst.msk [vmem:[#allocation3 + $0x3d8] sm:$0xf] %vm1117_vm3, %v1665_v3  ;;  %v9748_v13 = vor.u32 %v10327_v15, %v9747_v53  ;;  %v2707_v9 = vld [vmem:[#allocation2 + $0x421] sm:$0xff]  ;;  %7350 = vmatpush.bf16.msra.mxu2 %v10615_v1 }
 0x314   : > { %v8171_v14 = vsel %vm249_vm0, %v8077_v0, 0.0  ;;  %v12932_v42 = vpack.c.bf16 %v794_v29, %v794_v29  ;;  %720 = vst.msk [vmem:[#allocation3 + $0x3fc] sm:$0xf] %vm668_vm2, %v12910_v17  ;;  %v2771_v57 = vpack.c.bf16 %v2707_v9, %v2707_v9  ;;  %v593_v11 = vld [vmem:[#allocation2 + $0x410] sm:$0xff]  ;;  %v1431_v45 = vld [vmem:[#allocation2 + $0x480] sm:$0xff]  ;;  %7318 = vmatpush.bf16.msra.mxu1 %v10610_v8  ;;  %v2773_v8 = vpack.c.bf16 %v2709_v38, %v2709_v38 }
 0x315   : > { %v12928_v5 = vadd.f32 %v8171_v14, %v8170_v16  ;;  %1169 = vst.msk [vmem:[#allocation3 + $0x3fc] sm:$0xf] %vm1117_vm3, %v1028_v46  ;;  %v10602_v16 = vld [vmem:[%s11140_s26 + $0x768] sm:$0xff]  ;;  %v1430_v40 = vld [vmem:[#allocation2 + $0x470] sm:$0xff]  ;;  %v10621_v14 = vld [vmem:[%s11140_s26 + $0x800] sm:$0xff] }
 0x316   : > { %2314 = vrot.lane.b32.xlu0 %v12915_v56, %s10673_s17  ;;  %1047 = vrot.lane.b32.xlu2 %v12932_v42, %s10673_s17  ;;  %2632 = vst.msk [vmem:[#allocation3 + $0x340] sm:$0xf] %vm668_vm2, %v12725_v44  ;;  %v2932_v44 = vpop.permute.xlu2 %2931  ;;  %v12959_v10 = vpop.f32.mrf.mxu3  ;;  %v12977_v0 = vpack.c.bf16 %v1430_v40, %v1430_v40  ;;  %v10609_v29 = vld [vmem:[%s11140_s26 + $0x7a0] sm:$0xff]  ;;  %v10600_v40 = vld [vmem:[%s11140_s26 + $0x758] sm:$0xff] }
 0x317   : > { %2316 = vrot.lane.b32.xlu1 %v2133_v28, %s10673_s17  ;;  %719 = vst.msk [vmem:[#allocation3 + $0x3e8] sm:$0xf] %vm668_vm2, %v12925_v55  ;;  %7289 = vmatpush.bf16.msra.mxu0 %v10602_v16  ;;  %v12964_v2 = vpop.f32.mrf.mxu2  ;;  %v12982_v28 = vpack.c.bf16 %v1431_v45, %v1431_v45  ;;  %v594_v45 = vld [vmem:[#allocation2 + $0x420] sm:$0xff]  ;;  %v3148_v38 = vld [vmem:[#allocation2 + $0x392] sm:$0xff] }
 0x318   : > { %v1663_v60 = vpop.permute.xlu0 %1662  ;;  %v10322_v31 = vld [vmem:[#allocation3 + $0x3a8] sm:$0xf0]  ;;  %538 = vst.msk [vmem:[#allocation2 + $0x4d1] sm:$0xff] %vm249_vm0, %v473_v24  ;;  %7705 = vmatpush.bf16.msra.mxu3 %v10621_v14  ;;  %7319 = vmatpush.bf16.msra.mxu1 %v10609_v29  ;;  %v2071_v24 = vld [vmem:[#allocation2 + $0x482] sm:$0xff] }
 0x319   : > { %1806 = vst.msk [vmem:[#allocation3 + $0x3c4] sm:$0xf] %vm1117_vm3, %v1663_v60  ;;  %v9580_v25 = vor.u32 %v10322_v31, %v9579_v62  ;;  %v1026_v41 = vpop.permute.xlu1 %1025  ;;  %v12950_v30 = vpop.f32.mrf.mxu0  ;;  %v10306_v62 = vld [vmem:[#allocation3 + $0x32c] sm:$0xf]  ;;  %v3145_v60 = vld [vmem:[#allocation2 + $0x362] sm:$0xff] }
 0x31a   : > { %1168 = vst.msk [vmem:[#allocation3 + $0x3e8] sm:$0xf] %vm1117_vm3, %v1026_v41  ;;  %v9749_v7 = vld [vmem:[#allocation3 + $0x3d4] sm:$0xf0] }
 0x31b   : > { %6779 = vmatmul.bf16.gmra.mxu1 %v9580_v25  ;;  %2633 = vst.msk [vmem:[#allocation3 + $0x354] sm:$0xf] %vm668_vm2, %v12751_v47  ;;  %v12966_v47 = vpop.f32.mrf.mxu1  ;;  %7290 = vmatpush.bf16.msra.mxu0 %v10601_v22  ;;  %v1433_v22 = vld [vmem:[#allocation2 + $0x4a0] sm:$0xff] }
 0x31c   : > { %7237 = vmatmul.bf16.vlgmr.msrb.gmra.mxu2 %v9748_v13  ;;  %3081 = vst.msk [vmem:[#allocation3 + $0x354] sm:$0xf] %vm1117_vm3, %v2932_v44  ;;  %v10332_v15 = vld [vmem:[#allocation3 + $0x3f8] sm:$0xf0] }
 0x31d   : > { %1360 = vst.msk [vmem:[#allocation3 + $0x3ec] sm:$0xf] %vm668_vm2, %v12716_v37  ;;  %v12974_v37 = vpack.c.bf16 %v593_v11, %v593_v11 }
 0x31e   : > { %2957 = vrot.lane.b32.xlu0 %v2774_v43, %s10673_s17  ;;  %2951 = vrot.lane.b32.xlu2 %v2771_v57, %s10673_s17  ;;  %1361 = vst.msk [vmem:[#allocation3 + $0x400] sm:$0xf] %vm668_vm2, %v12797_v63  ;;  %v1032_v3 = vpop.permute.xlu2 %1031  ;;  %v13005_v31 = vpop.f32.mrf.mxu3  ;;  %v595_v57 = vld [vmem:[#allocation2 + $0x430] sm:$0xff] }
 0x31f   : > { %2959 = vrot.lane.b32.xlu1 %v12760_v50, %s10673_s17  ;;  %3271 = vst.msk [vmem:[#allocation3 + $0x330] sm:$0xf] %vm668_vm2, %v3207_v27  ;;  %v796_v34 = vld [vmem:[#allocation2 + $0x4d1] sm:$0xff]  ;;  %v13009_v1 = vpop.f32.mrf.mxu2  ;;  %v2135_v27 = vpack.c.bf16 %v2071_v24, %v2071_v24  ;;  %7291 = vmatpush.bf16.msra.mxu0 %v10600_v40 }
 0x320   : > { %v2930_v54 = vpop.permute.xlu0 %2929  ;;  %v10325_v49 = vld [vmem:[#allocation3 + $0x3c4] sm:$0xf]  ;;  %3272 = vst.msk [vmem:[#allocation3 + $0x344] sm:$0xf] %vm668_vm2, %v3208_v20  ;;  %v12980_v46 = vpack.c.bf16 %v796_v34, %v796_v34  ;;  %v13020_v20 = vpack.c.bf16 %v595_v57, %v595_v57  ;;  %v10599_v24 = vld [vmem:[%s11140_s26 + $0x750] sm:$0xff] }
 0x321   : > { %3080 = vst.msk [vmem:[#allocation3 + $0x340] sm:$0xf] %vm1117_vm3, %v2930_v54  ;;  %v9752_v50 = vor.u32 %v10325_v49, %v9749_v7  ;;  %v1669_v63 = vpop.permute.xlu1 %1668  ;;  %v12992_v21 = vpop.f32.mrf.mxu0  ;;  %v9767_v53 = vld [vmem:[#allocation3 + $0x3e8] sm:$0xf]  ;;  %v10620_v54 = vld [vmem:[%s11140_s26 + $0x7f8] sm:$0xff]  ;;  %v2510_v40 = vld [vmem:[#allocation2 + $0x3b0] sm:$0xff] }
 0x322   : > { %1809 = vst.msk [vmem:[#allocation3 + $0x400] sm:$0xf] %vm1117_vm3, %v1669_v63  ;;  %v9768_v25 = vor.u32 %v10332_v15, %v9767_v53  ;;  %v10614_v7 = vld [vmem:[%s11140_s26 + $0x7c8] sm:$0xff]  ;;  %7706 = vmatpush.bf16.msra.mxu3 %v10620_v54  ;;  %v10613_v54 = vld [vmem:[%s11140_s26 + $0x7c0] sm:$0xff] }
 0x323   : > { %7266 = vmatmul.bf16.vlgmr.msrb.gmra.mxu3 %v9752_v50  ;;  %722 = vst.msk [vmem:[#allocation3 + $0x424] sm:$0xf] %vm668_vm2, %v12974_v37  ;;  %v13011_v43 = vpop.f32.mrf.mxu1  ;;  %7351 = vmatpush.bf16.msra.mxu2 %v10614_v7  ;;  %v1432_v50 = vld [vmem:[#allocation2 + $0x490] sm:$0xff]  ;;  %v3212_v7 = vpack.c.bf16 %v3148_v38, %v3148_v38 }
 0x324   : > { %1171 = vst.msk [vmem:[#allocation3 + $0x424] sm:$0xf] %vm1117_vm3, %v1032_v3  ;;  %v13042_v29 = vpack.c.bf16 %v1432_v50, %v1432_v50  ;;  %7292 = vmatpush.bf16.msra.mxu0 %v10599_v24  ;;  %v1871_v24 = vld [vmem:[#allocation2 + $0x3e1] sm:$0xff] }
 0x325   : > { %2634 = vst.msk [vmem:[#allocation3 + $0x368] sm:$0xf] %vm668_vm2, %v12804_v32  ;;  %v3146_v32 = vld [vmem:[#allocation2 + $0x372] sm:$0xff] }
 0x326   : > { %1678 = vrot.lane.b32.xlu0 %v12977_v0, %s10673_s17  ;;  %1051 = vrot.lane.b32.xlu2 %v12980_v46, %s10673_s17  ;;  %v9535_v61 = vld [vmem:[#allocation3 + $0x330] sm:$0xf]  ;;  %721 = vst.msk [vmem:[#allocation3 + $0x410] sm:$0xf] %vm668_vm2, %v12985_v59  ;;  %v2936_v19 = vpop.permute.xlu2 %2935  ;;  %v3210_v11 = vpack.c.bf16 %v3146_v32, %v3146_v32 }
 0x327   : > { %1680 = vrot.lane.b32.xlu1 %v12982_v28, %s10673_s17  ;;  %2635 = vst.msk [vmem:[#allocation3 + $0x37c] sm:$0xf] %vm668_vm2, %v12822_v33  ;;  %v10309_v44 = vld [vmem:[#allocation3 + $0x340] sm:$0xf0]  ;;  %v3209_v33 = vpack.c.bf16 %v3145_v60, %v3145_v60  ;;  %v10619_v60 = vld [vmem:[%s11140_s26 + $0x7f0] sm:$0xff]  ;;  %7352 = vmatpush.bf16.msra.mxu2 %v10613_v54 }
 0x328   : > { %v1667_v13 = vpop.permute.xlu0 %1666  ;;  %v9529_v9 = vld [vmem:[#allocation3 + $0x33c] sm:$0xf0]  ;;  %v9536_v35 = vor.u32 %v10309_v44, %v9535_v61  ;;  %1362 = vst.msk [vmem:[#allocation3 + $0x414] sm:$0xf] %vm668_vm2, %v12778_v6  ;;  %v10608_v6 = vld [vmem:[%s11140_s26 + $0x798] sm:$0xff]  ;;  %v13046_v61 = vpack.c.bf16 %v1433_v22, %v1433_v22  ;;  %v10607_v32 = vld [vmem:[%s11140_s26 + $0x790] sm:$0xff]  ;;  %7707 = vmatpush.bf16.msra.mxu3 %v10619_v60 }
 0x329   : > { %1808 = vst.msk [vmem:[#allocation3 + $0x3ec] sm:$0xf] %vm1117_vm3, %v1667_v13  ;;  %v9532_v41 = vor.u32 %v10306_v62, %v9529_v9  ;;  %v1030_v16 = vpop.permute.xlu1 %1029  ;;  %v9769_v49 = vld [vmem:[#allocation3 + $0x3fc] sm:$0xf0]  ;;  %v13029_v52 = vpop.f32.mrf.mxu0  ;;  %7320 = vmatpush.bf16.msra.mxu1 %v10608_v6  ;;  %v10598_v60 = vld [vmem:[%s11140_s26 + $0x748] sm:$0xff] }
 0x32a   : > { %1170 = vst.msk [vmem:[#allocation3 + $0x410] sm:$0xf] %vm1117_vm3, %v1030_v16  ;;  %v13051_v13 = vpop.f32.mrf.mxu2  ;;  %7293 = vmatpush.bf16.msra.mxu0 %v10598_v60 }
 0x32b   : > { %6851 = vmatmul.bf16.vlgmr.msrb.gmra.mxu0 %v9532_v41  ;;  %9741 = vmatmul.msk.bf16.vlgmr.msrb.gmra.mxu1 %vm249_vm0, %v9536_v35  ;;  %3083 = vst.msk [vmem:[#allocation3 + $0x37c] sm:$0xf] %vm1117_vm3, %v2936_v19  ;;  %v13053_v9 = vpop.f32.mrf.mxu1  ;;  %v2073_v35 = vld [vmem:[#allocation2 + $0x4a2] sm:$0xff] }
 0x32c   : > { %7242 = vmatmul.bf16.gmra.mxu2 %v9768_v25  ;;  %1363 = vst.msk [vmem:[#allocation3 + $0x428] sm:$0xf] %vm668_vm2, %v12856_v58  ;;  %v2509_v58 = vld [vmem:[#allocation2 + $0x3a0] sm:$0xff] }
 0x32d   : > { %3273 = vst.msk [vmem:[#allocation3 + $0x358] sm:$0xf] %vm668_vm2, %v3209_v33  ;;  %v2573_v62 = vpack.c.bf16 %v2509_v58, %v2509_v58  ;;  %v10337_v25 = vld [vmem:[#allocation3 + $0x420] sm:$0xf0]  ;;  %7321 = vmatpush.bf16.msra.mxu1 %v10607_v32 }
 0x32e   : > { %2320 = vrot.lane.b32.xlu0 %v2135_v27, %s10673_s17  ;;  %2955 = vrot.lane.b32.xlu2 %v2773_v8, %s10673_s17  ;;  %3274 = vst.msk [vmem:[#allocation3 + $0x36c] sm:$0xf] %vm668_vm2, %v3210_v11  ;;  %v13035_v34 = vpop.f32.mrf.mxu3  ;;  %v1036_v15 = vpop.permute.xlu2 %1035  ;;  %v2070_v11 = vld [vmem:[#allocation2 + $0x472] sm:$0xff]  ;;  %v596_v58 = vld [vmem:[#allocation2 + $0x460] sm:$0xff] }
 0x32f   : > { %2963 = vrot.lane.b32.xlu1 %v12825_v39, %s10673_s17  ;;  %724 = vst.msk [vmem:[#allocation3 + $0x44c] sm:$0xf] %vm668_vm2, %v13020_v20  ;;  %v13040_v39 = vpack.c.bf16 %v594_v45, %v594_v45  ;;  %v2134_v45 = vpack.c.bf16 %v2070_v11, %v2070_v11 }
 0x330   : > { %v2934_v63 = vpop.permute.xlu0 %2933  ;;  %v10330_v3 = vld [vmem:[#allocation3 + $0x3ec] sm:$0xf]  ;;  %2636 = vst.msk [vmem:[#allocation3 + $0x390] sm:$0xf] %vm668_vm2, %v12872_v51  ;;  %v10311_v51 = vld [vmem:[#allocation3 + $0x354] sm:$0xf] }
 0x331   : > { %3082 = vst.msk [vmem:[#allocation3 + $0x368] sm:$0xf] %vm1117_vm3, %v2934_v63  ;;  %v9772_v14 = vor.u32 %v10330_v3, %v9769_v49  ;;  %v1673_v53 = vpop.permute.xlu1 %1672  ;;  %v9787_v44 = vld [vmem:[#allocation3 + $0x410] sm:$0xf]  ;;  %v2574_v3 = vpack.c.bf16 %v2510_v40, %v2510_v40 }
 0x332   : > { %1811 = vst.msk [vmem:[#allocation3 + $0x428] sm:$0xf] %vm1117_vm3, %v1673_v53  ;;  %v9788_v8 = vor.u32 %v10337_v25, %v9787_v44  ;;  %v1434_v53 = vld [vmem:[#allocation2 + $0x4b0] sm:$0xff]  ;;  %v10606_v25 = vld [vmem:[%s11140_s26 + $0x788] sm:$0xff] }
 0x333   : > { %7271 = vmatmul.bf16.gmra.mxu3 %v9772_v14  ;;  %1173 = vst.msk [vmem:[#allocation3 + $0x44c] sm:$0xf] %vm1117_vm3, %v1036_v15  ;;  %v13086_v22 = vpop.f32.mrf.mxu1  ;;  %v660_v15 = vpack.c.bf16 %v596_v58, %v596_v58  ;;  %v3149_v44 = vld [vmem:[#allocation2 + $0x3a2] sm:$0xff]  ;;  %7322 = vmatpush.bf16.msra.mxu1 %v10606_v25  ;;  %v10316_v58 = vld [vmem:[#allocation3 + $0x37c] sm:$0xf]  ;;  %v2072_v25 = vld [vmem:[#allocation2 + $0x492] sm:$0xff] }
 0x334   : > { %v9555_v41 = vld [vmem:[#allocation3 + $0x358] sm:$0xf]  ;;  %723 = vst.msk [vmem:[#allocation3 + $0x438] sm:$0xf] %vm668_vm2, %v13040_v39  ;;  %v3213_v11 = vpack.c.bf16 %v3149_v44, %v3149_v44 }
 0x335   : > { %v10314_v57 = vld [vmem:[#allocation3 + $0x368] sm:$0xf0]  ;;  %2637 = vst.msk [vmem:[#allocation3 + $0x3a4] sm:$0xf] %vm668_vm2, %v2573_v62  ;;  %v1870_v62 = vld [vmem:[#allocation2 + $0x3d1] sm:$0xff] }
 0x336   : > { %1682 = vrot.lane.b32.xlu0 %v13042_v29, %s10673_s17  ;;  %2961 = vrot.lane.b32.xlu2 %v12852_v48, %s10673_s17  ;;  %1364 = vst.msk [vmem:[#allocation3 + $0x43c] sm:$0xf] %vm668_vm2, %v12847_v18  ;;  %v9556_v33 = vor.u32 %v10314_v57, %v9555_v41  ;;  %v13074_v6 = vpop.f32.mrf.mxu3  ;;  %v2137_v18 = vpack.c.bf16 %v2073_v35, %v2073_v35  ;;  %v2940_v50 = vpop.permute.xlu2 %2939  ;;  %v1435_v41 = vld [vmem:[#allocation2 + $0x4c0] sm:$0xff]  ;;  %v3150_v35 = vld [vmem:[#allocation2 + $0x3b2] sm:$0xff] }
 0x337   : > { %1684 = vrot.lane.b32.xlu1 %v13046_v61, %s10673_s17  ;;  %1365 = vst.msk [vmem:[#allocation3 + $0x450] sm:$0xf] %vm668_vm2, %v12915_v56  ;;  %v474_v56 = vld [vmem:[%s11029_s22 + $0x1f8] sm:$0xff]  ;;  %v13080_v63 = vpop.f32.mrf.mxu2 }
 0x338   : > { %v1671_v27 = vpop.permute.xlu0 %1670  ;;  %v13068_v16 = vpop.f32.mrf.mxu0  ;;  %v9549_v19 = vld [vmem:[#allocation3 + $0x364] sm:$0xf0]  ;;  %3275 = vst.msk [vmem:[#allocation3 + $0x380] sm:$0xf] %vm668_vm2, %v12807_v4 }
 0x339   : > { %1810 = vst.msk [vmem:[#allocation3 + $0x414] sm:$0xf] %vm1117_vm3, %v1671_v27  ;;  %v9552_v48 = vor.u32 %v10311_v51, %v9549_v19  ;;  %v1034_v49 = vpop.permute.xlu1 %1033  ;;  %v10618_v4 = vld [vmem:[%s11140_s26 + $0x7e8] sm:$0xff]  ;;  %v13102_v27 = vpack.c.bf16 %v1434_v53, %v1434_v53  ;;  %v10605_v53 = vld [vmem:[%s11140_s26 + $0x780] sm:$0xff] }
 0x33a   : > { %1172 = vst.msk [vmem:[#allocation3 + $0x438] sm:$0xf] %vm1117_vm3, %v1034_v49  ;;  %v9789_v14 = vld [vmem:[#allocation3 + $0x424] sm:$0xf0]  ;;  %7708 = vmatpush.bf16.msra.mxu3 %v10618_v4  ;;  %v10342_v54 = vld [vmem:[#allocation3 + $0x448] sm:$0xf0]  ;;  %7323 = vmatpush.bf16.msra.mxu1 %v10605_v53 }
 0x33b   : > { %6856 = vmatmul.bf16.gmra.mxu0 %v9552_v48  ;;  %9742 = vmatmul.msk.bf16.gmra.mxu1 %vm249_vm0, %v9556_v33  ;;  %3085 = vst.msk [vmem:[#allocation3 + $0x3a4] sm:$0xf] %vm1117_vm3, %v2940_v50  ;;  %v1935_v33 = vpack.c.bf16 %v1871_v24, %v1871_v24  ;;  %v3151_v48 = vld [vmem:[#allocation2 + $0x3e2] sm:$0xff]  ;;  %v10640_v53 = vld [vmem:[%s11140_s26 + $0x898] sm:$0xff] }
 0x33c   : > { %7247 = vmatmul.bf16.gmra.mxu2 %v9788_v8  ;;  %3276 = vst.msk [vmem:[#allocation3 + $0x394] sm:$0xf] %vm668_vm2, %v3212_v7  ;;  %v13105_v8 = vpack.c.bf16 %v1435_v41, %v1435_v41  ;;  %v2075_v4 = vld [vmem:[#allocation2 + $0x4c2] sm:$0xff] }
 0x33d   : > { %539 = vst.msk [vmem:[#allocation2 + $0x4e1] sm:$0xff] %vm249_vm0, %v474_v56  ;;  %v2139_v44 = vpack.c.bf16 %v2075_v4, %v2075_v4 }
 0x33e   : > { %2324 = vrot.lane.b32.xlu0 %v2137_v18, %s10673_s17  ;;  %2318 = vrot.lane.b32.xlu2 %v2134_v45, %s10673_s17  ;;  %726 = vst.msk [vmem:[#allocation3 + $0x474] sm:$0xf] %vm668_vm2, %v12977_v0  ;;  %v10617_v0 = vld [vmem:[%s11140_s26 + $0x7e0] sm:$0xff]  ;;  %v13108_v7 = vpop.f32.mrf.mxu3  ;;  %v3214_v18 = vpack.c.bf16 %v3150_v35, %v3150_v35  ;;  %v2136_v35 = vpack.c.bf16 %v2072_v25, %v2072_v25 }
 0x33f   : > { %2967 = vrot.lane.b32.xlu1 %v12894_v23, %s10673_s17  ;;  %2638 = vst.msk [vmem:[#allocation3 + $0x3b8] sm:$0xf] %vm668_vm2, %v2574_v3  ;;  %v1934_v23 = vpack.c.bf16 %v1870_v62, %v1870_v62  ;;  %v9575_v40 = vld [vmem:[#allocation3 + $0x380] sm:$0xf]  ;;  %7709 = vmatpush.bf16.msra.mxu3 %v10617_v0  ;;  %v13113_v50 = vpop.f32.mrf.mxu2  ;;  %v3152_v3 = vld [vmem:[#allocation2 + $0x3f2] sm:$0xff] }
 0x340   : > { %v2938_v38 = vpop.permute.xlu0 %2937  ;;  %v10335_v32 = vld [vmem:[#allocation3 + $0x414] sm:$0xf]  ;;  %v13099_v51 = vpop.f32.mrf.mxu0  ;;  %725 = vst.msk [vmem:[#allocation3 + $0x460] sm:$0xf] %vm668_vm2, %v660_v15  ;;  %v3216_v41 = vpack.c.bf16 %v3152_v3, %v3152_v3  ;;  %v6322_v3 = vadd.f32 %v12966_v47, %v12908_v12  ;;  %7760 = vmatpush.bf16.msrb.mxu1 %v10640_v53 }
 0x341   : > { %3084 = vst.msk [vmem:[#allocation3 + $0x390] sm:$0xf] %vm1117_vm3, %v2938_v38  ;;  %v9792_v57 = vor.u32 %v10335_v32, %v9789_v14  ;;  %v1677_v19 = vpop.permute.xlu1 %1676  ;;  %v9807_v45 = vld [vmem:[#allocation3 + $0x438] sm:$0xf]  ;;  %v13115_v56 = vpop.f32.mrf.mxu1  ;;  %v10597_v14 = vld [vmem:[%s11140_s26 + $0x740] sm:$0xff] }
 0x342   : > { %1813 = vst.msk [vmem:[#allocation3 + $0x450] sm:$0xf] %vm1117_vm3, %v1677_v19  ;;  %v9808_v60 = vor.u32 %v10342_v54, %v9807_v45  ;;  %7294 = vmatpush.bf16.msra.mxu0 %v10597_v14  ;;  %v1436_v19 = vld [vmem:[#allocation2 + $0x4d0] sm:$0xff]  ;;  %v10648_v45 = vld [vmem:[%s11140_s26 + $0x8d8] sm:$0xff] }
 0x343   : > { %7276 = vmatmul.bf16.gmra.mxu3 %v9792_v57  ;;  %2639 = vst.msk [vmem:[#allocation3 + $0x3cc] sm:$0xf] %vm668_vm2, %v12925_v55  ;;  %v10319_v49 = vld [vmem:[#allocation3 + $0x390] sm:$0xf0]  ;;  %v3215_v55 = vpack.c.bf16 %v3151_v48, %v3151_v48  ;;  %7789 = vmatpush.bf16.msrb.mxu2 %v10648_v45 }
 0x344   : > { %1998 = vst.msk [vmem:[#allocation3 + $0x3c8] sm:$0xf] %vm668_vm2, %v1934_v23  ;;  %v9576_v24 = vor.u32 %v10319_v49, %v9575_v40  ;;  %v2717_v38 = vld [vmem:[#allocation2 + $0x4e1] sm:$0xff]  ;;  %v1872_v54 = vld [vmem:[#allocation2 + $0x3f1] sm:$0xff] }
 0x345   : > { %1999 = vst.msk [vmem:[#allocation3 + $0x3dc] sm:$0xf] %vm668_vm2, %v1935_v33  ;;  %v2781_v0 = vpack.c.bf16 %v2717_v38, %v2717_v38  ;;  %v1437_v40 = vld [vmem:[#allocation2 + $0x4e0] sm:$0xff] }
 0x346   : > { %1686 = vrot.lane.b32.xlu0 %v13102_v27, %s10673_s17  ;;  %2965 = vrot.lane.b32.xlu2 %v12932_v42, %s10673_s17  ;;  %3277 = vst.msk [vmem:[#allocation3 + $0x3a8] sm:$0xf] %vm668_vm2, %v3213_v11  ;;  %v13136_v33 = vpop.f32.mrf.mxu3  ;;  %v1873_v49 = vld [vmem:[#allocation2 + $0x401] sm:$0xff] }
 0x347   : > { %1688 = vrot.lane.b32.xlu1 %v13105_v8, %s10673_s17  ;;  %3278 = vst.msk [vmem:[#allocation3 + $0x3bc] sm:$0xf] %vm668_vm2, %v3214_v18  ;;  %v3153_v18 = vld [vmem:[#allocation2 + $0x402] sm:$0xff]  ;;  %v1937_v25 = vpack.c.bf16 %v1873_v49, %v1873_v49 }
 0x348   : > { %v1675_v15 = vpop.permute.xlu0 %1674  ;;  %v9569_v62 = vld [vmem:[#allocation3 + $0x38c] sm:$0xf0]  ;;  %v13129_v32 = vpop.f32.mrf.mxu0  ;;  %3279 = vst.msk [vmem:[#allocation3 + $0x3d0] sm:$0xf] %vm668_vm2, %v3215_v55  ;;  %v3217_v38 = vpack.c.bf16 %v3153_v18, %v3153_v18 }
 0x349   : > { %1812 = vst.msk [vmem:[#allocation3 + $0x43c] sm:$0xf] %vm1117_vm3, %v1675_v15  ;;  %v9572_v42 = vor.u32 %v10316_v58, %v9569_v62  ;;  %v1040_v57 = vpop.permute.xlu2 %1039  ;;  %v1038_v23 = vpop.permute.xlu1 %1037  ;;  %v9809_v48 = vld [vmem:[#allocation3 + $0x44c] sm:$0xf0]  ;;  %v10632_v58 = vld [vmem:[%s11140_s26 + $0x858] sm:$0xff]  ;;  %v1936_v62 = vpack.c.bf16 %v1872_v54, %v1872_v54  ;;  %v6324_v54 = vadd.f32 %v13011_v43, %v12950_v30 }
 0x34a   : > { %1175 = vst.msk [vmem:[#allocation3 + $0x474] sm:$0xf] %vm1117_vm3, %v1040_v57  ;;  %v13151_v55 = vpop.f32.mrf.mxu1  ;;  %7731 = vmatpush.bf16.msrb.mxu0 %v10632_v58 }
 0x34b   : > { %6861 = vmatmul.bf16.gmra.mxu0 %v9572_v42  ;;  %9743 = vmatmul.msk.bf16.gmra.mxu1 %vm249_vm0, %v9576_v24  ;;  %1174 = vst.msk [vmem:[#allocation3 + $0x460] sm:$0xf] %vm1117_vm3, %v1038_v23  ;;  %v3154_v24 = vld [vmem:[#allocation2 + $0x412] sm:$0xff]  ;;  %v6351_v42 = vadd.f32 %v12930_v26, %v6322_v3  ;;  %v2077_v26 = vld [vmem:[#allocation2 + $0x4e2] sm:$0xff] }
 0x34c   : > { %7252 = vmatmul.bf16.gmra.mxu2 %v9808_v60  ;;  %3280 = vst.msk [vmem:[#allocation3 + $0x3e4] sm:$0xf] %vm668_vm2, %v3216_v41  ;;  %v13160_v60 = vpack.c.bf16 %v1436_v19, %v1436_v19  ;;  %v3218_v57 = vpack.c.bf16 %v3154_v24, %v3154_v24  ;;  %v10321_v19 = vld [vmem:[#allocation3 + $0x3a4] sm:$0xf]  ;;  %v2141_v43 = vpack.c.bf16 %v2077_v26, %v2077_v26  ;;  %v10630_v26 = vld [vmem:[%s11140_s26 + $0x848] sm:$0xff] }
 0x34d   : > { %728 = vst.msk [vmem:[#allocation3 + $0x49c] sm:$0xf] %vm668_vm2, %v13042_v29  ;;  %v10652_v29 = vld [vmem:[%s11140_s26 + $0x8f8] sm:$0xff]  ;;  %v9595_v41 = vld [vmem:[#allocation3 + $0x3a8] sm:$0xf]  ;;  %v6380_v45 = vadd.f32 %v12959_v10, %v6351_v42  ;;  %v6353_v24 = vadd.f32 %v12964_v2, %v6324_v54  ;;  %v10651_v54 = vld [vmem:[%s11140_s26 + $0x8f0] sm:$0xff] }
 0x34e   : > { %2328 = vrot.lane.b32.xlu0 %v2139_v44, %s10673_s17  ;;  %v13139_v11 = vpop.f32.mrf.mxu2  ;;  %2322 = vrot.lane.b32.xlu2 %v2136_v35, %s10673_s17  ;;  %2640 = vst.msk [vmem:[#allocation3 + $0x3e0] sm:$0xf] %vm668_vm2, %v12910_v17  ;;  %v10324_v44 = vld [vmem:[#allocation3 + $0x3b8] sm:$0xf0] }
 0x34f   : > { %2971 = vrot.lane.b32.xlu1 %v2781_v0, %s10673_s17  ;;  %727 = vst.msk [vmem:[#allocation3 + $0x488] sm:$0xf] %vm668_vm2, %v12982_v28  ;;  %7822 = vmatpush.bf16.msrb.mxu3 %v10652_v29  ;;  %v1501_v28 = vpack.c.bf16 %v1437_v40, %v1437_v40  ;;  %v9763_v23 = vld [vmem:[#allocation3 + $0x3d0] sm:$0xf]  ;;  %v9596_v3 = vor.u32 %v10324_v44, %v9595_v41 }
 0x350   : > { %v2942_v4 = vpop.permute.xlu0 %2941  ;;  %v10340_v14 = vld [vmem:[#allocation3 + $0x43c] sm:$0xf]  ;;  %v13158_v15 = vpop.f32.mrf.mxu0  ;;  %2641 = vst.msk [vmem:[#allocation3 + $0x3f4] sm:$0xf] %vm668_vm2, %v12985_v59  ;;  %v10631_v40 = vld [vmem:[%s11140_s26 + $0x850] sm:$0xff] }
 0x351   : > { %3086 = vst.msk [vmem:[#allocation3 + $0x3b8] sm:$0xf] %vm1117_vm3, %v2942_v4  ;;  %v9812_v17 = vor.u32 %v10340_v14, %v9809_v48  ;;  %v2944_v12 = vpop.permute.xlu2 %2943  ;;  %v2305_v47 = vpop.permute.xlu1 %2304  ;;  %v10647_v48 = vld [vmem:[%s11140_s26 + $0x8d0] sm:$0xff]  ;;  %7732 = vmatpush.bf16.msrb.mxu0 %v10631_v40 }
 0x352   : > { %3087 = vst.msk [vmem:[#allocation3 + $0x3cc] sm:$0xf] %vm1117_vm3, %v2944_v12  ;;  %v2074_v14 = vld [vmem:[#allocation2 + $0x4b2] sm:$0xff]  ;;  %7790 = vmatpush.bf16.msrb.mxu2 %v10647_v48 }
 0x353   : > { %7281 = vmatmul.bf16.gmra.mxu3 %v9812_v17  ;;  %2447 = vst.msk [vmem:[#allocation3 + $0x3dc] sm:$0xf] %vm1117_vm3, %v2305_v47  ;;  %v10329_v35 = vld [vmem:[#allocation3 + $0x3e0] sm:$0xf0]  ;;  %v2138_v10 = vpack.c.bf16 %v2074_v14, %v2074_v14  ;;  %v2718_v41 = vld [vmem:[#allocation2 + $0x4f1] sm:$0xff] }
 0x354   : > { %2000 = vst.msk [vmem:[#allocation3 + $0x3f0] sm:$0xf] %vm668_vm2, %v1936_v62  ;;  %v9764_v4 = vor.u32 %v10329_v35, %v9763_v23  ;;  %v1874_v62 = vld [vmem:[#allocation2 + $0x411] sm:$0xff]  ;;  %v1875_v35 = vld [vmem:[#allocation2 + $0x421] sm:$0xff]  ;;  %7823 = vmatpush.bf16.msrb.mxu3 %v10651_v54 }
 0x355   : > { %2001 = vst.msk [vmem:[#allocation3 + $0x404] sm:$0xf] %vm668_vm2, %v1937_v25  ;;  %v1938_v44 = vpack.c.bf16 %v1874_v62, %v1874_v62  ;;  %7733 = vmatpush.bf16.msrb.mxu0 %v10630_v26  ;;  %v1876_v54 = vld [vmem:[#allocation2 + $0x431] sm:$0xff] }
 0x356   : > { %1690 = vrot.lane.b32.xlu0 %v13160_v60, %s10673_s17  ;;  %v13170_v59 = vpop.f32.mrf.mxu2  ;;  %v13172_v0 = vpop.f32.mrf.mxu3  ;;  %2969 = vrot.lane.b32.xlu2 %v12980_v46, %s10673_s17  ;;  %3281 = vst.msk [vmem:[#allocation3 + $0x3f8] sm:$0xf] %vm668_vm2, %v3217_v38  ;;  %v10639_v46 = vld [vmem:[%s11140_s26 + $0x890] sm:$0xff] }
 0x357   : > { %1692 = vrot.lane.b32.xlu1 %v1501_v28, %s10673_s17  ;;  %3282 = vst.msk [vmem:[#allocation3 + $0x40c] sm:$0xf] %vm668_vm2, %v3218_v57  ;;  %7761 = vmatpush.bf16.msrb.mxu1 %v10639_v46  ;;  %v9975_v28 = vld [vmem:[#allocation3 + $0x460] sm:$0xf] }
 0x358   : > { %v2303_v18 = vpop.permute.xlu0 %2302  ;;  %v13183_v49 = vpop.f32.mrf.mxu1  ;;  %v9589_v58 = vld [vmem:[#allocation3 + $0x3b4] sm:$0xf0]  ;;  %730 = vst.msk [vmem:[#allocation3 + $0x4c4] sm:$0xf] %vm668_vm2, %v13102_v27  ;;  %v10347_v27 = vld [vmem:[#allocation3 + $0x470] sm:$0xf0] }
 0x359   : > { %2446 = vst.msk [vmem:[#allocation3 + $0x3c8] sm:$0xf] %vm1117_vm3, %v2303_v18  ;;  %v6408_v29 = vpop.f32.mrf.mxu0  ;;  %v9592_v53 = vor.u32 %v10321_v19, %v9589_v58  ;;  %v1042_v17 = vpop.permute.xlu1 %1041  ;;  %v9976_v23 = vor.u32 %v10347_v27, %v9975_v28  ;;  %v10646_v19 = vld [vmem:[%s11140_s26 + $0x8c8] sm:$0xff]  ;;  %v6327_v58 = vadd.f32 %v13053_v9, %v12992_v21  ;;  %v2076_v27 = vld [vmem:[#allocation2 + $0x4d2] sm:$0xff] }
 0x35a   : > { %v6409_v30 = vadd.f32 %v6408_v29, %v6380_v45  ;;  %1176 = vst.msk [vmem:[#allocation3 + $0x488] sm:$0xf] %vm1117_vm3, %v1042_v17  ;;  %v10638_v18 = vld [vmem:[%s11140_s26 + $0x888] sm:$0xff]  ;;  %7791 = vmatpush.bf16.msrb.mxu2 %v10646_v19 }
 0x35b   : > { %6866 = vmatmul.bf16.gmra.mxu0 %v9592_v53  ;;  %9744 = vmatmul.msk.bf16.gmra.mxu1 %vm249_vm0, %v9596_v3  ;;  %v1044_v25 = vpop.permute.xlu2 %1043  ;;  %2642 = vst.msk [vmem:[#allocation3 + $0x408] sm:$0xf] %vm668_vm2, %v12974_v37  ;;  %v6382_v37 = vadd.f32 %v13005_v31, %v6353_v24  ;;  %v1939_v31 = vpack.c.bf16 %v1875_v35, %v1875_v35  ;;  %v10326_v21 = vld [vmem:[#allocation3 + $0x3cc] sm:$0xf]  ;;  %v10629_v35 = vld [vmem:[%s11140_s26 + $0x840] sm:$0xff] }
 0x35c   : > { %7879 = vst.msk [vmem:[%s11905_s29 + $0x100] sm:$0xff] %vm249_vm0, %v6409_v30  ;;  %v7974_v12 = vsel %vm249_vm0, %v6409_v30, 0.0  ;;  %v8078_v47 = vmul.f32 %v6409_v30, %v6409_v30  ;;  %9969 = vmatmul.msk.bf16.vlgmr.msra.gmra.mxu2 %vm249_vm0, %v9764_v4  ;;  %7762 = vmatpush.bf16.msrb.mxu1 %v10638_v18  ;;  %v10328_v30 = vld [vmem:[#allocation3 + $0x3d8] sm:$0xf0]  ;;  %v6356_v62 = vadd.f32 %v13009_v1, %v6327_v58 }
 0x35d   : > { %v7975_v38 = vadd.f32 %v7974_v12, %v12917_v36  ;;  %1177 = vst.msk [vmem:[#allocation3 + $0x49c] sm:$0xf] %vm1117_vm3, %v1044_v25  ;;  %v9783_v17 = vld [vmem:[#allocation3 + $0x3f8] sm:$0xf]  ;;  %7734 = vmatpush.bf16.msrb.mxu0 %v10629_v35 }
 0x35e   : > { %v8173_v2 = vsel %vm249_vm0, %v8078_v47, 0.0  ;;  %2332 = vrot.lane.b32.xlu0 %v2141_v43, %s10673_s17  ;;  %v13202_v42 = vpop.f32.mrf.mxu3  ;;  %2326 = vrot.lane.b32.xlu2 %v2138_v10, %s10673_s17  ;;  %729 = vst.msk [vmem:[#allocation3 + $0x4b0] sm:$0xf] %vm668_vm2, %v13046_v61  ;;  %v3156_v61 = vld [vmem:[#allocation2 + $0x432] sm:$0xff]  ;;  %v10334_v10 = vld [vmem:[#allocation3 + $0x408] sm:$0xf0]  ;;  %v6385_v1 = vadd.f32 %v13035_v34, %v6356_v62  ;;  %v6329_v34 = vadd.f32 %v13086_v22, %v13029_v52 }
 0x35f   : > { %v8174_v57 = vadd.f32 %v8173_v2, %v12928_v5  ;;  %v13208_v36 = vpop.f32.mrf.mxu2  ;;  %2643 = vst.msk [vmem:[#allocation3 + $0x41c] sm:$0xf] %vm668_vm2, %v13040_v39  ;;  %v3155_v5 = vld [vmem:[#allocation2 + $0x422] sm:$0xff]  ;;  %v2782_v39 = vpack.c.bf16 %v2718_v41, %v2718_v41  ;;  %v3220_v9 = vpack.c.bf16 %v3156_v61, %v3156_v61 }
 0x360   : > { %v2946_v48 = vpop.permute.xlu0 %2945  ;;  %v13214_v40 = vpop.f32.mrf.mxu1  ;;  %2002 = vst.msk [vmem:[#allocation3 + $0x418] sm:$0xf] %vm668_vm2, %v1938_v44  ;;  %v3219_v14 = vpack.c.bf16 %v3155_v5, %v3155_v5  ;;  %v9755_v47 = vld [vmem:[#allocation3 + $0x3c8] sm:$0xf]  ;;  %v9784_v44 = vor.u32 %v10334_v10, %v9783_v17  ;;  %v2520_v17 = vld [vmem:[#allocation2 + $0x490] sm:$0xff] }
 0x361   : > { %3088 = vst.msk [vmem:[#allocation3 + $0x3e0] sm:$0xf] %vm1117_vm3, %v2946_v48  ;;  %v6410_v45 = vpop.f32.mrf.mxu0  ;;  %v2309_v4 = vpop.permute.xlu1 %2308  ;;  %v9756_v19 = vor.u32 %v10328_v30, %v9755_v47  ;;  %v10637_v48 = vld [vmem:[%s11140_s26 + $0x880] sm:$0xff]  ;;  %v9995_v18 = vld [vmem:[#allocation3 + $0x488] sm:$0xf] }
 0x362   : > { %v6411_v3 = vadd.f32 %v6410_v45, %v6382_v37  ;;  %2449 = vst.msk [vmem:[#allocation3 + $0x404] sm:$0xf] %vm1117_vm3, %v2309_v4  ;;  %v2517_v37 = vld [vmem:[#allocation2 + $0x440] sm:$0xff]  ;;  %v13251_v45 = vpack.c.bf16 %v2076_v27, %v2076_v27  ;;  %7763 = vmatpush.bf16.msrb.mxu1 %v10637_v48  ;;  %v10650_v47 = vld [vmem:[%s11140_s26 + $0x8e8] sm:$0xff]  ;;  %v2584_v48 = vpack.c.bf16 %v2520_v17, %v2520_v17 }
 0x363   : > { %7710 = vmatmul.bf16.vlgmr.msra.gmra.mxu3 %v9976_v23  ;;  %v2948_v53 = vpop.permute.xlu2 %2947  ;;  %2003 = vst.msk [vmem:[#allocation3 + $0x42c] sm:$0xf] %vm668_vm2, %v1939_v31  ;;  %v10645_v23 = vld [vmem:[%s11140_s26 + $0x8c0] sm:$0xff]  ;;  %v2581_v61 = vpack.c.bf16 %v2517_v37, %v2517_v37  ;;  %v2518_v37 = vld [vmem:[#allocation2 + $0x450] sm:$0xff] }
 0x364   : > { %7880 = vst.msk [vmem:[%s11905_s29 + $0x108] sm:$0xff] %vm249_vm0, %v6411_v3  ;;  %v7976_v46 = vsel %vm249_vm0, %v6411_v3, 0.0  ;;  %v8079_v29 = vmul.f32 %v6411_v3, %v6411_v3  ;;  %7792 = vmatpush.bf16.msrb.mxu2 %v10645_v23  ;;  %v10352_v58 = vld [vmem:[#allocation3 + $0x498] sm:$0xf0]  ;;  %v1940_v3 = vpack.c.bf16 %v1876_v54, %v1876_v54  ;;  %v1877_v4 = vld [vmem:[#allocation2 + $0x441] sm:$0xff]  ;;  %7824 = vmatpush.bf16.msrb.mxu3 %v10650_v47 }
 0x365   : > { %v7977_v43 = vadd.f32 %v7976_v46, %v7975_v38  ;;  %3089 = vst.msk [vmem:[#allocation3 + $0x3f4] sm:$0xf] %vm1117_vm3, %v2948_v53 }
 0x366   : > { %v8175_v24 = vsel %vm249_vm0, %v8079_v29, 0.0  ;;  %v13232_v12 = vpop.f32.mrf.mxu3  ;;  %2973 = vrot.lane.b32.xlu2 %v2782_v39, %s10673_s17  ;;  %3283 = vst.msk [vmem:[#allocation3 + $0x420] sm:$0xf] %vm668_vm2, %v3219_v14  ;;  %v10644_v39 = vld [vmem:[%s11140_s26 + $0x8b8] sm:$0xff]  ;;  %v6332_v14 = vadd.f32 %v13115_v56, %v13068_v16  ;;  %v3157_v16 = vld [vmem:[#allocation2 + $0x442] sm:$0xff] }
 0x367   : > { %v8176_v25 = vadd.f32 %v8175_v24, %v8174_v57  ;;  %v13236_v28 = vpop.f32.mrf.mxu2  ;;  %3284 = vst.msk [vmem:[#allocation3 + $0x434] sm:$0xf] %vm668_vm2, %v3220_v9  ;;  %v10628_v24 = vld [vmem:[%s11140_s26 + $0x838] sm:$0xff] }
 0x368   : > { %v2307_v38 = vpop.permute.xlu0 %2306  ;;  %v13240_v2 = vpop.f32.mrf.mxu1  ;;  %v9757_v41 = vld [vmem:[#allocation3 + $0x3dc] sm:$0xf0]  ;;  %732 = vst.msk [vmem:[#allocation3 + $0x4ec] sm:$0xf] %vm668_vm2, %v13160_v60  ;;  %7793 = vmatpush.bf16.msrb.mxu2 %v10644_v39  ;;  %7735 = vmatpush.bf16.msrb.mxu0 %v10628_v24 }
 0x369   : > { %2448 = vst.msk [vmem:[#allocation3 + $0x3f0] sm:$0xf] %vm1117_vm3, %v2307_v38  ;;  %v6413_v57 = vpop.f32.mrf.mxu0  ;;  %v9760_v26 = vor.u32 %v10326_v21, %v9757_v41  ;;  %v9996_v21 = vor.u32 %v10352_v58, %v9995_v18  ;;  %v6361_v38 = vadd.f32 %v13080_v63, %v6332_v14  ;;  %v2582_v58 = vpack.c.bf16 %v2518_v37, %v2518_v37 }
 0x36a   : > { %v6414_v5 = vadd.f32 %v6413_v57, %v6385_v1  ;;  %2644 = vst.msk [vmem:[#allocation3 + $0x430] sm:$0xf] %vm668_vm2, %v13020_v20  ;;  %v6358_v20 = vadd.f32 %v13051_v13, %v6329_v34  ;;  %v1941_v13 = vpack.c.bf16 %v1877_v4, %v1877_v4  ;;  %v3221_v1 = vpack.c.bf16 %v3157_v16, %v3157_v16  ;;  %v10333_v57 = vld [vmem:[#allocation3 + $0x400] sm:$0xf0] }
 0x36b   : > { %7295 = vmatmul.bf16.vlgmr.msra.gmra.mxu0 %v9756_v19  ;;  %7324 = vmatmul.bf16.vlgmr.msra.gmra.mxu1 %v9760_v26  ;;  %v1046_v60 = vpop.permute.xlu1 %1045  ;;  %731 = vst.msk [vmem:[#allocation3 + $0x4d8] sm:$0xf] %vm668_vm2, %v13105_v8  ;;  %v6390_v39 = vadd.f32 %v13108_v7, %v6361_v38  ;;  %v1878_v7 = vld [vmem:[#allocation2 + $0x471] sm:$0xff] }
 0x36c   : > { %7881 = vst.msk [vmem:[%s11905_s29 + $0x110] sm:$0xff] %vm249_vm0, %v6414_v5  ;;  %v7978_v52 = vsel %vm249_vm0, %v6414_v5, 0.0  ;;  %v8080_v22 = vmul.f32 %v6414_v5, %v6414_v5  ;;  %9970 = vmatmul.msk.bf16.gmra.mxu2 %vm249_vm0, %v9784_v44  ;;  %v6387_v56 = vadd.f32 %v13074_v6, %v6358_v20  ;;  %v10643_v6 = vld [vmem:[%s11140_s26 + $0x8b0] sm:$0xff]  ;;  %v10642_v5 = vld [vmem:[%s11140_s26 + $0x8a8] sm:$0xff]  ;;  %v1942_v17 = vpack.c.bf16 %v1878_v7, %v1878_v7 }
 0x36d   : > { %v7979_v31 = vadd.f32 %v7978_v52, %v7977_v43  ;;  %1178 = vst.msk [vmem:[#allocation3 + $0x4b0] sm:$0xf] %vm1117_vm3, %v1046_v60  ;;  %v3158_v43 = vld [vmem:[#allocation2 + $0x452] sm:$0xff]  ;;  %v9803_v26 = vld [vmem:[#allocation3 + $0x420] sm:$0xf]  ;;  %7794 = vmatpush.bf16.msrb.mxu2 %v10643_v6 }
 0x36e   : > { %v8177_v46 = vsel %vm249_vm0, %v8080_v22, 0.0  ;;  %v13265_v29 = vpop.f32.mrf.mxu3  ;;  %2330 = vrot.lane.b32.xlu2 %v13251_v45, %s10673_s17  ;;  %2645 = vst.msk [vmem:[#allocation3 + $0x444] sm:$0xf] %vm668_vm2, %v2581_v61  ;;  %v3222_v41 = vpack.c.bf16 %v3158_v43, %v3158_v43  ;;  %v10331_v19 = vld [vmem:[#allocation3 + $0x3f4] sm:$0xf]  ;;  %v2519_v52 = vld [vmem:[#allocation2 + $0x480] sm:$0xff] }
 0x36f   : > { %v8178_v53 = vadd.f32 %v8177_v46, %v8176_v25  ;;  %v13269_v30 = vpop.f32.mrf.mxu2  ;;  %2004 = vst.msk [vmem:[#allocation3 + $0x440] sm:$0xf] %vm668_vm2, %v1940_v3  ;;  %v10636_v25 = vld [vmem:[%s11140_s26 + $0x878] sm:$0xff]  ;;  %v10339_v34 = vld [vmem:[#allocation3 + $0x430] sm:$0xf0]  ;;  %v6334_v3 = vadd.f32 %v13151_v55, %v13099_v51  ;;  %v2583_v16 = vpack.c.bf16 %v2519_v52, %v2519_v52  ;;  %v10641_v43 = vld [vmem:[%s11140_s26 + $0x8a0] sm:$0xff] }
 0x370   : > { %v2950_v9 = vpop.permute.xlu0 %2949  ;;  %v13275_v8 = vpop.f32.mrf.mxu1  ;;  %2005 = vst.msk [vmem:[#allocation3 + $0x454] sm:$0xf] %vm668_vm2, %v1941_v13  ;;  %7764 = vmatpush.bf16.msrb.mxu1 %v10636_v25  ;;  %v9775_v61 = vld [vmem:[#allocation3 + $0x3f0] sm:$0xf]  ;;  %v9804_v14 = vor.u32 %v10339_v34, %v9803_v26 }
 0x371   : > { %v1048_v10 = vpop.permute.xlu2 %1047  ;;  %3090 = vst.msk [vmem:[#allocation3 + $0x408] sm:$0xf] %vm1117_vm3, %v2950_v9  ;;  %v6415_v62 = vpop.f32.mrf.mxu0  ;;  %7795 = vmatpush.bf16.msrb.mxu2 %v10642_v5  ;;  %v10635_v51 = vld [vmem:[%s11140_s26 + $0x870] sm:$0xff]  ;;  %v1238_v9 = vld [vmem:[#allocation2 + $0x462] sm:$0xff]  ;;  %v6363_v6 = vadd.f32 %v13113_v50, %v6334_v3  ;;  %v6337_v3 = vadd.f32 %v13183_v49, %v13129_v32 }
 0x372   : > { %1179 = vst.msk [vmem:[#allocation3 + $0x4c4] sm:$0xf] %vm1117_vm3, %v1048_v10  ;;  %v6416_v27 = vadd.f32 %v6415_v62, %v6387_v56  ;;  %v10627_v56 = vld [vmem:[%s11140_s26 + $0x830] sm:$0xff]  ;;  %v1302_v10 = vpack.c.bf16 %v1238_v9, %v1238_v9  ;;  %v1879_v5 = vld [vmem:[#allocation2 + $0x481] sm:$0xff] }
 0x373   : > { %7715 = vmatmul.bf16.gmra.mxu3 %v9996_v21  ;;  %v2313_v35 = vpop.permute.xlu1 %2312  ;;  %3285 = vst.msk [vmem:[#allocation3 + $0x448] sm:$0xf] %vm668_vm2, %v3221_v1  ;;  %v9776_v21 = vor.u32 %v10333_v57, %v9775_v61  ;;  %v1239_v62 = vld [vmem:[#allocation2 + $0x472] sm:$0xff]  ;;  %7736 = vmatpush.bf16.msrb.mxu0 %v10627_v56 }
 0x374   : > { %7882 = vst.msk [vmem:[%s11905_s29 + $0x118] sm:$0xff] %vm249_vm0, %v6416_v27  ;;  %v7980_v44 = vsel %vm249_vm0, %v6416_v27, 0.0  ;;  %v8081_v23 = vmul.f32 %v6416_v27, %v6416_v27  ;;  %7765 = vmatpush.bf16.msrb.mxu1 %v10635_v51  ;;  %v10015_v25 = vld [vmem:[#allocation3 + $0x4b0] sm:$0xf]  ;;  %v1303_v1 = vpack.c.bf16 %v1239_v62, %v1239_v62  ;;  %v6366_v51 = vadd.f32 %v13139_v11, %v6337_v3 }
 0x375   : > { %v7981_v63 = vadd.f32 %v7980_v44, %v7979_v31  ;;  %2451 = vst.msk [vmem:[#allocation3 + $0x42c] sm:$0xf] %vm1117_vm3, %v2313_v35  ;;  %7796 = vmatpush.bf16.msrb.mxu2 %v10641_v43  ;;  %v10649_v44 = vld [vmem:[%s11140_s26 + $0x8e0] sm:$0xff]  ;;  %v2522_v50 = vld [vmem:[#allocation2 + $0x4b0] sm:$0xff] }
 0x376   : > { %v8179_v54 = vsel %vm249_vm0, %v8081_v23, 0.0  ;;  %v13292_v18 = vpop.f32.mrf.mxu3  ;;  %3286 = vst.msk [vmem:[#allocation3 + $0x45c] sm:$0xf] %vm668_vm2, %v3222_v41  ;;  %v10626_v41 = vld [vmem:[%s11140_s26 + $0x828] sm:$0xff]  ;;  %7825 = vmatpush.bf16.msrb.mxu3 %v10649_v44  ;;  %v2586_v34 = vpack.c.bf16 %v2522_v50, %v2522_v50  ;;  %v1880_v62 = vld [vmem:[#allocation2 + $0x491] sm:$0xff] }
 0x377   : > { %v8180_v22 = vadd.f32 %v8179_v54, %v8178_v53  ;;  %v13295_v60 = vpop.f32.mrf.mxu2  ;;  %2648 = vst.msk [vmem:[#allocation3 + $0x480] sm:$0xf] %vm668_vm2, %v2584_v48  ;;  %v10634_v23 = vld [vmem:[%s11140_s26 + $0x868] sm:$0xff]  ;;  %v2521_v54 = vld [vmem:[#allocation2 + $0x4a0] sm:$0xff]  ;;  %7737 = vmatpush.bf16.msrb.mxu0 %v10626_v41 }
 0x378   : > { %v2311_v4 = vpop.permute.xlu0 %2310  ;;  %v13300_v31 = vpop.f32.mrf.mxu1  ;;  %v9777_v20 = vld [vmem:[#allocation3 + $0x404] sm:$0xf0]  ;;  %2646 = vst.msk [vmem:[#allocation3 + $0x458] sm:$0xf] %vm668_vm2, %v2582_v58  ;;  %7766 = vmatpush.bf16.msrb.mxu1 %v10634_v23  ;;  %v1944_v23 = vpack.c.bf16 %v1880_v62, %v1880_v62 }
 0x379   : > { %v2952_v46 = vpop.permute.xlu2 %2951  ;;  %2450 = vst.msk [vmem:[#allocation3 + $0x418] sm:$0xf] %vm1117_vm3, %v2311_v4  ;;  %v6418_v53 = vpop.f32.mrf.mxu0  ;;  %v9780_v13 = vor.u32 %v10331_v19, %v9777_v20  ;;  %v10357_v27 = vld [vmem:[#allocation3 + $0x4c0] sm:$0xf0] }
 0x37a   : > { %3091 = vst.msk [vmem:[#allocation3 + $0x41c] sm:$0xf] %vm1117_vm3, %v2952_v46  ;;  %v6419_v55 = vadd.f32 %v6418_v53, %v6390_v39  ;;  %v10016_v48 = vor.u32 %v10357_v27, %v10015_v25  ;;  %v3159_v58 = vld [vmem:[#allocation2 + $0x482] sm:$0xff]  ;;  %v1943_v39 = vpack.c.bf16 %v1879_v5, %v1879_v5 }
 0x37b   : > { %7300 = vmatmul.bf16.gmra.mxu0 %v9776_v21  ;;  %7329 = vmatmul.bf16.gmra.mxu1 %v9780_v13  ;;  %2647 = vst.msk [vmem:[#allocation3 + $0x46c] sm:$0xf] %vm668_vm2, %v2583_v16  ;;  %v10625_v46 = vld [vmem:[%s11140_s26 + $0x820] sm:$0xff]  ;;  %v3223_v13 = vpack.c.bf16 %v3159_v58, %v3159_v58  ;;  %v9823_v16 = vld [vmem:[#allocation3 + $0x448] sm:$0xf] }
 0x37c   : > { %7883 = vst.msk [vmem:[%s11905_s29 + $0x120] sm:$0xff] %vm249_vm0, %v6419_v55  ;;  %v7982_v24 = vsel %vm249_vm0, %v6419_v55, 0.0  ;;  %v8082_v47 = vmul.f32 %v6419_v55, %v6419_v55  ;;  %9971 = vmatmul.msk.bf16.gmra.mxu2 %vm249_vm0, %v9804_v14  ;;  %v2585_v14 = vpack.c.bf16 %v2521_v54, %v2521_v54  ;;  %v10633_v53 = vld [vmem:[%s11140_s26 + $0x860] sm:$0xff]  ;;  %v10338_v21 = vld [vmem:[#allocation3 + $0x428] sm:$0xf0]  ;;  %7738 = vmatpush.bf16.msrb.mxu0 %v10625_v46 }
 0x37d   : > { %v7983_v38 = vadd.f32 %v7982_v24, %v7981_v63  ;;  %2006 = vst.msk [vmem:[#allocation3 + $0x468] sm:$0xf] %vm668_vm2, %v1942_v17  ;;  %v10344_v56 = vld [vmem:[#allocation3 + $0x458] sm:$0xf0]  ;;  %7767 = vmatpush.bf16.msrb.mxu1 %v10633_v53  ;;  %v1881_v46 = vld [vmem:[#allocation2 + $0x4a1] sm:$0xff] }
 0x37e   : > { %v8181_v35 = vsel %vm249_vm0, %v8082_v47, 0.0  ;;  %v13320_v57 = vpop.f32.mrf.mxu3  ;;  %1366 = vst.msk [vmem:[#allocation3 + $0x464] sm:$0xf] %vm668_vm2, %v1302_v10  ;;  %v9824_v11 = vor.u32 %v10344_v56, %v9823_v16  ;;  %v2523_v53 = vld [vmem:[#allocation2 + $0x4c0] sm:$0xff] }
 0x37f   : > { %v8182_v19 = vadd.f32 %v8181_v35, %v8180_v22  ;;  %v13323_v26 = vpop.f32.mrf.mxu2  ;;  %1367 = vst.msk [vmem:[#allocation3 + $0x478] sm:$0xf] %vm668_vm2, %v1303_v1  ;;  %v6392_v22 = vadd.f32 %v13136_v33, %v6363_v6  ;;  %v3160_v33 = vld [vmem:[#allocation2 + $0x492] sm:$0xff]  ;;  %v6339_v35 = vadd.f32 %v13214_v40, %v13158_v15 }
 0x380   : > { %v2954_v37 = vpop.permute.xlu0 %2953  ;;  %v13326_v63 = vpop.f32.mrf.mxu1  ;;  %2650 = vst.msk [vmem:[#allocation3 + $0x4a8] sm:$0xf] %vm668_vm2, %v2586_v34  ;;  %v9795_v9 = vld [vmem:[#allocation3 + $0x418] sm:$0xf]  ;;  %v3224_v1 = vpack.c.bf16 %v3160_v33, %v3160_v33 }
 0x381   : > { %v1052_v61 = vpop.permute.xlu2 %1051  ;;  %3092 = vst.msk [vmem:[#allocation3 + $0x430] sm:$0xf] %vm1117_vm3, %v2954_v37  ;;  %v1050_v52 = vpop.permute.xlu1 %1049  ;;  %v10336_v43 = vld [vmem:[#allocation3 + $0x41c] sm:$0xf]  ;;  %v9796_v41 = vor.u32 %v10338_v21, %v9795_v9  ;;  %v6368_v15 = vadd.f32 %v13170_v59, %v6339_v35  ;;  %v2524_v59 = vld [vmem:[#allocation2 + $0x4d0] sm:$0xff]  ;;  %v3161_v21 = vld [vmem:[#allocation2 + $0x4a2] sm:$0xff] }
 0x382   : > { %1181 = vst.msk [vmem:[#allocation3 + $0x4ec] sm:$0xf] %vm1117_vm3, %v1052_v61  ;;  %v6420_v4 = vpop.f32.mrf.mxu0  ;;  %v3225_v56 = vpack.c.bf16 %v3161_v21, %v3161_v21 }
 0x383   : > { %1180 = vst.msk [vmem:[#allocation3 + $0x4d8] sm:$0xf] %vm1117_vm3, %v1050_v52  ;;  %v6421_v20 = vadd.f32 %v6420_v4, %v6392_v22  ;;  %7720 = vmatmul.bf16.gmra.mxu3 %v10016_v48  ;;  %v6397_v33 = vadd.f32 %v13202_v42, %v6368_v15 }
 0x384   : > { %2007 = vst.msk [vmem:[#allocation3 + $0x47c] sm:$0xf] %vm668_vm2, %v1943_v39 }
 0x385   : > { %7884 = vst.msk [vmem:[%s11905_s29 + $0x128] sm:$0xff] %vm249_vm0, %v6421_v20  ;;  %v7984_v32 = vsel %vm249_vm0, %v6421_v20, 0.0  ;;  %v8083_v49 = vmul.f32 %v6421_v20, %v6421_v20 }
 0x386   : > { %v7985_v55 = vadd.f32 %v7984_v32, %v7983_v38  ;;  %v13342_v7 = vpop.f32.mrf.mxu3  ;;  %2649 = vst.msk [vmem:[#allocation3 + $0x494] sm:$0xf] %vm668_vm2, %v2585_v14  ;;  %v2588_v14 = vpack.c.bf16 %v2524_v59, %v2524_v59 }
 0x387   : > { %v8183_v17 = vsel %vm249_vm0, %v8083_v49, 0.0  ;;  %v13346_v10 = vpop.f32.mrf.mxu2  ;;  %3287 = vst.msk [vmem:[#allocation3 + $0x470] sm:$0xf] %vm668_vm2, %v3223_v13  ;;  %v2587_v49 = vpack.c.bf16 %v2523_v53, %v2523_v53 }
 0x388   : > { %v8184_v24 = vadd.f32 %v8183_v17, %v8182_v19  ;;  %v2315_v47 = vpop.permute.xlu0 %2314  ;;  %v13349_v25 = vpop.f32.mrf.mxu1  ;;  %v9797_v27 = vld [vmem:[#allocation3 + $0x42c] sm:$0xf0]  ;;  %v6395_v19 = vadd.f32 %v13172_v0, %v6366_v51  ;;  %3288 = vst.msk [vmem:[#allocation3 + $0x484] sm:$0xf] %vm668_vm2, %v3224_v1 }
 0x389   : > { %v2956_v6 = vpop.permute.xlu2 %2955  ;;  %2452 = vst.msk [vmem:[#allocation3 + $0x440] sm:$0xf] %vm1117_vm3, %v2315_v47  ;;  %v2317_v38 = vpop.permute.xlu1 %2316  ;;  %v9800_v44 = vor.u32 %v10336_v43, %v9797_v27  ;;  %v10362_v34 = vld [vmem:[#allocation3 + $0x4e8] sm:$0xf0] }
 0x38a   : > { %3093 = vst.msk [vmem:[#allocation3 + $0x444] sm:$0xf] %vm1117_vm3, %v2956_v6  ;;  %v6423_v48 = vpop.f32.mrf.mxu0  ;;  %v10035_v37 = vld [vmem:[#allocation3 + $0x4d8] sm:$0xf] }
 0x38b   : > { %2453 = vst.msk [vmem:[#allocation3 + $0x454] sm:$0xf] %vm1117_vm3, %v2317_v38  ;;  %7305 = vmatmul.bf16.gmra.mxu0 %v9796_v41  ;;  %v6424_v50 = vadd.f32 %v6423_v48, %v6395_v19  ;;  %7334 = vmatmul.bf16.gmra.mxu1 %v9800_v44  ;;  %v10036_v52 = vor.u32 %v10362_v34, %v10035_v37  ;;  %v1882_v41 = vld [vmem:[#allocation2 + $0x4b1] sm:$0xff]  ;;  %v3163_v34 = vld [vmem:[#allocation2 + $0x4c2] sm:$0xff] }
 0x38c   : > { %9972 = vmatmul.msk.bf16.gmra.mxu2 %vm249_vm0, %v9824_v11  ;;  %2008 = vst.msk [vmem:[#allocation3 + $0x490] sm:$0xf] %vm668_vm2, %v1944_v23  ;;  %v1946_v37 = vpack.c.bf16 %v1882_v41, %v1882_v41 }
 0x38d   : > { %7885 = vst.msk [vmem:[%s11905_s29 + $0x130] sm:$0xff] %vm249_vm0, %v6424_v50  ;;  %v7986_v0 = vsel %vm249_vm0, %v6424_v50, 0.0  ;;  %v8084_v40 = vmul.f32 %v6424_v50, %v6424_v50 }
 0x38e   : > { %v13365_v5 = vpop.f32.mrf.mxu3  ;;  %v7987_v54 = vadd.f32 %v7986_v0, %v7985_v55  ;;  %1368 = vst.msk [vmem:[#allocation3 + $0x48c] sm:$0xf] %vm668_vm2, %v3223_v13  ;;  %v1945_v13 = vpack.c.bf16 %v1881_v46, %v1881_v46  ;;  %v3162_v55 = vld [vmem:[#allocation2 + $0x4b2] sm:$0xff] }
 0x38f   : > { %v13367_v61 = vpop.f32.mrf.mxu2  ;;  %v8185_v22 = vsel %vm249_vm0, %v8084_v40, 0.0  ;;  %1369 = vst.msk [vmem:[#allocation3 + $0x4a0] sm:$0xf] %vm668_vm2, %v3224_v1  ;;  %v3226_v38 = vpack.c.bf16 %v3162_v55, %v3162_v55  ;;  %v9991_v40 = vld [vmem:[#allocation3 + $0x470] sm:$0xf] }
 0x390   : > { %v2958_v58 = vpop.permute.xlu0 %2957  ;;  %v13371_v3 = vpop.f32.mrf.mxu1  ;;  %v8186_v4 = vadd.f32 %v8185_v22, %v8184_v24  ;;  %2652 = vst.msk [vmem:[#allocation3 + $0x4d0] sm:$0xf] %vm668_vm2, %v2588_v14  ;;  %v9815_v51 = vld [vmem:[#allocation3 + $0x440] sm:$0xf] }
 0x391   : > { %v2962_v39 = vpop.permute.xlu2 %2961  ;;  %3094 = vst.msk [vmem:[#allocation3 + $0x458] sm:$0xf] %vm1117_vm3, %v2958_v58  ;;  %v2960_v20 = vpop.permute.xlu1 %2959  ;;  %v10341_v62 = vld [vmem:[#allocation3 + $0x444] sm:$0xf] }
 0x392   : > { %3096 = vst.msk [vmem:[#allocation3 + $0x480] sm:$0xf] %vm1117_vm3, %v2962_v39  ;;  %v6425_v32 = vpop.f32.mrf.mxu0  ;;  %v10343_v17 = vld [vmem:[#allocation3 + $0x450] sm:$0xf0]  ;;  %v1883_v14 = vld [vmem:[#allocation2 + $0x4c1] sm:$0xff] }
 0x393   : > { %3095 = vst.msk [vmem:[#allocation3 + $0x46c] sm:$0xf] %vm1117_vm3, %v2960_v20  ;;  %7725 = vmatmul.bf16.gmra.mxu3 %v10036_v52  ;;  %v6426_v16 = vadd.f32 %v6425_v32, %v6397_v33  ;;  %v9816_v19 = vor.u32 %v10343_v17, %v9815_v51  ;;  %v3227_v52 = vpack.c.bf16 %v3163_v34, %v3163_v34  ;;  %v2526_v20 = vld [vmem:[#allocation2 + $0x4f0] sm:$0xff] }
 0x394   : > { %2009 = vst.msk [vmem:[#allocation3 + $0x4a4] sm:$0xf] %vm668_vm2, %v1945_v13  ;;  %v2590_v21 = vpack.c.bf16 %v2526_v20, %v2526_v20  ;;  %v1947_v33 = vpack.c.bf16 %v1883_v14, %v1883_v14  ;;  %v2525_v13 = vld [vmem:[#allocation2 + $0x4e0] sm:$0xff] }
 0x395   : > { %7886 = vst.msk [vmem:[%s11905_s29 + $0x138] sm:$0xff] %vm249_vm0, %v6426_v16  ;;  %v7988_v9 = vsel %vm249_vm0, %v6426_v16, 0.0  ;;  %v8085_v43 = vmul.f32 %v6426_v16, %v6426_v16  ;;  %v2589_v32 = vpack.c.bf16 %v2525_v13, %v2525_v13 }
 0x396   : > { %v13383_v42 = vpop.f32.mrf.mxu3  ;;  %v13385_v24 = vadd.f32 %v7988_v9, %v7987_v54  ;;  %2651 = vst.msk [vmem:[#allocation3 + $0x4bc] sm:$0xf] %vm668_vm2, %v2587_v49  ;;  %v10349_v54 = vld [vmem:[#allocation3 + $0x480] sm:$0xf0]  ;;  %v6795_v49 = vadd.f32 %v13208_v36, %v13240_v2 }
 0x397   : > { %v13387_v47 = vpop.f32.mrf.mxu2  ;;  %v8187_v27 = vsel %vm249_vm0, %v8085_v43, 0.0  ;;  %3289 = vst.msk [vmem:[#allocation3 + $0x498] sm:$0xf] %vm668_vm2, %v3225_v56  ;;  %v9992_v59 = vor.u32 %v10349_v54, %v9991_v40 }
 0x398   : > { %v1679_v11 = vpop.permute.xlu0 %1678  ;;  %v13391_v1 = vpop.f32.mrf.mxu1  ;;  %v9817_v6 = vld [vmem:[#allocation3 + $0x454] sm:$0xf0]  ;;  %v13394_v44 = vadd.f32 %v8187_v27, %v8186_v4  ;;  %3290 = vst.msk [vmem:[#allocation3 + $0x4ac] sm:$0xf] %vm668_vm2, %v3226_v38  ;;  %v6824_v43 = vadd.f32 %v13232_v12, %v6795_v49  ;;  %v6797_v12 = vadd.f32 %v13236_v28, %v13275_v8 }
 0x399   : > { %v2319_v23 = vpop.permute.xlu2 %2318  ;;  %1814 = vst.msk [vmem:[#allocation3 + $0x464] sm:$0xf] %vm1117_vm3, %v1679_v11  ;;  %v1681_v35 = vpop.permute.xlu1 %1680  ;;  %v9820_v48 = vor.u32 %v10341_v62, %v9817_v6  ;;  %v9985_v50 = vld [vmem:[#allocation3 + $0x47c] sm:$0xf0] }
 0x39a   : > { %2454 = vst.msk [vmem:[#allocation3 + $0x468] sm:$0xf] %vm1117_vm3, %v2319_v23  ;;  %v10346_v15 = vld [vmem:[#allocation3 + $0x46c] sm:$0xf]  ;;  %v3165_v23 = vld [vmem:[#allocation2 + $0x4e2] sm:$0xff]  ;;  %v6826_v20 = vadd.f32 %v13265_v29, %v6797_v12 }
 0x39b   : > { %1815 = vst.msk [vmem:[#allocation3 + $0x478] sm:$0xf] %vm1117_vm3, %v1681_v35  ;;  %7310 = vmatmul.bf16.gmra.mxu0 %v9816_v19  ;;  %v9988_v0 = vor.u32 %v10346_v15, %v9985_v50  ;;  %7339 = vmatmul.bf16.gmra.mxu1 %v9820_v48  ;;  %v3166_v35 = vld [vmem:[#allocation2 + $0x4f2] sm:$0xff]  ;;  %v3229_v50 = vpack.c.bf16 %v3165_v23, %v3165_v23 }
 0x39c   : > { %2010 = vst.msk [vmem:[#allocation3 + $0x4b8] sm:$0xf] %vm668_vm2, %v1946_v37  ;;  %v3230_v15 = vpack.c.bf16 %v3166_v35, %v3166_v35 }
 0x39d   : > { %7797 = vmatmul.bf16.vlgmr.msrb.gmra.mxu2 %v9988_v0  ;;  %1370 = vst.msk [vmem:[#allocation3 + $0x4b4] sm:$0xf] %vm668_vm2, %v3225_v56 }
 0x39e   : > { %v13401_v22 = vpop.f32.mrf.mxu3  ;;  %1371 = vst.msk [vmem:[#allocation3 + $0x4c8] sm:$0xf] %vm668_vm2, %v3226_v38  ;;  %v10011_v0 = vld [vmem:[#allocation3 + $0x498] sm:$0xf] }
 0x39f   : > { %v13404_v58 = vpop.f32.mrf.mxu2  ;;  %3291 = vst.msk [vmem:[#allocation3 + $0x4c0] sm:$0xf] %vm668_vm2, %v3227_v52  ;;  %v10354_v40 = vld [vmem:[#allocation3 + $0x4a8] sm:$0xf0] }
 0x3a0   : > { %v2321_v4 = vpop.permute.xlu0 %2320  ;;  %v13407_v39 = vpop.f32.mrf.mxu1  ;;  %2654 = vst.msk [vmem:[#allocation3 + $0x4f8] sm:$0xf] %vm668_vm2, %v2590_v21  ;;  %v10345_v16 = vld [vmem:[#allocation3 + $0x464] sm:$0xf]  ;;  %v10012_v14 = vor.u32 %v10354_v40, %v10011_v0  ;;  %v1884_v21 = vld [vmem:[#allocation2 + $0x4d1] sm:$0xff] }
 0x3a1   : > { %v2966_v46 = vpop.permute.xlu2 %2965  ;;  %2455 = vst.msk [vmem:[#allocation3 + $0x47c] sm:$0xf] %vm1117_vm3, %v2321_v4  ;;  %v2964_v53 = vpop.permute.xlu1 %2963  ;;  %v9983_v55 = vld [vmem:[#allocation3 + $0x468] sm:$0xf]  ;;  %v1948_v49 = vpack.c.bf16 %v1884_v21, %v1884_v21 }
 0x3a2   : > { %3098 = vst.msk [vmem:[#allocation3 + $0x4a8] sm:$0xf] %vm1117_vm3, %v2966_v46  ;;  %v9977_v51 = vld [vmem:[#allocation3 + $0x474] sm:$0xf0] }
 0x3a3   : > { %3097 = vst.msk [vmem:[#allocation3 + $0x494] sm:$0xf] %vm1117_vm3, %v2964_v53  ;;  %10197 = vmatmul.msk.bf16.vlgmr.msrb.gmra.mxu3 %vm249_vm0, %v9992_v59  ;;  %v9980_v6 = vor.u32 %v10345_v16, %v9977_v51  ;;  %v6800_v51 = vadd.f32 %v13269_v30, %v13300_v31 }
 0x3a4   : > { %2011 = vst.msk [vmem:[#allocation3 + $0x4cc] sm:$0xf] %vm668_vm2, %v1947_v33 }
 0x3a5   : > { %2653 = vst.msk [vmem:[#allocation3 + $0x4e4] sm:$0xf] %vm668_vm2, %v2589_v32 }
 0x3a6   : > { %v13418_v56 = vpop.f32.mrf.mxu3  ;;  %3292 = vst.msk [vmem:[#allocation3 + $0x4d4] sm:$0xf] %vm668_vm2, %v13251_v45 }
 0x3a7   : > { %v13421_v9 = vpop.f32.mrf.mxu2  ;;  %1372 = vst.msk [vmem:[#allocation3 + $0x4dc] sm:$0xf] %vm668_vm2, %v3227_v52 }
 0x3a8   : > { %v1683_v36 = vpop.permute.xlu0 %1682  ;;  %v6852_v2 = vpop.f32.mrf.mxu0  ;;  %v10348_v17 = vld [vmem:[#allocation3 + $0x478] sm:$0xf0]  ;;  %1373 = vst.msk [vmem:[#allocation3 + $0x4f0] sm:$0xf] %vm668_vm2, %v13251_v45 }
 0x3a9   : > { %v2323_v62 = vpop.permute.xlu2 %2322  ;;  %1816 = vst.msk [vmem:[#allocation3 + $0x48c] sm:$0xf] %vm1117_vm3, %v1683_v36  ;;  %v6881_v27 = vpop.f32.mrf.mxu1  ;;  %v6853_v11 = vadd.f32 %v6852_v2, %v6824_v43  ;;  %v9984_v38 = vor.u32 %v10348_v17, %v9983_v55  ;;  %v10005_v41 = vld [vmem:[#allocation3 + $0x4a4] sm:$0xf0] }
 0x3aa   : > { %2456 = vst.msk [vmem:[#allocation3 + $0x490] sm:$0xf] %vm1117_vm3, %v2323_v62  ;;  %v1685_v19 = vpop.permute.xlu1 %1684  ;;  %v10351_v48 = vld [vmem:[#allocation3 + $0x494] sm:$0xf] }
 0x3ab   : > { %1817 = vst.msk [vmem:[#allocation3 + $0x4a0] sm:$0xf] %vm1117_vm3, %v1685_v19  ;;  %v6882_v37 = vadd.f32 %v6881_v27, %v6853_v11  ;;  %7739 = vmatmul.bf16.vlgmr.msrb.gmra.mxu0 %v9980_v6  ;;  %v10008_v34 = vor.u32 %v10351_v48, %v10005_v41  ;;  %7768 = vmatmul.bf16.vlgmr.msrb.gmra.mxu1 %v9984_v38 }
 0x3ac   : > { %3293 = vst.msk [vmem:[#allocation3 + $0x4e8] sm:$0xf] %vm668_vm2, %v3229_v50  ;;  %v6829_v11 = vadd.f32 %v13292_v18, %v6800_v51  ;;  %v6802_v18 = vadd.f32 %v13295_v60, %v13326_v63 }
 0x3ad   : > { %7887 = vst.msk [vmem:[%s11905_s29 + $0x140] sm:$0xff] %vm249_vm0, %v6882_v37  ;;  %v7990_v28 = vsel %vm249_vm0, %v6882_v37, 0.0  ;;  %v8086_v8 = vmul.f32 %v6882_v37, %v6882_v37  ;;  %7802 = vmatmul.bf16.gmra.mxu2 %v10008_v34 }
 0x3ae   : > { %v7991_v54 = vadd.f32 %v7990_v28, %v13385_v24  ;;  %v13438_v52 = vpop.f32.mrf.mxu3  ;;  %3294 = vst.msk [vmem:[#allocation3 + $0x4fc] sm:$0xf] %vm668_vm2, %v3230_v15  ;;  %v1885_v24 = vld [vmem:[#allocation2 + $0x4e1] sm:$0xff]  ;;  %v6831_v63 = vadd.f32 %v13320_v57, %v6802_v18 }
 0x3af   : > { %v8189_v59 = vsel %vm249_vm0, %v8086_v8, 0.0  ;;  %v13442_v4 = vpop.f32.mrf.mxu2  ;;  %v1949_v29 = vpack.c.bf16 %v1885_v24, %v1885_v24  ;;  %2012 = vst.msk [vmem:[#allocation3 + $0x4e0] sm:$0xf] %vm668_vm2, %v1948_v49  ;;  %v10031_v28 = vld [vmem:[#allocation3 + $0x4c0] sm:$0xf] }
 0x3b0   : > { %v8190_v45 = vadd.f32 %v8189_v59, %v13394_v44  ;;  %v2325_v46 = vpop.permute.xlu0 %2324  ;;  %v6854_v53 = vpop.f32.mrf.mxu0  ;;  %v10350_v36 = vld [vmem:[#allocation3 + $0x48c] sm:$0xf]  ;;  %v10359_v8 = vld [vmem:[#allocation3 + $0x4d0] sm:$0xf0] }
 0x3b1   : > { %v2970_v33 = vpop.permute.xlu2 %2969  ;;  %2457 = vst.msk [vmem:[#allocation3 + $0x4a4] sm:$0xf] %vm1117_vm3, %v2325_v46  ;;  %v6883_v13 = vpop.f32.mrf.mxu1  ;;  %v6855_v32 = vadd.f32 %v6854_v53, %v6826_v20  ;;  %v10003_v27 = vld [vmem:[#allocation3 + $0x490] sm:$0xf]  ;;  %v10032_v46 = vor.u32 %v10359_v8, %v10031_v28 }
 0x3b2   : > { %3100 = vst.msk [vmem:[#allocation3 + $0x4d0] sm:$0xf] %vm1117_vm3, %v2970_v33  ;;  %v2968_v16 = vpop.permute.xlu1 %2967  ;;  %v9997_v62 = vld [vmem:[#allocation3 + $0x49c] sm:$0xf0] }
 0x3b3   : > { %3099 = vst.msk [vmem:[#allocation3 + $0x4bc] sm:$0xf] %vm1117_vm3, %v2968_v16  ;;  %v6884_v44 = vadd.f32 %v6883_v13, %v6855_v32  ;;  %10198 = vmatmul.msk.bf16.gmra.mxu3 %vm249_vm0, %v10012_v14  ;;  %v10000_v48 = vor.u32 %v10350_v36, %v9997_v62  ;;  %v6805_v16 = vadd.f32 %v13323_v26, %v13349_v25 }
 0x3b4   : > { %2013 = vst.msk [vmem:[#allocation3 + $0x4f4] sm:$0xf] %vm668_vm2, %v1949_v29 }
 0x3b5   : > { %7888 = vst.msk [vmem:[%s11905_s29 + $0x148] sm:$0xff] %vm249_vm0, %v6884_v44  ;;  %v7992_v55 = vsel %vm249_vm0, %v6884_v44, 0.0  ;;  %v8087_v43 = vmul.f32 %v6884_v44, %v6884_v44  ;;  %v6834_v26 = vadd.f32 %v13342_v7, %v6805_v16  ;;  %v6807_v7 = vadd.f32 %v13346_v10, %v13371_v3  ;;  %v10364_v18 = vld [vmem:[#allocation3 + $0x4f8] sm:$0xf0] }
 0x3b6   : > { %v7993_v2 = vadd.f32 %v7992_v55, %v7991_v54  ;;  %v13457_v17 = vpop.f32.mrf.mxu3 }
 0x3b7   : > { %v8191_v30 = vsel %vm249_vm0, %v8087_v43, 0.0  ;;  %v13461_v31 = vpop.f32.mrf.mxu2 }
 0x3b8   : > { %v8192_v6 = vadd.f32 %v8191_v30, %v8190_v45  ;;  %v1687_v38 = vpop.permute.xlu0 %1686  ;;  %v6857_v41 = vpop.f32.mrf.mxu0  ;;  %v10353_v23 = vld [vmem:[#allocation3 + $0x4a0] sm:$0xf0] }
 0x3b9   : > { %v2327_v35 = vpop.permute.xlu2 %2326  ;;  %1818 = vst.msk [vmem:[#allocation3 + $0x4b4] sm:$0xf] %vm1117_vm3, %v1687_v38  ;;  %v6886_v12 = vpop.f32.mrf.mxu1  ;;  %v6858_v19 = vadd.f32 %v6857_v41, %v6829_v11  ;;  %v10004_v50 = vor.u32 %v10353_v23, %v10003_v27  ;;  %v10025_v37 = vld [vmem:[#allocation3 + $0x4cc] sm:$0xf0] }
 0x3ba   : > { %2458 = vst.msk [vmem:[#allocation3 + $0x4b8] sm:$0xf] %vm1117_vm3, %v2327_v35  ;;  %v1689_v34 = vpop.permute.xlu1 %1688  ;;  %v10356_v15 = vld [vmem:[#allocation3 + $0x4bc] sm:$0xf] }
 0x3bb   : > { %1819 = vst.msk [vmem:[#allocation3 + $0x4c8] sm:$0xf] %vm1117_vm3, %v1689_v34  ;;  %v6887_v0 = vadd.f32 %v6886_v12, %v6858_v19  ;;  %7744 = vmatmul.bf16.gmra.mxu0 %v10000_v48  ;;  %v10028_v40 = vor.u32 %v10356_v15, %v10025_v37  ;;  %7773 = vmatmul.bf16.gmra.mxu1 %v10004_v50  ;;  %v10051_v15 = vld [vmem:[#allocation3 + $0x4e8] sm:$0xf] }
 0x3bd   : > { %7889 = vst.msk [vmem:[%s11905_s29 + $0x150] sm:$0xff] %vm249_vm0, %v6887_v0  ;;  %v7994_v54 = vsel %vm249_vm0, %v6887_v0, 0.0  ;;  %v8088_v59 = vmul.f32 %v6887_v0, %v6887_v0  ;;  %7807 = vmatmul.bf16.gmra.mxu2 %v10028_v40 }
 0x3be   : > { %v7995_v20 = vadd.f32 %v7994_v54, %v7993_v2  ;;  %v13472_v14 = vpop.f32.mrf.mxu3  ;;  %v6836_v54 = vadd.f32 %v13365_v5, %v6807_v7 }
 0x3bf   : > { %v8193_v45 = vsel %vm249_vm0, %v8088_v59, 0.0  ;;  %v13475_v60 = vpop.f32.mrf.mxu2  ;;  %v10052_v59 = vor.u32 %v10364_v18, %v10051_v15  ;;  %v7268_v15 = vadd.f32 %v13418_v56, %v13404_v58 }
 0x3c0   : > { %v8194_v53 = vadd.f32 %v8193_v45, %v8192_v6  ;;  %v2329_v21 = vpop.permute.xlu0 %2328  ;;  %v6859_v24 = vpop.f32.mrf.mxu0  ;;  %v10355_v43 = vld [vmem:[#allocation3 + $0x4b4] sm:$0xf] }
 0x3c1   : > { %v2974_v33 = vpop.permute.xlu2 %2973  ;;  %2459 = vst.msk [vmem:[#allocation3 + $0x4cc] sm:$0xf] %vm1117_vm3, %v2329_v21  ;;  %v6888_v13 = vpop.f32.mrf.mxu1  ;;  %v6860_v32 = vadd.f32 %v6859_v24, %v6831_v63  ;;  %v10023_v2 = vld [vmem:[#allocation3 + $0x4b8] sm:$0xf]  ;;  %v6810_v21 = vadd.f32 %v13367_v61, %v13391_v1 }
 0x3c2   : > { %3102 = vst.msk [vmem:[#allocation3 + $0x4f8] sm:$0xf] %vm1117_vm3, %v2974_v33  ;;  %v2972_v49 = vpop.permute.xlu1 %2971  ;;  %v10017_v36 = vld [vmem:[#allocation3 + $0x4c4] sm:$0xf0] }
 0x3c3   : > { %3101 = vst.msk [vmem:[#allocation3 + $0x4e4] sm:$0xf] %vm1117_vm3, %v2972_v49  ;;  %v6889_v29 = vadd.f32 %v6888_v13, %v6860_v32  ;;  %10199 = vmatmul.msk.bf16.gmra.mxu3 %vm249_vm0, %v10032_v46  ;;  %v10020_v23 = vor.u32 %v10355_v43, %v10017_v36  ;;  %v6839_v61 = vadd.f32 %v13383_v42, %v6810_v21 }
 0x3c5   : > { %7890 = vst.msk [vmem:[%s11905_s29 + $0x158] sm:$0xff] %vm249_vm0, %v6889_v29  ;;  %v7996_v57 = vsel %vm249_vm0, %v6889_v29, 0.0  ;;  %v8089_v51 = vmul.f32 %v6889_v29, %v6889_v29 }
 0x3c6   : > { %v13487_v44 = vpop.f32.mrf.mxu3  ;;  %v7997_v55 = vadd.f32 %v7996_v57, %v7995_v20 }
 0x3c7   : > { %v8195_v62 = vsel %vm249_vm0, %v8089_v51, 0.0  ;;  %v13490_v27 = vpop.f32.mrf.mxu2 }
 0x3c8   : > { %v1691_v25 = vpop.permute.xlu0 %1690  ;;  %v6862_v30 = vpop.f32.mrf.mxu0  ;;  %v8196_v11 = vadd.f32 %v8195_v62, %v8194_v53  ;;  %v10358_v6 = vld [vmem:[#allocation3 + $0x4c8] sm:$0xf0] }
 0x3c9   : > { %1820 = vst.msk [vmem:[#allocation3 + $0x4dc] sm:$0xf] %vm1117_vm3, %v1691_v25  ;;  %v6863_v38 = vadd.f32 %v6862_v30, %v6834_v26  ;;  %v6891_v41 = vpop.f32.mrf.mxu1  ;;  %v10024_v35 = vor.u32 %v10358_v6, %v10023_v2  ;;  %v10045_v12 = vld [vmem:[#allocation3 + $0x4f4] sm:$0xf0]  ;;  %v2331_v19 = vpop.permute.xlu2 %2330  ;;  %v6812_v25 = vadd.f32 %v13387_v47, %v13407_v39 }
 0x3ca   : > { %v1693_v48 = vpop.permute.xlu1 %1692  ;;  %v10361_v50 = vld [vmem:[#allocation3 + $0x4e4] sm:$0xf]  ;;  %2460 = vst.msk [vmem:[#allocation3 + $0x4e0] sm:$0xf] %vm1117_vm3, %v2331_v19 }
 0x3cb   : > { %v6892_v37 = vadd.f32 %v6891_v41, %v6863_v38  ;;  %1821 = vst.msk [vmem:[#allocation3 + $0x4f0] sm:$0xf] %vm1117_vm3, %v1693_v48  ;;  %7749 = vmatmul.bf16.gmra.mxu0 %v10020_v23  ;;  %v10048_v34 = vor.u32 %v10361_v50, %v10045_v12  ;;  %7778 = vmatmul.bf16.gmra.mxu1 %v10024_v35 }
 0x3cc   : > { %v6841_v35 = vadd.f32 %v13401_v22, %v6812_v25 }
 0x3cd   : > { %7891 = vst.msk [vmem:[%s11905_s29 + $0x160] sm:$0xff] %vm249_vm0, %v6892_v37  ;;  %v7998_v0 = vsel %vm249_vm0, %v6892_v37, 0.0  ;;  %v8090_v40 = vmul.f32 %v6892_v37, %v6892_v37  ;;  %7812 = vmatmul.bf16.gmra.mxu2 %v10048_v34 }
 0x3ce   : > { %v7999_v28 = vadd.f32 %v7998_v0, %v7997_v55  ;;  %v13501_v8 = vpop.f32.mrf.mxu3 }
 0x3cf   : > { %v8197_v10 = vsel %vm249_vm0, %v8090_v40, 0.0  ;;  %v13504_v3 = vpop.f32.mrf.mxu2 }
 0x3d0   : > { %v8198_v20 = vadd.f32 %v8197_v10, %v8196_v11  ;;  %v2333_v45 = vpop.permute.xlu0 %2332  ;;  %v6864_v63 = vpop.f32.mrf.mxu0  ;;  %v10360_v49 = vld [vmem:[#allocation3 + $0x4dc] sm:$0xf] }
 0x3d1   : > { %2461 = vst.msk [vmem:[#allocation3 + $0x4f4] sm:$0xf] %vm1117_vm3, %v2333_v45  ;;  %v6865_v46 = vadd.f32 %v6864_v63, %v6836_v54  ;;  %v6893_v53 = vpop.f32.mrf.mxu1  ;;  %v10043_v29 = vld [vmem:[#allocation3 + $0x4e0] sm:$0xf]  ;;  %v7270_v45 = vadd.f32 %v13438_v52, %v13421_v9  ;;  %v7273_v9 = vadd.f32 %v13457_v17, %v13442_v4  ;;  %v7275_v4 = vadd.f32 %v13472_v14, %v13461_v31 }
 0x3d2   : > { %v10037_v16 = vld [vmem:[#allocation3 + $0x4ec] sm:$0xf0]  ;;  %v7278_v31 = vadd.f32 %v13487_v44, %v13475_v60  ;;  %v7280_v60 = vadd.f32 %v13501_v8, %v13490_v27 }
 0x3d3   : > { %v6894_v24 = vadd.f32 %v6893_v53, %v6865_v46  ;;  %10200 = vmatmul.msk.bf16.gmra.mxu3 %vm249_vm0, %v10052_v59  ;;  %v10040_v62 = vor.u32 %v10360_v49, %v10037_v16 }
 0x3d5   : > { %7892 = vst.msk [vmem:[%s11905_s29 + $0x168] sm:$0xff] %vm249_vm0, %v6894_v24  ;;  %v8000_v33 = vsel %vm249_vm0, %v6894_v24, 0.0  ;;  %v8091_v13 = vmul.f32 %v6894_v24, %v6894_v24 }
 0x3d6   : > { %v8001_v5 = vadd.f32 %v8000_v33, %v7999_v28  ;;  %v13514_v32 = vpop.f32.mrf.mxu3 }
 0x3d7   : > { %v8199_v57 = vsel %vm249_vm0, %v8091_v13, 0.0  ;;  %v13517_v51 = vpop.f32.mrf.mxu2  ;;  %v7283_v8 = vadd.f32 %v13514_v32, %v13504_v3 }
 0x3d8   : > { %v8200_v1 = vadd.f32 %v8199_v57, %v8198_v20  ;;  %v6867_v55 = vpop.f32.mrf.mxu0  ;;  %v10363_v43 = vld [vmem:[#allocation3 + $0x4f0] sm:$0xf0] }
 0x3d9   : > { %v6868_v36 = vadd.f32 %v6867_v55, %v6839_v61  ;;  %v6896_v2 = vpop.f32.mrf.mxu1  ;;  %v10044_v26 = vor.u32 %v10363_v43, %v10043_v29 }
 0x3db   : > { %v6897_v30 = vadd.f32 %v6896_v2, %v6868_v36  ;;  %7754 = vmatmul.bf16.gmra.mxu0 %v10040_v62  ;;  %7783 = vmatmul.bf16.gmra.mxu1 %v10044_v26 }
 0x3dd   : > { %7893 = vst.msk [vmem:[%s11905_s29 + $0x170] sm:$0xff] %vm249_vm0, %v6897_v30  ;;  %v8002_v11 = vsel %vm249_vm0, %v6897_v30, 0.0  ;;  %v8092_v6 = vmul.f32 %v6897_v30, %v6897_v30 }
 0x3de   : > { %v8003_v42 = vadd.f32 %v8002_v11, %v8001_v5  ;;  %v13525_v38 = vpop.f32.mrf.mxu3 }
 0x3df   : > { %v8201_v41 = vsel %vm249_vm0, %v8092_v6, 0.0  ;;  %v7354_v23 = vpop.f32.mrf.mxu2 }
 0x3e0   : > { %v8202_v12 = vadd.f32 %v8201_v41, %v8200_v1  ;;  %v6869_v19 = vpop.f32.mrf.mxu0 }
 0x3e1   : > { %v6870_v47 = vadd.f32 %v6869_v19, %v6841_v35  ;;  %v6898_v39 = vpop.f32.mrf.mxu1 }
 0x3e3   : > { %v6899_v48 = vadd.f32 %v6898_v39, %v6870_v47 }
 0x3e5   : > { %7894 = vst.msk [vmem:[%s11905_s29 + $0x178] sm:$0xff] %vm249_vm0, %v6899_v48  ;;  %v8004_v50 = vsel %vm249_vm0, %v6899_v48, 0.0  ;;  %v8093_v7 = vmul.f32 %v6899_v48, %v6899_v48 }
 0x3e6   : > { %v8005_v37 = vadd.f32 %v8004_v50, %v8003_v42  ;;  %v13532_v34 = vpop.f32.mrf.mxu3 }
 0x3e7   : > { %v8203_v18 = vsel %vm249_vm0, %v8093_v7, 0.0  ;;  %v7356_v22 = vpop.f32.mrf.mxu2 }
 0x3e8   : > { %v8204_v0 = vadd.f32 %v8203_v18, %v8202_v12  ;;  %v7296_v40 = vpop.f32.mrf.mxu0 }
 0x3e9   : > { %v7297_v28 = vadd.f32 %v7296_v40, %v7268_v15  ;;  %v7325_v10 = vpop.f32.mrf.mxu1 }
 0x3eb   : > { %v7326_v54 = vadd.f32 %v7325_v10, %v7297_v28 }
 0x3ed   : > { %v7355_v59 = vadd.f32 %v7354_v23, %v7326_v54 }
 0x3ee   : > { %v13537_v20 = vpop.f32.mrf.mxu3 }
 0x3ef   : > { %7895 = vst.msk [vmem:[%s11905_s29 + $0x180] sm:$0xff] %vm249_vm0, %v7355_v59  ;;  %v8006_v63 = vsel %vm249_vm0, %v7355_v59, 0.0  ;;  %v8094_v58 = vmul.f32 %v7355_v59, %v7355_v59  ;;  %v7359_v56 = vpop.f32.mrf.mxu2 }
 0x3f0   : > { %v8007_v46 = vadd.f32 %v8006_v63, %v8005_v37  ;;  %v7298_v53 = vpop.f32.mrf.mxu0 }
 0x3f1   : > { %v8205_v21 = vsel %vm249_vm0, %v8094_v58, 0.0  ;;  %v7299_v24 = vadd.f32 %v7298_v53, %v7270_v45  ;;  %v7327_v33 = vpop.f32.mrf.mxu1 }
 0x3f2   : > { %v8206_v13 = vadd.f32 %v8205_v21, %v8204_v0 }
 0x3f3   : > { %v7328_v5 = vadd.f32 %v7327_v33, %v7299_v24 }
 0x3f5   : > { %v7357_v49 = vadd.f32 %v7356_v22, %v7328_v5 }
 0x3f6   : > { %v13545_v16 = vpop.f32.mrf.mxu3 }
 0x3f7   : > { %7896 = vst.msk [vmem:[%s11905_s29 + $0x188] sm:$0xff] %vm249_vm0, %v7357_v49  ;;  %v8008_v52 = vsel %vm249_vm0, %v7357_v49, 0.0  ;;  %v8095_v29 = vmul.f32 %v7357_v49, %v7357_v49  ;;  %v7361_v57 = vpop.f32.mrf.mxu2 }
 0x3f8   : > { %v8009_v61 = vadd.f32 %v8008_v52, %v8007_v46  ;;  %v7301_v1 = vpop.f32.mrf.mxu0 }
 0x3f9   : > { %v8207_v55 = vsel %vm249_vm0, %v8095_v29, 0.0  ;;  %v7302_v43 = vadd.f32 %v7301_v1, %v7273_v9  ;;  %v7330_v36 = vpop.f32.mrf.mxu1 }
 0x3fa   : > { %v8208_v2 = vadd.f32 %v8207_v55, %v8206_v13 }
 0x3fb   : > { %v7331_v62 = vadd.f32 %v7330_v36, %v7302_v43 }
 0x3fd   : > { %v7360_v26 = vadd.f32 %v7359_v56, %v7331_v62 }
 0x3fe   : > { %v13553_v25 = vpop.f32.mrf.mxu3 }
 0x3ff   : > { %7897 = vst.msk [vmem:[%s11905_s29 + $0x190] sm:$0xff] %vm249_vm0, %v7360_v26  ;;  %v8010_v17 = vsel %vm249_vm0, %v7360_v26, 0.0  ;;  %v8096_v30 = vmul.f32 %v7360_v26, %v7360_v26  ;;  %v7364_v11 = vpop.f32.mrf.mxu2 }
 0x400   : > { %v8011_v6 = vadd.f32 %v8010_v17, %v8009_v61  ;;  %v7303_v42 = vpop.f32.mrf.mxu0 }
 0x401   : > { %v8209_v41 = vsel %vm249_vm0, %v8096_v30, 0.0  ;;  %v7304_v23 = vadd.f32 %v7303_v42, %v7275_v4  ;;  %v7332_v35 = vpop.f32.mrf.mxu1 }
 0x402   : > { %v8210_v12 = vadd.f32 %v8209_v41, %v8208_v2 }
 0x403   : > { %v7333_v19 = vadd.f32 %v7332_v35, %v7304_v23 }
 0x405   : > { %v7362_v47 = vadd.f32 %v7361_v57, %v7333_v19  ;;  %v7285_v57 = vadd.f32 %v13525_v38, %v13517_v51 }
 0x406   : > { %v13561_v39 = vpop.f32.mrf.mxu3 }
 0x407   : > { %7898 = vst.msk [vmem:[%s11905_s29 + $0x198] sm:$0xff] %vm249_vm0, %v7362_v47  ;;  %v8012_v14 = vsel %vm249_vm0, %v7362_v47, 0.0  ;;  %v8097_v48 = vmul.f32 %v7362_v47, %v7362_v47  ;;  %v7366_v50 = vpop.f32.mrf.mxu2 }
 0x408   : > { %v8013_v7 = vadd.f32 %v8012_v14, %v8011_v6  ;;  %v7306_v37 = vpop.f32.mrf.mxu0 }
 0x409   : > { %v8211_v15 = vsel %vm249_vm0, %v8097_v48, 0.0  ;;  %v7307_v18 = vadd.f32 %v7306_v37, %v7278_v31  ;;  %v7335_v22 = vpop.f32.mrf.mxu1 }
 0x40a   : > { %v8212_v0 = vadd.f32 %v8211_v15, %v8210_v12 }
 0x40b   : > { %v7336_v40 = vadd.f32 %v7335_v22, %v7307_v18 }
 0x40d   : > { %v7365_v28 = vadd.f32 %v7364_v11, %v7336_v40 }
 0x40e   : > { %v13569_v10 = vpop.f32.mrf.mxu3 }
 0x40f   : > { %7899 = vst.msk [vmem:[%s11905_s29 + $0x1a0] sm:$0xff] %vm249_vm0, %v7365_v28  ;;  %v8014_v44 = vsel %vm249_vm0, %v7365_v28, 0.0  ;;  %v8098_v54 = vmul.f32 %v7365_v28, %v7365_v28  ;;  %v7369_v59 = vpop.f32.mrf.mxu2 }
 0x410   : > { %v13576_v45 = vadd.f32 %v8014_v44, %v8013_v7  ;;  %v7308_v63 = vpop.f32.mrf.mxu0 }
 0x411   : > { %v8213_v58 = vsel %vm249_vm0, %v8098_v54, 0.0  ;;  %v7309_v56 = vadd.f32 %v7308_v63, %v7280_v60  ;;  %v7337_v46 = vpop.f32.mrf.mxu1 }
 0x412   : > { %v13579_v53 = vadd.f32 %v8213_v58, %v8212_v0 }
 0x413   : > { %v7338_v21 = vadd.f32 %v7337_v46, %v7309_v56 }
 0x415   : > { %v13581_v24 = vadd.f32 %v7366_v50, %v7338_v21 }
 0x416   : > { %v13583_v27 = vpop.f32.mrf.mxu3 }
 0x417   : > { %7900 = vst.msk [vmem:[%s11905_s29 + $0x1a8] sm:$0xff] %vm249_vm0, %v13581_v24  ;;  %v7371_v33 = vpop.f32.mrf.mxu2 }
 0x418   : > { %v7311_v13 = vpop.f32.mrf.mxu0 }
 0x419   : > { %v7312_v5 = vadd.f32 %v7311_v13, %v7283_v8  ;;  %v7340_v49 = vpop.f32.mrf.mxu1  ;;  %v8016_v13 = vsel %vm249_vm0, %v13581_v24, 0.0 }
 0x41b   : > { %v7341_v9 = vadd.f32 %v7340_v49, %v7312_v5 }
 0x41d   : > { %v13590_v52 = vadd.f32 %v7369_v59, %v7341_v9 }
 0x41e   : > { %v13592_v29 = vpop.f32.mrf.mxu3 }
 0x41f   : > { %7901 = vst.msk [vmem:[%s11905_s29 + $0x1b0] sm:$0xff] %vm249_vm0, %v13590_v52  ;;  %v8018_v9 = vsel %vm249_vm0, %v13590_v52, 0.0 }
 0x420   : > { %v7798_v3 = vpop.f32.mrf.mxu2  ;;  %v7313_v32 = vpop.f32.mrf.mxu0 }
 0x421   : > { %v7314_v61 = vadd.f32 %v7313_v32, %v7285_v57  ;;  %v7342_v1 = vpop.f32.mrf.mxu1  ;;  %v8017_v32 = vadd.f32 %v8016_v13, %v13576_v45 }
 0x423   : > { %v7343_v55 = vadd.f32 %v7342_v1, %v7314_v61 }
 0x425   : > { %v7372_v43 = vadd.f32 %v7371_v33, %v7343_v55 }
 0x426   : > { %v7827_v36 = vpop.f32.mrf.mxu3 }
 0x427   : > { %7902 = vst.msk [vmem:[%s11905_s29 + $0x1b8] sm:$0xff] %vm249_vm0, %v7372_v43  ;;  %v8101_v57 = vmul.f32 %v7372_v43, %v7372_v43  ;;  %v8020_v61 = vsel %vm249_vm0, %v7372_v43, 0.0 }
 0x428   : > { %v7800_v2 = vpop.f32.mrf.mxu2  ;;  %v7740_v62 = vpop.f32.mrf.mxu0 }
 0x429   : > { %v7741_v26 = vadd.f32 %v7740_v62, %v13532_v34  ;;  %v7769_v4 = vpop.f32.mrf.mxu1  ;;  %v8219_v62 = vsel %vm249_vm0, %v8101_v57, 0.0 }
 0x42b   : > { %v7770_v51 = vadd.f32 %v7769_v4, %v7741_v26 }
 0x42d   : > { %v7799_v38 = vadd.f32 %v7798_v3, %v7770_v51 }
 0x42e   : > { %v7829_v17 = vpop.f32.mrf.mxu3 }
 0x42f   : > { %v7828_v30 = vadd.f32 %v7827_v36, %v7799_v38  ;;  %v8019_v36 = vadd.f32 %v8018_v9, %v8017_v32 }
 0x430   : > { %v7742_v11 = vpop.f32.mrf.mxu0  ;;  %v7803_v41 = vpop.f32.mrf.mxu2 }
 0x431   : > { %7903 = vst.msk [vmem:[%s11905_s29 + $0x1c0] sm:$0xff] %vm249_vm0, %v7828_v30  ;;  %v7743_v6 = vadd.f32 %v7742_v11, %v13537_v20  ;;  %v7771_v42 = vpop.f32.mrf.mxu1  ;;  %v8102_v1 = vmul.f32 %v7828_v30, %v7828_v30  ;;  %v8022_v26 = vsel %vm249_vm0, %v7828_v30, 0.0  ;;  %v8021_v38 = vadd.f32 %v8020_v61, %v8019_v36 }
 0x433   : > { %v7772_v23 = vadd.f32 %v7771_v42, %v7743_v6  ;;  %v8221_v43 = vsel %vm249_vm0, %v8102_v1, 0.0 }
 0x435   : > { %v7801_v35 = vadd.f32 %v7800_v2, %v7772_v23 }
 0x436   : > { %v7832_v12 = vpop.f32.mrf.mxu3 }
 0x437   : > { %v7830_v19 = vadd.f32 %v7829_v17, %v7801_v35 }
 0x438   : > { %v7745_v47 = vpop.f32.mrf.mxu0  ;;  %v7805_v48 = vpop.f32.mrf.mxu2 }
 0x439   : > { %7904 = vst.msk [vmem:[%s11905_s29 + $0x1c8] sm:$0xff] %vm249_vm0, %v7830_v19  ;;  %v7746_v34 = vadd.f32 %v7745_v47, %v13545_v16  ;;  %v7774_v31 = vpop.f32.mrf.mxu1  ;;  %v8103_v4 = vmul.f32 %v7830_v19, %v7830_v19  ;;  %v8024_v11 = vsel %vm249_vm0, %v7830_v19, 0.0 }
 0x43b   : > { %v7775_v14 = vadd.f32 %v7774_v31, %v7746_v34  ;;  %v8223_v30 = vsel %vm249_vm0, %v8103_v4, 0.0 }
 0x43d   : > { %v7804_v50 = vadd.f32 %v7803_v41, %v7775_v14  ;;  %v8023_v41 = vadd.f32 %v8022_v26, %v8021_v38 }
 0x43e   : > { %v7834_v7 = vpop.f32.mrf.mxu3 }
 0x43f   : > { %v7833_v37 = vadd.f32 %v7832_v12, %v7804_v50  ;;  %v8025_v34 = vadd.f32 %v8024_v11, %v8023_v41 }
 0x440   : > { %v7747_v20 = vpop.f32.mrf.mxu0  ;;  %v7808_v40 = vpop.f32.mrf.mxu2 }
 0x441   : > { %7905 = vst.msk [vmem:[%s11905_s29 + $0x1d0] sm:$0xff] %vm249_vm0, %v7833_v37  ;;  %v7748_v15 = vadd.f32 %v7747_v20, %v13553_v25  ;;  %v7776_v18 = vpop.f32.mrf.mxu1  ;;  %v8099_v25 = vmul.f32 %v13581_v24, %v13581_v24  ;;  %v8026_v35 = vsel %vm249_vm0, %v7833_v37, 0.0 }
 0x443   : > { %v7777_v22 = vadd.f32 %v7776_v18, %v7748_v15  ;;  %v8215_v49 = vsel %vm249_vm0, %v8099_v25, 0.0 }
 0x444   : > { %v8216_v55 = vadd.f32 %v8215_v49, %v13579_v53  ;;  %v8104_v53 = vmul.f32 %v7833_v37, %v7833_v37 }
 0x445   : > { %v7806_v0 = vadd.f32 %v7805_v48, %v7777_v22 }
 0x446   : > { %v7837_v60 = vpop.f32.mrf.mxu3  ;;  %v8225_v31 = vsel %vm249_vm0, %v8104_v53, 0.0 }
 0x447   : > { %v7835_v28 = vadd.f32 %v7834_v7, %v7806_v0  ;;  %v8027_v7 = vadd.f32 %v8026_v35, %v8025_v34 }
 0x448   : > { %v7750_v16 = vpop.f32.mrf.mxu0  ;;  %v7810_v56 = vpop.f32.mrf.mxu2 }
 0x449   : > { %7906 = vst.msk [vmem:[%s11905_s29 + $0x1d8] sm:$0xff] %vm249_vm0, %v7835_v28  ;;  %v7751_v44 = vadd.f32 %v7750_v16, %v13561_v39  ;;  %v7779_v54 = vpop.f32.mrf.mxu1  ;;  %v8100_v39 = vmul.f32 %v13590_v52, %v13590_v52  ;;  %v8105_v12 = vmul.f32 %v7835_v28, %v7835_v28  ;;  %v8028_v14 = vsel %vm249_vm0, %v7835_v28, 0.0 }
 0x44b   : > { %v7780_v59 = vadd.f32 %v7779_v54, %v7751_v44  ;;  %v8227_v15 = vsel %vm249_vm0, %v8105_v12, 0.0 }
 0x44d   : > { %v7809_v63 = vadd.f32 %v7808_v40, %v7780_v59  ;;  %v8029_v40 = vadd.f32 %v8028_v14, %v8027_v7 }
 0x44e   : > { %v7839_v33 = vpop.f32.mrf.mxu3 }
 0x44f   : > { %v7838_v58 = vadd.f32 %v7837_v60, %v7809_v63 }
 0x450   : > { %v7752_v46 = vpop.f32.mrf.mxu0  ;;  %v7813_v17 = vpop.f32.mrf.mxu2 }
 0x451   : > { %7907 = vst.msk [vmem:[%s11905_s29 + $0x1e0] sm:$0xff] %vm249_vm0, %v7838_v58  ;;  %v7753_v21 = vadd.f32 %v7752_v46, %v13569_v10  ;;  %v7781_v8 = vpop.f32.mrf.mxu1  ;;  %v8217_v10 = vsel %vm249_vm0, %v8100_v39, 0.0  ;;  %v8106_v48 = vmul.f32 %v7838_v58, %v7838_v58  ;;  %v8030_v18 = vsel %vm249_vm0, %v7838_v58, 0.0 }
 0x452   : > { %v8218_v51 = vadd.f32 %v8217_v10, %v8216_v55  ;;  %v8031_v63 = vadd.f32 %v8030_v18, %v8029_v40 }
 0x453   : > { %v7782_v5 = vadd.f32 %v7781_v8, %v7753_v21  ;;  %v8229_v16 = vsel %vm249_vm0, %v8106_v48, 0.0 }
 0x454   : > { %v8220_v42 = vadd.f32 %v8219_v62, %v8218_v51 }
 0x455   : > { %v7811_v3 = vadd.f32 %v7810_v56, %v7782_v5 }
 0x456   : > { %v7842_v23 = vpop.f32.mrf.mxu3  ;;  %v8222_v47 = vadd.f32 %v8221_v43, %v8220_v42 }
 0x457   : > { %v7840_v24 = vadd.f32 %v7839_v33, %v7811_v3 }
 0x458   : > { %v7755_v2 = vpop.f32.mrf.mxu0  ;;  %v8224_v50 = vadd.f32 %v8223_v30, %v8222_v47  ;;  %v7815_v56 = vpop.f32.mrf.mxu2 }
 0x459   : > { %7908 = vst.msk [vmem:[%s11905_s29 + $0x1e8] sm:$0xff] %vm249_vm0, %v7840_v24  ;;  %v7756_v52 = vadd.f32 %v7755_v2, %v13583_v27  ;;  %v7784_v45 = vpop.f32.mrf.mxu1  ;;  %v8107_v22 = vmul.f32 %v7840_v24, %v7840_v24  ;;  %v8032_v28 = vsel %vm249_vm0, %v7840_v24, 0.0 }
 0x45a   : > { %v8226_v0 = vadd.f32 %v8225_v31, %v8224_v50  ;;  %v8033_v21 = vadd.f32 %v8032_v28, %v8031_v63 }
 0x45b   : > { %v7785_v6 = vadd.f32 %v7784_v45, %v7756_v52  ;;  %v8231_v58 = vsel %vm249_vm0, %v8107_v22, 0.0 }
 0x45c   : > { %v8228_v59 = vadd.f32 %v8227_v15, %v8226_v0 }
 0x45d   : > { %v7814_v27 = vadd.f32 %v7813_v17, %v7785_v6 }
 0x45e   : > { %v7844_v8 = vpop.f32.mrf.mxu3 }
 0x45f   : > { %v7843_v19 = vadd.f32 %v7842_v23, %v7814_v27 }
 0x460   : > { %v7757_v20 = vpop.f32.mrf.mxu0 }
 0x461   : > { %7909 = vst.msk [vmem:[%s11905_s29 + $0x1f0] sm:$0xff] %vm249_vm0, %v7843_v19  ;;  %v7758_v37 = vadd.f32 %v7757_v20, %v13592_v29  ;;  %v7786_v60 = vpop.f32.mrf.mxu1  ;;  %v8108_v44 = vmul.f32 %v7843_v19, %v7843_v19  ;;  %v8034_v46 = vsel %vm249_vm0, %v7843_v19, 0.0  ;;  %v8230_v29 = vadd.f32 %v8229_v16, %v8228_v59 }
 0x462   : > { %v8035_v5 = vadd.f32 %v8034_v46, %v8033_v21 }
 0x463   : > { %v7787_v54 = vadd.f32 %v7786_v60, %v7758_v37  ;;  %v8233_v33 = vsel %vm249_vm0, %v8108_v44, 0.0  ;;  %v8232_v39 = vadd.f32 %v8231_v58, %v8230_v29 }
 0x465   : > { %v7816_v25 = vadd.f32 %v7815_v56, %v7787_v54  ;;  %v8234_v57 = vadd.f32 %v8233_v33, %v8232_v39 }
 0x467   : > { %v7845_v13 = vadd.f32 %v7844_v8, %v7816_v25 }
 0x469   : > { %7910 = vst.msk [vmem:[%s11905_s29 + $0x1f8] sm:$0xff] %vm249_vm0, %v7845_v13  ;;  %v8036_v49 = vsel %vm249_vm0, %v7845_v13, 0.0  ;;  %v8109_v9 = vmul.f32 %v7845_v13, %v7845_v13 }
 0x46a   : > { %v8037_v3 = vadd.f32 %v8036_v49, %v8035_v5 }
 0x46b   : > { %v8235_v32 = vsel %vm249_vm0, %v8109_v9, 0.0 }
 0x46c   : > { %v8038_v10 = vrot.slane %v8037_v3, 4  ;;  %v8236_v61 = vadd.f32 %v8235_v32, %v8234_v57 }
 0x46e   : > { %v8039_v1 = vadd.f32 %v8038_v10, %v8037_v3  ;;  %v8237_v24 = vrot.slane %v8236_v61, 4 }
 0x470   : > { %v8040_v55 = vrot.slane %v8039_v1, 2  ;;  %v8238_v36 = vadd.f32 %v8237_v24, %v8236_v61 }
 0x472   : > { %v8041_v2 = vadd.f32 %v8040_v55, %v8039_v1  ;;  %v8239_v62 = vrot.slane %v8238_v36, 2 }
 0x474   : > { %v8042_v26 = vrot.slane %v8041_v2, 1  ;;  %v8240_v4 = vadd.f32 %v8239_v62, %v8238_v36 }
 0x476   : > { %v8043_v52 = vadd.f32 %v8042_v26, %v8041_v2  ;;  %v8241_v45 = vrot.slane %v8240_v4, 1 }
 0x478   : > { %8045 = vst.msk [vmem:[%s244_s6] sm:$0x1] %vm8044_vm4, %v8043_v52  ;;  %v8242_v51 = vadd.f32 %v8241_v45, %v8240_v4 }
 0x47a   : > { %8243 = vst.msk [vmem:[%s247_s9] sm:$0x1] %vm8044_vm4, %v8242_v51 }
 0x47b PF: > { %s15_s15 = sadd.s32 1, %s10670_s15  }
 0x47c   : > { %p12_p5 = scmp.ge.s32.totalorder %s15_s15, 4  }
 0x47e   :  { %14 = sbr.rel (!%p12_p5) target bundleno = 1 (0x1), region = 87 }

</bundles_post_ra>
